<compile_context>
chip_gen: v6e
topology: v6e:2x2x1
jax: 0.10.0
libtpu: 0.0.40
codegen_flags: <defaults>
</compile_context>

<pallas_src>
import functools

import jax
import jax.numpy as jnp
from jax.experimental import pallas as pl
from jax.experimental.pallas import tpu as pltpu

# ----------------------------- model config (small, synthetic) ----------------
PATCH = 8          # patch size (DeiT uses 16; scaled down)
EMBED = 32         # embedding dim (DeiT-small uses 384)
HEADS = 4          # attention heads
DEPTH = 2          # transformer blocks (DeiT-small uses 12)
MLP_H = 64         # MLP hidden dim (4 * EMBED)
OUT_DIM = 32       # args.dim (feature dim of TransGeo embeddings)
LN_EPS = 1e-6


# ----------------------------- in-kernel helpers --------------------------------

def _ln(x, g, b):
    """LayerNorm over the last axis in f32 (biased variance, matches PyTorch)."""
    mean = jnp.mean(x, axis=-1, keepdims=True)
    var = jnp.mean(jnp.square(x - mean), axis=-1, keepdims=True)
    return (x - mean) * jax.lax.rsqrt(var + LN_EPS) * g + b


def _mm(x_f32, w_bf16, b_f32):
    """bf16-operand MXU matmul with f32 accumulation, plus f32 bias add."""
    return jnp.dot(x_f32.astype(jnp.bfloat16), w_bf16,
                   preferred_element_type=jnp.float32) + b_f32


# ----------------------------- fused DeiT forward kernel ------------------------

def _deit_fwd_kernel(
    patches_ref,                        # (B, T, C*P*P) f32   im2col patch slab
    patch_w_ref, patch_b_ref,           # (CPP, D) bf16, (1, D) f32
    tok_ref, pos_ref,                   # (2, D) f32 [cls; dist], (N, D) f32
    ln1_g_ref, ln1_b_ref,               # (DEPTH, 1, D) f32
    qkv_w_ref, qkv_b_ref,               # (DEPTH, D, 3D) bf16, (DEPTH, 1, 3D) f32
    proj_w_ref, proj_b_ref,             # (DEPTH, D, D) bf16, (DEPTH, 1, D) f32
    ln2_g_ref, ln2_b_ref,               # (DEPTH, 1, D) f32
    fc1_w_ref, fc1_b_ref,               # (DEPTH, D, MLP_H) bf16, (DEPTH, 1, MLP_H) f32
    fc2_w_ref, fc2_b_ref,               # (DEPTH, MLP_H, D) bf16, (DEPTH, 1, D) f32
    norm_g_ref, norm_b_ref,             # (1, D) f32
    head_w_ref, head_b_ref,             # (D, OUT) bf16, (1, OUT) f32
    headd_w_ref, headd_b_ref,           # (D, OUT) bf16, (1, OUT) f32
    out_ref,                            # (B, OUT) f32
    x_scr,                              # (B*N, D)  f32 VMEM scratch
    qkv_scr,                            # (B*N, 3D) f32 VMEM scratch
    attn_scr,                           # (B*N, D)  f32 VMEM scratch
    *, B, T, N):
    D = EMBED
    dh = D // HEADS
    scale = dh ** -0.5

    # ---- patch embedding + [cls, dist] tokens + positional embedding -> x_scr ----
    patch_w = patch_w_ref[...]
    patch_b = patch_b_ref[...]
    tokpos = tok_ref[...] + pos_ref[0:2, :]              # (2, D)
    for b in range(B):
        xp = _mm(patches_ref[b], patch_w, patch_b)       # (T, D)
        x_scr[b * N:b * N + 2, :] = tokpos
        x_scr[b * N + 2:(b + 1) * N, :] = xp + pos_ref[2:N, :]

    x = x_scr[...]                                       # (B*N, D) f32 residual stream

    # ---- transformer blocks (DEPTH is small -> static unroll) ----
    for d in range(DEPTH):
        # --- multi-head self-attention ---
        h = _ln(x, ln1_g_ref[d], ln1_b_ref[d])
        qkv_scr[...] = _mm(h, qkv_w_ref[d], qkv_b_ref[d])          # (B*N, 3D)
        for b in range(B):
            r0, r1 = b * N, (b + 1) * N
            for hh in range(HEADS):
                c0 = hh * dh
                # fold 1/sqrt(dh) into q; keep attention math in f32 (tiny tiles)
                qh = qkv_scr[r0:r1, c0:c0 + dh] * scale            # (N, dh)
                kh = qkv_scr[r0:r1, D + c0:D + c0 + dh]            # (N, dh)
                vh = qkv_scr[r0:r1, 2 * D + c0:2 * D + c0 + dh]    # (N, dh)
                s = jnp.dot(qh, kh.T, preferred_element_type=jnp.float32)
                s = s - jnp.max(s, axis=-1, keepdims=True)
                p = jnp.exp(s)
                p = p * pl.reciprocal(jnp.sum(p, axis=-1, keepdims=True), approx=True)
                attn_scr[r0:r1, c0:c0 + dh] = jnp.dot(
                    p, vh, preferred_element_type=jnp.float32)
        x = x + _mm(attn_scr[...], proj_w_ref[d], proj_b_ref[d])

        # --- MLP ---
        h = _ln(x, ln2_g_ref[d], ln2_b_ref[d])
        h = _mm(h, fc1_w_ref[d], fc1_b_ref[d])
        # TODO(synk): PyTorch nn.GELU defaults to exact erf; tanh approximation used here.
        h = jax.nn.gelu(h, approximate=True)
        x = x + _mm(h, fc2_w_ref[d], fc2_b_ref[d])

    # ---- final norm + distilled heads, averaged (all fused, single HBM writeback) ----
    x_scr[...] = _ln(x, norm_g_ref[...], norm_b_ref[...])
    head_w, head_b = head_w_ref[...], head_b_ref[...]
    headd_w, headd_b = headd_w_ref[...], headd_b_ref[...]
    for b in range(B):
        cls_row = x_scr[b * N:b * N + 1, :]                        # (1, D)
        dist_row = x_scr[b * N + 1:b * N + 2, :]                   # (1, D)
        out_b = (_mm(cls_row, head_w, head_b) +
                 _mm(dist_row, headd_w, headd_b)) * 0.5            # (1, OUT)
        out_ref[b:b + 1, :] = out_b.astype(out_ref.dtype)


# ----------------------------- parameter init ----------------------------------

def _normal(key, shape, std=0.02):
    return jax.random.normal(key, shape, dtype=jnp.float32) * std


def init_deit_params(key, num_patches):
    """deit_*_distilled_patch16-style parameters at the small synthetic size.

    Per-block weights are stacked along a leading DEPTH axis; matmul weights are
    stored bf16 (MXU operands), biases / LN params / tokens stay f32.
    """
    D, N = EMBED, num_patches + 2
    keys = jax.random.split(key, 9)
    return {
        "patch_w": _normal(keys[0], (3 * PATCH * PATCH, D)).astype(jnp.bfloat16),
        "patch_b": jnp.zeros((1, D), jnp.float32),
        "tok": _normal(keys[1], (2, D)),                     # rows: [cls_token, dist_token]
        "pos_embed": _normal(keys[2], (N, D)),
        "ln1_g": jnp.ones((DEPTH, 1, D), jnp.float32),
        "ln1_b": jnp.zeros((DEPTH, 1, D), jnp.float32),
        "qkv_w": _normal(keys[3], (DEPTH, D, 3 * D)).astype(jnp.bfloat16),
        "qkv_b": jnp.zeros((DEPTH, 1, 3 * D), jnp.float32),
        "proj_w": _normal(keys[4], (DEPTH, D, D)).astype(jnp.bfloat16),
        "proj_b": jnp.zeros((DEPTH, 1, D), jnp.float32),
        "ln2_g": jnp.ones((DEPTH, 1, D), jnp.float32),
        "ln2_b": jnp.zeros((DEPTH, 1, D), jnp.float32),
        "fc1_w": _normal(keys[5], (DEPTH, D, MLP_H)).astype(jnp.bfloat16),
        "fc1_b": jnp.zeros((DEPTH, 1, MLP_H), jnp.float32),
        "fc2_w": _normal(keys[6], (DEPTH, MLP_H, D)).astype(jnp.bfloat16),
        "fc2_b": jnp.zeros((DEPTH, 1, D), jnp.float32),
        "norm_g": jnp.ones((1, D), jnp.float32),
        "norm_b": jnp.zeros((1, D), jnp.float32),
        "head_w": _normal(keys[7], (D, OUT_DIM)).astype(jnp.bfloat16),
        "head_b": jnp.zeros((1, OUT_DIM), jnp.float32),
        "head_dist_w": _normal(keys[8], (D, OUT_DIM)).astype(jnp.bfloat16),
        "head_dist_b": jnp.zeros((1, OUT_DIM), jnp.float32),
    }


# ----------------------------- tower / TransGeo forward -------------------------

def deit_forward(params, img):
    """img: (B, 3, H, W) NCHW f32 -> (B, OUT_DIM) embedding.  One fused pallas_call."""
    B, C, Hi, Wi = img.shape
    T = (Hi // PATCH) * (Wi // PATCH)
    N = T + 2

    # Patch-embed im2col: conv(k=stride=PATCH) expressed as a per-patch row slab.
    # TODO(synk): at production DeiT-small sizes, express this im2col via the patch-embed
    # BlockSpec index_map and tile the token axis (v7x has only 64 MiB VMEM).
    patches = img.reshape(B, C, Hi // PATCH, PATCH, Wi // PATCH, PATCH)
    patches = patches.transpose(0, 2, 4, 1, 3, 5).reshape(B, T, C * PATCH * PATCH)

    return pl.pallas_call(
        functools.partial(_deit_fwd_kernel, B=B, T=T, N=N),
        out_shape=jax.ShapeDtypeStruct((B, OUT_DIM), jnp.float32),
        scratch_shapes=[
            pltpu.VMEM((B * N, EMBED), jnp.float32),      # residual-stream staging
            pltpu.VMEM((B * N, 3 * EMBED), jnp.float32),  # QKV staging (head slicing)
            pltpu.VMEM((B * N, EMBED), jnp.float32),      # attention-output assembly
        ],
    )(patches,
      params["patch_w"], params["patch_b"],
      params["tok"], params["pos_embed"],
      params["ln1_g"], params["ln1_b"],
      params["qkv_w"], params["qkv_b"],
      params["proj_w"], params["proj_b"],
      params["ln2_g"], params["ln2_b"],
      params["fc1_w"], params["fc1_b"],
      params["fc2_w"], params["fc2_b"],
      params["norm_g"], params["norm_b"],
      params["head_w"], params["head_b"],
      params["head_dist_w"], params["head_dist_b"])


def transgeo_forward(query_params, reference_params, im_q, im_k):
    """Matches TransGeo.forward(im_q, im_k): returns (query_net(im_q), reference_net(im_k))."""
    # TODO(synk): on v7x (2 TensorCores) the two Siamese towers could run concurrently via
    # pl.core_map over a tensorcore mesh; kept as two sequential calls for v5e/v6e portability.
    return deit_forward(query_params, im_q), deit_forward(reference_params, im_k)


# ----------------------------- main ---------------------------------------------

if __name__ == "__main__":
    key = jax.random.PRNGKey(0)
    k_img_q, k_img_k, k_qnet, k_rnet = jax.random.split(key, 4)

    # Small stand-ins for the VIGOR-style sizes (grd 320x640, sat 320x320), scaled down.
    im_q = jax.random.normal(k_img_q, (2, 3, 16, 32), dtype=jnp.float32)  # ground/drone
    im_k = jax.random.normal(k_img_k, (2, 3, 16, 16), dtype=jnp.float32)  # satellite

    n_patches_q = (16 // PATCH) * (32 // PATCH)   # 8
    n_patches_k = (16 // PATCH) * (16 // PATCH)   # 4
    query_params = init_deit_params(k_qnet, n_patches_q)
    reference_params = init_deit_params(k_rnet, n_patches_k)

    fwd = jax.jit(transgeo_forward)
    out_q, out_k = fwd(query_params, reference_params, im_q, im_k)
    jax.block_until_ready((out_q, out_k))

    assert out_q.shape == (2, OUT_DIM) and out_k.shape == (2, OUT_DIM)
    assert jnp.all(jnp.isfinite(out_q)) and jnp.all(jnp.isfinite(out_k))
    print("KERNEL_OK")
</pallas_src>

<mosaic_0001>
module attributes {stable_mosaic.version = 11 : i64} {
  func.func @_deit_fwd_kernel(%arg0: memref<2x4x192xf32, #tpu.memory_space<vmem>>, %arg1: memref<192x32xbf16, #tpu.memory_space<vmem>>, %arg2: memref<1x32xf32, #tpu.memory_space<vmem>>, %arg3: memref<2x32xf32, #tpu.memory_space<vmem>>, %arg4: memref<6x32xf32, #tpu.memory_space<vmem>>, %arg5: memref<2x1x32xf32, #tpu.memory_space<vmem>>, %arg6: memref<2x1x32xf32, #tpu.memory_space<vmem>>, %arg7: memref<2x32x96xbf16, #tpu.memory_space<vmem>>, %arg8: memref<2x1x96xf32, #tpu.memory_space<vmem>>, %arg9: memref<2x32x32xbf16, #tpu.memory_space<vmem>>, %arg10: memref<2x1x32xf32, #tpu.memory_space<vmem>>, %arg11: memref<2x1x32xf32, #tpu.memory_space<vmem>>, %arg12: memref<2x1x32xf32, #tpu.memory_space<vmem>>, %arg13: memref<2x32x64xbf16, #tpu.memory_space<vmem>>, %arg14: memref<2x1x64xf32, #tpu.memory_space<vmem>>, %arg15: memref<2x64x32xbf16, #tpu.memory_space<vmem>>, %arg16: memref<2x1x32xf32, #tpu.memory_space<vmem>>, %arg17: memref<1x32xf32, #tpu.memory_space<vmem>>, %arg18: memref<1x32xf32, #tpu.memory_space<vmem>>, %arg19: memref<32x32xbf16, #tpu.memory_space<vmem>>, %arg20: memref<1x32xf32, #tpu.memory_space<vmem>>, %arg21: memref<32x32xbf16, #tpu.memory_space<vmem>>, %arg22: memref<1x32xf32, #tpu.memory_space<vmem>>, %arg23: memref<2x32xf32, #tpu.memory_space<vmem>>, %arg24: memref<12x32xf32, #tpu.memory_space<vmem>>, %arg25: memref<12x96xf32, #tpu.memory_space<vmem>>, %arg26: memref<12x32xf32, #tpu.memory_space<vmem>>) attributes {dimension_semantics = [], scalar_prefetch = 0 : i64, scratch_operands = 3 : i64, tpu.core_type = #tpu.core_type<tc>} {
    %c0 = arith.constant 0 : index
    %c0_0 = arith.constant 0 : index
    %0 = vector.load %arg1[%c0, %c0_0] : memref<192x32xbf16, #tpu.memory_space<vmem>>, vector<192x32xbf16>
    %c0_1 = arith.constant 0 : index
    %c0_2 = arith.constant 0 : index
    %1 = vector.load %arg2[%c0_1, %c0_2] : memref<1x32xf32, #tpu.memory_space<vmem>>, vector<1x32xf32>
    %c0_3 = arith.constant 0 : index
    %c0_4 = arith.constant 0 : index
    %2 = vector.load %arg3[%c0_3, %c0_4] : memref<2x32xf32, #tpu.memory_space<vmem>>, vector<2x32xf32>
    %c0_5 = arith.constant 0 : index
    %c0_6 = arith.constant 0 : index
    %3 = vector.load %arg4[%c0_5, %c0_6] : memref<6x32xf32, #tpu.memory_space<vmem>>, vector<2x32xf32>
    %4 = arith.addf %2, %3 : vector<2x32xf32>
    %c0_7 = arith.constant 0 : index
    %c0_8 = arith.constant 0 : index
    %c0_9 = arith.constant 0 : index
    %5 = vector.load %arg0[%c0_7, %c0_8, %c0_9] : memref<2x4x192xf32, #tpu.memory_space<vmem>>, vector<1x4x192xf32>
    %6 = vector.shape_cast %5 : vector<1x4x192xf32> to vector<4x192xf32>
    %7 = arith.truncf %6 : vector<4x192xf32> to vector<4x192xbf16>
    %cst = arith.constant dense<0.000000e+00> : vector<4x32xf32>
    %8 = tpu.matmul %7, %0, %cst {dimension_numbers = #tpu.dot_dimension_numbers<[1], [0], [0], [1], [0, 0, 1, 1], [], []>} : vector<4x192xbf16>, vector<192x32xbf16>, vector<4x32xf32> -> vector<4x32xf32>
    %9 = vector.broadcast %1 : vector<1x32xf32> to vector<4x32xf32>
    %10 = arith.addf %8, %9 : vector<4x32xf32>
    %c0_10 = arith.constant 0 : index
    %c0_11 = arith.constant 0 : index
    %11 = vector.load %arg24[%c0_10, %c0_11] : memref<12x32xf32, #tpu.memory_space<vmem>>, vector<2x32xf32>
    tpu.vector_store %arg24[%c0_10, %c0_11], %4 {strides = array<i32>} : memref<12x32xf32, #tpu.memory_space<vmem>>, vector<2x32xf32>,
    %c2 = arith.constant 2 : index
    %c0_12 = arith.constant 0 : index
    %12 = vector.load %arg4[%c2, %c0_12] : memref<6x32xf32, #tpu.memory_space<vmem>>, vector<4x32xf32>
    %13 = arith.addf %10, %12 : vector<4x32xf32>
    %c2_13 = arith.constant 2 : index
    %c0_14 = arith.constant 0 : index
    %14 = vector.load %arg24[%c2_13, %c0_14] : memref<12x32xf32, #tpu.memory_space<vmem>>, vector<4x32xf32>
    tpu.vector_store %arg24[%c2_13, %c0_14], %13 {strides = array<i32>} : memref<12x32xf32, #tpu.memory_space<vmem>>, vector<4x32xf32>,
    %c1 = arith.constant 1 : index
    %c0_15 = arith.constant 0 : index
    %c0_16 = arith.constant 0 : index
    %15 = vector.load %arg0[%c1, %c0_15, %c0_16] : memref<2x4x192xf32, #tpu.memory_space<vmem>>, vector<1x4x192xf32>
    %16 = vector.shape_cast %15 : vector<1x4x192xf32> to vector<4x192xf32>
    %17 = arith.truncf %16 : vector<4x192xf32> to vector<4x192xbf16>
    %cst_17 = arith.constant dense<0.000000e+00> : vector<4x32xf32>
    %18 = tpu.matmul %17, %0, %cst_17 {dimension_numbers = #tpu.dot_dimension_numbers<[1], [0], [0], [1], [0, 0, 1, 1], [], []>} : vector<4x192xbf16>, vector<192x32xbf16>, vector<4x32xf32> -> vector<4x32xf32>
    %19 = vector.broadcast %1 : vector<1x32xf32> to vector<4x32xf32>
    %20 = arith.addf %18, %19 : vector<4x32xf32>
    %c6 = arith.constant 6 : index
    %c0_18 = arith.constant 0 : index
    %21 = vector.load %arg24[%c6, %c0_18] : memref<12x32xf32, #tpu.memory_space<vmem>>, vector<2x32xf32>
    tpu.vector_store %arg24[%c6, %c0_18], %4 {strides = array<i32>} : memref<12x32xf32, #tpu.memory_space<vmem>>, vector<2x32xf32>,
    %c2_19 = arith.constant 2 : index
    %c0_20 = arith.constant 0 : index
    %22 = vector.load %arg4[%c2_19, %c0_20] : memref<6x32xf32, #tpu.memory_space<vmem>>, vector<4x32xf32>
    %23 = arith.addf %20, %22 : vector<4x32xf32>
    %c8 = arith.constant 8 : index
    %c0_21 = arith.constant 0 : index
    %24 = vector.load %arg24[%c8, %c0_21] : memref<12x32xf32, #tpu.memory_space<vmem>>, vector<4x32xf32>
    tpu.vector_store %arg24[%c8, %c0_21], %23 {strides = array<i32>} : memref<12x32xf32, #tpu.memory_space<vmem>>, vector<4x32xf32>,
    %c0_22 = arith.constant 0 : index
    %c0_23 = arith.constant 0 : index
    %25 = vector.load %arg24[%c0_22, %c0_23] : memref<12x32xf32, #tpu.memory_space<vmem>>, vector<12x32xf32>
    %c0_24 = arith.constant 0 : index
    %c0_25 = arith.constant 0 : index
    %c0_26 = arith.constant 0 : index
    %26 = vector.load %arg5[%c0_24, %c0_25, %c0_26] : memref<2x1x32xf32, #tpu.memory_space<vmem>>, vector<1x1x32xf32>
    %27 = vector.shape_cast %26 : vector<1x1x32xf32> to vector<1x32xf32>
    %c0_27 = arith.constant 0 : index
    %c0_28 = arith.constant 0 : index
    %c0_29 = arith.constant 0 : index
    %28 = vector.load %arg6[%c0_27, %c0_28, %c0_29] : memref<2x1x32xf32, #tpu.memory_space<vmem>>, vector<1x1x32xf32>
    %29 = vector.shape_cast %28 : vector<1x1x32xf32> to vector<1x32xf32>
    %cst_30 = arith.constant dense<0.000000e+00> : vector<12xf32>
    %30 = vector.multi_reduction <add>, %25, %cst_30 [1] : vector<12x32xf32> to vector<12xf32>
    %31 = vector.shape_cast %30 : vector<12xf32> to vector<12x1xf32>
    %cst_31 = arith.constant 3.200000e+01 : f32
    %32 = vector.broadcast %cst_31 : f32 to vector<12x1xf32>
    %33 = arith.divf %31, %32 : vector<12x1xf32>
    %34 = vector.broadcast %33 : vector<12x1xf32> to vector<12x32xf32>
    %35 = arith.subf %25, %34 : vector<12x32xf32>
    %36 = arith.mulf %35, %35 : vector<12x32xf32>
    %cst_32 = arith.constant dense<0.000000e+00> : vector<12xf32>
    %37 = vector.multi_reduction <add>, %36, %cst_32 [1] : vector<12x32xf32> to vector<12xf32>
    %38 = vector.shape_cast %37 : vector<12xf32> to vector<12x1xf32>
    %cst_33 = arith.constant 3.200000e+01 : f32
    %39 = vector.broadcast %cst_33 : f32 to vector<12x1xf32>
    %40 = arith.divf %38, %39 : vector<12x1xf32>
    %41 = vector.broadcast %33 : vector<12x1xf32> to vector<12x32xf32>
    %42 = arith.subf %25, %41 : vector<12x32xf32>
    %cst_34 = arith.constant 9.99999997E-7 : f32
    %43 = vector.broadcast %cst_34 : f32 to vector<12x1xf32>
    %44 = arith.addf %40, %43 : vector<12x1xf32>
    %45 = math.rsqrt %44 : vector<12x1xf32>
    %46 = vector.broadcast %45 : vector<12x1xf32> to vector<12x32xf32>
    %47 = arith.mulf %42, %46 : vector<12x32xf32>
    %48 = vector.broadcast %27 : vector<1x32xf32> to vector<12x32xf32>
    %49 = arith.mulf %47, %48 : vector<12x32xf32>
    %50 = vector.broadcast %29 : vector<1x32xf32> to vector<12x32xf32>
    %51 = arith.addf %49, %50 : vector<12x32xf32>
    %c0_35 = arith.constant 0 : index
    %c0_36 = arith.constant 0 : index
    %c0_37 = arith.constant 0 : index
    %52 = vector.load %arg7[%c0_35, %c0_36, %c0_37] : memref<2x32x96xbf16, #tpu.memory_space<vmem>>, vector<1x32x96xbf16>
    %53 = vector.shape_cast %52 : vector<1x32x96xbf16> to vector<32x96xbf16>
    %c0_38 = arith.constant 0 : index
    %c0_39 = arith.constant 0 : index
    %c0_40 = arith.constant 0 : index
    %54 = vector.load %arg8[%c0_38, %c0_39, %c0_40] : memref<2x1x96xf32, #tpu.memory_space<vmem>>, vector<1x1x96xf32>
    %55 = vector.shape_cast %54 : vector<1x1x96xf32> to vector<1x96xf32>
    %56 = arith.truncf %51 : vector<12x32xf32> to vector<12x32xbf16>
    %cst_41 = arith.constant dense<0.000000e+00> : vector<12x96xf32>
    %57 = tpu.matmul %56, %53, %cst_41 {dimension_numbers = #tpu.dot_dimension_numbers<[1], [0], [0], [1], [0, 0, 1, 1], [], []>} : vector<12x32xbf16>, vector<32x96xbf16>, vector<12x96xf32> -> vector<12x96xf32>
    %58 = vector.broadcast %55 : vector<1x96xf32> to vector<12x96xf32>
    %59 = arith.addf %57, %58 : vector<12x96xf32>
    %c0_42 = arith.constant 0 : index
    %c0_43 = arith.constant 0 : index
    %60 = vector.load %arg25[%c0_42, %c0_43] : memref<12x96xf32, #tpu.memory_space<vmem>>, vector<12x96xf32>
    tpu.vector_store %arg25[%c0_42, %c0_43], %59 {strides = array<i32>} : memref<12x96xf32, #tpu.memory_space<vmem>>, vector<12x96xf32>,
    %c0_44 = arith.constant 0 : index
    %c0_45 = arith.constant 0 : index
    %61 = vector.load %arg25[%c0_44, %c0_45] : memref<12x96xf32, #tpu.memory_space<vmem>>, vector<6x8xf32>
    %cst_46 = arith.constant 0.353553385 : f32
    %62 = vector.broadcast %cst_46 : f32 to vector<6x8xf32>
    %63 = arith.mulf %61, %62 : vector<6x8xf32>
    %c0_47 = arith.constant 0 : index
    %c32 = arith.constant 32 : index
    %64 = vector.load %arg25[%c0_47, %c32] : memref<12x96xf32, #tpu.memory_space<vmem>>, vector<6x8xf32>
    %c0_48 = arith.constant 0 : index
    %c64 = arith.constant 64 : index
    %65 = vector.load %arg25[%c0_48, %c64] : memref<12x96xf32, #tpu.memory_space<vmem>>, vector<6x8xf32>
    %66 = tpu.transpose %64, [1, 0] : vector<6x8xf32> -> vector<8x6xf32>
    %cst_49 = arith.constant dense<0.000000e+00> : vector<6x6xf32>
    %67 = tpu.matmul %63, %66, %cst_49 {dimension_numbers = #tpu.dot_dimension_numbers<[1], [0], [0], [1], [0, 0, 1, 1], [], []>} : vector<6x8xf32>, vector<8x6xf32>, vector<6x6xf32> -> vector<6x6xf32>
    %cst_50 = arith.constant dense<0xFF800000> : vector<6xf32>
    %68 = vector.multi_reduction <maximumf>, %67, %cst_50 [1] : vector<6x6xf32> to vector<6xf32>
    %69 = vector.shape_cast %68 : vector<6xf32> to vector<6x1xf32>
    %70 = vector.broadcast %69 : vector<6x1xf32> to vector<6x6xf32>
    %71 = arith.subf %67, %70 : vector<6x6xf32>
    %72 = math.exp %71 : vector<6x6xf32>
    %cst_51 = arith.constant dense<0.000000e+00> : vector<6xf32>
    %73 = vector.multi_reduction <add>, %72, %cst_51 [1] : vector<6x6xf32> to vector<6xf32>
    %74 = vector.shape_cast %73 : vector<6xf32> to vector<6x1xf32>
    %75 = tpu.reciprocal %74 {approx = true} : vector<6x1xf32> -> vector<6x1xf32>
    %76 = vector.broadcast %75 : vector<6x1xf32> to vector<6x6xf32>
    %77 = arith.mulf %72, %76 : vector<6x6xf32>
    %cst_52 = arith.constant dense<0.000000e+00> : vector<6x8xf32>
    %78 = tpu.matmul %77, %65, %cst_52 {dimension_numbers = #tpu.dot_dimension_numbers<[1], [0], [0], [1], [0, 0, 1, 1], [], []>} : vector<6x6xf32>, vector<6x8xf32>, vector<6x8xf32> -> vector<6x8xf32>
    %c0_53 = arith.constant 0 : index
    %c0_54 = arith.constant 0 : index
    %79 = vector.load %arg26[%c0_53, %c0_54] : memref<12x32xf32, #tpu.memory_space<vmem>>, vector<6x8xf32>
    tpu.vector_store %arg26[%c0_53, %c0_54], %78 {strides = array<i32>} : memref<12x32xf32, #tpu.memory_space<vmem>>, vector<6x8xf32>,
    %c0_55 = arith.constant 0 : index
    %c8_56 = arith.constant 8 : index
    %80 = vector.load %arg25[%c0_55, %c8_56] : memref<12x96xf32, #tpu.memory_space<vmem>>, vector<6x8xf32>
    %cst_57 = arith.constant 0.353553385 : f32
    %81 = vector.broadcast %cst_57 : f32 to vector<6x8xf32>
    %82 = arith.mulf %80, %81 : vector<6x8xf32>
    %c0_58 = arith.constant 0 : index
    %c40 = arith.constant 40 : index
    %83 = vector.load %arg25[%c0_58, %c40] : memref<12x96xf32, #tpu.memory_space<vmem>>, vector<6x8xf32>
    %c0_59 = arith.constant 0 : index
    %c72 = arith.constant 72 : index
    %84 = vector.load %arg25[%c0_59, %c72] : memref<12x96xf32, #tpu.memory_space<vmem>>, vector<6x8xf32>
    %85 = tpu.transpose %83, [1, 0] : vector<6x8xf32> -> vector<8x6xf32>
    %cst_60 = arith.constant dense<0.000000e+00> : vector<6x6xf32>
    %86 = tpu.matmul %82, %85, %cst_60 {dimension_numbers = #tpu.dot_dimension_numbers<[1], [0], [0], [1], [0, 0, 1, 1], [], []>} : vector<6x8xf32>, vector<8x6xf32>, vector<6x6xf32> -> vector<6x6xf32>
    %cst_61 = arith.constant dense<0xFF800000> : vector<6xf32>
    %87 = vector.multi_reduction <maximumf>, %86, %cst_61 [1] : vector<6x6xf32> to vector<6xf32>
    %88 = vector.shape_cast %87 : vector<6xf32> to vector<6x1xf32>
    %89 = vector.broadcast %88 : vector<6x1xf32> to vector<6x6xf32>
    %90 = arith.subf %86, %89 : vector<6x6xf32>
    %91 = math.exp %90 : vector<6x6xf32>
    %cst_62 = arith.constant dense<0.000000e+00> : vector<6xf32>
    %92 = vector.multi_reduction <add>, %91, %cst_62 [1] : vector<6x6xf32> to vector<6xf32>
    %93 = vector.shape_cast %92 : vector<6xf32> to vector<6x1xf32>
    %94 = tpu.reciprocal %93 {approx = true} : vector<6x1xf32> -> vector<6x1xf32>
    %95 = vector.broadcast %94 : vector<6x1xf32> to vector<6x6xf32>
    %96 = arith.mulf %91, %95 : vector<6x6xf32>
    %cst_63 = arith.constant dense<0.000000e+00> : vector<6x8xf32>
    %97 = tpu.matmul %96, %84, %cst_63 {dimension_numbers = #tpu.dot_dimension_numbers<[1], [0], [0], [1], [0, 0, 1, 1], [], []>} : vector<6x6xf32>, vector<6x8xf32>, vector<6x8xf32> -> vector<6x8xf32>
    %c0_64 = arith.constant 0 : index
    %c8_65 = arith.constant 8 : index
    %98 = vector.load %arg26[%c0_64, %c8_65] : memref<12x32xf32, #tpu.memory_space<vmem>>, vector<6x8xf32>
    tpu.vector_store %arg26[%c0_64, %c8_65], %97 {strides = array<i32>} : memref<12x32xf32, #tpu.memory_space<vmem>>, vector<6x8xf32>,
    %c0_66 = arith.constant 0 : index
    %c16 = arith.constant 16 : index
    %99 = vector.load %arg25[%c0_66, %c16] : memref<12x96xf32, #tpu.memory_space<vmem>>, vector<6x8xf32>
    %cst_67 = arith.constant 0.353553385 : f32
    %100 = vector.broadcast %cst_67 : f32 to vector<6x8xf32>
    %101 = arith.mulf %99, %100 : vector<6x8xf32>
    %c0_68 = arith.constant 0 : index
    %c48 = arith.constant 48 : index
    %102 = vector.load %arg25[%c0_68, %c48] : memref<12x96xf32, #tpu.memory_space<vmem>>, vector<6x8xf32>
    %c0_69 = arith.constant 0 : index
    %c80 = arith.constant 80 : index
    %103 = vector.load %arg25[%c0_69, %c80] : memref<12x96xf32, #tpu.memory_space<vmem>>, vector<6x8xf32>
    %104 = tpu.transpose %102, [1, 0] : vector<6x8xf32> -> vector<8x6xf32>
    %cst_70 = arith.constant dense<0.000000e+00> : vector<6x6xf32>
    %105 = tpu.matmul %101, %104, %cst_70 {dimension_numbers = #tpu.dot_dimension_numbers<[1], [0], [0], [1], [0, 0, 1, 1], [], []>} : vector<6x8xf32>, vector<8x6xf32>, vector<6x6xf32> -> vector<6x6xf32>
    %cst_71 = arith.constant dense<0xFF800000> : vector<6xf32>
    %106 = vector.multi_reduction <maximumf>, %105, %cst_71 [1] : vector<6x6xf32> to vector<6xf32>
    %107 = vector.shape_cast %106 : vector<6xf32> to vector<6x1xf32>
    %108 = vector.broadcast %107 : vector<6x1xf32> to vector<6x6xf32>
    %109 = arith.subf %105, %108 : vector<6x6xf32>
    %110 = math.exp %109 : vector<6x6xf32>
    %cst_72 = arith.constant dense<0.000000e+00> : vector<6xf32>
    %111 = vector.multi_reduction <add>, %110, %cst_72 [1] : vector<6x6xf32> to vector<6xf32>
    %112 = vector.shape_cast %111 : vector<6xf32> to vector<6x1xf32>
    %113 = tpu.reciprocal %112 {approx = true} : vector<6x1xf32> -> vector<6x1xf32>
    %114 = vector.broadcast %113 : vector<6x1xf32> to vector<6x6xf32>
    %115 = arith.mulf %110, %114 : vector<6x6xf32>
    %cst_73 = arith.constant dense<0.000000e+00> : vector<6x8xf32>
    %116 = tpu.matmul %115, %103, %cst_73 {dimension_numbers = #tpu.dot_dimension_numbers<[1], [0], [0], [1], [0, 0, 1, 1], [], []>} : vector<6x6xf32>, vector<6x8xf32>, vector<6x8xf32> -> vector<6x8xf32>
    %c0_74 = arith.constant 0 : index
    %c16_75 = arith.constant 16 : index
    %117 = vector.load %arg26[%c0_74, %c16_75] : memref<12x32xf32, #tpu.memory_space<vmem>>, vector<6x8xf32>
    tpu.vector_store %arg26[%c0_74, %c16_75], %116 {strides = array<i32>} : memref<12x32xf32, #tpu.memory_space<vmem>>, vector<6x8xf32>,
    %c0_76 = arith.constant 0 : index
    %c24 = arith.constant 24 : index
    %118 = vector.load %arg25[%c0_76, %c24] : memref<12x96xf32, #tpu.memory_space<vmem>>, vector<6x8xf32>
    %cst_77 = arith.constant 0.353553385 : f32
    %119 = vector.broadcast %cst_77 : f32 to vector<6x8xf32>
    %120 = arith.mulf %118, %119 : vector<6x8xf32>
    %c0_78 = arith.constant 0 : index
    %c56 = arith.constant 56 : index
    %121 = vector.load %arg25[%c0_78, %c56] : memref<12x96xf32, #tpu.memory_space<vmem>>, vector<6x8xf32>
    %c0_79 = arith.constant 0 : index
    %c88 = arith.constant 88 : index
    %122 = vector.load %arg25[%c0_79, %c88] : memref<12x96xf32, #tpu.memory_space<vmem>>, vector<6x8xf32>
    %123 = tpu.transpose %121, [1, 0] : vector<6x8xf32> -> vector<8x6xf32>
    %cst_80 = arith.constant dense<0.000000e+00> : vector<6x6xf32>
    %124 = tpu.matmul %120, %123, %cst_80 {dimension_numbers = #tpu.dot_dimension_numbers<[1], [0], [0], [1], [0, 0, 1, 1], [], []>} : vector<6x8xf32>, vector<8x6xf32>, vector<6x6xf32> -> vector<6x6xf32>
    %cst_81 = arith.constant dense<0xFF800000> : vector<6xf32>
    %125 = vector.multi_reduction <maximumf>, %124, %cst_81 [1] : vector<6x6xf32> to vector<6xf32>
    %126 = vector.shape_cast %125 : vector<6xf32> to vector<6x1xf32>
    %127 = vector.broadcast %126 : vector<6x1xf32> to vector<6x6xf32>
    %128 = arith.subf %124, %127 : vector<6x6xf32>
    %129 = math.exp %128 : vector<6x6xf32>
    %cst_82 = arith.constant dense<0.000000e+00> : vector<6xf32>
    %130 = vector.multi_reduction <add>, %129, %cst_82 [1] : vector<6x6xf32> to vector<6xf32>
    %131 = vector.shape_cast %130 : vector<6xf32> to vector<6x1xf32>
    %132 = tpu.reciprocal %131 {approx = true} : vector<6x1xf32> -> vector<6x1xf32>
    %133 = vector.broadcast %132 : vector<6x1xf32> to vector<6x6xf32>
    %134 = arith.mulf %129, %133 : vector<6x6xf32>
    %cst_83 = arith.constant dense<0.000000e+00> : vector<6x8xf32>
    %135 = tpu.matmul %134, %122, %cst_83 {dimension_numbers = #tpu.dot_dimension_numbers<[1], [0], [0], [1], [0, 0, 1, 1], [], []>} : vector<6x6xf32>, vector<6x8xf32>, vector<6x8xf32> -> vector<6x8xf32>
    %c0_84 = arith.constant 0 : index
    %c24_85 = arith.constant 24 : index
    %136 = vector.load %arg26[%c0_84, %c24_85] : memref<12x32xf32, #tpu.memory_space<vmem>>, vector<6x8xf32>
    tpu.vector_store %arg26[%c0_84, %c24_85], %135 {strides = array<i32>} : memref<12x32xf32, #tpu.memory_space<vmem>>, vector<6x8xf32>,
    %c6_86 = arith.constant 6 : index
    %c0_87 = arith.constant 0 : index
    %137 = vector.load %arg25[%c6_86, %c0_87] : memref<12x96xf32, #tpu.memory_space<vmem>>, vector<6x8xf32>
    %cst_88 = arith.constant 0.353553385 : f32
    %138 = vector.broadcast %cst_88 : f32 to vector<6x8xf32>
    %139 = arith.mulf %137, %138 : vector<6x8xf32>
    %c6_89 = arith.constant 6 : index
    %c32_90 = arith.constant 32 : index
    %140 = vector.load %arg25[%c6_89, %c32_90] : memref<12x96xf32, #tpu.memory_space<vmem>>, vector<6x8xf32>
    %c6_91 = arith.constant 6 : index
    %c64_92 = arith.constant 64 : index
    %141 = vector.load %arg25[%c6_91, %c64_92] : memref<12x96xf32, #tpu.memory_space<vmem>>, vector<6x8xf32>
    %142 = tpu.transpose %140, [1, 0] : vector<6x8xf32> -> vector<8x6xf32>
    %cst_93 = arith.constant dense<0.000000e+00> : vector<6x6xf32>
    %143 = tpu.matmul %139, %142, %cst_93 {dimension_numbers = #tpu.dot_dimension_numbers<[1], [0], [0], [1], [0, 0, 1, 1], [], []>} : vector<6x8xf32>, vector<8x6xf32>, vector<6x6xf32> -> vector<6x6xf32>
    %cst_94 = arith.constant dense<0xFF800000> : vector<6xf32>
    %144 = vector.multi_reduction <maximumf>, %143, %cst_94 [1] : vector<6x6xf32> to vector<6xf32>
    %145 = vector.shape_cast %144 : vector<6xf32> to vector<6x1xf32>
    %146 = vector.broadcast %145 : vector<6x1xf32> to vector<6x6xf32>
    %147 = arith.subf %143, %146 : vector<6x6xf32>
    %148 = math.exp %147 : vector<6x6xf32>
    %cst_95 = arith.constant dense<0.000000e+00> : vector<6xf32>
    %149 = vector.multi_reduction <add>, %148, %cst_95 [1] : vector<6x6xf32> to vector<6xf32>
    %150 = vector.shape_cast %149 : vector<6xf32> to vector<6x1xf32>
    %151 = tpu.reciprocal %150 {approx = true} : vector<6x1xf32> -> vector<6x1xf32>
    %152 = vector.broadcast %151 : vector<6x1xf32> to vector<6x6xf32>
    %153 = arith.mulf %148, %152 : vector<6x6xf32>
    %cst_96 = arith.constant dense<0.000000e+00> : vector<6x8xf32>
    %154 = tpu.matmul %153, %141, %cst_96 {dimension_numbers = #tpu.dot_dimension_numbers<[1], [0], [0], [1], [0, 0, 1, 1], [], []>} : vector<6x6xf32>, vector<6x8xf32>, vector<6x8xf32> -> vector<6x8xf32>
    %c6_97 = arith.constant 6 : index
    %c0_98 = arith.constant 0 : index
    %155 = vector.load %arg26[%c6_97, %c0_98] : memref<12x32xf32, #tpu.memory_space<vmem>>, vector<6x8xf32>
    tpu.vector_store %arg26[%c6_97, %c0_98], %154 {strides = array<i32>} : memref<12x32xf32, #tpu.memory_space<vmem>>, vector<6x8xf32>,
    %c6_99 = arith.constant 6 : index
    %c8_100 = arith.constant 8 : index
    %156 = vector.load %arg25[%c6_99, %c8_100] : memref<12x96xf32, #tpu.memory_space<vmem>>, vector<6x8xf32>
    %cst_101 = arith.constant 0.353553385 : f32
    %157 = vector.broadcast %cst_101 : f32 to vector<6x8xf32>
    %158 = arith.mulf %156, %157 : vector<6x8xf32>
    %c6_102 = arith.constant 6 : index
    %c40_103 = arith.constant 40 : index
    %159 = vector.load %arg25[%c6_102, %c40_103] : memref<12x96xf32, #tpu.memory_space<vmem>>, vector<6x8xf32>
    %c6_104 = arith.constant 6 : index
    %c72_105 = arith.constant 72 : index
    %160 = vector.load %arg25[%c6_104, %c72_105] : memref<12x96xf32, #tpu.memory_space<vmem>>, vector<6x8xf32>
    %161 = tpu.transpose %159, [1, 0] : vector<6x8xf32> -> vector<8x6xf32>
    %cst_106 = arith.constant dense<0.000000e+00> : vector<6x6xf32>
    %162 = tpu.matmul %158, %161, %cst_106 {dimension_numbers = #tpu.dot_dimension_numbers<[1], [0], [0], [1], [0, 0, 1, 1], [], []>} : vector<6x8xf32>, vector<8x6xf32>, vector<6x6xf32> -> vector<6x6xf32>
    %cst_107 = arith.constant dense<0xFF800000> : vector<6xf32>
    %163 = vector.multi_reduction <maximumf>, %162, %cst_107 [1] : vector<6x6xf32> to vector<6xf32>
    %164 = vector.shape_cast %163 : vector<6xf32> to vector<6x1xf32>
    %165 = vector.broadcast %164 : vector<6x1xf32> to vector<6x6xf32>
    %166 = arith.subf %162, %165 : vector<6x6xf32>
    %167 = math.exp %166 : vector<6x6xf32>
    %cst_108 = arith.constant dense<0.000000e+00> : vector<6xf32>
    %168 = vector.multi_reduction <add>, %167, %cst_108 [1] : vector<6x6xf32> to vector<6xf32>
    %169 = vector.shape_cast %168 : vector<6xf32> to vector<6x1xf32>
    %170 = tpu.reciprocal %169 {approx = true} : vector<6x1xf32> -> vector<6x1xf32>
    %171 = vector.broadcast %170 : vector<6x1xf32> to vector<6x6xf32>
    %172 = arith.mulf %167, %171 : vector<6x6xf32>
    %cst_109 = arith.constant dense<0.000000e+00> : vector<6x8xf32>
    %173 = tpu.matmul %172, %160, %cst_109 {dimension_numbers = #tpu.dot_dimension_numbers<[1], [0], [0], [1], [0, 0, 1, 1], [], []>} : vector<6x6xf32>, vector<6x8xf32>, vector<6x8xf32> -> vector<6x8xf32>
    %c6_110 = arith.constant 6 : index
    %c8_111 = arith.constant 8 : index
    %174 = vector.load %arg26[%c6_110, %c8_111] : memref<12x32xf32, #tpu.memory_space<vmem>>, vector<6x8xf32>
    tpu.vector_store %arg26[%c6_110, %c8_111], %173 {strides = array<i32>} : memref<12x32xf32, #tpu.memory_space<vmem>>, vector<6x8xf32>,
    %c6_112 = arith.constant 6 : index
    %c16_113 = arith.constant 16 : index
    %175 = vector.load %arg25[%c6_112, %c16_113] : memref<12x96xf32, #tpu.memory_space<vmem>>, vector<6x8xf32>
    %cst_114 = arith.constant 0.353553385 : f32
    %176 = vector.broadcast %cst_114 : f32 to vector<6x8xf32>
    %177 = arith.mulf %175, %176 : vector<6x8xf32>
    %c6_115 = arith.constant 6 : index
    %c48_116 = arith.constant 48 : index
    %178 = vector.load %arg25[%c6_115, %c48_116] : memref<12x96xf32, #tpu.memory_space<vmem>>, vector<6x8xf32>
    %c6_117 = arith.constant 6 : index
    %c80_118 = arith.constant 80 : index
    %179 = vector.load %arg25[%c6_117, %c80_118] : memref<12x96xf32, #tpu.memory_space<vmem>>, vector<6x8xf32>
    %180 = tpu.transpose %178, [1, 0] : vector<6x8xf32> -> vector<8x6xf32>
    %cst_119 = arith.constant dense<0.000000e+00> : vector<6x6xf32>
    %181 = tpu.matmul %177, %180, %cst_119 {dimension_numbers = #tpu.dot_dimension_numbers<[1], [0], [0], [1], [0, 0, 1, 1], [], []>} : vector<6x8xf32>, vector<8x6xf32>, vector<6x6xf32> -> vector<6x6xf32>
    %cst_120 = arith.constant dense<0xFF800000> : vector<6xf32>
    %182 = vector.multi_reduction <maximumf>, %181, %cst_120 [1] : vector<6x6xf32> to vector<6xf32>
    %183 = vector.shape_cast %182 : vector<6xf32> to vector<6x1xf32>
    %184 = vector.broadcast %183 : vector<6x1xf32> to vector<6x6xf32>
    %185 = arith.subf %181, %184 : vector<6x6xf32>
    %186 = math.exp %185 : vector<6x6xf32>
    %cst_121 = arith.constant dense<0.000000e+00> : vector<6xf32>
    %187 = vector.multi_reduction <add>, %186, %cst_121 [1] : vector<6x6xf32> to vector<6xf32>
    %188 = vector.shape_cast %187 : vector<6xf32> to vector<6x1xf32>
    %189 = tpu.reciprocal %188 {approx = true} : vector<6x1xf32> -> vector<6x1xf32>
    %190 = vector.broadcast %189 : vector<6x1xf32> to vector<6x6xf32>
    %191 = arith.mulf %186, %190 : vector<6x6xf32>
    %cst_122 = arith.constant dense<0.000000e+00> : vector<6x8xf32>
    %192 = tpu.matmul %191, %179, %cst_122 {dimension_numbers = #tpu.dot_dimension_numbers<[1], [0], [0], [1], [0, 0, 1, 1], [], []>} : vector<6x6xf32>, vector<6x8xf32>, vector<6x8xf32> -> vector<6x8xf32>
    %c6_123 = arith.constant 6 : index
    %c16_124 = arith.constant 16 : index
    %193 = vector.load %arg26[%c6_123, %c16_124] : memref<12x32xf32, #tpu.memory_space<vmem>>, vector<6x8xf32>
    tpu.vector_store %arg26[%c6_123, %c16_124], %192 {strides = array<i32>} : memref<12x32xf32, #tpu.memory_space<vmem>>, vector<6x8xf32>,
    %c6_125 = arith.constant 6 : index
    %c24_126 = arith.constant 24 : index
    %194 = vector.load %arg25[%c6_125, %c24_126] : memref<12x96xf32, #tpu.memory_space<vmem>>, vector<6x8xf32>
    %cst_127 = arith.constant 0.353553385 : f32
    %195 = vector.broadcast %cst_127 : f32 to vector<6x8xf32>
    %196 = arith.mulf %194, %195 : vector<6x8xf32>
    %c6_128 = arith.constant 6 : index
    %c56_129 = arith.constant 56 : index
    %197 = vector.load %arg25[%c6_128, %c56_129] : memref<12x96xf32, #tpu.memory_space<vmem>>, vector<6x8xf32>
    %c6_130 = arith.constant 6 : index
    %c88_131 = arith.constant 88 : index
    %198 = vector.load %arg25[%c6_130, %c88_131] : memref<12x96xf32, #tpu.memory_space<vmem>>, vector<6x8xf32>
    %199 = tpu.transpose %197, [1, 0] : vector<6x8xf32> -> vector<8x6xf32>
    %cst_132 = arith.constant dense<0.000000e+00> : vector<6x6xf32>
    %200 = tpu.matmul %196, %199, %cst_132 {dimension_numbers = #tpu.dot_dimension_numbers<[1], [0], [0], [1], [0, 0, 1, 1], [], []>} : vector<6x8xf32>, vector<8x6xf32>, vector<6x6xf32> -> vector<6x6xf32>
    %cst_133 = arith.constant dense<0xFF800000> : vector<6xf32>
    %201 = vector.multi_reduction <maximumf>, %200, %cst_133 [1] : vector<6x6xf32> to vector<6xf32>
    %202 = vector.shape_cast %201 : vector<6xf32> to vector<6x1xf32>
    %203 = vector.broadcast %202 : vector<6x1xf32> to vector<6x6xf32>
    %204 = arith.subf %200, %203 : vector<6x6xf32>
    %205 = math.exp %204 : vector<6x6xf32>
    %cst_134 = arith.constant dense<0.000000e+00> : vector<6xf32>
    %206 = vector.multi_reduction <add>, %205, %cst_134 [1] : vector<6x6xf32> to vector<6xf32>
    %207 = vector.shape_cast %206 : vector<6xf32> to vector<6x1xf32>
    %208 = tpu.reciprocal %207 {approx = true} : vector<6x1xf32> -> vector<6x1xf32>
    %209 = vector.broadcast %208 : vector<6x1xf32> to vector<6x6xf32>
    %210 = arith.mulf %205, %209 : vector<6x6xf32>
    %cst_135 = arith.constant dense<0.000000e+00> : vector<6x8xf32>
    %211 = tpu.matmul %210, %198, %cst_135 {dimension_numbers = #tpu.dot_dimension_numbers<[1], [0], [0], [1], [0, 0, 1, 1], [], []>} : vector<6x6xf32>, vector<6x8xf32>, vector<6x8xf32> -> vector<6x8xf32>
    %c6_136 = arith.constant 6 : index
    %c24_137 = arith.constant 24 : index
    %212 = vector.load %arg26[%c6_136, %c24_137] : memref<12x32xf32, #tpu.memory_space<vmem>>, vector<6x8xf32>
    tpu.vector_store %arg26[%c6_136, %c24_137], %211 {strides = array<i32>} : memref<12x32xf32, #tpu.memory_space<vmem>>, vector<6x8xf32>,
    %c0_138 = arith.constant 0 : index
    %c0_139 = arith.constant 0 : index
    %213 = vector.load %arg26[%c0_138, %c0_139] : memref<12x32xf32, #tpu.memory_space<vmem>>, vector<12x32xf32>
    %c0_140 = arith.constant 0 : index
    %c0_141 = arith.constant 0 : index
    %c0_142 = arith.constant 0 : index
    %214 = vector.load %arg9[%c0_140, %c0_141, %c0_142] : memref<2x32x32xbf16, #tpu.memory_space<vmem>>, vector<1x32x32xbf16>
    %215 = vector.shape_cast %214 : vector<1x32x32xbf16> to vector<32x32xbf16>
    %c0_143 = arith.constant 0 : index
    %c0_144 = arith.constant 0 : index
    %c0_145 = arith.constant 0 : index
    %216 = vector.load %arg10[%c0_143, %c0_144, %c0_145] : memref<2x1x32xf32, #tpu.memory_space<vmem>>, vector<1x1x32xf32>
    %217 = vector.shape_cast %216 : vector<1x1x32xf32> to vector<1x32xf32>
    %218 = arith.truncf %213 : vector<12x32xf32> to vector<12x32xbf16>
    %cst_146 = arith.constant dense<0.000000e+00> : vector<12x32xf32>
    %219 = tpu.matmul %218, %215, %cst_146 {dimension_numbers = #tpu.dot_dimension_numbers<[1], [0], [0], [1], [0, 0, 1, 1], [], []>} : vector<12x32xbf16>, vector<32x32xbf16>, vector<12x32xf32> -> vector<12x32xf32>
    %220 = vector.broadcast %217 : vector<1x32xf32> to vector<12x32xf32>
    %221 = arith.addf %219, %220 : vector<12x32xf32>
    %222 = arith.addf %25, %221 : vector<12x32xf32>
    %c0_147 = arith.constant 0 : index
    %c0_148 = arith.constant 0 : index
    %c0_149 = arith.constant 0 : index
    %223 = vector.load %arg11[%c0_147, %c0_148, %c0_149] : memref<2x1x32xf32, #tpu.memory_space<vmem>>, vector<1x1x32xf32>
    %224 = vector.shape_cast %223 : vector<1x1x32xf32> to vector<1x32xf32>
    %c0_150 = arith.constant 0 : index
    %c0_151 = arith.constant 0 : index
    %c0_152 = arith.constant 0 : index
    %225 = vector.load %arg12[%c0_150, %c0_151, %c0_152] : memref<2x1x32xf32, #tpu.memory_space<vmem>>, vector<1x1x32xf32>
    %226 = vector.shape_cast %225 : vector<1x1x32xf32> to vector<1x32xf32>
    %cst_153 = arith.constant dense<0.000000e+00> : vector<12xf32>
    %227 = vector.multi_reduction <add>, %222, %cst_153 [1] : vector<12x32xf32> to vector<12xf32>
    %228 = vector.shape_cast %227 : vector<12xf32> to vector<12x1xf32>
    %cst_154 = arith.constant 3.200000e+01 : f32
    %229 = vector.broadcast %cst_154 : f32 to vector<12x1xf32>
    %230 = arith.divf %228, %229 : vector<12x1xf32>
    %231 = vector.broadcast %230 : vector<12x1xf32> to vector<12x32xf32>
    %232 = arith.subf %222, %231 : vector<12x32xf32>
    %233 = arith.mulf %232, %232 : vector<12x32xf32>
    %cst_155 = arith.constant dense<0.000000e+00> : vector<12xf32>
    %234 = vector.multi_reduction <add>, %233, %cst_155 [1] : vector<12x32xf32> to vector<12xf32>
    %235 = vector.shape_cast %234 : vector<12xf32> to vector<12x1xf32>
    %cst_156 = arith.constant 3.200000e+01 : f32
    %236 = vector.broadcast %cst_156 : f32 to vector<12x1xf32>
    %237 = arith.divf %235, %236 : vector<12x1xf32>
    %238 = vector.broadcast %230 : vector<12x1xf32> to vector<12x32xf32>
    %239 = arith.subf %222, %238 : vector<12x32xf32>
    %cst_157 = arith.constant 9.99999997E-7 : f32
    %240 = vector.broadcast %cst_157 : f32 to vector<12x1xf32>
    %241 = arith.addf %237, %240 : vector<12x1xf32>
    %242 = math.rsqrt %241 : vector<12x1xf32>
    %243 = vector.broadcast %242 : vector<12x1xf32> to vector<12x32xf32>
    %244 = arith.mulf %239, %243 : vector<12x32xf32>
    %245 = vector.broadcast %224 : vector<1x32xf32> to vector<12x32xf32>
    %246 = arith.mulf %244, %245 : vector<12x32xf32>
    %247 = vector.broadcast %226 : vector<1x32xf32> to vector<12x32xf32>
    %248 = arith.addf %246, %247 : vector<12x32xf32>
    %c0_158 = arith.constant 0 : index
    %c0_159 = arith.constant 0 : index
    %c0_160 = arith.constant 0 : index
    %249 = vector.load %arg13[%c0_158, %c0_159, %c0_160] : memref<2x32x64xbf16, #tpu.memory_space<vmem>>, vector<1x32x64xbf16>
    %250 = vector.shape_cast %249 : vector<1x32x64xbf16> to vector<32x64xbf16>
    %c0_161 = arith.constant 0 : index
    %c0_162 = arith.constant 0 : index
    %c0_163 = arith.constant 0 : index
    %251 = vector.load %arg14[%c0_161, %c0_162, %c0_163] : memref<2x1x64xf32, #tpu.memory_space<vmem>>, vector<1x1x64xf32>
    %252 = vector.shape_cast %251 : vector<1x1x64xf32> to vector<1x64xf32>
    %253 = arith.truncf %248 : vector<12x32xf32> to vector<12x32xbf16>
    %cst_164 = arith.constant dense<0.000000e+00> : vector<12x64xf32>
    %254 = tpu.matmul %253, %250, %cst_164 {dimension_numbers = #tpu.dot_dimension_numbers<[1], [0], [0], [1], [0, 0, 1, 1], [], []>} : vector<12x32xbf16>, vector<32x64xbf16>, vector<12x64xf32> -> vector<12x64xf32>
    %255 = vector.broadcast %252 : vector<1x64xf32> to vector<12x64xf32>
    %256 = arith.addf %254, %255 : vector<12x64xf32>
    %257 = arith.mulf %256, %256 : vector<12x64xf32>
    %258 = arith.mulf %256, %257 : vector<12x64xf32>
    %cst_165 = arith.constant 4.471500e-02 : f32
    %259 = vector.broadcast %cst_165 : f32 to vector<12x64xf32>
    %260 = arith.mulf %259, %258 : vector<12x64xf32>
    %261 = arith.addf %256, %260 : vector<12x64xf32>
    %cst_166 = arith.constant 0.797884583 : f32
    %262 = vector.broadcast %cst_166 : f32 to vector<12x64xf32>
    %263 = arith.mulf %262, %261 : vector<12x64xf32>
    %264 = math.tanh %263 : vector<12x64xf32>
    %cst_167 = arith.constant 1.000000e+00 : f32
    %265 = vector.broadcast %cst_167 : f32 to vector<12x64xf32>
    %266 = arith.addf %265, %264 : vector<12x64xf32>
    %cst_168 = arith.constant 5.000000e-01 : f32
    %267 = vector.broadcast %cst_168 : f32 to vector<12x64xf32>
    %268 = arith.mulf %267, %266 : vector<12x64xf32>
    %269 = arith.mulf %256, %268 : vector<12x64xf32>
    %c0_169 = arith.constant 0 : index
    %c0_170 = arith.constant 0 : index
    %c0_171 = arith.constant 0 : index
    %270 = vector.load %arg15[%c0_169, %c0_170, %c0_171] : memref<2x64x32xbf16, #tpu.memory_space<vmem>>, vector<1x64x32xbf16>
    %271 = vector.shape_cast %270 : vector<1x64x32xbf16> to vector<64x32xbf16>
    %c0_172 = arith.constant 0 : index
    %c0_173 = arith.constant 0 : index
    %c0_174 = arith.constant 0 : index
    %272 = vector.load %arg16[%c0_172, %c0_173, %c0_174] : memref<2x1x32xf32, #tpu.memory_space<vmem>>, vector<1x1x32xf32>
    %273 = vector.shape_cast %272 : vector<1x1x32xf32> to vector<1x32xf32>
    %274 = arith.truncf %269 : vector<12x64xf32> to vector<12x64xbf16>
    %cst_175 = arith.constant dense<0.000000e+00> : vector<12x32xf32>
    %275 = tpu.matmul %274, %271, %cst_175 {dimension_numbers = #tpu.dot_dimension_numbers<[1], [0], [0], [1], [0, 0, 1, 1], [], []>} : vector<12x64xbf16>, vector<64x32xbf16>, vector<12x32xf32> -> vector<12x32xf32>
    %276 = vector.broadcast %273 : vector<1x32xf32> to vector<12x32xf32>
    %277 = arith.addf %275, %276 : vector<12x32xf32>
    %278 = arith.addf %222, %277 : vector<12x32xf32>
    %c1_176 = arith.constant 1 : index
    %c0_177 = arith.constant 0 : index
    %c0_178 = arith.constant 0 : index
    %279 = vector.load %arg5[%c1_176, %c0_177, %c0_178] : memref<2x1x32xf32, #tpu.memory_space<vmem>>, vector<1x1x32xf32>
    %280 = vector.shape_cast %279 : vector<1x1x32xf32> to vector<1x32xf32>
    %c1_179 = arith.constant 1 : index
    %c0_180 = arith.constant 0 : index
    %c0_181 = arith.constant 0 : index
    %281 = vector.load %arg6[%c1_179, %c0_180, %c0_181] : memref<2x1x32xf32, #tpu.memory_space<vmem>>, vector<1x1x32xf32>
    %282 = vector.shape_cast %281 : vector<1x1x32xf32> to vector<1x32xf32>
    %cst_182 = arith.constant dense<0.000000e+00> : vector<12xf32>
    %283 = vector.multi_reduction <add>, %278, %cst_182 [1] : vector<12x32xf32> to vector<12xf32>
    %284 = vector.shape_cast %283 : vector<12xf32> to vector<12x1xf32>
    %cst_183 = arith.constant 3.200000e+01 : f32
    %285 = vector.broadcast %cst_183 : f32 to vector<12x1xf32>
    %286 = arith.divf %284, %285 : vector<12x1xf32>
    %287 = vector.broadcast %286 : vector<12x1xf32> to vector<12x32xf32>
    %288 = arith.subf %278, %287 : vector<12x32xf32>
    %289 = arith.mulf %288, %288 : vector<12x32xf32>
    %cst_184 = arith.constant dense<0.000000e+00> : vector<12xf32>
    %290 = vector.multi_reduction <add>, %289, %cst_184 [1] : vector<12x32xf32> to vector<12xf32>
    %291 = vector.shape_cast %290 : vector<12xf32> to vector<12x1xf32>
    %cst_185 = arith.constant 3.200000e+01 : f32
    %292 = vector.broadcast %cst_185 : f32 to vector<12x1xf32>
    %293 = arith.divf %291, %292 : vector<12x1xf32>
    %294 = vector.broadcast %286 : vector<12x1xf32> to vector<12x32xf32>
    %295 = arith.subf %278, %294 : vector<12x32xf32>
    %cst_186 = arith.constant 9.99999997E-7 : f32
    %296 = vector.broadcast %cst_186 : f32 to vector<12x1xf32>
    %297 = arith.addf %293, %296 : vector<12x1xf32>
    %298 = math.rsqrt %297 : vector<12x1xf32>
    %299 = vector.broadcast %298 : vector<12x1xf32> to vector<12x32xf32>
    %300 = arith.mulf %295, %299 : vector<12x32xf32>
    %301 = vector.broadcast %280 : vector<1x32xf32> to vector<12x32xf32>
    %302 = arith.mulf %300, %301 : vector<12x32xf32>
    %303 = vector.broadcast %282 : vector<1x32xf32> to vector<12x32xf32>
    %304 = arith.addf %302, %303 : vector<12x32xf32>
    %c1_187 = arith.constant 1 : index
    %c0_188 = arith.constant 0 : index
    %c0_189 = arith.constant 0 : index
    %305 = vector.load %arg7[%c1_187, %c0_188, %c0_189] : memref<2x32x96xbf16, #tpu.memory_space<vmem>>, vector<1x32x96xbf16>
    %306 = vector.shape_cast %305 : vector<1x32x96xbf16> to vector<32x96xbf16>
    %c1_190 = arith.constant 1 : index
    %c0_191 = arith.constant 0 : index
    %c0_192 = arith.constant 0 : index
    %307 = vector.load %arg8[%c1_190, %c0_191, %c0_192] : memref<2x1x96xf32, #tpu.memory_space<vmem>>, vector<1x1x96xf32>
    %308 = vector.shape_cast %307 : vector<1x1x96xf32> to vector<1x96xf32>
    %309 = arith.truncf %304 : vector<12x32xf32> to vector<12x32xbf16>
    %cst_193 = arith.constant dense<0.000000e+00> : vector<12x96xf32>
    %310 = tpu.matmul %309, %306, %cst_193 {dimension_numbers = #tpu.dot_dimension_numbers<[1], [0], [0], [1], [0, 0, 1, 1], [], []>} : vector<12x32xbf16>, vector<32x96xbf16>, vector<12x96xf32> -> vector<12x96xf32>
    %311 = vector.broadcast %308 : vector<1x96xf32> to vector<12x96xf32>
    %312 = arith.addf %310, %311 : vector<12x96xf32>
    %c0_194 = arith.constant 0 : index
    %c0_195 = arith.constant 0 : index
    %313 = vector.load %arg25[%c0_194, %c0_195] : memref<12x96xf32, #tpu.memory_space<vmem>>, vector<12x96xf32>
    tpu.vector_store %arg25[%c0_194, %c0_195], %312 {strides = array<i32>} : memref<12x96xf32, #tpu.memory_space<vmem>>, vector<12x96xf32>,
    %c0_196 = arith.constant 0 : index
    %c0_197 = arith.constant 0 : index
    %314 = vector.load %arg25[%c0_196, %c0_197] : memref<12x96xf32, #tpu.memory_space<vmem>>, vector<6x8xf32>
    %cst_198 = arith.constant 0.353553385 : f32
    %315 = vector.broadcast %cst_198 : f32 to vector<6x8xf32>
    %316 = arith.mulf %314, %315 : vector<6x8xf32>
    %c0_199 = arith.constant 0 : index
    %c32_200 = arith.constant 32 : index
    %317 = vector.load %arg25[%c0_199, %c32_200] : memref<12x96xf32, #tpu.memory_space<vmem>>, vector<6x8xf32>
    %c0_201 = arith.constant 0 : index
    %c64_202 = arith.constant 64 : index
    %318 = vector.load %arg25[%c0_201, %c64_202] : memref<12x96xf32, #tpu.memory_space<vmem>>, vector<6x8xf32>
    %319 = tpu.transpose %317, [1, 0] : vector<6x8xf32> -> vector<8x6xf32>
    %cst_203 = arith.constant dense<0.000000e+00> : vector<6x6xf32>
    %320 = tpu.matmul %316, %319, %cst_203 {dimension_numbers = #tpu.dot_dimension_numbers<[1], [0], [0], [1], [0, 0, 1, 1], [], []>} : vector<6x8xf32>, vector<8x6xf32>, vector<6x6xf32> -> vector<6x6xf32>
    %cst_204 = arith.constant dense<0xFF800000> : vector<6xf32>
    %321 = vector.multi_reduction <maximumf>, %320, %cst_204 [1] : vector<6x6xf32> to vector<6xf32>
    %322 = vector.shape_cast %321 : vector<6xf32> to vector<6x1xf32>
    %323 = vector.broadcast %322 : vector<6x1xf32> to vector<6x6xf32>
    %324 = arith.subf %320, %323 : vector<6x6xf32>
    %325 = math.exp %324 : vector<6x6xf32>
    %cst_205 = arith.constant dense<0.000000e+00> : vector<6xf32>
    %326 = vector.multi_reduction <add>, %325, %cst_205 [1] : vector<6x6xf32> to vector<6xf32>
    %327 = vector.shape_cast %326 : vector<6xf32> to vector<6x1xf32>
    %328 = tpu.reciprocal %327 {approx = true} : vector<6x1xf32> -> vector<6x1xf32>
    %329 = vector.broadcast %328 : vector<6x1xf32> to vector<6x6xf32>
    %330 = arith.mulf %325, %329 : vector<6x6xf32>
    %cst_206 = arith.constant dense<0.000000e+00> : vector<6x8xf32>
    %331 = tpu.matmul %330, %318, %cst_206 {dimension_numbers = #tpu.dot_dimension_numbers<[1], [0], [0], [1], [0, 0, 1, 1], [], []>} : vector<6x6xf32>, vector<6x8xf32>, vector<6x8xf32> -> vector<6x8xf32>
    %c0_207 = arith.constant 0 : index
    %c0_208 = arith.constant 0 : index
    %332 = vector.load %arg26[%c0_207, %c0_208] : memref<12x32xf32, #tpu.memory_space<vmem>>, vector<6x8xf32>
    tpu.vector_store %arg26[%c0_207, %c0_208], %331 {strides = array<i32>} : memref<12x32xf32, #tpu.memory_space<vmem>>, vector<6x8xf32>,
    %c0_209 = arith.constant 0 : index
    %c8_210 = arith.constant 8 : index
    %333 = vector.load %arg25[%c0_209, %c8_210] : memref<12x96xf32, #tpu.memory_space<vmem>>, vector<6x8xf32>
    %cst_211 = arith.constant 0.353553385 : f32
    %334 = vector.broadcast %cst_211 : f32 to vector<6x8xf32>
    %335 = arith.mulf %333, %334 : vector<6x8xf32>
    %c0_212 = arith.constant 0 : index
    %c40_213 = arith.constant 40 : index
    %336 = vector.load %arg25[%c0_212, %c40_213] : memref<12x96xf32, #tpu.memory_space<vmem>>, vector<6x8xf32>
    %c0_214 = arith.constant 0 : index
    %c72_215 = arith.constant 72 : index
    %337 = vector.load %arg25[%c0_214, %c72_215] : memref<12x96xf32, #tpu.memory_space<vmem>>, vector<6x8xf32>
    %338 = tpu.transpose %336, [1, 0] : vector<6x8xf32> -> vector<8x6xf32>
    %cst_216 = arith.constant dense<0.000000e+00> : vector<6x6xf32>
    %339 = tpu.matmul %335, %338, %cst_216 {dimension_numbers = #tpu.dot_dimension_numbers<[1], [0], [0], [1], [0, 0, 1, 1], [], []>} : vector<6x8xf32>, vector<8x6xf32>, vector<6x6xf32> -> vector<6x6xf32>
    %cst_217 = arith.constant dense<0xFF800000> : vector<6xf32>
    %340 = vector.multi_reduction <maximumf>, %339, %cst_217 [1] : vector<6x6xf32> to vector<6xf32>
    %341 = vector.shape_cast %340 : vector<6xf32> to vector<6x1xf32>
    %342 = vector.broadcast %341 : vector<6x1xf32> to vector<6x6xf32>
    %343 = arith.subf %339, %342 : vector<6x6xf32>
    %344 = math.exp %343 : vector<6x6xf32>
    %cst_218 = arith.constant dense<0.000000e+00> : vector<6xf32>
    %345 = vector.multi_reduction <add>, %344, %cst_218 [1] : vector<6x6xf32> to vector<6xf32>
    %346 = vector.shape_cast %345 : vector<6xf32> to vector<6x1xf32>
    %347 = tpu.reciprocal %346 {approx = true} : vector<6x1xf32> -> vector<6x1xf32>
    %348 = vector.broadcast %347 : vector<6x1xf32> to vector<6x6xf32>
    %349 = arith.mulf %344, %348 : vector<6x6xf32>
    %cst_219 = arith.constant dense<0.000000e+00> : vector<6x8xf32>
    %350 = tpu.matmul %349, %337, %cst_219 {dimension_numbers = #tpu.dot_dimension_numbers<[1], [0], [0], [1], [0, 0, 1, 1], [], []>} : vector<6x6xf32>, vector<6x8xf32>, vector<6x8xf32> -> vector<6x8xf32>
    %c0_220 = arith.constant 0 : index
    %c8_221 = arith.constant 8 : index
    %351 = vector.load %arg26[%c0_220, %c8_221] : memref<12x32xf32, #tpu.memory_space<vmem>>, vector<6x8xf32>
    tpu.vector_store %arg26[%c0_220, %c8_221], %350 {strides = array<i32>} : memref<12x32xf32, #tpu.memory_space<vmem>>, vector<6x8xf32>,
    %c0_222 = arith.constant 0 : index
    %c16_223 = arith.constant 16 : index
    %352 = vector.load %arg25[%c0_222, %c16_223] : memref<12x96xf32, #tpu.memory_space<vmem>>, vector<6x8xf32>
    %cst_224 = arith.constant 0.353553385 : f32
    %353 = vector.broadcast %cst_224 : f32 to vector<6x8xf32>
    %354 = arith.mulf %352, %353 : vector<6x8xf32>
    %c0_225 = arith.constant 0 : index
    %c48_226 = arith.constant 48 : index
    %355 = vector.load %arg25[%c0_225, %c48_226] : memref<12x96xf32, #tpu.memory_space<vmem>>, vector<6x8xf32>
    %c0_227 = arith.constant 0 : index
    %c80_228 = arith.constant 80 : index
    %356 = vector.load %arg25[%c0_227, %c80_228] : memref<12x96xf32, #tpu.memory_space<vmem>>, vector<6x8xf32>
    %357 = tpu.transpose %355, [1, 0] : vector<6x8xf32> -> vector<8x6xf32>
    %cst_229 = arith.constant dense<0.000000e+00> : vector<6x6xf32>
    %358 = tpu.matmul %354, %357, %cst_229 {dimension_numbers = #tpu.dot_dimension_numbers<[1], [0], [0], [1], [0, 0, 1, 1], [], []>} : vector<6x8xf32>, vector<8x6xf32>, vector<6x6xf32> -> vector<6x6xf32>
    %cst_230 = arith.constant dense<0xFF800000> : vector<6xf32>
    %359 = vector.multi_reduction <maximumf>, %358, %cst_230 [1] : vector<6x6xf32> to vector<6xf32>
    %360 = vector.shape_cast %359 : vector<6xf32> to vector<6x1xf32>
    %361 = vector.broadcast %360 : vector<6x1xf32> to vector<6x6xf32>
    %362 = arith.subf %358, %361 : vector<6x6xf32>
    %363 = math.exp %362 : vector<6x6xf32>
    %cst_231 = arith.constant dense<0.000000e+00> : vector<6xf32>
    %364 = vector.multi_reduction <add>, %363, %cst_231 [1] : vector<6x6xf32> to vector<6xf32>
    %365 = vector.shape_cast %364 : vector<6xf32> to vector<6x1xf32>
    %366 = tpu.reciprocal %365 {approx = true} : vector<6x1xf32> -> vector<6x1xf32>
    %367 = vector.broadcast %366 : vector<6x1xf32> to vector<6x6xf32>
    %368 = arith.mulf %363, %367 : vector<6x6xf32>
    %cst_232 = arith.constant dense<0.000000e+00> : vector<6x8xf32>
    %369 = tpu.matmul %368, %356, %cst_232 {dimension_numbers = #tpu.dot_dimension_numbers<[1], [0], [0], [1], [0, 0, 1, 1], [], []>} : vector<6x6xf32>, vector<6x8xf32>, vector<6x8xf32> -> vector<6x8xf32>
    %c0_233 = arith.constant 0 : index
    %c16_234 = arith.constant 16 : index
    %370 = vector.load %arg26[%c0_233, %c16_234] : memref<12x32xf32, #tpu.memory_space<vmem>>, vector<6x8xf32>
    tpu.vector_store %arg26[%c0_233, %c16_234], %369 {strides = array<i32>} : memref<12x32xf32, #tpu.memory_space<vmem>>, vector<6x8xf32>,
    %c0_235 = arith.constant 0 : index
    %c24_236 = arith.constant 24 : index
    %371 = vector.load %arg25[%c0_235, %c24_236] : memref<12x96xf32, #tpu.memory_space<vmem>>, vector<6x8xf32>
    %cst_237 = arith.constant 0.353553385 : f32
    %372 = vector.broadcast %cst_237 : f32 to vector<6x8xf32>
    %373 = arith.mulf %371, %372 : vector<6x8xf32>
    %c0_238 = arith.constant 0 : index
    %c56_239 = arith.constant 56 : index
    %374 = vector.load %arg25[%c0_238, %c56_239] : memref<12x96xf32, #tpu.memory_space<vmem>>, vector<6x8xf32>
    %c0_240 = arith.constant 0 : index
    %c88_241 = arith.constant 88 : index
    %375 = vector.load %arg25[%c0_240, %c88_241] : memref<12x96xf32, #tpu.memory_space<vmem>>, vector<6x8xf32>
    %376 = tpu.transpose %374, [1, 0] : vector<6x8xf32> -> vector<8x6xf32>
    %cst_242 = arith.constant dense<0.000000e+00> : vector<6x6xf32>
    %377 = tpu.matmul %373, %376, %cst_242 {dimension_numbers = #tpu.dot_dimension_numbers<[1], [0], [0], [1], [0, 0, 1, 1], [], []>} : vector<6x8xf32>, vector<8x6xf32>, vector<6x6xf32> -> vector<6x6xf32>
    %cst_243 = arith.constant dense<0xFF800000> : vector<6xf32>
    %378 = vector.multi_reduction <maximumf>, %377, %cst_243 [1] : vector<6x6xf32> to vector<6xf32>
    %379 = vector.shape_cast %378 : vector<6xf32> to vector<6x1xf32>
    %380 = vector.broadcast %379 : vector<6x1xf32> to vector<6x6xf32>
    %381 = arith.subf %377, %380 : vector<6x6xf32>
    %382 = math.exp %381 : vector<6x6xf32>
    %cst_244 = arith.constant dense<0.000000e+00> : vector<6xf32>
    %383 = vector.multi_reduction <add>, %382, %cst_244 [1] : vector<6x6xf32> to vector<6xf32>
    %384 = vector.shape_cast %383 : vector<6xf32> to vector<6x1xf32>
    %385 = tpu.reciprocal %384 {approx = true} : vector<6x1xf32> -> vector<6x1xf32>
    %386 = vector.broadcast %385 : vector<6x1xf32> to vector<6x6xf32>
    %387 = arith.mulf %382, %386 : vector<6x6xf32>
    %cst_245 = arith.constant dense<0.000000e+00> : vector<6x8xf32>
    %388 = tpu.matmul %387, %375, %cst_245 {dimension_numbers = #tpu.dot_dimension_numbers<[1], [0], [0], [1], [0, 0, 1, 1], [], []>} : vector<6x6xf32>, vector<6x8xf32>, vector<6x8xf32> -> vector<6x8xf32>
    %c0_246 = arith.constant 0 : index
    %c24_247 = arith.constant 24 : index
    %389 = vector.load %arg26[%c0_246, %c24_247] : memref<12x32xf32, #tpu.memory_space<vmem>>, vector<6x8xf32>
    tpu.vector_store %arg26[%c0_246, %c24_247], %388 {strides = array<i32>} : memref<12x32xf32, #tpu.memory_space<vmem>>, vector<6x8xf32>,
    %c6_248 = arith.constant 6 : index
    %c0_249 = arith.constant 0 : index
    %390 = vector.load %arg25[%c6_248, %c0_249] : memref<12x96xf32, #tpu.memory_space<vmem>>, vector<6x8xf32>
    %cst_250 = arith.constant 0.353553385 : f32
    %391 = vector.broadcast %cst_250 : f32 to vector<6x8xf32>
    %392 = arith.mulf %390, %391 : vector<6x8xf32>
    %c6_251 = arith.constant 6 : index
    %c32_252 = arith.constant 32 : index
    %393 = vector.load %arg25[%c6_251, %c32_252] : memref<12x96xf32, #tpu.memory_space<vmem>>, vector<6x8xf32>
    %c6_253 = arith.constant 6 : index
    %c64_254 = arith.constant 64 : index
    %394 = vector.load %arg25[%c6_253, %c64_254] : memref<12x96xf32, #tpu.memory_space<vmem>>, vector<6x8xf32>
    %395 = tpu.transpose %393, [1, 0] : vector<6x8xf32> -> vector<8x6xf32>
    %cst_255 = arith.constant dense<0.000000e+00> : vector<6x6xf32>
    %396 = tpu.matmul %392, %395, %cst_255 {dimension_numbers = #tpu.dot_dimension_numbers<[1], [0], [0], [1], [0, 0, 1, 1], [], []>} : vector<6x8xf32>, vector<8x6xf32>, vector<6x6xf32> -> vector<6x6xf32>
    %cst_256 = arith.constant dense<0xFF800000> : vector<6xf32>
    %397 = vector.multi_reduction <maximumf>, %396, %cst_256 [1] : vector<6x6xf32> to vector<6xf32>
    %398 = vector.shape_cast %397 : vector<6xf32> to vector<6x1xf32>
    %399 = vector.broadcast %398 : vector<6x1xf32> to vector<6x6xf32>
    %400 = arith.subf %396, %399 : vector<6x6xf32>
    %401 = math.exp %400 : vector<6x6xf32>
    %cst_257 = arith.constant dense<0.000000e+00> : vector<6xf32>
    %402 = vector.multi_reduction <add>, %401, %cst_257 [1] : vector<6x6xf32> to vector<6xf32>
    %403 = vector.shape_cast %402 : vector<6xf32> to vector<6x1xf32>
    %404 = tpu.reciprocal %403 {approx = true} : vector<6x1xf32> -> vector<6x1xf32>
    %405 = vector.broadcast %404 : vector<6x1xf32> to vector<6x6xf32>
    %406 = arith.mulf %401, %405 : vector<6x6xf32>
    %cst_258 = arith.constant dense<0.000000e+00> : vector<6x8xf32>
    %407 = tpu.matmul %406, %394, %cst_258 {dimension_numbers = #tpu.dot_dimension_numbers<[1], [0], [0], [1], [0, 0, 1, 1], [], []>} : vector<6x6xf32>, vector<6x8xf32>, vector<6x8xf32> -> vector<6x8xf32>
    %c6_259 = arith.constant 6 : index
    %c0_260 = arith.constant 0 : index
    %408 = vector.load %arg26[%c6_259, %c0_260] : memref<12x32xf32, #tpu.memory_space<vmem>>, vector<6x8xf32>
    tpu.vector_store %arg26[%c6_259, %c0_260], %407 {strides = array<i32>} : memref<12x32xf32, #tpu.memory_space<vmem>>, vector<6x8xf32>,
    %c6_261 = arith.constant 6 : index
    %c8_262 = arith.constant 8 : index
    %409 = vector.load %arg25[%c6_261, %c8_262] : memref<12x96xf32, #tpu.memory_space<vmem>>, vector<6x8xf32>
    %cst_263 = arith.constant 0.353553385 : f32
    %410 = vector.broadcast %cst_263 : f32 to vector<6x8xf32>
    %411 = arith.mulf %409, %410 : vector<6x8xf32>
    %c6_264 = arith.constant 6 : index
    %c40_265 = arith.constant 40 : index
    %412 = vector.load %arg25[%c6_264, %c40_265] : memref<12x96xf32, #tpu.memory_space<vmem>>, vector<6x8xf32>
    %c6_266 = arith.constant 6 : index
    %c72_267 = arith.constant 72 : index
    %413 = vector.load %arg25[%c6_266, %c72_267] : memref<12x96xf32, #tpu.memory_space<vmem>>, vector<6x8xf32>
    %414 = tpu.transpose %412, [1, 0] : vector<6x8xf32> -> vector<8x6xf32>
    %cst_268 = arith.constant dense<0.000000e+00> : vector<6x6xf32>
    %415 = tpu.matmul %411, %414, %cst_268 {dimension_numbers = #tpu.dot_dimension_numbers<[1], [0], [0], [1], [0, 0, 1, 1], [], []>} : vector<6x8xf32>, vector<8x6xf32>, vector<6x6xf32> -> vector<6x6xf32>
    %cst_269 = arith.constant dense<0xFF800000> : vector<6xf32>
    %416 = vector.multi_reduction <maximumf>, %415, %cst_269 [1] : vector<6x6xf32> to vector<6xf32>
    %417 = vector.shape_cast %416 : vector<6xf32> to vector<6x1xf32>
    %418 = vector.broadcast %417 : vector<6x1xf32> to vector<6x6xf32>
    %419 = arith.subf %415, %418 : vector<6x6xf32>
    %420 = math.exp %419 : vector<6x6xf32>
    %cst_270 = arith.constant dense<0.000000e+00> : vector<6xf32>
    %421 = vector.multi_reduction <add>, %420, %cst_270 [1] : vector<6x6xf32> to vector<6xf32>
    %422 = vector.shape_cast %421 : vector<6xf32> to vector<6x1xf32>
    %423 = tpu.reciprocal %422 {approx = true} : vector<6x1xf32> -> vector<6x1xf32>
    %424 = vector.broadcast %423 : vector<6x1xf32> to vector<6x6xf32>
    %425 = arith.mulf %420, %424 : vector<6x6xf32>
    %cst_271 = arith.constant dense<0.000000e+00> : vector<6x8xf32>
    %426 = tpu.matmul %425, %413, %cst_271 {dimension_numbers = #tpu.dot_dimension_numbers<[1], [0], [0], [1], [0, 0, 1, 1], [], []>} : vector<6x6xf32>, vector<6x8xf32>, vector<6x8xf32> -> vector<6x8xf32>
    %c6_272 = arith.constant 6 : index
    %c8_273 = arith.constant 8 : index
    %427 = vector.load %arg26[%c6_272, %c8_273] : memref<12x32xf32, #tpu.memory_space<vmem>>, vector<6x8xf32>
    tpu.vector_store %arg26[%c6_272, %c8_273], %426 {strides = array<i32>} : memref<12x32xf32, #tpu.memory_space<vmem>>, vector<6x8xf32>,
    %c6_274 = arith.constant 6 : index
    %c16_275 = arith.constant 16 : index
    %428 = vector.load %arg25[%c6_274, %c16_275] : memref<12x96xf32, #tpu.memory_space<vmem>>, vector<6x8xf32>
    %cst_276 = arith.constant 0.353553385 : f32
    %429 = vector.broadcast %cst_276 : f32 to vector<6x8xf32>
    %430 = arith.mulf %428, %429 : vector<6x8xf32>
    %c6_277 = arith.constant 6 : index
    %c48_278 = arith.constant 48 : index
    %431 = vector.load %arg25[%c6_277, %c48_278] : memref<12x96xf32, #tpu.memory_space<vmem>>, vector<6x8xf32>
    %c6_279 = arith.constant 6 : index
    %c80_280 = arith.constant 80 : index
    %432 = vector.load %arg25[%c6_279, %c80_280] : memref<12x96xf32, #tpu.memory_space<vmem>>, vector<6x8xf32>
    %433 = tpu.transpose %431, [1, 0] : vector<6x8xf32> -> vector<8x6xf32>
    %cst_281 = arith.constant dense<0.000000e+00> : vector<6x6xf32>
    %434 = tpu.matmul %430, %433, %cst_281 {dimension_numbers = #tpu.dot_dimension_numbers<[1], [0], [0], [1], [0, 0, 1, 1], [], []>} : vector<6x8xf32>, vector<8x6xf32>, vector<6x6xf32> -> vector<6x6xf32>
    %cst_282 = arith.constant dense<0xFF800000> : vector<6xf32>
    %435 = vector.multi_reduction <maximumf>, %434, %cst_282 [1] : vector<6x6xf32> to vector<6xf32>
    %436 = vector.shape_cast %435 : vector<6xf32> to vector<6x1xf32>
    %437 = vector.broadcast %436 : vector<6x1xf32> to vector<6x6xf32>
    %438 = arith.subf %434, %437 : vector<6x6xf32>
    %439 = math.exp %438 : vector<6x6xf32>
    %cst_283 = arith.constant dense<0.000000e+00> : vector<6xf32>
    %440 = vector.multi_reduction <add>, %439, %cst_283 [1] : vector<6x6xf32> to vector<6xf32>
    %441 = vector.shape_cast %440 : vector<6xf32> to vector<6x1xf32>
    %442 = tpu.reciprocal %441 {approx = true} : vector<6x1xf32> -> vector<6x1xf32>
    %443 = vector.broadcast %442 : vector<6x1xf32> to vector<6x6xf32>
    %444 = arith.mulf %439, %443 : vector<6x6xf32>
    %cst_284 = arith.constant dense<0.000000e+00> : vector<6x8xf32>
    %445 = tpu.matmul %444, %432, %cst_284 {dimension_numbers = #tpu.dot_dimension_numbers<[1], [0], [0], [1], [0, 0, 1, 1], [], []>} : vector<6x6xf32>, vector<6x8xf32>, vector<6x8xf32> -> vector<6x8xf32>
    %c6_285 = arith.constant 6 : index
    %c16_286 = arith.constant 16 : index
    %446 = vector.load %arg26[%c6_285, %c16_286] : memref<12x32xf32, #tpu.memory_space<vmem>>, vector<6x8xf32>
    tpu.vector_store %arg26[%c6_285, %c16_286], %445 {strides = array<i32>} : memref<12x32xf32, #tpu.memory_space<vmem>>, vector<6x8xf32>,
    %c6_287 = arith.constant 6 : index
    %c24_288 = arith.constant 24 : index
    %447 = vector.load %arg25[%c6_287, %c24_288] : memref<12x96xf32, #tpu.memory_space<vmem>>, vector<6x8xf32>
    %cst_289 = arith.constant 0.353553385 : f32
    %448 = vector.broadcast %cst_289 : f32 to vector<6x8xf32>
    %449 = arith.mulf %447, %448 : vector<6x8xf32>
    %c6_290 = arith.constant 6 : index
    %c56_291 = arith.constant 56 : index
    %450 = vector.load %arg25[%c6_290, %c56_291] : memref<12x96xf32, #tpu.memory_space<vmem>>, vector<6x8xf32>
    %c6_292 = arith.constant 6 : index
    %c88_293 = arith.constant 88 : index
    %451 = vector.load %arg25[%c6_292, %c88_293] : memref<12x96xf32, #tpu.memory_space<vmem>>, vector<6x8xf32>
    %452 = tpu.transpose %450, [1, 0] : vector<6x8xf32> -> vector<8x6xf32>
    %cst_294 = arith.constant dense<0.000000e+00> : vector<6x6xf32>
    %453 = tpu.matmul %449, %452, %cst_294 {dimension_numbers = #tpu.dot_dimension_numbers<[1], [0], [0], [1], [0, 0, 1, 1], [], []>} : vector<6x8xf32>, vector<8x6xf32>, vector<6x6xf32> -> vector<6x6xf32>
    %cst_295 = arith.constant dense<0xFF800000> : vector<6xf32>
    %454 = vector.multi_reduction <maximumf>, %453, %cst_295 [1] : vector<6x6xf32> to vector<6xf32>
    %455 = vector.shape_cast %454 : vector<6xf32> to vector<6x1xf32>
    %456 = vector.broadcast %455 : vector<6x1xf32> to vector<6x6xf32>
    %457 = arith.subf %453, %456 : vector<6x6xf32>
    %458 = math.exp %457 : vector<6x6xf32>
    %cst_296 = arith.constant dense<0.000000e+00> : vector<6xf32>
    %459 = vector.multi_reduction <add>, %458, %cst_296 [1] : vector<6x6xf32> to vector<6xf32>
    %460 = vector.shape_cast %459 : vector<6xf32> to vector<6x1xf32>
    %461 = tpu.reciprocal %460 {approx = true} : vector<6x1xf32> -> vector<6x1xf32>
    %462 = vector.broadcast %461 : vector<6x1xf32> to vector<6x6xf32>
    %463 = arith.mulf %458, %462 : vector<6x6xf32>
    %cst_297 = arith.constant dense<0.000000e+00> : vector<6x8xf32>
    %464 = tpu.matmul %463, %451, %cst_297 {dimension_numbers = #tpu.dot_dimension_numbers<[1], [0], [0], [1], [0, 0, 1, 1], [], []>} : vector<6x6xf32>, vector<6x8xf32>, vector<6x8xf32> -> vector<6x8xf32>
    %c6_298 = arith.constant 6 : index
    %c24_299 = arith.constant 24 : index
    %465 = vector.load %arg26[%c6_298, %c24_299] : memref<12x32xf32, #tpu.memory_space<vmem>>, vector<6x8xf32>
    tpu.vector_store %arg26[%c6_298, %c24_299], %464 {strides = array<i32>} : memref<12x32xf32, #tpu.memory_space<vmem>>, vector<6x8xf32>,
    %c0_300 = arith.constant 0 : index
    %c0_301 = arith.constant 0 : index
    %466 = vector.load %arg26[%c0_300, %c0_301] : memref<12x32xf32, #tpu.memory_space<vmem>>, vector<12x32xf32>
    %c1_302 = arith.constant 1 : index
    %c0_303 = arith.constant 0 : index
    %c0_304 = arith.constant 0 : index
    %467 = vector.load %arg9[%c1_302, %c0_303, %c0_304] : memref<2x32x32xbf16, #tpu.memory_space<vmem>>, vector<1x32x32xbf16>
    %468 = vector.shape_cast %467 : vector<1x32x32xbf16> to vector<32x32xbf16>
    %c1_305 = arith.constant 1 : index
    %c0_306 = arith.constant 0 : index
    %c0_307 = arith.constant 0 : index
    %469 = vector.load %arg10[%c1_305, %c0_306, %c0_307] : memref<2x1x32xf32, #tpu.memory_space<vmem>>, vector<1x1x32xf32>
    %470 = vector.shape_cast %469 : vector<1x1x32xf32> to vector<1x32xf32>
    %471 = arith.truncf %466 : vector<12x32xf32> to vector<12x32xbf16>
    %cst_308 = arith.constant dense<0.000000e+00> : vector<12x32xf32>
    %472 = tpu.matmul %471, %468, %cst_308 {dimension_numbers = #tpu.dot_dimension_numbers<[1], [0], [0], [1], [0, 0, 1, 1], [], []>} : vector<12x32xbf16>, vector<32x32xbf16>, vector<12x32xf32> -> vector<12x32xf32>
    %473 = vector.broadcast %470 : vector<1x32xf32> to vector<12x32xf32>
    %474 = arith.addf %472, %473 : vector<12x32xf32>
    %475 = arith.addf %278, %474 : vector<12x32xf32>
    %c1_309 = arith.constant 1 : index
    %c0_310 = arith.constant 0 : index
    %c0_311 = arith.constant 0 : index
    %476 = vector.load %arg11[%c1_309, %c0_310, %c0_311] : memref<2x1x32xf32, #tpu.memory_space<vmem>>, vector<1x1x32xf32>
    %477 = vector.shape_cast %476 : vector<1x1x32xf32> to vector<1x32xf32>
    %c1_312 = arith.constant 1 : index
    %c0_313 = arith.constant 0 : index
    %c0_314 = arith.constant 0 : index
    %478 = vector.load %arg12[%c1_312, %c0_313, %c0_314] : memref<2x1x32xf32, #tpu.memory_space<vmem>>, vector<1x1x32xf32>
    %479 = vector.shape_cast %478 : vector<1x1x32xf32> to vector<1x32xf32>
    %cst_315 = arith.constant dense<0.000000e+00> : vector<12xf32>
    %480 = vector.multi_reduction <add>, %475, %cst_315 [1] : vector<12x32xf32> to vector<12xf32>
    %481 = vector.shape_cast %480 : vector<12xf32> to vector<12x1xf32>
    %cst_316 = arith.constant 3.200000e+01 : f32
    %482 = vector.broadcast %cst_316 : f32 to vector<12x1xf32>
    %483 = arith.divf %481, %482 : vector<12x1xf32>
    %484 = vector.broadcast %483 : vector<12x1xf32> to vector<12x32xf32>
    %485 = arith.subf %475, %484 : vector<12x32xf32>
    %486 = arith.mulf %485, %485 : vector<12x32xf32>
    %cst_317 = arith.constant dense<0.000000e+00> : vector<12xf32>
    %487 = vector.multi_reduction <add>, %486, %cst_317 [1] : vector<12x32xf32> to vector<12xf32>
    %488 = vector.shape_cast %487 : vector<12xf32> to vector<12x1xf32>
    %cst_318 = arith.constant 3.200000e+01 : f32
    %489 = vector.broadcast %cst_318 : f32 to vector<12x1xf32>
    %490 = arith.divf %488, %489 : vector<12x1xf32>
    %491 = vector.broadcast %483 : vector<12x1xf32> to vector<12x32xf32>
    %492 = arith.subf %475, %491 : vector<12x32xf32>
    %cst_319 = arith.constant 9.99999997E-7 : f32
    %493 = vector.broadcast %cst_319 : f32 to vector<12x1xf32>
    %494 = arith.addf %490, %493 : vector<12x1xf32>
    %495 = math.rsqrt %494 : vector<12x1xf32>
    %496 = vector.broadcast %495 : vector<12x1xf32> to vector<12x32xf32>
    %497 = arith.mulf %492, %496 : vector<12x32xf32>
    %498 = vector.broadcast %477 : vector<1x32xf32> to vector<12x32xf32>
    %499 = arith.mulf %497, %498 : vector<12x32xf32>
    %500 = vector.broadcast %479 : vector<1x32xf32> to vector<12x32xf32>
    %501 = arith.addf %499, %500 : vector<12x32xf32>
    %c1_320 = arith.constant 1 : index
    %c0_321 = arith.constant 0 : index
    %c0_322 = arith.constant 0 : index
    %502 = vector.load %arg13[%c1_320, %c0_321, %c0_322] : memref<2x32x64xbf16, #tpu.memory_space<vmem>>, vector<1x32x64xbf16>
    %503 = vector.shape_cast %502 : vector<1x32x64xbf16> to vector<32x64xbf16>
    %c1_323 = arith.constant 1 : index
    %c0_324 = arith.constant 0 : index
    %c0_325 = arith.constant 0 : index
    %504 = vector.load %arg14[%c1_323, %c0_324, %c0_325] : memref<2x1x64xf32, #tpu.memory_space<vmem>>, vector<1x1x64xf32>
    %505 = vector.shape_cast %504 : vector<1x1x64xf32> to vector<1x64xf32>
    %506 = arith.truncf %501 : vector<12x32xf32> to vector<12x32xbf16>
    %cst_326 = arith.constant dense<0.000000e+00> : vector<12x64xf32>
    %507 = tpu.matmul %506, %503, %cst_326 {dimension_numbers = #tpu.dot_dimension_numbers<[1], [0], [0], [1], [0, 0, 1, 1], [], []>} : vector<12x32xbf16>, vector<32x64xbf16>, vector<12x64xf32> -> vector<12x64xf32>
    %508 = vector.broadcast %505 : vector<1x64xf32> to vector<12x64xf32>
    %509 = arith.addf %507, %508 : vector<12x64xf32>
    %510 = arith.mulf %509, %509 : vector<12x64xf32>
    %511 = arith.mulf %509, %510 : vector<12x64xf32>
    %cst_327 = arith.constant 4.471500e-02 : f32
    %512 = vector.broadcast %cst_327 : f32 to vector<12x64xf32>
    %513 = arith.mulf %512, %511 : vector<12x64xf32>
    %514 = arith.addf %509, %513 : vector<12x64xf32>
    %cst_328 = arith.constant 0.797884583 : f32
    %515 = vector.broadcast %cst_328 : f32 to vector<12x64xf32>
    %516 = arith.mulf %515, %514 : vector<12x64xf32>
    %517 = math.tanh %516 : vector<12x64xf32>
    %cst_329 = arith.constant 1.000000e+00 : f32
    %518 = vector.broadcast %cst_329 : f32 to vector<12x64xf32>
    %519 = arith.addf %518, %517 : vector<12x64xf32>
    %cst_330 = arith.constant 5.000000e-01 : f32
    %520 = vector.broadcast %cst_330 : f32 to vector<12x64xf32>
    %521 = arith.mulf %520, %519 : vector<12x64xf32>
    %522 = arith.mulf %509, %521 : vector<12x64xf32>
    %c1_331 = arith.constant 1 : index
    %c0_332 = arith.constant 0 : index
    %c0_333 = arith.constant 0 : index
    %523 = vector.load %arg15[%c1_331, %c0_332, %c0_333] : memref<2x64x32xbf16, #tpu.memory_space<vmem>>, vector<1x64x32xbf16>
    %524 = vector.shape_cast %523 : vector<1x64x32xbf16> to vector<64x32xbf16>
    %c1_334 = arith.constant 1 : index
    %c0_335 = arith.constant 0 : index
    %c0_336 = arith.constant 0 : index
    %525 = vector.load %arg16[%c1_334, %c0_335, %c0_336] : memref<2x1x32xf32, #tpu.memory_space<vmem>>, vector<1x1x32xf32>
    %526 = vector.shape_cast %525 : vector<1x1x32xf32> to vector<1x32xf32>
    %527 = arith.truncf %522 : vector<12x64xf32> to vector<12x64xbf16>
    %cst_337 = arith.constant dense<0.000000e+00> : vector<12x32xf32>
    %528 = tpu.matmul %527, %524, %cst_337 {dimension_numbers = #tpu.dot_dimension_numbers<[1], [0], [0], [1], [0, 0, 1, 1], [], []>} : vector<12x64xbf16>, vector<64x32xbf16>, vector<12x32xf32> -> vector<12x32xf32>
    %529 = vector.broadcast %526 : vector<1x32xf32> to vector<12x32xf32>
    %530 = arith.addf %528, %529 : vector<12x32xf32>
    %531 = arith.addf %475, %530 : vector<12x32xf32>
    %c0_338 = arith.constant 0 : index
    %c0_339 = arith.constant 0 : index
    %532 = vector.load %arg17[%c0_338, %c0_339] : memref<1x32xf32, #tpu.memory_space<vmem>>, vector<1x32xf32>
    %c0_340 = arith.constant 0 : index
    %c0_341 = arith.constant 0 : index
    %533 = vector.load %arg18[%c0_340, %c0_341] : memref<1x32xf32, #tpu.memory_space<vmem>>, vector<1x32xf32>
    %cst_342 = arith.constant dense<0.000000e+00> : vector<12xf32>
    %534 = vector.multi_reduction <add>, %531, %cst_342 [1] : vector<12x32xf32> to vector<12xf32>
    %535 = vector.shape_cast %534 : vector<12xf32> to vector<12x1xf32>
    %cst_343 = arith.constant 3.200000e+01 : f32
    %536 = vector.broadcast %cst_343 : f32 to vector<12x1xf32>
    %537 = arith.divf %535, %536 : vector<12x1xf32>
    %538 = vector.broadcast %537 : vector<12x1xf32> to vector<12x32xf32>
    %539 = arith.subf %531, %538 : vector<12x32xf32>
    %540 = arith.mulf %539, %539 : vector<12x32xf32>
    %cst_344 = arith.constant dense<0.000000e+00> : vector<12xf32>
    %541 = vector.multi_reduction <add>, %540, %cst_344 [1] : vector<12x32xf32> to vector<12xf32>
    %542 = vector.shape_cast %541 : vector<12xf32> to vector<12x1xf32>
    %cst_345 = arith.constant 3.200000e+01 : f32
    %543 = vector.broadcast %cst_345 : f32 to vector<12x1xf32>
    %544 = arith.divf %542, %543 : vector<12x1xf32>
    %545 = vector.broadcast %537 : vector<12x1xf32> to vector<12x32xf32>
    %546 = arith.subf %531, %545 : vector<12x32xf32>
    %cst_346 = arith.constant 9.99999997E-7 : f32
    %547 = vector.broadcast %cst_346 : f32 to vector<12x1xf32>
    %548 = arith.addf %544, %547 : vector<12x1xf32>
    %549 = math.rsqrt %548 : vector<12x1xf32>
    %550 = vector.broadcast %549 : vector<12x1xf32> to vector<12x32xf32>
    %551 = arith.mulf %546, %550 : vector<12x32xf32>
    %552 = vector.broadcast %532 : vector<1x32xf32> to vector<12x32xf32>
    %553 = arith.mulf %551, %552 : vector<12x32xf32>
    %554 = vector.broadcast %533 : vector<1x32xf32> to vector<12x32xf32>
    %555 = arith.addf %553, %554 : vector<12x32xf32>
    %c0_347 = arith.constant 0 : index
    %c0_348 = arith.constant 0 : index
    %556 = vector.load %arg24[%c0_347, %c0_348] : memref<12x32xf32, #tpu.memory_space<vmem>>, vector<12x32xf32>
    tpu.vector_store %arg24[%c0_347, %c0_348], %555 {strides = array<i32>} : memref<12x32xf32, #tpu.memory_space<vmem>>, vector<12x32xf32>,
    %c0_349 = arith.constant 0 : index
    %c0_350 = arith.constant 0 : index
    %557 = vector.load %arg19[%c0_349, %c0_350] : memref<32x32xbf16, #tpu.memory_space<vmem>>, vector<32x32xbf16>
    %c0_351 = arith.constant 0 : index
    %c0_352 = arith.constant 0 : index
    %558 = vector.load %arg20[%c0_351, %c0_352] : memref<1x32xf32, #tpu.memory_space<vmem>>, vector<1x32xf32>
    %c0_353 = arith.constant 0 : index
    %c0_354 = arith.constant 0 : index
    %559 = vector.load %arg21[%c0_353, %c0_354] : memref<32x32xbf16, #tpu.memory_space<vmem>>, vector<32x32xbf16>
    %c0_355 = arith.constant 0 : index
    %c0_356 = arith.constant 0 : index
    %560 = vector.load %arg22[%c0_355, %c0_356] : memref<1x32xf32, #tpu.memory_space<vmem>>, vector<1x32xf32>
    %c0_357 = arith.constant 0 : index
    %c0_358 = arith.constant 0 : index
    %561 = vector.load %arg24[%c0_357, %c0_358] : memref<12x32xf32, #tpu.memory_space<vmem>>, vector<1x32xf32>
    %c1_359 = arith.constant 1 : index
    %c0_360 = arith.constant 0 : index
    %562 = vector.load %arg24[%c1_359, %c0_360] : memref<12x32xf32, #tpu.memory_space<vmem>>, vector<1x32xf32>
    %563 = arith.truncf %561 : vector<1x32xf32> to vector<1x32xbf16>
    %cst_361 = arith.constant dense<0.000000e+00> : vector<1x32xf32>
    %564 = tpu.matmul %563, %557, %cst_361 {dimension_numbers = #tpu.dot_dimension_numbers<[1], [0], [0], [1], [0, 0, 1, 1], [], []>} : vector<1x32xbf16>, vector<32x32xbf16>, vector<1x32xf32> -> vector<1x32xf32>
    %565 = arith.addf %564, %558 : vector<1x32xf32>
    %566 = arith.truncf %562 : vector<1x32xf32> to vector<1x32xbf16>
    %cst_362 = arith.constant dense<0.000000e+00> : vector<1x32xf32>
    %567 = tpu.matmul %566, %559, %cst_362 {dimension_numbers = #tpu.dot_dimension_numbers<[1], [0], [0], [1], [0, 0, 1, 1], [], []>} : vector<1x32xbf16>, vector<32x32xbf16>, vector<1x32xf32> -> vector<1x32xf32>
    %568 = arith.addf %567, %560 : vector<1x32xf32>
    %569 = arith.addf %565, %568 : vector<1x32xf32>
    %cst_363 = arith.constant 5.000000e-01 : f32
    %570 = vector.broadcast %cst_363 : f32 to vector<1x32xf32>
    %571 = arith.mulf %569, %570 : vector<1x32xf32>
    %c0_364 = arith.constant 0 : index
    %c0_365 = arith.constant 0 : index
    %572 = vector.load %arg23[%c0_364, %c0_365] : memref<2x32xf32, #tpu.memory_space<vmem>>, vector<1x32xf32>
    tpu.vector_store %arg23[%c0_364, %c0_365], %571 {strides = array<i32>} : memref<2x32xf32, #tpu.memory_space<vmem>>, vector<1x32xf32>,
    %c6_366 = arith.constant 6 : index
    %c0_367 = arith.constant 0 : index
    %573 = vector.load %arg24[%c6_366, %c0_367] : memref<12x32xf32, #tpu.memory_space<vmem>>, vector<1x32xf32>
    %c7 = arith.constant 7 : index
    %c0_368 = arith.constant 0 : index
    %574 = vector.load %arg24[%c7, %c0_368] : memref<12x32xf32, #tpu.memory_space<vmem>>, vector<1x32xf32>
    %575 = arith.truncf %573 : vector<1x32xf32> to vector<1x32xbf16>
    %cst_369 = arith.constant dense<0.000000e+00> : vector<1x32xf32>
    %576 = tpu.matmul %575, %557, %cst_369 {dimension_numbers = #tpu.dot_dimension_numbers<[1], [0], [0], [1], [0, 0, 1, 1], [], []>} : vector<1x32xbf16>, vector<32x32xbf16>, vector<1x32xf32> -> vector<1x32xf32>
    %577 = arith.addf %576, %558 : vector<1x32xf32>
    %578 = arith.truncf %574 : vector<1x32xf32> to vector<1x32xbf16>
    %cst_370 = arith.constant dense<0.000000e+00> : vector<1x32xf32>
    %579 = tpu.matmul %578, %559, %cst_370 {dimension_numbers = #tpu.dot_dimension_numbers<[1], [0], [0], [1], [0, 0, 1, 1], [], []>} : vector<1x32xbf16>, vector<32x32xbf16>, vector<1x32xf32> -> vector<1x32xf32>
    %580 = arith.addf %579, %560 : vector<1x32xf32>
    %581 = arith.addf %577, %580 : vector<1x32xf32>
    %cst_371 = arith.constant 5.000000e-01 : f32
    %582 = vector.broadcast %cst_371 : f32 to vector<1x32xf32>
    %583 = arith.mulf %581, %582 : vector<1x32xf32>
    %c1_372 = arith.constant 1 : index
    %c0_373 = arith.constant 0 : index
    %584 = vector.load %arg23[%c1_372, %c0_373] : memref<2x32xf32, #tpu.memory_space<vmem>>, vector<1x32xf32>
    tpu.vector_store %arg23[%c1_372, %c0_373], %583 {strides = array<i32>} : memref<2x32xf32, #tpu.memory_space<vmem>>, vector<1x32xf32>,
    return
  }
}

module attributes {stable_mosaic.version = 11 : i64} {
  func.func @_deit_fwd_kernel(%arg0: memref<2x8x192xf32, #tpu.memory_space<vmem>>, %arg1: memref<192x32xbf16, #tpu.memory_space<vmem>>, %arg2: memref<1x32xf32, #tpu.memory_space<vmem>>, %arg3: memref<2x32xf32, #tpu.memory_space<vmem>>, %arg4: memref<10x32xf32, #tpu.memory_space<vmem>>, %arg5: memref<2x1x32xf32, #tpu.memory_space<vmem>>, %arg6: memref<2x1x32xf32, #tpu.memory_space<vmem>>, %arg7: memref<2x32x96xbf16, #tpu.memory_space<vmem>>, %arg8: memref<2x1x96xf32, #tpu.memory_space<vmem>>, %arg9: memref<2x32x32xbf16, #tpu.memory_space<vmem>>, %arg10: memref<2x1x32xf32, #tpu.memory_space<vmem>>, %arg11: memref<2x1x32xf32, #tpu.memory_space<vmem>>, %arg12: memref<2x1x32xf32, #tpu.memory_space<vmem>>, %arg13: memref<2x32x64xbf16, #tpu.memory_space<vmem>>, %arg14: memref<2x1x64xf32, #tpu.memory_space<vmem>>, %arg15: memref<2x64x32xbf16, #tpu.memory_space<vmem>>, %arg16: memref<2x1x32xf32, #tpu.memory_space<vmem>>, %arg17: memref<1x32xf32, #tpu.memory_space<vmem>>, %arg18: memref<1x32xf32, #tpu.memory_space<vmem>>, %arg19: memref<32x32xbf16, #tpu.memory_space<vmem>>, %arg20: memref<1x32xf32, #tpu.memory_space<vmem>>, %arg21: memref<32x32xbf16, #tpu.memory_space<vmem>>, %arg22: memref<1x32xf32, #tpu.memory_space<vmem>>, %arg23: memref<2x32xf32, #tpu.memory_space<vmem>>, %arg24: memref<20x32xf32, #tpu.memory_space<vmem>>, %arg25: memref<20x96xf32, #tpu.memory_space<vmem>>, %arg26: memref<20x32xf32, #tpu.memory_space<vmem>>) attributes {dimension_semantics = [], scalar_prefetch = 0 : i64, scratch_operands = 3 : i64, tpu.core_type = #tpu.core_type<tc>} {
    %c0 = arith.constant 0 : index
    %c0_0 = arith.constant 0 : index
    %0 = vector.load %arg1[%c0, %c0_0] : memref<192x32xbf16, #tpu.memory_space<vmem>>, vector<192x32xbf16>
    %c0_1 = arith.constant 0 : index
    %c0_2 = arith.constant 0 : index
    %1 = vector.load %arg2[%c0_1, %c0_2] : memref<1x32xf32, #tpu.memory_space<vmem>>, vector<1x32xf32>
    %c0_3 = arith.constant 0 : index
    %c0_4 = arith.constant 0 : index
    %2 = vector.load %arg3[%c0_3, %c0_4] : memref<2x32xf32, #tpu.memory_space<vmem>>, vector<2x32xf32>
    %c0_5 = arith.constant 0 : index
    %c0_6 = arith.constant 0 : index
    %3 = vector.load %arg4[%c0_5, %c0_6] : memref<10x32xf32, #tpu.memory_space<vmem>>, vector<2x32xf32>
    %4 = arith.addf %2, %3 : vector<2x32xf32>
    %c0_7 = arith.constant 0 : index
    %c0_8 = arith.constant 0 : index
    %c0_9 = arith.constant 0 : index
    %5 = vector.load %arg0[%c0_7, %c0_8, %c0_9] : memref<2x8x192xf32, #tpu.memory_space<vmem>>, vector<1x8x192xf32>
    %6 = vector.shape_cast %5 : vector<1x8x192xf32> to vector<8x192xf32>
    %7 = arith.truncf %6 : vector<8x192xf32> to vector<8x192xbf16>
    %cst = arith.constant dense<0.000000e+00> : vector<8x32xf32>
    %8 = tpu.matmul %7, %0, %cst {dimension_numbers = #tpu.dot_dimension_numbers<[1], [0], [0], [1], [0, 0, 1, 1], [], []>} : vector<8x192xbf16>, vector<192x32xbf16>, vector<8x32xf32> -> vector<8x32xf32>
    %9 = vector.broadcast %1 : vector<1x32xf32> to vector<8x32xf32>
    %10 = arith.addf %8, %9 : vector<8x32xf32>
    %c0_10 = arith.constant 0 : index
    %c0_11 = arith.constant 0 : index
    %11 = vector.load %arg24[%c0_10, %c0_11] : memref<20x32xf32, #tpu.memory_space<vmem>>, vector<2x32xf32>
    tpu.vector_store %arg24[%c0_10, %c0_11], %4 {strides = array<i32>} : memref<20x32xf32, #tpu.memory_space<vmem>>, vector<2x32xf32>,
    %c2 = arith.constant 2 : index
    %c0_12 = arith.constant 0 : index
    %12 = vector.load %arg4[%c2, %c0_12] : memref<10x32xf32, #tpu.memory_space<vmem>>, vector<8x32xf32>
    %13 = arith.addf %10, %12 : vector<8x32xf32>
    %c2_13 = arith.constant 2 : index
    %c0_14 = arith.constant 0 : index
    %14 = vector.load %arg24[%c2_13, %c0_14] : memref<20x32xf32, #tpu.memory_space<vmem>>, vector<8x32xf32>
    tpu.vector_store %arg24[%c2_13, %c0_14], %13 {strides = array<i32>} : memref<20x32xf32, #tpu.memory_space<vmem>>, vector<8x32xf32>,
    %c1 = arith.constant 1 : index
    %c0_15 = arith.constant 0 : index
    %c0_16 = arith.constant 0 : index
    %15 = vector.load %arg0[%c1, %c0_15, %c0_16] : memref<2x8x192xf32, #tpu.memory_space<vmem>>, vector<1x8x192xf32>
    %16 = vector.shape_cast %15 : vector<1x8x192xf32> to vector<8x192xf32>
    %17 = arith.truncf %16 : vector<8x192xf32> to vector<8x192xbf16>
    %cst_17 = arith.constant dense<0.000000e+00> : vector<8x32xf32>
    %18 = tpu.matmul %17, %0, %cst_17 {dimension_numbers = #tpu.dot_dimension_numbers<[1], [0], [0], [1], [0, 0, 1, 1], [], []>} : vector<8x192xbf16>, vector<192x32xbf16>, vector<8x32xf32> -> vector<8x32xf32>
    %19 = vector.broadcast %1 : vector<1x32xf32> to vector<8x32xf32>
    %20 = arith.addf %18, %19 : vector<8x32xf32>
    %c10 = arith.constant 10 : index
    %c0_18 = arith.constant 0 : index
    %21 = vector.load %arg24[%c10, %c0_18] : memref<20x32xf32, #tpu.memory_space<vmem>>, vector<2x32xf32>
    tpu.vector_store %arg24[%c10, %c0_18], %4 {strides = array<i32>} : memref<20x32xf32, #tpu.memory_space<vmem>>, vector<2x32xf32>,
    %c2_19 = arith.constant 2 : index
    %c0_20 = arith.constant 0 : index
    %22 = vector.load %arg4[%c2_19, %c0_20] : memref<10x32xf32, #tpu.memory_space<vmem>>, vector<8x32xf32>
    %23 = arith.addf %20, %22 : vector<8x32xf32>
    %c12 = arith.constant 12 : index
    %c0_21 = arith.constant 0 : index
    %24 = vector.load %arg24[%c12, %c0_21] : memref<20x32xf32, #tpu.memory_space<vmem>>, vector<8x32xf32>
    tpu.vector_store %arg24[%c12, %c0_21], %23 {strides = array<i32>} : memref<20x32xf32, #tpu.memory_space<vmem>>, vector<8x32xf32>,
    %c0_22 = arith.constant 0 : index
    %c0_23 = arith.constant 0 : index
    %25 = vector.load %arg24[%c0_22, %c0_23] : memref<20x32xf32, #tpu.memory_space<vmem>>, vector<20x32xf32>
    %c0_24 = arith.constant 0 : index
    %c0_25 = arith.constant 0 : index
    %c0_26 = arith.constant 0 : index
    %26 = vector.load %arg5[%c0_24, %c0_25, %c0_26] : memref<2x1x32xf32, #tpu.memory_space<vmem>>, vector<1x1x32xf32>
    %27 = vector.shape_cast %26 : vector<1x1x32xf32> to vector<1x32xf32>
    %c0_27 = arith.constant 0 : index
    %c0_28 = arith.constant 0 : index
    %c0_29 = arith.constant 0 : index
    %28 = vector.load %arg6[%c0_27, %c0_28, %c0_29] : memref<2x1x32xf32, #tpu.memory_space<vmem>>, vector<1x1x32xf32>
    %29 = vector.shape_cast %28 : vector<1x1x32xf32> to vector<1x32xf32>
    %cst_30 = arith.constant dense<0.000000e+00> : vector<20xf32>
    %30 = vector.multi_reduction <add>, %25, %cst_30 [1] : vector<20x32xf32> to vector<20xf32>
    %31 = vector.shape_cast %30 : vector<20xf32> to vector<20x1xf32>
    %cst_31 = arith.constant 3.200000e+01 : f32
    %32 = vector.broadcast %cst_31 : f32 to vector<20x1xf32>
    %33 = arith.divf %31, %32 : vector<20x1xf32>
    %34 = vector.broadcast %33 : vector<20x1xf32> to vector<20x32xf32>
    %35 = arith.subf %25, %34 : vector<20x32xf32>
    %36 = arith.mulf %35, %35 : vector<20x32xf32>
    %cst_32 = arith.constant dense<0.000000e+00> : vector<20xf32>
    %37 = vector.multi_reduction <add>, %36, %cst_32 [1] : vector<20x32xf32> to vector<20xf32>
    %38 = vector.shape_cast %37 : vector<20xf32> to vector<20x1xf32>
    %cst_33 = arith.constant 3.200000e+01 : f32
    %39 = vector.broadcast %cst_33 : f32 to vector<20x1xf32>
    %40 = arith.divf %38, %39 : vector<20x1xf32>
    %41 = vector.broadcast %33 : vector<20x1xf32> to vector<20x32xf32>
    %42 = arith.subf %25, %41 : vector<20x32xf32>
    %cst_34 = arith.constant 9.99999997E-7 : f32
    %43 = vector.broadcast %cst_34 : f32 to vector<20x1xf32>
    %44 = arith.addf %40, %43 : vector<20x1xf32>
    %45 = math.rsqrt %44 : vector<20x1xf32>
    %46 = vector.broadcast %45 : vector<20x1xf32> to vector<20x32xf32>
    %47 = arith.mulf %42, %46 : vector<20x32xf32>
    %48 = vector.broadcast %27 : vector<1x32xf32> to vector<20x32xf32>
    %49 = arith.mulf %47, %48 : vector<20x32xf32>
    %50 = vector.broadcast %29 : vector<1x32xf32> to vector<20x32xf32>
    %51 = arith.addf %49, %50 : vector<20x32xf32>
    %c0_35 = arith.constant 0 : index
    %c0_36 = arith.constant 0 : index
    %c0_37 = arith.constant 0 : index
    %52 = vector.load %arg7[%c0_35, %c0_36, %c0_37] : memref<2x32x96xbf16, #tpu.memory_space<vmem>>, vector<1x32x96xbf16>
    %53 = vector.shape_cast %52 : vector<1x32x96xbf16> to vector<32x96xbf16>
    %c0_38 = arith.constant 0 : index
    %c0_39 = arith.constant 0 : index
    %c0_40 = arith.constant 0 : index
    %54 = vector.load %arg8[%c0_38, %c0_39, %c0_40] : memref<2x1x96xf32, #tpu.memory_space<vmem>>, vector<1x1x96xf32>
    %55 = vector.shape_cast %54 : vector<1x1x96xf32> to vector<1x96xf32>
    %56 = arith.truncf %51 : vector<20x32xf32> to vector<20x32xbf16>
    %cst_41 = arith.constant dense<0.000000e+00> : vector<20x96xf32>
    %57 = tpu.matmul %56, %53, %cst_41 {dimension_numbers = #tpu.dot_dimension_numbers<[1], [0], [0], [1], [0, 0, 1, 1], [], []>} : vector<20x32xbf16>, vector<32x96xbf16>, vector<20x96xf32> -> vector<20x96xf32>
    %58 = vector.broadcast %55 : vector<1x96xf32> to vector<20x96xf32>
    %59 = arith.addf %57, %58 : vector<20x96xf32>
    %c0_42 = arith.constant 0 : index
    %c0_43 = arith.constant 0 : index
    %60 = vector.load %arg25[%c0_42, %c0_43] : memref<20x96xf32, #tpu.memory_space<vmem>>, vector<20x96xf32>
    tpu.vector_store %arg25[%c0_42, %c0_43], %59 {strides = array<i32>} : memref<20x96xf32, #tpu.memory_space<vmem>>, vector<20x96xf32>,
    %c0_44 = arith.constant 0 : index
    %c0_45 = arith.constant 0 : index
    %61 = vector.load %arg25[%c0_44, %c0_45] : memref<20x96xf32, #tpu.memory_space<vmem>>, vector<10x8xf32>
    %cst_46 = arith.constant 0.353553385 : f32
    %62 = vector.broadcast %cst_46 : f32 to vector<10x8xf32>
    %63 = arith.mulf %61, %62 : vector<10x8xf32>
    %c0_47 = arith.constant 0 : index
    %c32 = arith.constant 32 : index
    %64 = vector.load %arg25[%c0_47, %c32] : memref<20x96xf32, #tpu.memory_space<vmem>>, vector<10x8xf32>
    %c0_48 = arith.constant 0 : index
    %c64 = arith.constant 64 : index
    %65 = vector.load %arg25[%c0_48, %c64] : memref<20x96xf32, #tpu.memory_space<vmem>>, vector<10x8xf32>
    %66 = tpu.transpose %64, [1, 0] : vector<10x8xf32> -> vector<8x10xf32>
    %cst_49 = arith.constant dense<0.000000e+00> : vector<10x10xf32>
    %67 = tpu.matmul %63, %66, %cst_49 {dimension_numbers = #tpu.dot_dimension_numbers<[1], [0], [0], [1], [0, 0, 1, 1], [], []>} : vector<10x8xf32>, vector<8x10xf32>, vector<10x10xf32> -> vector<10x10xf32>
    %cst_50 = arith.constant dense<0xFF800000> : vector<10xf32>
    %68 = vector.multi_reduction <maximumf>, %67, %cst_50 [1] : vector<10x10xf32> to vector<10xf32>
    %69 = vector.shape_cast %68 : vector<10xf32> to vector<10x1xf32>
    %70 = vector.broadcast %69 : vector<10x1xf32> to vector<10x10xf32>
    %71 = arith.subf %67, %70 : vector<10x10xf32>
    %72 = math.exp %71 : vector<10x10xf32>
    %cst_51 = arith.constant dense<0.000000e+00> : vector<10xf32>
    %73 = vector.multi_reduction <add>, %72, %cst_51 [1] : vector<10x10xf32> to vector<10xf32>
    %74 = vector.shape_cast %73 : vector<10xf32> to vector<10x1xf32>
    %75 = tpu.reciprocal %74 {approx = true} : vector<10x1xf32> -> vector<10x1xf32>
    %76 = vector.broadcast %75 : vector<10x1xf32> to vector<10x10xf32>
    %77 = arith.mulf %72, %76 : vector<10x10xf32>
    %cst_52 = arith.constant dense<0.000000e+00> : vector<10x8xf32>
    %78 = tpu.matmul %77, %65, %cst_52 {dimension_numbers = #tpu.dot_dimension_numbers<[1], [0], [0], [1], [0, 0, 1, 1], [], []>} : vector<10x10xf32>, vector<10x8xf32>, vector<10x8xf32> -> vector<10x8xf32>
    %c0_53 = arith.constant 0 : index
    %c0_54 = arith.constant 0 : index
    %79 = vector.load %arg26[%c0_53, %c0_54] : memref<20x32xf32, #tpu.memory_space<vmem>>, vector<10x8xf32>
    tpu.vector_store %arg26[%c0_53, %c0_54], %78 {strides = array<i32>} : memref<20x32xf32, #tpu.memory_space<vmem>>, vector<10x8xf32>,
    %c0_55 = arith.constant 0 : index
    %c8 = arith.constant 8 : index
    %80 = vector.load %arg25[%c0_55, %c8] : memref<20x96xf32, #tpu.memory_space<vmem>>, vector<10x8xf32>
    %cst_56 = arith.constant 0.353553385 : f32
    %81 = vector.broadcast %cst_56 : f32 to vector<10x8xf32>
    %82 = arith.mulf %80, %81 : vector<10x8xf32>
    %c0_57 = arith.constant 0 : index
    %c40 = arith.constant 40 : index
    %83 = vector.load %arg25[%c0_57, %c40] : memref<20x96xf32, #tpu.memory_space<vmem>>, vector<10x8xf32>
    %c0_58 = arith.constant 0 : index
    %c72 = arith.constant 72 : index
    %84 = vector.load %arg25[%c0_58, %c72] : memref<20x96xf32, #tpu.memory_space<vmem>>, vector<10x8xf32>
    %85 = tpu.transpose %83, [1, 0] : vector<10x8xf32> -> vector<8x10xf32>
    %cst_59 = arith.constant dense<0.000000e+00> : vector<10x10xf32>
    %86 = tpu.matmul %82, %85, %cst_59 {dimension_numbers = #tpu.dot_dimension_numbers<[1], [0], [0], [1], [0, 0, 1, 1], [], []>} : vector<10x8xf32>, vector<8x10xf32>, vector<10x10xf32> -> vector<10x10xf32>
    %cst_60 = arith.constant dense<0xFF800000> : vector<10xf32>
    %87 = vector.multi_reduction <maximumf>, %86, %cst_60 [1] : vector<10x10xf32> to vector<10xf32>
    %88 = vector.shape_cast %87 : vector<10xf32> to vector<10x1xf32>
    %89 = vector.broadcast %88 : vector<10x1xf32> to vector<10x10xf32>
    %90 = arith.subf %86, %89 : vector<10x10xf32>
    %91 = math.exp %90 : vector<10x10xf32>
    %cst_61 = arith.constant dense<0.000000e+00> : vector<10xf32>
    %92 = vector.multi_reduction <add>, %91, %cst_61 [1] : vector<10x10xf32> to vector<10xf32>
    %93 = vector.shape_cast %92 : vector<10xf32> to vector<10x1xf32>
    %94 = tpu.reciprocal %93 {approx = true} : vector<10x1xf32> -> vector<10x1xf32>
    %95 = vector.broadcast %94 : vector<10x1xf32> to vector<10x10xf32>
    %96 = arith.mulf %91, %95 : vector<10x10xf32>
    %cst_62 = arith.constant dense<0.000000e+00> : vector<10x8xf32>
    %97 = tpu.matmul %96, %84, %cst_62 {dimension_numbers = #tpu.dot_dimension_numbers<[1], [0], [0], [1], [0, 0, 1, 1], [], []>} : vector<10x10xf32>, vector<10x8xf32>, vector<10x8xf32> -> vector<10x8xf32>
    %c0_63 = arith.constant 0 : index
    %c8_64 = arith.constant 8 : index
    %98 = vector.load %arg26[%c0_63, %c8_64] : memref<20x32xf32, #tpu.memory_space<vmem>>, vector<10x8xf32>
    tpu.vector_store %arg26[%c0_63, %c8_64], %97 {strides = array<i32>} : memref<20x32xf32, #tpu.memory_space<vmem>>, vector<10x8xf32>,
    %c0_65 = arith.constant 0 : index
    %c16 = arith.constant 16 : index
    %99 = vector.load %arg25[%c0_65, %c16] : memref<20x96xf32, #tpu.memory_space<vmem>>, vector<10x8xf32>
    %cst_66 = arith.constant 0.353553385 : f32
    %100 = vector.broadcast %cst_66 : f32 to vector<10x8xf32>
    %101 = arith.mulf %99, %100 : vector<10x8xf32>
    %c0_67 = arith.constant 0 : index
    %c48 = arith.constant 48 : index
    %102 = vector.load %arg25[%c0_67, %c48] : memref<20x96xf32, #tpu.memory_space<vmem>>, vector<10x8xf32>
    %c0_68 = arith.constant 0 : index
    %c80 = arith.constant 80 : index
    %103 = vector.load %arg25[%c0_68, %c80] : memref<20x96xf32, #tpu.memory_space<vmem>>, vector<10x8xf32>
    %104 = tpu.transpose %102, [1, 0] : vector<10x8xf32> -> vector<8x10xf32>
    %cst_69 = arith.constant dense<0.000000e+00> : vector<10x10xf32>
    %105 = tpu.matmul %101, %104, %cst_69 {dimension_numbers = #tpu.dot_dimension_numbers<[1], [0], [0], [1], [0, 0, 1, 1], [], []>} : vector<10x8xf32>, vector<8x10xf32>, vector<10x10xf32> -> vector<10x10xf32>
    %cst_70 = arith.constant dense<0xFF800000> : vector<10xf32>
    %106 = vector.multi_reduction <maximumf>, %105, %cst_70 [1] : vector<10x10xf32> to vector<10xf32>
    %107 = vector.shape_cast %106 : vector<10xf32> to vector<10x1xf32>
    %108 = vector.broadcast %107 : vector<10x1xf32> to vector<10x10xf32>
    %109 = arith.subf %105, %108 : vector<10x10xf32>
    %110 = math.exp %109 : vector<10x10xf32>
    %cst_71 = arith.constant dense<0.000000e+00> : vector<10xf32>
    %111 = vector.multi_reduction <add>, %110, %cst_71 [1] : vector<10x10xf32> to vector<10xf32>
    %112 = vector.shape_cast %111 : vector<10xf32> to vector<10x1xf32>
    %113 = tpu.reciprocal %112 {approx = true} : vector<10x1xf32> -> vector<10x1xf32>
    %114 = vector.broadcast %113 : vector<10x1xf32> to vector<10x10xf32>
    %115 = arith.mulf %110, %114 : vector<10x10xf32>
    %cst_72 = arith.constant dense<0.000000e+00> : vector<10x8xf32>
    %116 = tpu.matmul %115, %103, %cst_72 {dimension_numbers = #tpu.dot_dimension_numbers<[1], [0], [0], [1], [0, 0, 1, 1], [], []>} : vector<10x10xf32>, vector<10x8xf32>, vector<10x8xf32> -> vector<10x8xf32>
    %c0_73 = arith.constant 0 : index
    %c16_74 = arith.constant 16 : index
    %117 = vector.load %arg26[%c0_73, %c16_74] : memref<20x32xf32, #tpu.memory_space<vmem>>, vector<10x8xf32>
    tpu.vector_store %arg26[%c0_73, %c16_74], %116 {strides = array<i32>} : memref<20x32xf32, #tpu.memory_space<vmem>>, vector<10x8xf32>,
    %c0_75 = arith.constant 0 : index
    %c24 = arith.constant 24 : index
    %118 = vector.load %arg25[%c0_75, %c24] : memref<20x96xf32, #tpu.memory_space<vmem>>, vector<10x8xf32>
    %cst_76 = arith.constant 0.353553385 : f32
    %119 = vector.broadcast %cst_76 : f32 to vector<10x8xf32>
    %120 = arith.mulf %118, %119 : vector<10x8xf32>
    %c0_77 = arith.constant 0 : index
    %c56 = arith.constant 56 : index
    %121 = vector.load %arg25[%c0_77, %c56] : memref<20x96xf32, #tpu.memory_space<vmem>>, vector<10x8xf32>
    %c0_78 = arith.constant 0 : index
    %c88 = arith.constant 88 : index
    %122 = vector.load %arg25[%c0_78, %c88] : memref<20x96xf32, #tpu.memory_space<vmem>>, vector<10x8xf32>
    %123 = tpu.transpose %121, [1, 0] : vector<10x8xf32> -> vector<8x10xf32>
    %cst_79 = arith.constant dense<0.000000e+00> : vector<10x10xf32>
    %124 = tpu.matmul %120, %123, %cst_79 {dimension_numbers = #tpu.dot_dimension_numbers<[1], [0], [0], [1], [0, 0, 1, 1], [], []>} : vector<10x8xf32>, vector<8x10xf32>, vector<10x10xf32> -> vector<10x10xf32>
    %cst_80 = arith.constant dense<0xFF800000> : vector<10xf32>
    %125 = vector.multi_reduction <maximumf>, %124, %cst_80 [1] : vector<10x10xf32> to vector<10xf32>
    %126 = vector.shape_cast %125 : vector<10xf32> to vector<10x1xf32>
    %127 = vector.broadcast %126 : vector<10x1xf32> to vector<10x10xf32>
    %128 = arith.subf %124, %127 : vector<10x10xf32>
    %129 = math.exp %128 : vector<10x10xf32>
    %cst_81 = arith.constant dense<0.000000e+00> : vector<10xf32>
    %130 = vector.multi_reduction <add>, %129, %cst_81 [1] : vector<10x10xf32> to vector<10xf32>
    %131 = vector.shape_cast %130 : vector<10xf32> to vector<10x1xf32>
    %132 = tpu.reciprocal %131 {approx = true} : vector<10x1xf32> -> vector<10x1xf32>
    %133 = vector.broadcast %132 : vector<10x1xf32> to vector<10x10xf32>
    %134 = arith.mulf %129, %133 : vector<10x10xf32>
    %cst_82 = arith.constant dense<0.000000e+00> : vector<10x8xf32>
    %135 = tpu.matmul %134, %122, %cst_82 {dimension_numbers = #tpu.dot_dimension_numbers<[1], [0], [0], [1], [0, 0, 1, 1], [], []>} : vector<10x10xf32>, vector<10x8xf32>, vector<10x8xf32> -> vector<10x8xf32>
    %c0_83 = arith.constant 0 : index
    %c24_84 = arith.constant 24 : index
    %136 = vector.load %arg26[%c0_83, %c24_84] : memref<20x32xf32, #tpu.memory_space<vmem>>, vector<10x8xf32>
    tpu.vector_store %arg26[%c0_83, %c24_84], %135 {strides = array<i32>} : memref<20x32xf32, #tpu.memory_space<vmem>>, vector<10x8xf32>,
    %c10_85 = arith.constant 10 : index
    %c0_86 = arith.constant 0 : index
    %137 = vector.load %arg25[%c10_85, %c0_86] : memref<20x96xf32, #tpu.memory_space<vmem>>, vector<10x8xf32>
    %cst_87 = arith.constant 0.353553385 : f32
    %138 = vector.broadcast %cst_87 : f32 to vector<10x8xf32>
    %139 = arith.mulf %137, %138 : vector<10x8xf32>
    %c10_88 = arith.constant 10 : index
    %c32_89 = arith.constant 32 : index
    %140 = vector.load %arg25[%c10_88, %c32_89] : memref<20x96xf32, #tpu.memory_space<vmem>>, vector<10x8xf32>
    %c10_90 = arith.constant 10 : index
    %c64_91 = arith.constant 64 : index
    %141 = vector.load %arg25[%c10_90, %c64_91] : memref<20x96xf32, #tpu.memory_space<vmem>>, vector<10x8xf32>
    %142 = tpu.transpose %140, [1, 0] : vector<10x8xf32> -> vector<8x10xf32>
    %cst_92 = arith.constant dense<0.000000e+00> : vector<10x10xf32>
    %143 = tpu.matmul %139, %142, %cst_92 {dimension_numbers = #tpu.dot_dimension_numbers<[1], [0], [0], [1], [0, 0, 1, 1], [], []>} : vector<10x8xf32>, vector<8x10xf32>, vector<10x10xf32> -> vector<10x10xf32>
    %cst_93 = arith.constant dense<0xFF800000> : vector<10xf32>
    %144 = vector.multi_reduction <maximumf>, %143, %cst_93 [1] : vector<10x10xf32> to vector<10xf32>
    %145 = vector.shape_cast %144 : vector<10xf32> to vector<10x1xf32>
    %146 = vector.broadcast %145 : vector<10x1xf32> to vector<10x10xf32>
    %147 = arith.subf %143, %146 : vector<10x10xf32>
    %148 = math.exp %147 : vector<10x10xf32>
    %cst_94 = arith.constant dense<0.000000e+00> : vector<10xf32>
    %149 = vector.multi_reduction <add>, %148, %cst_94 [1] : vector<10x10xf32> to vector<10xf32>
    %150 = vector.shape_cast %149 : vector<10xf32> to vector<10x1xf32>
    %151 = tpu.reciprocal %150 {approx = true} : vector<10x1xf32> -> vector<10x1xf32>
    %152 = vector.broadcast %151 : vector<10x1xf32> to vector<10x10xf32>
    %153 = arith.mulf %148, %152 : vector<10x10xf32>
    %cst_95 = arith.constant dense<0.000000e+00> : vector<10x8xf32>
    %154 = tpu.matmul %153, %141, %cst_95 {dimension_numbers = #tpu.dot_dimension_numbers<[1], [0], [0], [1], [0, 0, 1, 1], [], []>} : vector<10x10xf32>, vector<10x8xf32>, vector<10x8xf32> -> vector<10x8xf32>
    %c10_96 = arith.constant 10 : index
    %c0_97 = arith.constant 0 : index
    %155 = vector.load %arg26[%c10_96, %c0_97] : memref<20x32xf32, #tpu.memory_space<vmem>>, vector<10x8xf32>
    tpu.vector_store %arg26[%c10_96, %c0_97], %154 {strides = array<i32>} : memref<20x32xf32, #tpu.memory_space<vmem>>, vector<10x8xf32>,
    %c10_98 = arith.constant 10 : index
    %c8_99 = arith.constant 8 : index
    %156 = vector.load %arg25[%c10_98, %c8_99] : memref<20x96xf32, #tpu.memory_space<vmem>>, vector<10x8xf32>
    %cst_100 = arith.constant 0.353553385 : f32
    %157 = vector.broadcast %cst_100 : f32 to vector<10x8xf32>
    %158 = arith.mulf %156, %157 : vector<10x8xf32>
    %c10_101 = arith.constant 10 : index
    %c40_102 = arith.constant 40 : index
    %159 = vector.load %arg25[%c10_101, %c40_102] : memref<20x96xf32, #tpu.memory_space<vmem>>, vector<10x8xf32>
    %c10_103 = arith.constant 10 : index
    %c72_104 = arith.constant 72 : index
    %160 = vector.load %arg25[%c10_103, %c72_104] : memref<20x96xf32, #tpu.memory_space<vmem>>, vector<10x8xf32>
    %161 = tpu.transpose %159, [1, 0] : vector<10x8xf32> -> vector<8x10xf32>
    %cst_105 = arith.constant dense<0.000000e+00> : vector<10x10xf32>
    %162 = tpu.matmul %158, %161, %cst_105 {dimension_numbers = #tpu.dot_dimension_numbers<[1], [0], [0], [1], [0, 0, 1, 1], [], []>} : vector<10x8xf32>, vector<8x10xf32>, vector<10x10xf32> -> vector<10x10xf32>
    %cst_106 = arith.constant dense<0xFF800000> : vector<10xf32>
    %163 = vector.multi_reduction <maximumf>, %162, %cst_106 [1] : vector<10x10xf32> to vector<10xf32>
    %164 = vector.shape_cast %163 : vector<10xf32> to vector<10x1xf32>
    %165 = vector.broadcast %164 : vector<10x1xf32> to vector<10x10xf32>
    %166 = arith.subf %162, %165 : vector<10x10xf32>
    %167 = math.exp %166 : vector<10x10xf32>
    %cst_107 = arith.constant dense<0.000000e+00> : vector<10xf32>
    %168 = vector.multi_reduction <add>, %167, %cst_107 [1] : vector<10x10xf32> to vector<10xf32>
    %169 = vector.shape_cast %168 : vector<10xf32> to vector<10x1xf32>
    %170 = tpu.reciprocal %169 {approx = true} : vector<10x1xf32> -> vector<10x1xf32>
    %171 = vector.broadcast %170 : vector<10x1xf32> to vector<10x10xf32>
    %172 = arith.mulf %167, %171 : vector<10x10xf32>
    %cst_108 = arith.constant dense<0.000000e+00> : vector<10x8xf32>
    %173 = tpu.matmul %172, %160, %cst_108 {dimension_numbers = #tpu.dot_dimension_numbers<[1], [0], [0], [1], [0, 0, 1, 1], [], []>} : vector<10x10xf32>, vector<10x8xf32>, vector<10x8xf32> -> vector<10x8xf32>
    %c10_109 = arith.constant 10 : index
    %c8_110 = arith.constant 8 : index
    %174 = vector.load %arg26[%c10_109, %c8_110] : memref<20x32xf32, #tpu.memory_space<vmem>>, vector<10x8xf32>
    tpu.vector_store %arg26[%c10_109, %c8_110], %173 {strides = array<i32>} : memref<20x32xf32, #tpu.memory_space<vmem>>, vector<10x8xf32>,
    %c10_111 = arith.constant 10 : index
    %c16_112 = arith.constant 16 : index
    %175 = vector.load %arg25[%c10_111, %c16_112] : memref<20x96xf32, #tpu.memory_space<vmem>>, vector<10x8xf32>
    %cst_113 = arith.constant 0.353553385 : f32
    %176 = vector.broadcast %cst_113 : f32 to vector<10x8xf32>
    %177 = arith.mulf %175, %176 : vector<10x8xf32>
    %c10_114 = arith.constant 10 : index
    %c48_115 = arith.constant 48 : index
    %178 = vector.load %arg25[%c10_114, %c48_115] : memref<20x96xf32, #tpu.memory_space<vmem>>, vector<10x8xf32>
    %c10_116 = arith.constant 10 : index
    %c80_117 = arith.constant 80 : index
    %179 = vector.load %arg25[%c10_116, %c80_117] : memref<20x96xf32, #tpu.memory_space<vmem>>, vector<10x8xf32>
    %180 = tpu.transpose %178, [1, 0] : vector<10x8xf32> -> vector<8x10xf32>
    %cst_118 = arith.constant dense<0.000000e+00> : vector<10x10xf32>
    %181 = tpu.matmul %177, %180, %cst_118 {dimension_numbers = #tpu.dot_dimension_numbers<[1], [0], [0], [1], [0, 0, 1, 1], [], []>} : vector<10x8xf32>, vector<8x10xf32>, vector<10x10xf32> -> vector<10x10xf32>
    %cst_119 = arith.constant dense<0xFF800000> : vector<10xf32>
    %182 = vector.multi_reduction <maximumf>, %181, %cst_119 [1] : vector<10x10xf32> to vector<10xf32>
    %183 = vector.shape_cast %182 : vector<10xf32> to vector<10x1xf32>
    %184 = vector.broadcast %183 : vector<10x1xf32> to vector<10x10xf32>
    %185 = arith.subf %181, %184 : vector<10x10xf32>
    %186 = math.exp %185 : vector<10x10xf32>
    %cst_120 = arith.constant dense<0.000000e+00> : vector<10xf32>
    %187 = vector.multi_reduction <add>, %186, %cst_120 [1] : vector<10x10xf32> to vector<10xf32>
    %188 = vector.shape_cast %187 : vector<10xf32> to vector<10x1xf32>
    %189 = tpu.reciprocal %188 {approx = true} : vector<10x1xf32> -> vector<10x1xf32>
    %190 = vector.broadcast %189 : vector<10x1xf32> to vector<10x10xf32>
    %191 = arith.mulf %186, %190 : vector<10x10xf32>
    %cst_121 = arith.constant dense<0.000000e+00> : vector<10x8xf32>
    %192 = tpu.matmul %191, %179, %cst_121 {dimension_numbers = #tpu.dot_dimension_numbers<[1], [0], [0], [1], [0, 0, 1, 1], [], []>} : vector<10x10xf32>, vector<10x8xf32>, vector<10x8xf32> -> vector<10x8xf32>
    %c10_122 = arith.constant 10 : index
    %c16_123 = arith.constant 16 : index
    %193 = vector.load %arg26[%c10_122, %c16_123] : memref<20x32xf32, #tpu.memory_space<vmem>>, vector<10x8xf32>
    tpu.vector_store %arg26[%c10_122, %c16_123], %192 {strides = array<i32>} : memref<20x32xf32, #tpu.memory_space<vmem>>, vector<10x8xf32>,
    %c10_124 = arith.constant 10 : index
    %c24_125 = arith.constant 24 : index
    %194 = vector.load %arg25[%c10_124, %c24_125] : memref<20x96xf32, #tpu.memory_space<vmem>>, vector<10x8xf32>
    %cst_126 = arith.constant 0.353553385 : f32
    %195 = vector.broadcast %cst_126 : f32 to vector<10x8xf32>
    %196 = arith.mulf %194, %195 : vector<10x8xf32>
    %c10_127 = arith.constant 10 : index
    %c56_128 = arith.constant 56 : index
    %197 = vector.load %arg25[%c10_127, %c56_128] : memref<20x96xf32, #tpu.memory_space<vmem>>, vector<10x8xf32>
    %c10_129 = arith.constant 10 : index
    %c88_130 = arith.constant 88 : index
    %198 = vector.load %arg25[%c10_129, %c88_130] : memref<20x96xf32, #tpu.memory_space<vmem>>, vector<10x8xf32>
    %199 = tpu.transpose %197, [1, 0] : vector<10x8xf32> -> vector<8x10xf32>
    %cst_131 = arith.constant dense<0.000000e+00> : vector<10x10xf32>
    %200 = tpu.matmul %196, %199, %cst_131 {dimension_numbers = #tpu.dot_dimension_numbers<[1], [0], [0], [1], [0, 0, 1, 1], [], []>} : vector<10x8xf32>, vector<8x10xf32>, vector<10x10xf32> -> vector<10x10xf32>
    %cst_132 = arith.constant dense<0xFF800000> : vector<10xf32>
    %201 = vector.multi_reduction <maximumf>, %200, %cst_132 [1] : vector<10x10xf32> to vector<10xf32>
    %202 = vector.shape_cast %201 : vector<10xf32> to vector<10x1xf32>
    %203 = vector.broadcast %202 : vector<10x1xf32> to vector<10x10xf32>
    %204 = arith.subf %200, %203 : vector<10x10xf32>
    %205 = math.exp %204 : vector<10x10xf32>
    %cst_133 = arith.constant dense<0.000000e+00> : vector<10xf32>
    %206 = vector.multi_reduction <add>, %205, %cst_133 [1] : vector<10x10xf32> to vector<10xf32>
    %207 = vector.shape_cast %206 : vector<10xf32> to vector<10x1xf32>
    %208 = tpu.reciprocal %207 {approx = true} : vector<10x1xf32> -> vector<10x1xf32>
    %209 = vector.broadcast %208 : vector<10x1xf32> to vector<10x10xf32>
    %210 = arith.mulf %205, %209 : vector<10x10xf32>
    %cst_134 = arith.constant dense<0.000000e+00> : vector<10x8xf32>
    %211 = tpu.matmul %210, %198, %cst_134 {dimension_numbers = #tpu.dot_dimension_numbers<[1], [0], [0], [1], [0, 0, 1, 1], [], []>} : vector<10x10xf32>, vector<10x8xf32>, vector<10x8xf32> -> vector<10x8xf32>
    %c10_135 = arith.constant 10 : index
    %c24_136 = arith.constant 24 : index
    %212 = vector.load %arg26[%c10_135, %c24_136] : memref<20x32xf32, #tpu.memory_space<vmem>>, vector<10x8xf32>
    tpu.vector_store %arg26[%c10_135, %c24_136], %211 {strides = array<i32>} : memref<20x32xf32, #tpu.memory_space<vmem>>, vector<10x8xf32>,
    %c0_137 = arith.constant 0 : index
    %c0_138 = arith.constant 0 : index
    %213 = vector.load %arg26[%c0_137, %c0_138] : memref<20x32xf32, #tpu.memory_space<vmem>>, vector<20x32xf32>
    %c0_139 = arith.constant 0 : index
    %c0_140 = arith.constant 0 : index
    %c0_141 = arith.constant 0 : index
    %214 = vector.load %arg9[%c0_139, %c0_140, %c0_141] : memref<2x32x32xbf16, #tpu.memory_space<vmem>>, vector<1x32x32xbf16>
    %215 = vector.shape_cast %214 : vector<1x32x32xbf16> to vector<32x32xbf16>
    %c0_142 = arith.constant 0 : index
    %c0_143 = arith.constant 0 : index
    %c0_144 = arith.constant 0 : index
    %216 = vector.load %arg10[%c0_142, %c0_143, %c0_144] : memref<2x1x32xf32, #tpu.memory_space<vmem>>, vector<1x1x32xf32>
    %217 = vector.shape_cast %216 : vector<1x1x32xf32> to vector<1x32xf32>
    %218 = arith.truncf %213 : vector<20x32xf32> to vector<20x32xbf16>
    %cst_145 = arith.constant dense<0.000000e+00> : vector<20x32xf32>
    %219 = tpu.matmul %218, %215, %cst_145 {dimension_numbers = #tpu.dot_dimension_numbers<[1], [0], [0], [1], [0, 0, 1, 1], [], []>} : vector<20x32xbf16>, vector<32x32xbf16>, vector<20x32xf32> -> vector<20x32xf32>
    %220 = vector.broadcast %217 : vector<1x32xf32> to vector<20x32xf32>
    %221 = arith.addf %219, %220 : vector<20x32xf32>
    %222 = arith.addf %25, %221 : vector<20x32xf32>
    %c0_146 = arith.constant 0 : index
    %c0_147 = arith.constant 0 : index
    %c0_148 = arith.constant 0 : index
    %223 = vector.load %arg11[%c0_146, %c0_147, %c0_148] : memref<2x1x32xf32, #tpu.memory_space<vmem>>, vector<1x1x32xf32>
    %224 = vector.shape_cast %223 : vector<1x1x32xf32> to vector<1x32xf32>
    %c0_149 = arith.constant 0 : index
    %c0_150 = arith.constant 0 : index
    %c0_151 = arith.constant 0 : index
    %225 = vector.load %arg12[%c0_149, %c0_150, %c0_151] : memref<2x1x32xf32, #tpu.memory_space<vmem>>, vector<1x1x32xf32>
    %226 = vector.shape_cast %225 : vector<1x1x32xf32> to vector<1x32xf32>
    %cst_152 = arith.constant dense<0.000000e+00> : vector<20xf32>
    %227 = vector.multi_reduction <add>, %222, %cst_152 [1] : vector<20x32xf32> to vector<20xf32>
    %228 = vector.shape_cast %227 : vector<20xf32> to vector<20x1xf32>
    %cst_153 = arith.constant 3.200000e+01 : f32
    %229 = vector.broadcast %cst_153 : f32 to vector<20x1xf32>
    %230 = arith.divf %228, %229 : vector<20x1xf32>
    %231 = vector.broadcast %230 : vector<20x1xf32> to vector<20x32xf32>
    %232 = arith.subf %222, %231 : vector<20x32xf32>
    %233 = arith.mulf %232, %232 : vector<20x32xf32>
    %cst_154 = arith.constant dense<0.000000e+00> : vector<20xf32>
    %234 = vector.multi_reduction <add>, %233, %cst_154 [1] : vector<20x32xf32> to vector<20xf32>
    %235 = vector.shape_cast %234 : vector<20xf32> to vector<20x1xf32>
    %cst_155 = arith.constant 3.200000e+01 : f32
    %236 = vector.broadcast %cst_155 : f32 to vector<20x1xf32>
    %237 = arith.divf %235, %236 : vector<20x1xf32>
    %238 = vector.broadcast %230 : vector<20x1xf32> to vector<20x32xf32>
    %239 = arith.subf %222, %238 : vector<20x32xf32>
    %cst_156 = arith.constant 9.99999997E-7 : f32
    %240 = vector.broadcast %cst_156 : f32 to vector<20x1xf32>
    %241 = arith.addf %237, %240 : vector<20x1xf32>
    %242 = math.rsqrt %241 : vector<20x1xf32>
    %243 = vector.broadcast %242 : vector<20x1xf32> to vector<20x32xf32>
    %244 = arith.mulf %239, %243 : vector<20x32xf32>
    %245 = vector.broadcast %224 : vector<1x32xf32> to vector<20x32xf32>
    %246 = arith.mulf %244, %245 : vector<20x32xf32>
    %247 = vector.broadcast %226 : vector<1x32xf32> to vector<20x32xf32>
    %248 = arith.addf %246, %247 : vector<20x32xf32>
    %c0_157 = arith.constant 0 : index
    %c0_158 = arith.constant 0 : index
    %c0_159 = arith.constant 0 : index
    %249 = vector.load %arg13[%c0_157, %c0_158, %c0_159] : memref<2x32x64xbf16, #tpu.memory_space<vmem>>, vector<1x32x64xbf16>
    %250 = vector.shape_cast %249 : vector<1x32x64xbf16> to vector<32x64xbf16>
    %c0_160 = arith.constant 0 : index
    %c0_161 = arith.constant 0 : index
    %c0_162 = arith.constant 0 : index
    %251 = vector.load %arg14[%c0_160, %c0_161, %c0_162] : memref<2x1x64xf32, #tpu.memory_space<vmem>>, vector<1x1x64xf32>
    %252 = vector.shape_cast %251 : vector<1x1x64xf32> to vector<1x64xf32>
    %253 = arith.truncf %248 : vector<20x32xf32> to vector<20x32xbf16>
    %cst_163 = arith.constant dense<0.000000e+00> : vector<20x64xf32>
    %254 = tpu.matmul %253, %250, %cst_163 {dimension_numbers = #tpu.dot_dimension_numbers<[1], [0], [0], [1], [0, 0, 1, 1], [], []>} : vector<20x32xbf16>, vector<32x64xbf16>, vector<20x64xf32> -> vector<20x64xf32>
    %255 = vector.broadcast %252 : vector<1x64xf32> to vector<20x64xf32>
    %256 = arith.addf %254, %255 : vector<20x64xf32>
    %257 = arith.mulf %256, %256 : vector<20x64xf32>
    %258 = arith.mulf %256, %257 : vector<20x64xf32>
    %cst_164 = arith.constant 4.471500e-02 : f32
    %259 = vector.broadcast %cst_164 : f32 to vector<20x64xf32>
    %260 = arith.mulf %259, %258 : vector<20x64xf32>
    %261 = arith.addf %256, %260 : vector<20x64xf32>
    %cst_165 = arith.constant 0.797884583 : f32
    %262 = vector.broadcast %cst_165 : f32 to vector<20x64xf32>
    %263 = arith.mulf %262, %261 : vector<20x64xf32>
    %264 = math.tanh %263 : vector<20x64xf32>
    %cst_166 = arith.constant 1.000000e+00 : f32
    %265 = vector.broadcast %cst_166 : f32 to vector<20x64xf32>
    %266 = arith.addf %265, %264 : vector<20x64xf32>
    %cst_167 = arith.constant 5.000000e-01 : f32
    %267 = vector.broadcast %cst_167 : f32 to vector<20x64xf32>
    %268 = arith.mulf %267, %266 : vector<20x64xf32>
    %269 = arith.mulf %256, %268 : vector<20x64xf32>
    %c0_168 = arith.constant 0 : index
    %c0_169 = arith.constant 0 : index
    %c0_170 = arith.constant 0 : index
    %270 = vector.load %arg15[%c0_168, %c0_169, %c0_170] : memref<2x64x32xbf16, #tpu.memory_space<vmem>>, vector<1x64x32xbf16>
    %271 = vector.shape_cast %270 : vector<1x64x32xbf16> to vector<64x32xbf16>
    %c0_171 = arith.constant 0 : index
    %c0_172 = arith.constant 0 : index
    %c0_173 = arith.constant 0 : index
    %272 = vector.load %arg16[%c0_171, %c0_172, %c0_173] : memref<2x1x32xf32, #tpu.memory_space<vmem>>, vector<1x1x32xf32>
    %273 = vector.shape_cast %272 : vector<1x1x32xf32> to vector<1x32xf32>
    %274 = arith.truncf %269 : vector<20x64xf32> to vector<20x64xbf16>
    %cst_174 = arith.constant dense<0.000000e+00> : vector<20x32xf32>
    %275 = tpu.matmul %274, %271, %cst_174 {dimension_numbers = #tpu.dot_dimension_numbers<[1], [0], [0], [1], [0, 0, 1, 1], [], []>} : vector<20x64xbf16>, vector<64x32xbf16>, vector<20x32xf32> -> vector<20x32xf32>
    %276 = vector.broadcast %273 : vector<1x32xf32> to vector<20x32xf32>
    %277 = arith.addf %275, %276 : vector<20x32xf32>
    %278 = arith.addf %222, %277 : vector<20x32xf32>
    %c1_175 = arith.constant 1 : index
    %c0_176 = arith.constant 0 : index
    %c0_177 = arith.constant 0 : index
    %279 = vector.load %arg5[%c1_175, %c0_176, %c0_177] : memref<2x1x32xf32, #tpu.memory_space<vmem>>, vector<1x1x32xf32>
    %280 = vector.shape_cast %279 : vector<1x1x32xf32> to vector<1x32xf32>
    %c1_178 = arith.constant 1 : index
    %c0_179 = arith.constant 0 : index
    %c0_180 = arith.constant 0 : index
    %281 = vector.load %arg6[%c1_178, %c0_179, %c0_180] : memref<2x1x32xf32, #tpu.memory_space<vmem>>, vector<1x1x32xf32>
    %282 = vector.shape_cast %281 : vector<1x1x32xf32> to vector<1x32xf32>
    %cst_181 = arith.constant dense<0.000000e+00> : vector<20xf32>
    %283 = vector.multi_reduction <add>, %278, %cst_181 [1] : vector<20x32xf32> to vector<20xf32>
    %284 = vector.shape_cast %283 : vector<20xf32> to vector<20x1xf32>
    %cst_182 = arith.constant 3.200000e+01 : f32
    %285 = vector.broadcast %cst_182 : f32 to vector<20x1xf32>
    %286 = arith.divf %284, %285 : vector<20x1xf32>
    %287 = vector.broadcast %286 : vector<20x1xf32> to vector<20x32xf32>
    %288 = arith.subf %278, %287 : vector<20x32xf32>
    %289 = arith.mulf %288, %288 : vector<20x32xf32>
    %cst_183 = arith.constant dense<0.000000e+00> : vector<20xf32>
    %290 = vector.multi_reduction <add>, %289, %cst_183 [1] : vector<20x32xf32> to vector<20xf32>
    %291 = vector.shape_cast %290 : vector<20xf32> to vector<20x1xf32>
    %cst_184 = arith.constant 3.200000e+01 : f32
    %292 = vector.broadcast %cst_184 : f32 to vector<20x1xf32>
    %293 = arith.divf %291, %292 : vector<20x1xf32>
    %294 = vector.broadcast %286 : vector<20x1xf32> to vector<20x32xf32>
    %295 = arith.subf %278, %294 : vector<20x32xf32>
    %cst_185 = arith.constant 9.99999997E-7 : f32
    %296 = vector.broadcast %cst_185 : f32 to vector<20x1xf32>
    %297 = arith.addf %293, %296 : vector<20x1xf32>
    %298 = math.rsqrt %297 : vector<20x1xf32>
    %299 = vector.broadcast %298 : vector<20x1xf32> to vector<20x32xf32>
    %300 = arith.mulf %295, %299 : vector<20x32xf32>
    %301 = vector.broadcast %280 : vector<1x32xf32> to vector<20x32xf32>
    %302 = arith.mulf %300, %301 : vector<20x32xf32>
    %303 = vector.broadcast %282 : vector<1x32xf32> to vector<20x32xf32>
    %304 = arith.addf %302, %303 : vector<20x32xf32>
    %c1_186 = arith.constant 1 : index
    %c0_187 = arith.constant 0 : index
    %c0_188 = arith.constant 0 : index
    %305 = vector.load %arg7[%c1_186, %c0_187, %c0_188] : memref<2x32x96xbf16, #tpu.memory_space<vmem>>, vector<1x32x96xbf16>
    %306 = vector.shape_cast %305 : vector<1x32x96xbf16> to vector<32x96xbf16>
    %c1_189 = arith.constant 1 : index
    %c0_190 = arith.constant 0 : index
    %c0_191 = arith.constant 0 : index
    %307 = vector.load %arg8[%c1_189, %c0_190, %c0_191] : memref<2x1x96xf32, #tpu.memory_space<vmem>>, vector<1x1x96xf32>
    %308 = vector.shape_cast %307 : vector<1x1x96xf32> to vector<1x96xf32>
    %309 = arith.truncf %304 : vector<20x32xf32> to vector<20x32xbf16>
    %cst_192 = arith.constant dense<0.000000e+00> : vector<20x96xf32>
    %310 = tpu.matmul %309, %306, %cst_192 {dimension_numbers = #tpu.dot_dimension_numbers<[1], [0], [0], [1], [0, 0, 1, 1], [], []>} : vector<20x32xbf16>, vector<32x96xbf16>, vector<20x96xf32> -> vector<20x96xf32>
    %311 = vector.broadcast %308 : vector<1x96xf32> to vector<20x96xf32>
    %312 = arith.addf %310, %311 : vector<20x96xf32>
    %c0_193 = arith.constant 0 : index
    %c0_194 = arith.constant 0 : index
    %313 = vector.load %arg25[%c0_193, %c0_194] : memref<20x96xf32, #tpu.memory_space<vmem>>, vector<20x96xf32>
    tpu.vector_store %arg25[%c0_193, %c0_194], %312 {strides = array<i32>} : memref<20x96xf32, #tpu.memory_space<vmem>>, vector<20x96xf32>,
    %c0_195 = arith.constant 0 : index
    %c0_196 = arith.constant 0 : index
    %314 = vector.load %arg25[%c0_195, %c0_196] : memref<20x96xf32, #tpu.memory_space<vmem>>, vector<10x8xf32>
    %cst_197 = arith.constant 0.353553385 : f32
    %315 = vector.broadcast %cst_197 : f32 to vector<10x8xf32>
    %316 = arith.mulf %314, %315 : vector<10x8xf32>
    %c0_198 = arith.constant 0 : index
    %c32_199 = arith.constant 32 : index
    %317 = vector.load %arg25[%c0_198, %c32_199] : memref<20x96xf32, #tpu.memory_space<vmem>>, vector<10x8xf32>
    %c0_200 = arith.constant 0 : index
    %c64_201 = arith.constant 64 : index
    %318 = vector.load %arg25[%c0_200, %c64_201] : memref<20x96xf32, #tpu.memory_space<vmem>>, vector<10x8xf32>
    %319 = tpu.transpose %317, [1, 0] : vector<10x8xf32> -> vector<8x10xf32>
    %cst_202 = arith.constant dense<0.000000e+00> : vector<10x10xf32>
    %320 = tpu.matmul %316, %319, %cst_202 {dimension_numbers = #tpu.dot_dimension_numbers<[1], [0], [0], [1], [0, 0, 1, 1], [], []>} : vector<10x8xf32>, vector<8x10xf32>, vector<10x10xf32> -> vector<10x10xf32>
    %cst_203 = arith.constant dense<0xFF800000> : vector<10xf32>
    %321 = vector.multi_reduction <maximumf>, %320, %cst_203 [1] : vector<10x10xf32> to vector<10xf32>
    %322 = vector.shape_cast %321 : vector<10xf32> to vector<10x1xf32>
    %323 = vector.broadcast %322 : vector<10x1xf32> to vector<10x10xf32>
    %324 = arith.subf %320, %323 : vector<10x10xf32>
    %325 = math.exp %324 : vector<10x10xf32>
    %cst_204 = arith.constant dense<0.000000e+00> : vector<10xf32>
    %326 = vector.multi_reduction <add>, %325, %cst_204 [1] : vector<10x10xf32> to vector<10xf32>
    %327 = vector.shape_cast %326 : vector<10xf32> to vector<10x1xf32>
    %328 = tpu.reciprocal %327 {approx = true} : vector<10x1xf32> -> vector<10x1xf32>
    %329 = vector.broadcast %328 : vector<10x1xf32> to vector<10x10xf32>
    %330 = arith.mulf %325, %329 : vector<10x10xf32>
    %cst_205 = arith.constant dense<0.000000e+00> : vector<10x8xf32>
    %331 = tpu.matmul %330, %318, %cst_205 {dimension_numbers = #tpu.dot_dimension_numbers<[1], [0], [0], [1], [0, 0, 1, 1], [], []>} : vector<10x10xf32>, vector<10x8xf32>, vector<10x8xf32> -> vector<10x8xf32>
    %c0_206 = arith.constant 0 : index
    %c0_207 = arith.constant 0 : index
    %332 = vector.load %arg26[%c0_206, %c0_207] : memref<20x32xf32, #tpu.memory_space<vmem>>, vector<10x8xf32>
    tpu.vector_store %arg26[%c0_206, %c0_207], %331 {strides = array<i32>} : memref<20x32xf32, #tpu.memory_space<vmem>>, vector<10x8xf32>,
    %c0_208 = arith.constant 0 : index
    %c8_209 = arith.constant 8 : index
    %333 = vector.load %arg25[%c0_208, %c8_209] : memref<20x96xf32, #tpu.memory_space<vmem>>, vector<10x8xf32>
    %cst_210 = arith.constant 0.353553385 : f32
    %334 = vector.broadcast %cst_210 : f32 to vector<10x8xf32>
    %335 = arith.mulf %333, %334 : vector<10x8xf32>
    %c0_211 = arith.constant 0 : index
    %c40_212 = arith.constant 40 : index
    %336 = vector.load %arg25[%c0_211, %c40_212] : memref<20x96xf32, #tpu.memory_space<vmem>>, vector<10x8xf32>
    %c0_213 = arith.constant 0 : index
    %c72_214 = arith.constant 72 : index
    %337 = vector.load %arg25[%c0_213, %c72_214] : memref<20x96xf32, #tpu.memory_space<vmem>>, vector<10x8xf32>
    %338 = tpu.transpose %336, [1, 0] : vector<10x8xf32> -> vector<8x10xf32>
    %cst_215 = arith.constant dense<0.000000e+00> : vector<10x10xf32>
    %339 = tpu.matmul %335, %338, %cst_215 {dimension_numbers = #tpu.dot_dimension_numbers<[1], [0], [0], [1], [0, 0, 1, 1], [], []>} : vector<10x8xf32>, vector<8x10xf32>, vector<10x10xf32> -> vector<10x10xf32>
    %cst_216 = arith.constant dense<0xFF800000> : vector<10xf32>
    %340 = vector.multi_reduction <maximumf>, %339, %cst_216 [1] : vector<10x10xf32> to vector<10xf32>
    %341 = vector.shape_cast %340 : vector<10xf32> to vector<10x1xf32>
    %342 = vector.broadcast %341 : vector<10x1xf32> to vector<10x10xf32>
    %343 = arith.subf %339, %342 : vector<10x10xf32>
    %344 = math.exp %343 : vector<10x10xf32>
    %cst_217 = arith.constant dense<0.000000e+00> : vector<10xf32>
    %345 = vector.multi_reduction <add>, %344, %cst_217 [1] : vector<10x10xf32> to vector<10xf32>
    %346 = vector.shape_cast %345 : vector<10xf32> to vector<10x1xf32>
    %347 = tpu.reciprocal %346 {approx = true} : vector<10x1xf32> -> vector<10x1xf32>
    %348 = vector.broadcast %347 : vector<10x1xf32> to vector<10x10xf32>
    %349 = arith.mulf %344, %348 : vector<10x10xf32>
    %cst_218 = arith.constant dense<0.000000e+00> : vector<10x8xf32>
    %350 = tpu.matmul %349, %337, %cst_218 {dimension_numbers = #tpu.dot_dimension_numbers<[1], [0], [0], [1], [0, 0, 1, 1], [], []>} : vector<10x10xf32>, vector<10x8xf32>, vector<10x8xf32> -> vector<10x8xf32>
    %c0_219 = arith.constant 0 : index
    %c8_220 = arith.constant 8 : index
    %351 = vector.load %arg26[%c0_219, %c8_220] : memref<20x32xf32, #tpu.memory_space<vmem>>, vector<10x8xf32>
    tpu.vector_store %arg26[%c0_219, %c8_220], %350 {strides = array<i32>} : memref<20x32xf32, #tpu.memory_space<vmem>>, vector<10x8xf32>,
    %c0_221 = arith.constant 0 : index
    %c16_222 = arith.constant 16 : index
    %352 = vector.load %arg25[%c0_221, %c16_222] : memref<20x96xf32, #tpu.memory_space<vmem>>, vector<10x8xf32>
    %cst_223 = arith.constant 0.353553385 : f32
    %353 = vector.broadcast %cst_223 : f32 to vector<10x8xf32>
    %354 = arith.mulf %352, %353 : vector<10x8xf32>
    %c0_224 = arith.constant 0 : index
    %c48_225 = arith.constant 48 : index
    %355 = vector.load %arg25[%c0_224, %c48_225] : memref<20x96xf32, #tpu.memory_space<vmem>>, vector<10x8xf32>
    %c0_226 = arith.constant 0 : index
    %c80_227 = arith.constant 80 : index
    %356 = vector.load %arg25[%c0_226, %c80_227] : memref<20x96xf32, #tpu.memory_space<vmem>>, vector<10x8xf32>
    %357 = tpu.transpose %355, [1, 0] : vector<10x8xf32> -> vector<8x10xf32>
    %cst_228 = arith.constant dense<0.000000e+00> : vector<10x10xf32>
    %358 = tpu.matmul %354, %357, %cst_228 {dimension_numbers = #tpu.dot_dimension_numbers<[1], [0], [0], [1], [0, 0, 1, 1], [], []>} : vector<10x8xf32>, vector<8x10xf32>, vector<10x10xf32> -> vector<10x10xf32>
    %cst_229 = arith.constant dense<0xFF800000> : vector<10xf32>
    %359 = vector.multi_reduction <maximumf>, %358, %cst_229 [1] : vector<10x10xf32> to vector<10xf32>
    %360 = vector.shape_cast %359 : vector<10xf32> to vector<10x1xf32>
    %361 = vector.broadcast %360 : vector<10x1xf32> to vector<10x10xf32>
    %362 = arith.subf %358, %361 : vector<10x10xf32>
    %363 = math.exp %362 : vector<10x10xf32>
    %cst_230 = arith.constant dense<0.000000e+00> : vector<10xf32>
    %364 = vector.multi_reduction <add>, %363, %cst_230 [1] : vector<10x10xf32> to vector<10xf32>
    %365 = vector.shape_cast %364 : vector<10xf32> to vector<10x1xf32>
    %366 = tpu.reciprocal %365 {approx = true} : vector<10x1xf32> -> vector<10x1xf32>
    %367 = vector.broadcast %366 : vector<10x1xf32> to vector<10x10xf32>
    %368 = arith.mulf %363, %367 : vector<10x10xf32>
    %cst_231 = arith.constant dense<0.000000e+00> : vector<10x8xf32>
    %369 = tpu.matmul %368, %356, %cst_231 {dimension_numbers = #tpu.dot_dimension_numbers<[1], [0], [0], [1], [0, 0, 1, 1], [], []>} : vector<10x10xf32>, vector<10x8xf32>, vector<10x8xf32> -> vector<10x8xf32>
    %c0_232 = arith.constant 0 : index
    %c16_233 = arith.constant 16 : index
    %370 = vector.load %arg26[%c0_232, %c16_233] : memref<20x32xf32, #tpu.memory_space<vmem>>, vector<10x8xf32>
    tpu.vector_store %arg26[%c0_232, %c16_233], %369 {strides = array<i32>} : memref<20x32xf32, #tpu.memory_space<vmem>>, vector<10x8xf32>,
    %c0_234 = arith.constant 0 : index
    %c24_235 = arith.constant 24 : index
    %371 = vector.load %arg25[%c0_234, %c24_235] : memref<20x96xf32, #tpu.memory_space<vmem>>, vector<10x8xf32>
    %cst_236 = arith.constant 0.353553385 : f32
    %372 = vector.broadcast %cst_236 : f32 to vector<10x8xf32>
    %373 = arith.mulf %371, %372 : vector<10x8xf32>
    %c0_237 = arith.constant 0 : index
    %c56_238 = arith.constant 56 : index
    %374 = vector.load %arg25[%c0_237, %c56_238] : memref<20x96xf32, #tpu.memory_space<vmem>>, vector<10x8xf32>
    %c0_239 = arith.constant 0 : index
    %c88_240 = arith.constant 88 : index
    %375 = vector.load %arg25[%c0_239, %c88_240] : memref<20x96xf32, #tpu.memory_space<vmem>>, vector<10x8xf32>
    %376 = tpu.transpose %374, [1, 0] : vector<10x8xf32> -> vector<8x10xf32>
    %cst_241 = arith.constant dense<0.000000e+00> : vector<10x10xf32>
    %377 = tpu.matmul %373, %376, %cst_241 {dimension_numbers = #tpu.dot_dimension_numbers<[1], [0], [0], [1], [0, 0, 1, 1], [], []>} : vector<10x8xf32>, vector<8x10xf32>, vector<10x10xf32> -> vector<10x10xf32>
    %cst_242 = arith.constant dense<0xFF800000> : vector<10xf32>
    %378 = vector.multi_reduction <maximumf>, %377, %cst_242 [1] : vector<10x10xf32> to vector<10xf32>
    %379 = vector.shape_cast %378 : vector<10xf32> to vector<10x1xf32>
    %380 = vector.broadcast %379 : vector<10x1xf32> to vector<10x10xf32>
    %381 = arith.subf %377, %380 : vector<10x10xf32>
    %382 = math.exp %381 : vector<10x10xf32>
    %cst_243 = arith.constant dense<0.000000e+00> : vector<10xf32>
    %383 = vector.multi_reduction <add>, %382, %cst_243 [1] : vector<10x10xf32> to vector<10xf32>
    %384 = vector.shape_cast %383 : vector<10xf32> to vector<10x1xf32>
    %385 = tpu.reciprocal %384 {approx = true} : vector<10x1xf32> -> vector<10x1xf32>
    %386 = vector.broadcast %385 : vector<10x1xf32> to vector<10x10xf32>
    %387 = arith.mulf %382, %386 : vector<10x10xf32>
    %cst_244 = arith.constant dense<0.000000e+00> : vector<10x8xf32>
    %388 = tpu.matmul %387, %375, %cst_244 {dimension_numbers = #tpu.dot_dimension_numbers<[1], [0], [0], [1], [0, 0, 1, 1], [], []>} : vector<10x10xf32>, vector<10x8xf32>, vector<10x8xf32> -> vector<10x8xf32>
    %c0_245 = arith.constant 0 : index
    %c24_246 = arith.constant 24 : index
    %389 = vector.load %arg26[%c0_245, %c24_246] : memref<20x32xf32, #tpu.memory_space<vmem>>, vector<10x8xf32>
    tpu.vector_store %arg26[%c0_245, %c24_246], %388 {strides = array<i32>} : memref<20x32xf32, #tpu.memory_space<vmem>>, vector<10x8xf32>,
    %c10_247 = arith.constant 10 : index
    %c0_248 = arith.constant 0 : index
    %390 = vector.load %arg25[%c10_247, %c0_248] : memref<20x96xf32, #tpu.memory_space<vmem>>, vector<10x8xf32>
    %cst_249 = arith.constant 0.353553385 : f32
    %391 = vector.broadcast %cst_249 : f32 to vector<10x8xf32>
    %392 = arith.mulf %390, %391 : vector<10x8xf32>
    %c10_250 = arith.constant 10 : index
    %c32_251 = arith.constant 32 : index
    %393 = vector.load %arg25[%c10_250, %c32_251] : memref<20x96xf32, #tpu.memory_space<vmem>>, vector<10x8xf32>
    %c10_252 = arith.constant 10 : index
    %c64_253 = arith.constant 64 : index
    %394 = vector.load %arg25[%c10_252, %c64_253] : memref<20x96xf32, #tpu.memory_space<vmem>>, vector<10x8xf32>
    %395 = tpu.transpose %393, [1, 0] : vector<10x8xf32> -> vector<8x10xf32>
    %cst_254 = arith.constant dense<0.000000e+00> : vector<10x10xf32>
    %396 = tpu.matmul %392, %395, %cst_254 {dimension_numbers = #tpu.dot_dimension_numbers<[1], [0], [0], [1], [0, 0, 1, 1], [], []>} : vector<10x8xf32>, vector<8x10xf32>, vector<10x10xf32> -> vector<10x10xf32>
    %cst_255 = arith.constant dense<0xFF800000> : vector<10xf32>
    %397 = vector.multi_reduction <maximumf>, %396, %cst_255 [1] : vector<10x10xf32> to vector<10xf32>
    %398 = vector.shape_cast %397 : vector<10xf32> to vector<10x1xf32>
    %399 = vector.broadcast %398 : vector<10x1xf32> to vector<10x10xf32>
    %400 = arith.subf %396, %399 : vector<10x10xf32>
    %401 = math.exp %400 : vector<10x10xf32>
    %cst_256 = arith.constant dense<0.000000e+00> : vector<10xf32>
    %402 = vector.multi_reduction <add>, %401, %cst_256 [1] : vector<10x10xf32> to vector<10xf32>
    %403 = vector.shape_cast %402 : vector<10xf32> to vector<10x1xf32>
    %404 = tpu.reciprocal %403 {approx = true} : vector<10x1xf32> -> vector<10x1xf32>
    %405 = vector.broadcast %404 : vector<10x1xf32> to vector<10x10xf32>
    %406 = arith.mulf %401, %405 : vector<10x10xf32>
    %cst_257 = arith.constant dense<0.000000e+00> : vector<10x8xf32>
    %407 = tpu.matmul %406, %394, %cst_257 {dimension_numbers = #tpu.dot_dimension_numbers<[1], [0], [0], [1], [0, 0, 1, 1], [], []>} : vector<10x10xf32>, vector<10x8xf32>, vector<10x8xf32> -> vector<10x8xf32>
    %c10_258 = arith.constant 10 : index
    %c0_259 = arith.constant 0 : index
    %408 = vector.load %arg26[%c10_258, %c0_259] : memref<20x32xf32, #tpu.memory_space<vmem>>, vector<10x8xf32>
    tpu.vector_store %arg26[%c10_258, %c0_259], %407 {strides = array<i32>} : memref<20x32xf32, #tpu.memory_space<vmem>>, vector<10x8xf32>,
    %c10_260 = arith.constant 10 : index
    %c8_261 = arith.constant 8 : index
    %409 = vector.load %arg25[%c10_260, %c8_261] : memref<20x96xf32, #tpu.memory_space<vmem>>, vector<10x8xf32>
    %cst_262 = arith.constant 0.353553385 : f32
    %410 = vector.broadcast %cst_262 : f32 to vector<10x8xf32>
    %411 = arith.mulf %409, %410 : vector<10x8xf32>
    %c10_263 = arith.constant 10 : index
    %c40_264 = arith.constant 40 : index
    %412 = vector.load %arg25[%c10_263, %c40_264] : memref<20x96xf32, #tpu.memory_space<vmem>>, vector<10x8xf32>
    %c10_265 = arith.constant 10 : index
    %c72_266 = arith.constant 72 : index
    %413 = vector.load %arg25[%c10_265, %c72_266] : memref<20x96xf32, #tpu.memory_space<vmem>>, vector<10x8xf32>
    %414 = tpu.transpose %412, [1, 0] : vector<10x8xf32> -> vector<8x10xf32>
    %cst_267 = arith.constant dense<0.000000e+00> : vector<10x10xf32>
    %415 = tpu.matmul %411, %414, %cst_267 {dimension_numbers = #tpu.dot_dimension_numbers<[1], [0], [0], [1], [0, 0, 1, 1], [], []>} : vector<10x8xf32>, vector<8x10xf32>, vector<10x10xf32> -> vector<10x10xf32>
    %cst_268 = arith.constant dense<0xFF800000> : vector<10xf32>
    %416 = vector.multi_reduction <maximumf>, %415, %cst_268 [1] : vector<10x10xf32> to vector<10xf32>
    %417 = vector.shape_cast %416 : vector<10xf32> to vector<10x1xf32>
    %418 = vector.broadcast %417 : vector<10x1xf32> to vector<10x10xf32>
    %419 = arith.subf %415, %418 : vector<10x10xf32>
    %420 = math.exp %419 : vector<10x10xf32>
    %cst_269 = arith.constant dense<0.000000e+00> : vector<10xf32>
    %421 = vector.multi_reduction <add>, %420, %cst_269 [1] : vector<10x10xf32> to vector<10xf32>
    %422 = vector.shape_cast %421 : vector<10xf32> to vector<10x1xf32>
    %423 = tpu.reciprocal %422 {approx = true} : vector<10x1xf32> -> vector<10x1xf32>
    %424 = vector.broadcast %423 : vector<10x1xf32> to vector<10x10xf32>
    %425 = arith.mulf %420, %424 : vector<10x10xf32>
    %cst_270 = arith.constant dense<0.000000e+00> : vector<10x8xf32>
    %426 = tpu.matmul %425, %413, %cst_270 {dimension_numbers = #tpu.dot_dimension_numbers<[1], [0], [0], [1], [0, 0, 1, 1], [], []>} : vector<10x10xf32>, vector<10x8xf32>, vector<10x8xf32> -> vector<10x8xf32>
    %c10_271 = arith.constant 10 : index
    %c8_272 = arith.constant 8 : index
    %427 = vector.load %arg26[%c10_271, %c8_272] : memref<20x32xf32, #tpu.memory_space<vmem>>, vector<10x8xf32>
    tpu.vector_store %arg26[%c10_271, %c8_272], %426 {strides = array<i32>} : memref<20x32xf32, #tpu.memory_space<vmem>>, vector<10x8xf32>,
    %c10_273 = arith.constant 10 : index
    %c16_274 = arith.constant 16 : index
    %428 = vector.load %arg25[%c10_273, %c16_274] : memref<20x96xf32, #tpu.memory_space<vmem>>, vector<10x8xf32>
    %cst_275 = arith.constant 0.353553385 : f32
    %429 = vector.broadcast %cst_275 : f32 to vector<10x8xf32>
    %430 = arith.mulf %428, %429 : vector<10x8xf32>
    %c10_276 = arith.constant 10 : index
    %c48_277 = arith.constant 48 : index
    %431 = vector.load %arg25[%c10_276, %c48_277] : memref<20x96xf32, #tpu.memory_space<vmem>>, vector<10x8xf32>
    %c10_278 = arith.constant 10 : index
    %c80_279 = arith.constant 80 : index
    %432 = vector.load %arg25[%c10_278, %c80_279] : memref<20x96xf32, #tpu.memory_space<vmem>>, vector<10x8xf32>
    %433 = tpu.transpose %431, [1, 0] : vector<10x8xf32> -> vector<8x10xf32>
    %cst_280 = arith.constant dense<0.000000e+00> : vector<10x10xf32>
    %434 = tpu.matmul %430, %433, %cst_280 {dimension_numbers = #tpu.dot_dimension_numbers<[1], [0], [0], [1], [0, 0, 1, 1], [], []>} : vector<10x8xf32>, vector<8x10xf32>, vector<10x10xf32> -> vector<10x10xf32>
    %cst_281 = arith.constant dense<0xFF800000> : vector<10xf32>
    %435 = vector.multi_reduction <maximumf>, %434, %cst_281 [1] : vector<10x10xf32> to vector<10xf32>
    %436 = vector.shape_cast %435 : vector<10xf32> to vector<10x1xf32>
    %437 = vector.broadcast %436 : vector<10x1xf32> to vector<10x10xf32>
    %438 = arith.subf %434, %437 : vector<10x10xf32>
    %439 = math.exp %438 : vector<10x10xf32>
    %cst_282 = arith.constant dense<0.000000e+00> : vector<10xf32>
    %440 = vector.multi_reduction <add>, %439, %cst_282 [1] : vector<10x10xf32> to vector<10xf32>
    %441 = vector.shape_cast %440 : vector<10xf32> to vector<10x1xf32>
    %442 = tpu.reciprocal %441 {approx = true} : vector<10x1xf32> -> vector<10x1xf32>
    %443 = vector.broadcast %442 : vector<10x1xf32> to vector<10x10xf32>
    %444 = arith.mulf %439, %443 : vector<10x10xf32>
    %cst_283 = arith.constant dense<0.000000e+00> : vector<10x8xf32>
    %445 = tpu.matmul %444, %432, %cst_283 {dimension_numbers = #tpu.dot_dimension_numbers<[1], [0], [0], [1], [0, 0, 1, 1], [], []>} : vector<10x10xf32>, vector<10x8xf32>, vector<10x8xf32> -> vector<10x8xf32>
    %c10_284 = arith.constant 10 : index
    %c16_285 = arith.constant 16 : index
    %446 = vector.load %arg26[%c10_284, %c16_285] : memref<20x32xf32, #tpu.memory_space<vmem>>, vector<10x8xf32>
    tpu.vector_store %arg26[%c10_284, %c16_285], %445 {strides = array<i32>} : memref<20x32xf32, #tpu.memory_space<vmem>>, vector<10x8xf32>,
    %c10_286 = arith.constant 10 : index
    %c24_287 = arith.constant 24 : index
    %447 = vector.load %arg25[%c10_286, %c24_287] : memref<20x96xf32, #tpu.memory_space<vmem>>, vector<10x8xf32>
    %cst_288 = arith.constant 0.353553385 : f32
    %448 = vector.broadcast %cst_288 : f32 to vector<10x8xf32>
    %449 = arith.mulf %447, %448 : vector<10x8xf32>
    %c10_289 = arith.constant 10 : index
    %c56_290 = arith.constant 56 : index
    %450 = vector.load %arg25[%c10_289, %c56_290] : memref<20x96xf32, #tpu.memory_space<vmem>>, vector<10x8xf32>
    %c10_291 = arith.constant 10 : index
    %c88_292 = arith.constant 88 : index
    %451 = vector.load %arg25[%c10_291, %c88_292] : memref<20x96xf32, #tpu.memory_space<vmem>>, vector<10x8xf32>
    %452 = tpu.transpose %450, [1, 0] : vector<10x8xf32> -> vector<8x10xf32>
    %cst_293 = arith.constant dense<0.000000e+00> : vector<10x10xf32>
    %453 = tpu.matmul %449, %452, %cst_293 {dimension_numbers = #tpu.dot_dimension_numbers<[1], [0], [0], [1], [0, 0, 1, 1], [], []>} : vector<10x8xf32>, vector<8x10xf32>, vector<10x10xf32> -> vector<10x10xf32>
    %cst_294 = arith.constant dense<0xFF800000> : vector<10xf32>
    %454 = vector.multi_reduction <maximumf>, %453, %cst_294 [1] : vector<10x10xf32> to vector<10xf32>
    %455 = vector.shape_cast %454 : vector<10xf32> to vector<10x1xf32>
    %456 = vector.broadcast %455 : vector<10x1xf32> to vector<10x10xf32>
    %457 = arith.subf %453, %456 : vector<10x10xf32>
    %458 = math.exp %457 : vector<10x10xf32>
    %cst_295 = arith.constant dense<0.000000e+00> : vector<10xf32>
    %459 = vector.multi_reduction <add>, %458, %cst_295 [1] : vector<10x10xf32> to vector<10xf32>
    %460 = vector.shape_cast %459 : vector<10xf32> to vector<10x1xf32>
    %461 = tpu.reciprocal %460 {approx = true} : vector<10x1xf32> -> vector<10x1xf32>
    %462 = vector.broadcast %461 : vector<10x1xf32> to vector<10x10xf32>
    %463 = arith.mulf %458, %462 : vector<10x10xf32>
    %cst_296 = arith.constant dense<0.000000e+00> : vector<10x8xf32>
    %464 = tpu.matmul %463, %451, %cst_296 {dimension_numbers = #tpu.dot_dimension_numbers<[1], [0], [0], [1], [0, 0, 1, 1], [], []>} : vector<10x10xf32>, vector<10x8xf32>, vector<10x8xf32> -> vector<10x8xf32>
    %c10_297 = arith.constant 10 : index
    %c24_298 = arith.constant 24 : index
    %465 = vector.load %arg26[%c10_297, %c24_298] : memref<20x32xf32, #tpu.memory_space<vmem>>, vector<10x8xf32>
    tpu.vector_store %arg26[%c10_297, %c24_298], %464 {strides = array<i32>} : memref<20x32xf32, #tpu.memory_space<vmem>>, vector<10x8xf32>,
    %c0_299 = arith.constant 0 : index
    %c0_300 = arith.constant 0 : index
    %466 = vector.load %arg26[%c0_299, %c0_300] : memref<20x32xf32, #tpu.memory_space<vmem>>, vector<20x32xf32>
    %c1_301 = arith.constant 1 : index
    %c0_302 = arith.constant 0 : index
    %c0_303 = arith.constant 0 : index
    %467 = vector.load %arg9[%c1_301, %c0_302, %c0_303] : memref<2x32x32xbf16, #tpu.memory_space<vmem>>, vector<1x32x32xbf16>
    %468 = vector.shape_cast %467 : vector<1x32x32xbf16> to vector<32x32xbf16>
    %c1_304 = arith.constant 1 : index
    %c0_305 = arith.constant 0 : index
    %c0_306 = arith.constant 0 : index
    %469 = vector.load %arg10[%c1_304, %c0_305, %c0_306] : memref<2x1x32xf32, #tpu.memory_space<vmem>>, vector<1x1x32xf32>
    %470 = vector.shape_cast %469 : vector<1x1x32xf32> to vector<1x32xf32>
    %471 = arith.truncf %466 : vector<20x32xf32> to vector<20x32xbf16>
    %cst_307 = arith.constant dense<0.000000e+00> : vector<20x32xf32>
    %472 = tpu.matmul %471, %468, %cst_307 {dimension_numbers = #tpu.dot_dimension_numbers<[1], [0], [0], [1], [0, 0, 1, 1], [], []>} : vector<20x32xbf16>, vector<32x32xbf16>, vector<20x32xf32> -> vector<20x32xf32>
    %473 = vector.broadcast %470 : vector<1x32xf32> to vector<20x32xf32>
    %474 = arith.addf %472, %473 : vector<20x32xf32>
    %475 = arith.addf %278, %474 : vector<20x32xf32>
    %c1_308 = arith.constant 1 : index
    %c0_309 = arith.constant 0 : index
    %c0_310 = arith.constant 0 : index
    %476 = vector.load %arg11[%c1_308, %c0_309, %c0_310] : memref<2x1x32xf32, #tpu.memory_space<vmem>>, vector<1x1x32xf32>
    %477 = vector.shape_cast %476 : vector<1x1x32xf32> to vector<1x32xf32>
    %c1_311 = arith.constant 1 : index
    %c0_312 = arith.constant 0 : index
    %c0_313 = arith.constant 0 : index
    %478 = vector.load %arg12[%c1_311, %c0_312, %c0_313] : memref<2x1x32xf32, #tpu.memory_space<vmem>>, vector<1x1x32xf32>
    %479 = vector.shape_cast %478 : vector<1x1x32xf32> to vector<1x32xf32>
    %cst_314 = arith.constant dense<0.000000e+00> : vector<20xf32>
    %480 = vector.multi_reduction <add>, %475, %cst_314 [1] : vector<20x32xf32> to vector<20xf32>
    %481 = vector.shape_cast %480 : vector<20xf32> to vector<20x1xf32>
    %cst_315 = arith.constant 3.200000e+01 : f32
    %482 = vector.broadcast %cst_315 : f32 to vector<20x1xf32>
    %483 = arith.divf %481, %482 : vector<20x1xf32>
    %484 = vector.broadcast %483 : vector<20x1xf32> to vector<20x32xf32>
    %485 = arith.subf %475, %484 : vector<20x32xf32>
    %486 = arith.mulf %485, %485 : vector<20x32xf32>
    %cst_316 = arith.constant dense<0.000000e+00> : vector<20xf32>
    %487 = vector.multi_reduction <add>, %486, %cst_316 [1] : vector<20x32xf32> to vector<20xf32>
    %488 = vector.shape_cast %487 : vector<20xf32> to vector<20x1xf32>
    %cst_317 = arith.constant 3.200000e+01 : f32
    %489 = vector.broadcast %cst_317 : f32 to vector<20x1xf32>
    %490 = arith.divf %488, %489 : vector<20x1xf32>
    %491 = vector.broadcast %483 : vector<20x1xf32> to vector<20x32xf32>
    %492 = arith.subf %475, %491 : vector<20x32xf32>
    %cst_318 = arith.constant 9.99999997E-7 : f32
    %493 = vector.broadcast %cst_318 : f32 to vector<20x1xf32>
    %494 = arith.addf %490, %493 : vector<20x1xf32>
    %495 = math.rsqrt %494 : vector<20x1xf32>
    %496 = vector.broadcast %495 : vector<20x1xf32> to vector<20x32xf32>
    %497 = arith.mulf %492, %496 : vector<20x32xf32>
    %498 = vector.broadcast %477 : vector<1x32xf32> to vector<20x32xf32>
    %499 = arith.mulf %497, %498 : vector<20x32xf32>
    %500 = vector.broadcast %479 : vector<1x32xf32> to vector<20x32xf32>
    %501 = arith.addf %499, %500 : vector<20x32xf32>
    %c1_319 = arith.constant 1 : index
    %c0_320 = arith.constant 0 : index
    %c0_321 = arith.constant 0 : index
    %502 = vector.load %arg13[%c1_319, %c0_320, %c0_321] : memref<2x32x64xbf16, #tpu.memory_space<vmem>>, vector<1x32x64xbf16>
    %503 = vector.shape_cast %502 : vector<1x32x64xbf16> to vector<32x64xbf16>
    %c1_322 = arith.constant 1 : index
    %c0_323 = arith.constant 0 : index
    %c0_324 = arith.constant 0 : index
    %504 = vector.load %arg14[%c1_322, %c0_323, %c0_324] : memref<2x1x64xf32, #tpu.memory_space<vmem>>, vector<1x1x64xf32>
    %505 = vector.shape_cast %504 : vector<1x1x64xf32> to vector<1x64xf32>
    %506 = arith.truncf %501 : vector<20x32xf32> to vector<20x32xbf16>
    %cst_325 = arith.constant dense<0.000000e+00> : vector<20x64xf32>
    %507 = tpu.matmul %506, %503, %cst_325 {dimension_numbers = #tpu.dot_dimension_numbers<[1], [0], [0], [1], [0, 0, 1, 1], [], []>} : vector<20x32xbf16>, vector<32x64xbf16>, vector<20x64xf32> -> vector<20x64xf32>
    %508 = vector.broadcast %505 : vector<1x64xf32> to vector<20x64xf32>
    %509 = arith.addf %507, %508 : vector<20x64xf32>
    %510 = arith.mulf %509, %509 : vector<20x64xf32>
    %511 = arith.mulf %509, %510 : vector<20x64xf32>
    %cst_326 = arith.constant 4.471500e-02 : f32
    %512 = vector.broadcast %cst_326 : f32 to vector<20x64xf32>
    %513 = arith.mulf %512, %511 : vector<20x64xf32>
    %514 = arith.addf %509, %513 : vector<20x64xf32>
    %cst_327 = arith.constant 0.797884583 : f32
    %515 = vector.broadcast %cst_327 : f32 to vector<20x64xf32>
    %516 = arith.mulf %515, %514 : vector<20x64xf32>
    %517 = math.tanh %516 : vector<20x64xf32>
    %cst_328 = arith.constant 1.000000e+00 : f32
    %518 = vector.broadcast %cst_328 : f32 to vector<20x64xf32>
    %519 = arith.addf %518, %517 : vector<20x64xf32>
    %cst_329 = arith.constant 5.000000e-01 : f32
    %520 = vector.broadcast %cst_329 : f32 to vector<20x64xf32>
    %521 = arith.mulf %520, %519 : vector<20x64xf32>
    %522 = arith.mulf %509, %521 : vector<20x64xf32>
    %c1_330 = arith.constant 1 : index
    %c0_331 = arith.constant 0 : index
    %c0_332 = arith.constant 0 : index
    %523 = vector.load %arg15[%c1_330, %c0_331, %c0_332] : memref<2x64x32xbf16, #tpu.memory_space<vmem>>, vector<1x64x32xbf16>
    %524 = vector.shape_cast %523 : vector<1x64x32xbf16> to vector<64x32xbf16>
    %c1_333 = arith.constant 1 : index
    %c0_334 = arith.constant 0 : index
    %c0_335 = arith.constant 0 : index
    %525 = vector.load %arg16[%c1_333, %c0_334, %c0_335] : memref<2x1x32xf32, #tpu.memory_space<vmem>>, vector<1x1x32xf32>
    %526 = vector.shape_cast %525 : vector<1x1x32xf32> to vector<1x32xf32>
    %527 = arith.truncf %522 : vector<20x64xf32> to vector<20x64xbf16>
    %cst_336 = arith.constant dense<0.000000e+00> : vector<20x32xf32>
    %528 = tpu.matmul %527, %524, %cst_336 {dimension_numbers = #tpu.dot_dimension_numbers<[1], [0], [0], [1], [0, 0, 1, 1], [], []>} : vector<20x64xbf16>, vector<64x32xbf16>, vector<20x32xf32> -> vector<20x32xf32>
    %529 = vector.broadcast %526 : vector<1x32xf32> to vector<20x32xf32>
    %530 = arith.addf %528, %529 : vector<20x32xf32>
    %531 = arith.addf %475, %530 : vector<20x32xf32>
    %c0_337 = arith.constant 0 : index
    %c0_338 = arith.constant 0 : index
    %532 = vector.load %arg17[%c0_337, %c0_338] : memref<1x32xf32, #tpu.memory_space<vmem>>, vector<1x32xf32>
    %c0_339 = arith.constant 0 : index
    %c0_340 = arith.constant 0 : index
    %533 = vector.load %arg18[%c0_339, %c0_340] : memref<1x32xf32, #tpu.memory_space<vmem>>, vector<1x32xf32>
    %cst_341 = arith.constant dense<0.000000e+00> : vector<20xf32>
    %534 = vector.multi_reduction <add>, %531, %cst_341 [1] : vector<20x32xf32> to vector<20xf32>
    %535 = vector.shape_cast %534 : vector<20xf32> to vector<20x1xf32>
    %cst_342 = arith.constant 3.200000e+01 : f32
    %536 = vector.broadcast %cst_342 : f32 to vector<20x1xf32>
    %537 = arith.divf %535, %536 : vector<20x1xf32>
    %538 = vector.broadcast %537 : vector<20x1xf32> to vector<20x32xf32>
    %539 = arith.subf %531, %538 : vector<20x32xf32>
    %540 = arith.mulf %539, %539 : vector<20x32xf32>
    %cst_343 = arith.constant dense<0.000000e+00> : vector<20xf32>
    %541 = vector.multi_reduction <add>, %540, %cst_343 [1] : vector<20x32xf32> to vector<20xf32>
    %542 = vector.shape_cast %541 : vector<20xf32> to vector<20x1xf32>
    %cst_344 = arith.constant 3.200000e+01 : f32
    %543 = vector.broadcast %cst_344 : f32 to vector<20x1xf32>
    %544 = arith.divf %542, %543 : vector<20x1xf32>
    %545 = vector.broadcast %537 : vector<20x1xf32> to vector<20x32xf32>
    %546 = arith.subf %531, %545 : vector<20x32xf32>
    %cst_345 = arith.constant 9.99999997E-7 : f32
    %547 = vector.broadcast %cst_345 : f32 to vector<20x1xf32>
    %548 = arith.addf %544, %547 : vector<20x1xf32>
    %549 = math.rsqrt %548 : vector<20x1xf32>
    %550 = vector.broadcast %549 : vector<20x1xf32> to vector<20x32xf32>
    %551 = arith.mulf %546, %550 : vector<20x32xf32>
    %552 = vector.broadcast %532 : vector<1x32xf32> to vector<20x32xf32>
    %553 = arith.mulf %551, %552 : vector<20x32xf32>
    %554 = vector.broadcast %533 : vector<1x32xf32> to vector<20x32xf32>
    %555 = arith.addf %553, %554 : vector<20x32xf32>
    %c0_346 = arith.constant 0 : index
    %c0_347 = arith.constant 0 : index
    %556 = vector.load %arg24[%c0_346, %c0_347] : memref<20x32xf32, #tpu.memory_space<vmem>>, vector<20x32xf32>
    tpu.vector_store %arg24[%c0_346, %c0_347], %555 {strides = array<i32>} : memref<20x32xf32, #tpu.memory_space<vmem>>, vector<20x32xf32>,
    %c0_348 = arith.constant 0 : index
    %c0_349 = arith.constant 0 : index
    %557 = vector.load %arg19[%c0_348, %c0_349] : memref<32x32xbf16, #tpu.memory_space<vmem>>, vector<32x32xbf16>
    %c0_350 = arith.constant 0 : index
    %c0_351 = arith.constant 0 : index
    %558 = vector.load %arg20[%c0_350, %c0_351] : memref<1x32xf32, #tpu.memory_space<vmem>>, vector<1x32xf32>
    %c0_352 = arith.constant 0 : index
    %c0_353 = arith.constant 0 : index
    %559 = vector.load %arg21[%c0_352, %c0_353] : memref<32x32xbf16, #tpu.memory_space<vmem>>, vector<32x32xbf16>
    %c0_354 = arith.constant 0 : index
    %c0_355 = arith.constant 0 : index
    %560 = vector.load %arg22[%c0_354, %c0_355] : memref<1x32xf32, #tpu.memory_space<vmem>>, vector<1x32xf32>
    %c0_356 = arith.constant 0 : index
    %c0_357 = arith.constant 0 : index
    %561 = vector.load %arg24[%c0_356, %c0_357] : memref<20x32xf32, #tpu.memory_space<vmem>>, vector<1x32xf32>
    %c1_358 = arith.constant 1 : index
    %c0_359 = arith.constant 0 : index
    %562 = vector.load %arg24[%c1_358, %c0_359] : memref<20x32xf32, #tpu.memory_space<vmem>>, vector<1x32xf32>
    %563 = arith.truncf %561 : vector<1x32xf32> to vector<1x32xbf16>
    %cst_360 = arith.constant dense<0.000000e+00> : vector<1x32xf32>
    %564 = tpu.matmul %563, %557, %cst_360 {dimension_numbers = #tpu.dot_dimension_numbers<[1], [0], [0], [1], [0, 0, 1, 1], [], []>} : vector<1x32xbf16>, vector<32x32xbf16>, vector<1x32xf32> -> vector<1x32xf32>
    %565 = arith.addf %564, %558 : vector<1x32xf32>
    %566 = arith.truncf %562 : vector<1x32xf32> to vector<1x32xbf16>
    %cst_361 = arith.constant dense<0.000000e+00> : vector<1x32xf32>
    %567 = tpu.matmul %566, %559, %cst_361 {dimension_numbers = #tpu.dot_dimension_numbers<[1], [0], [0], [1], [0, 0, 1, 1], [], []>} : vector<1x32xbf16>, vector<32x32xbf16>, vector<1x32xf32> -> vector<1x32xf32>
    %568 = arith.addf %567, %560 : vector<1x32xf32>
    %569 = arith.addf %565, %568 : vector<1x32xf32>
    %cst_362 = arith.constant 5.000000e-01 : f32
    %570 = vector.broadcast %cst_362 : f32 to vector<1x32xf32>
    %571 = arith.mulf %569, %570 : vector<1x32xf32>
    %c0_363 = arith.constant 0 : index
    %c0_364 = arith.constant 0 : index
    %572 = vector.load %arg23[%c0_363, %c0_364] : memref<2x32xf32, #tpu.memory_space<vmem>>, vector<1x32xf32>
    tpu.vector_store %arg23[%c0_363, %c0_364], %571 {strides = array<i32>} : memref<2x32xf32, #tpu.memory_space<vmem>>, vector<1x32xf32>,
    %c10_365 = arith.constant 10 : index
    %c0_366 = arith.constant 0 : index
    %573 = vector.load %arg24[%c10_365, %c0_366] : memref<20x32xf32, #tpu.memory_space<vmem>>, vector<1x32xf32>
    %c11 = arith.constant 11 : index
    %c0_367 = arith.constant 0 : index
    %574 = vector.load %arg24[%c11, %c0_367] : memref<20x32xf32, #tpu.memory_space<vmem>>, vector<1x32xf32>
    %575 = arith.truncf %573 : vector<1x32xf32> to vector<1x32xbf16>
    %cst_368 = arith.constant dense<0.000000e+00> : vector<1x32xf32>
    %576 = tpu.matmul %575, %557, %cst_368 {dimension_numbers = #tpu.dot_dimension_numbers<[1], [0], [0], [1], [0, 0, 1, 1], [], []>} : vector<1x32xbf16>, vector<32x32xbf16>, vector<1x32xf32> -> vector<1x32xf32>
    %577 = arith.addf %576, %558 : vector<1x32xf32>
    %578 = arith.truncf %574 : vector<1x32xf32> to vector<1x32xbf16>
    %cst_369 = arith.constant dense<0.000000e+00> : vector<1x32xf32>
    %579 = tpu.matmul %578, %559, %cst_369 {dimension_numbers = #tpu.dot_dimension_numbers<[1], [0], [0], [1], [0, 0, 1, 1], [], []>} : vector<1x32xbf16>, vector<32x32xbf16>, vector<1x32xf32> -> vector<1x32xf32>
    %580 = arith.addf %579, %560 : vector<1x32xf32>
    %581 = arith.addf %577, %580 : vector<1x32xf32>
    %cst_370 = arith.constant 5.000000e-01 : f32
    %582 = vector.broadcast %cst_370 : f32 to vector<1x32xf32>
    %583 = arith.mulf %581, %582 : vector<1x32xf32>
    %c1_371 = arith.constant 1 : index
    %c0_372 = arith.constant 0 : index
    %584 = vector.load %arg23[%c1_371, %c0_372] : memref<2x32xf32, #tpu.memory_space<vmem>>, vector<1x32xf32>
    tpu.vector_store %arg23[%c1_371, %c0_372], %583 {strides = array<i32>} : memref<2x32xf32, #tpu.memory_space<vmem>>, vector<1x32xf32>,
    return
  }
}

</mosaic_0001>

<bundles_post_ra>
// kernel: transgeo_forward.3
= control target key start
LH: loop header
LB: loop body
LE: loop exit
PB: predicated region body
PF: predicated region fallthrough
CT: control target
= control target key end

     0   :  { %s5755_s0 = inlined_call_operand.vmem [shape: f32[2,4,192], index: 0, kind: input, shape index: {}]   ;;  %s5756_s1 = inlined_call_operand.vmem [shape: bf16[192,32], index: 1, kind: input, shape index: {}]   ;;  %s5757_s2 = inlined_call_operand.vmem [shape: f32[1,32], index: 2, kind: input, shape index: {}]   ;;  %s5758_s3 = inlined_call_operand.vmem [shape: f32[2,32], index: 3, kind: input, shape index: {}]   ;;  %s5759_s4 = inlined_call_operand.vmem [shape: f32[6,32], index: 4, kind: input, shape index: {}]   ;;  %s5760_s5 = inlined_call_operand.vmem [shape: f32[2,1,32], index: 5, kind: input, shape index: {}]   ;;  %s5761_s6 = inlined_call_operand.vmem [shape: f32[2,1,32], index: 6, kind: input, shape index: {}]   ;;  %s5762_s7 = inlined_call_operand.vmem [shape: bf16[2,32,96], index: 7, kind: input, shape index: {}]   ;;  %s5763_s8 = inlined_call_operand.vmem [shape: f32[2,1,96], index: 8, kind: input, shape index: {}]   ;;  %s5764_s9 = inlined_call_operand.vmem [shape: bf16[2,32,32], index: 9, kind: input, shape index: {}]   ;;  %s5765_s10 = inlined_call_operand.vmem [shape: f32[2,1,32], index: 10, kind: input, shape index: {}]   ;;  %s5766_s11 = inlined_call_operand.vmem [shape: f32[2,1,32], index: 11, kind: input, shape index: {}]   ;;  %s5767_s12 = inlined_call_operand.vmem [shape: f32[2,1,32], index: 12, kind: input, shape index: {}]   ;;  %s5768_s13 = inlined_call_operand.vmem [shape: bf16[2,32,64], index: 13, kind: input, shape index: {}]   ;;  %s5769_s14 = inlined_call_operand.vmem [shape: f32[2,1,64], index: 14, kind: input, shape index: {}]   ;;  %s5770_s15 = inlined_call_operand.vmem [shape: bf16[2,64,32], index: 15, kind: input, shape index: {}]   ;;  %s5771_s16 = inlined_call_operand.vmem [shape: f32[2,1,32], index: 16, kind: input, shape index: {}]   ;;  %s5772_s17 = inlined_call_operand.vmem [shape: f32[1,32], index: 17, kind: input, shape index: {}]   ;;  %s5773_s18 = inlined_call_operand.vmem [shape: f32[1,32], index: 18, kind: input, shape index: {}]   ;;  %s5774_s19 = inlined_call_operand.vmem [shape: bf16[32,32], index: 19, kind: input, shape index: {}]   ;;  %s5775_s20 = inlined_call_operand.vmem [shape: f32[1,32], index: 20, kind: input, shape index: {}]   ;;  %s5776_s21 = inlined_call_operand.vmem [shape: bf16[32,32], index: 21, kind: input, shape index: {}]   ;;  %s5777_s22 = inlined_call_operand.vmem [shape: f32[1,32], index: 22, kind: input, shape index: {}]   ;;  %s5778_s23 = inlined_call_operand.hbm [shape: f32[2,32], index: 23, kind: output, shape index: {}]  }
   0x1   :  { %5803 = sst [smem:[#allocation8_spill]] %s5755_s0 }
   0x2   :  { %5804 = sst [smem:[#allocation9_spill]] %s5756_s1 }
   0x3   :  { %5805 = sst [smem:[#allocation10_spill]] %s5757_s2 }
   0x4   :  { %5806 = sst [smem:[#allocation11_spill]] %s5758_s3 }
   0x5   :  { %5807 = sst [smem:[#allocation12_spill]] %s5759_s4 }
   0x6   :  { %5808 = sst [smem:[#allocation13_spill]] %s5760_s5 }
   0x7   :  { %5809 = sst [smem:[#allocation14_spill]] %s5761_s6 }
   0x8   :  { %5810 = sst [smem:[#allocation15_spill]] %s5762_s7 }
   0x9   :  { %s5811_s24 = sld [smem:[#allocation9_spill]]  ;;  %v4879_v1 = vmov 0   ;;  %vm188_vm0 = vcmask 523264  }
   0xa   :  { %192 = vmatprep.subr.bf16.mxu0 %v4879_v1  ;;  %248 = vmatprep.subr.bf16.mxu1 %v4879_v1  ;;  %s5812_s3 = sld [smem:[#allocation8_spill]] }
   0xf   :  { %v4727_v0 = vld [vmem:[%s5811_s24 + $0x38] sm:$0xff]   ;;  %v4728_v2 = vld [vmem:[%s5811_s24 + $0x30] sm:$0xff]   ;;  %v4729_v3 = vld [vmem:[%s5811_s24 + $0x28] sm:$0xff]  }
  0x10   :  { %193 = vmatpush1.bf16.msra.mxu0 %v4727_v0  ;;  %249 = vmatpush1.bf16.msra.mxu1 %v4727_v0  ;;  %v4730_v4 = vld [vmem:[%s5811_s24 + $0x20] sm:$0xff]   ;;  %v4731_v5 = vld [vmem:[%s5811_s24 + $0x18] sm:$0xff]   ;;  %v4193_v7 = vld [vmem:[%s5812_s3 + $0x8] sm:$0xff] }
  0x11   :  { %194 = vmatprep.subr.bf16.mxu0 %v4879_v1  ;;  %250 = vmatprep.subr.bf16.mxu1 %v4879_v1  ;;  %v104_v6 = vld [vmem:[%s5812_s3] sm:$0xff]  ;;  %v241_v9 = vcombine.high %v4193_v7, %v4193_v7  ;;  %v4732_v12 = vld [vmem:[%s5811_s24 + $0x10] sm:$0xff]   ;;  %v4733_v13 = vld [vmem:[%s5811_s24 + $0x8] sm:$0xff]  }
  0x12   :  { %v106_v8 = vcombine.high %v104_v6, %v104_v6  ;;  %v4734_v14 = vld [vmem:[%s5811_s24] sm:$0xff]  }
  0x13   :  { %v244_v11 = vpack.c.bf16 %v241_v9, %v241_v9 }
  0x14   :  { %195 = vmatpush1.bf16.msra.mxu0 %v4728_v2  ;;  %251 = vmatpush1.bf16.msra.mxu1 %v4728_v2  ;;  %v109_v10 = vpack.c.bf16 %v106_v8, %v106_v8 }
  0x15   :  { %196 = vmatprep.subr.bf16.mxu0 %v4879_v1  ;;  %252 = vmatprep.subr.bf16.mxu1 %v4879_v1 }
  0x16   :  { %4192 = vmatprep.mubr.msk.bf16.mxu0 %vm188_vm0, %v109_v10  ;;  %4194 = vmatprep.mubr.msk.bf16.mxu1 %vm188_vm0, %v244_v11 }
  0x18   :  { %197 = vmatpush1.bf16.msra.mxu0 %v4729_v3  ;;  %253 = vmatpush1.bf16.msra.mxu1 %v4729_v3 }
  0x19   :  { %198 = vmatprep.subr.bf16.mxu0 %v4879_v1  ;;  %254 = vmatprep.subr.bf16.mxu1 %v4879_v1 }
  0x1c   :  { %199 = vmatpush1.bf16.msra.mxu0 %v4730_v4  ;;  %255 = vmatpush1.bf16.msra.mxu1 %v4730_v4 }
  0x1d   :  { %200 = vmatprep.subr.bf16.mxu0 %v4879_v1  ;;  %256 = vmatprep.subr.bf16.mxu1 %v4879_v1 }
  0x20   :  { %201 = vmatpush1.bf16.msra.mxu0 %v4731_v5  ;;  %257 = vmatpush1.bf16.msra.mxu1 %v4731_v5 }
  0x21   :  { %202 = vmatprep.subr.bf16.mxu0 %v4879_v1  ;;  %258 = vmatprep.subr.bf16.mxu1 %v4879_v1 }
  0x24   :  { %203 = vmatpush1.bf16.msra.mxu0 %v4732_v12  ;;  %259 = vmatpush1.bf16.msra.mxu1 %v4732_v12 }
  0x25   :  { %204 = vmatprep.subr.bf16.mxu0 %v4879_v1  ;;  %260 = vmatprep.subr.bf16.mxu1 %v4879_v1 }
  0x28   :  { %205 = vmatpush1.bf16.msra.mxu0 %v4733_v13  ;;  %261 = vmatpush1.bf16.msra.mxu1 %v4733_v13 }
  0x29   :  { %206 = vmatprep.subr.bf16.mxu0 %v4879_v1  ;;  %262 = vmatprep.subr.bf16.mxu1 %v4879_v1 }
  0x2a   :  { %28 = vsyncpa [#allocation6], 0  ;;  %v4735_v15 = vld [vmem:[%s5811_s24 + $0x58] sm:$0xff]   ;;  %v4736_v16 = vld [vmem:[%s5811_s24 + $0x50] sm:$0xff]   ;;  %v108_v19 = vpack.c.bf16 %v104_v6, %v104_v6  ;;  %v243_v20 = vpack.c.bf16 %v4193_v7, %v4193_v7  ;;  %s5813_s5 = sld [smem:[#allocation11_spill]]  ;;  %vm232_vm1 = vcmask 254976  }
  0x2b   :  { %v4737_v17 = vld [vmem:[%s5811_s24 + $0x48] sm:$0xff]   ;;  %v4738_v18 = vld [vmem:[%s5811_s24 + $0x40] sm:$0xff]   ;;  %s5814_s2 = sld [smem:[#allocation12_spill]]  ;;  %vm236_vm2 = vcmask 257024   ;;  %vm296_vm3 = vcmask 261120   ;;  %v4880_v54 = vmov 0.0  }
  0x2c   :  { %207 = vmatpush1.bf16.msra.mxu0 %v4734_v14  ;;  %263 = vmatpush1.bf16.msra.mxu1 %v4734_v14  ;;  %s5815_s27 = sld [smem:[#allocation10_spill]]  ;;  %vm4881_vm4 = vmmov 0   ;;  %v4197_v9 = vld [vmem:[%s5763_s8] ss:$0 sm:$0xff]  ;;  %vm408_vm5 = vcmask 785408   ;;  %vm410_vm6 = vcmask 781312  }
  0x2d   :  { %216 = vmatprep.subr.bf16.mxu0 %v4879_v1  ;;  %272 = vmatprep.subr.bf16.mxu1 %v4879_v1  ;;  %s5816_s30 = sld [smem:[#allocation15_spill]]  ;;  %s4882_s29 = smov 88   ;;  %vm417_vm7 = vcmask 64512   ;;  %vm493_vm8 = vcmask 46080   ;;  %vm511_vm9 = vcmask 1045504   ;;  %vm507_vm10 = vcmask 48128  }
  0x2e   :  { %s4883_s3 = smov 96   ;;  %s4884_s0 = smov 120   ;;  %vm584_vm11 = vcmask 62464   ;;  %vm760_vm12 = vcmask 128064   ;;  %vm936_vm13 = vcmask 193664   ;;  %vm1112_vm14 = vcmask 259264  }
  0x2f   :  { %s4885_s4 = smov 112   ;;  %s4886_s25 = smov 80   ;;  %vm4070_vm15 = vcmask 253952  }
  0x30   :  { %217 = vmatpush2.bf16.msra.mxu0 %v4735_v15  ;;  %273 = vmatpush2.bf16.msra.mxu1 %v4735_v15  ;;  %v101_v21 = vld [vmem:[%s5813_s5] sm:$0x3]  ;;  %s5795_s5 = smov 104   ;;  %s5793_s1 = smov 72  }
  0x31   :  { %218 = vmatprep.subr.bf16.mxu0 %v4879_v1  ;;  %274 = vmatprep.subr.bf16.mxu1 %v4879_v1  ;;  %v102_v22 = vld [vmem:[%s5814_s2] sm:$0x3]  ;;  %v234_v26 = vld [vmem:[%s5814_s2 + $0x2] sm:$0xf]  ;;  %s5791_s26 = smov 64   ;;  %s5789_s24 = smov 48  }
  0x32   :  { %v103_v23 = vadd.f32 %v102_v22, %v101_v21  ;;  %v4179_v24 = vld [vmem:[%s5815_s27] ss:$0 sm:$0xff]  ;;  %v289_v28 = vld [vmem:[%s5814_s2 + $0x2] sm:$0xf]  ;;  %s5817_s2 = sld [smem:[#allocation13_spill]]  ;;  %s5787_s6 = smov 40  }
  0x33   :  { %v4741_v53 = vld [vmem:[%s5816_s30 + $0x8] sm:$0xff]   ;;  %v4742_v55 = vld [vmem:[%s5816_s30] sm:$0xff]   ;;  %s5818_s27 = sld [smem:[#allocation14_spill]]  ;;  %s5785_s7 = smov 56  }
  0x34   :  { %219 = vmatpush2.bf16.msra.mxu0 %v4736_v16  ;;  %275 = vmatpush2.bf16.msra.mxu1 %v4736_v16  ;;  %233 = vst.msk [vmem:[#allocation2] sm:$0x3] %vm232_vm1, %v103_v23  ;;  %288 = vst.msk [vmem:[#allocation2 + $0x6] sm:$0x3] %vm232_vm1, %v103_v23  ;;  %s5801_s28 = smov 8  }
  0x35   :  { %220 = vmatprep.subr.bf16.mxu0 %v4879_v1  ;;  %276 = vmatprep.subr.bf16.mxu1 %v4879_v1 }
  0x38   :  { %221 = vmatpush2.bf16.msra.mxu0 %v4737_v17  ;;  %277 = vmatpush2.bf16.msra.mxu1 %v4737_v17  ;;  %v4195_v0 = vld [vmem:[%s5817_s2] ss:$0 sm:$0xff] }
  0x39   :  { %222 = vmatprep.subr.bf16.mxu0 %v4879_v1  ;;  %278 = vmatprep.subr.bf16.mxu1 %v4879_v1  ;;  %v4196_v4 = vld [vmem:[%s5818_s27] ss:$0 sm:$0xff] }
  0x3c   :  { %223 = vmatpush2.bf16.msra.mxu0 %v4738_v18  ;;  %279 = vmatpush2.bf16.msra.mxu1 %v4738_v18 }
  0x3d   :  { %4445 = vmatprep.subr.bf16.mxu0 %v4880_v54  ;;  %4453 = vmatprep.subr.mxu1 %v4880_v54 }
  0x3f   :  { %225 = vmatmul.mubr.bf16.vlgmr.msra.gmra.mxu0 %v108_v19  ;;  %281 = vmatmul.mubr.bf16.vlgmr.msra.gmra.mxu1 %v243_v20 }
  0x40   :  { %4446 = vmatpush3.bf16.msra.mxu0 %v4741_v53  ;;  %4449 = vmatprep.mubr.msk.bf16.mxu0 %vm4881_vm4, %v4880_v54 }
  0x41   :  { %4447 = vmatprep.subr.bf16.mxu0 %v4880_v54  ;;  %4455 = vmatprep.mubr.msk.f32.mxu1 %vm4881_vm4, %v4880_v54 }
  0x44   :  { %4448 = vmatpush3.bf16.msra.mxu0 %v4742_v55 }
  0x45   :  { %4463 = vmatprep.subr.mxu0 %v4880_v54 }
  0xff   :  { %v226_v25 = vpop.f32.mrf.mxu0  ;;  %v282_v27 = vpop.f32.mrf.mxu1 }
 0x100   :  { %v227_v29 = vadd.f32 %v4179_v24, %v226_v25  ;;  %v283_v30 = vadd.f32 %v4179_v24, %v282_v27 }
 0x101   :  { %v228_v31 = vpop.f32.mrf.mxu0  ;;  %v284_v32 = vpop.f32.mrf.mxu1 }
 0x102   :  { %v235_v33 = vadd.f32 %v234_v26, %v227_v29  ;;  %v290_v34 = vadd.f32 %v289_v28, %v283_v30 }
 0x103   :  { %v229_v35 = vpop.f32.mrf.mxu0  ;;  %v285_v36 = vpop.f32.mrf.mxu1 }
 0x104   :  { %237 = vst.msk [vmem:[#allocation2 + $0x2] sm:$0xf] %vm236_vm2, %v235_v33  ;;  %291 = vst.msk [vmem:[#allocation2 + $0x8] sm:$0xf] %vm236_vm2, %v290_v34 }
 0x105   :  { %v230_v37 = vpop.f32.mrf.mxu0  ;;  %v286_v38 = vpop.f32.mrf.mxu1 }
 0x10b   :  { %v5102_v39 = vld [vmem:[#allocation2] sm:$0xff]  ;;  %v5104_v40 = vld [vmem:[#allocation2 + $0x8] sm:$0xf] }
 0x10c   :  { %v297_v41 = vsel %vm296_vm3, %v5102_v39, 0.0  ;;  %v300_v42 = vsel %vm236_vm2, %v5104_v40, 0.0 }
 0x10d   :  { %298 = vadd.xlane.f32.xlu0 %v297_v41 }
 0x111   :  { %301 = vadd.xlane.f32.xlu0 %v300_v42 }
 0x196   :  { %v299_v43 = vpop.xlane.xlu0 %298 }
 0x197   :  { %v304_v44 = vmul.f32 0.03125, %v299_v43 }
 0x199   :  { %v306_v45 = vsub.f32 %v5102_v39, %v304_v44 }
 0x19a   :  { %v302_v46 = vpop.xlane.xlu0 %301 }
 0x19b   :  { %v305_v47 = vmul.f32 0.03125, %v302_v46  ;;  %v308_v48 = vmul.f32 %v306_v45, %v306_v45 }
 0x19d   :  { %v307_v49 = vsub.f32 %v5104_v40, %v305_v47  ;;  %v310_v50 = vsel %vm296_vm3, %v308_v48, 0.0 }
 0x19e   :  { %311 = vadd.xlane.f32.xlu1 %v310_v50 }
 0x19f   :  { %v309_v51 = vmul.f32 %v307_v49, %v307_v49 }
 0x1a1   :  { %v313_v52 = vsel %vm236_vm2, %v309_v51, 0.0 }
 0x1a2   :  { %314 = vadd.xlane.f32.xlu1 %v313_v52 }
 0x227   :  { %v312_v56 = vpop.xlane.xlu1 %311 }
 0x228   :  { %v316_v57 = vmul.f32 0.03125, %v312_v56 }
 0x22a   :  { %v318_v58 = vadd.f32 1e-06, %v316_v57 }
 0x22b   :  { %v315_v59 = vpop.xlane.xlu1 %314 }
 0x22c   :  { %4765 = vrsqrt.f32 %v318_v58  ;;  %v317_v60 = vmul.f32 0.03125, %v315_v59 }
 0x22e   :  { %v319_v61 = vadd.f32 1e-06, %v317_v60 }
 0x230   :  { %4767 = vrsqrt.f32 %v319_v61 }
 0x239   :  { %v4766_v62 = vpop.eup %4765 }
 0x23a   :  { %v322_v63 = vmul.f32 %v4766_v62, %v306_v45 }
 0x23c   :  { %v330_v3 = vmul.f32 %v4195_v0, %v322_v63 }
 0x23d   :  { %v4768_v1 = vpop.eup %4767 }
 0x23e   :  { %v323_v2 = vmul.f32 %v4768_v1, %v307_v49  ;;  %v338_v6 = vadd.f32 %v4196_v4, %v330_v3 }
 0x240   :  { %v331_v5 = vmul.f32 %v4195_v0, %v323_v2 }
 0x242   :  { %v339_v7 = vadd.f32 %v4196_v4, %v331_v5 }
 0x244   :  { %v345_v8 = vpack.c.bf16 %v339_v7, %v338_v6 }
 0x246   :  { %4450 = vmatmul.mubr.msk.bf16.vlgmr.msra.gmra.mxu0 %vm296_vm3, %v345_v8 }
 0x247   :  { %4465 = vmatprep.mubr.msk.f32.mxu0 %vm4881_vm4, %v4880_v54 }
 0x306   :  { %v401_v10 = vpop.f32.mrf.mxu0 }
 0x307   :  { %v402_v11 = vadd.f32 %v4197_v9, %v401_v10 }
 0x308   :  { %v4451_v12 = vpop.f32.mrf.mxu0 }
 0x309   :  { %409 = vst.msk [vmem:[#allocation3] sm:$0xff] %vm408_vm5, %v402_v11 }
 0x30a   :  { %v404_v13 = vpop.f32.mrf.mxu0 }
 0x30b   :  { %v405_v14 = vadd.f32 %v4197_v9, %v404_v13 }
 0x30c   :  { %v4452_v15 = vpop.f32.mrf.mxu0 }
 0x30d   :  { %411 = vst.msk [vmem:[#allocation3 + $0x8] sm:$0xf] %vm410_vm6, %v405_v14 }
 0x310   :  { %v5142_v16 = vld [vmem:[#allocation3] sm:$0x3f] }
 0x311   :  { %v5144_v17 = vld [vmem:[#allocation3] sm:$0x3f]  ;;  %592 = vrot.lane.b32.xlu1 %v5142_v16, %s4882_s29  ;;  %v587_v19 = vmul.f32 0.35355338, %v5142_v16 }
 0x312   :  { %v5146_v18 = vld [vmem:[#allocation3] sm:$0x3f]  ;;  %415 = vrot.lane.b32.xlu0 %v5144_v17, %s4883_s3  ;;  %v413_v32 = vmul.f32 0.35355338, %v5144_v17 }
 0x313   :  { %v763_v20 = vmul.f32 0.35355338, %v5146_v18  ;;  %v5154_v21 = vld [vmem:[#allocation3] sm:$0x3f] }
 0x314   :  { %v939_v22 = vmul.f32 0.35355338, %v5154_v21  ;;  %v5162_v23 = vld [vmem:[#allocation3 + $0x6] sm:$0x3f] }
 0x315   :  { %589 = vrot.lane.b32.xlu1 %v587_v19, %s4884_s0  ;;  %v5168_v24 = vld [vmem:[#allocation3 + $0x6] sm:$0x3f]  ;;  %v1284_v26 = vmul.f32 0.35355338, %v5162_v23 }
 0x316   :  { %765 = vrot.lane.b32.xlu0 %v763_v20, %s4885_s4  ;;  %v5170_v25 = vld [vmem:[#allocation3 + $0x6] sm:$0x3f]  ;;  %v1459_v28 = vmul.f32 0.35355338, %v5168_v24 }
 0x317   :  { %v5177_v27 = vld [vmem:[#allocation3 + $0x6] sm:$0x3f]  ;;  %v1115_v42 = vmul.f32 0.35355338, %v5170_v25 }
 0x318   :  { %v1634_v29 = vmul.f32 0.35355338, %v5177_v27 }
 0x319   :  { %768 = vrot.lane.b32.xlu1 %v5146_v18, %s4886_s25 }
 0x31a   :  { %941 = vrot.lane.b32.xlu0 %v939_v22, %s5795_s5 }
 0x31d   :  { %944 = vrot.lane.b32.xlu1 %v5154_v21, %s5793_s1 }
 0x31e   :  { %1289 = vrot.lane.b32.xlu0 %v5162_v23, %s4882_s29 }
 0x321   :  { %1117 = vrot.lane.b32.xlu1 %v5170_v25, %s4883_s3 }
 0x322   :  { %1464 = vrot.lane.b32.xlu0 %v5168_v24, %s4886_s25 }
 0x325   :  { %1286 = vrot.lane.b32.xlu1 %v1284_v26, %s4884_s0 }
 0x326   :  { %1639 = vrot.lane.b32.xlu0 %v5177_v27, %s5793_s1 }
 0x329   :  { %1461 = vrot.lane.b32.xlu1 %v1459_v28, %s4885_s4 }
 0x32d   :  { %1636 = vrot.lane.b32.xlu1 %v1634_v29, %s5795_s5 }
 0x383   :  { %v593_v30 = vpop.permute.xlu1 %592 }
 0x384   :  { %v416_v31 = vpop.permute.xlu0 %415  ;;  %4464 = vmatpush3.xpose.msk.msra.mxu0 %vm417_vm7, %v593_v30 }
 0x385   :  { %4454 = vmatpush3.xpose.msk.msra.mxu1 %vm417_vm7, %v416_v31  ;;  %4473 = vmatprep.subr.mxu0 %v4880_v54 }
 0x386   :  { %4458 = vmatprep.subr.mxu1 %v4880_v54 }
 0x387   :  { %v590_v33 = vpop.permute.xlu1 %589 }
 0x388   :  { %v766_v34 = vpop.permute.xlu0 %765  ;;  %4456 = vmatmul.mubr.msk.f32.vlgmr.msra.gmra.mxu1 %vm417_vm7, %v413_v32  ;;  %4466 = vmatmul.mubr.msk.f32.vlgmr.msra.gmra.mxu0 %vm417_vm7, %v590_v33 }
 0x389   :  { %4460 = vmatprep.mubr.msk.f32.mxu1 %vm4881_vm4, %v4880_v54  ;;  %4475 = vmatprep.mubr.msk.f32.mxu0 %vm4881_vm4, %v4880_v54 }
 0x38b   :  { %v769_v35 = vpop.permute.xlu1 %768 }
 0x38c   :  { %4474 = vmatpush3.xpose.msk.msra.mxu0 %vm417_vm7, %v769_v35  ;;  %v942_v36 = vpop.permute.xlu0 %941 }
 0x38d   :  { %4483 = vmatprep.subr.mxu0 %v4880_v54 }
 0x38f   :  { %v945_v37 = vpop.permute.xlu1 %944  ;;  %4476 = vmatmul.mubr.msk.f32.vlgmr.msra.gmra.mxu0 %vm417_vm7, %v766_v34 }
 0x390   :  { %4484 = vmatpush3.xpose.msk.msra.mxu0 %vm417_vm7, %v945_v37  ;;  %4485 = vmatprep.mubr.msk.f32.mxu0 %vm4881_vm4, %v4880_v54  ;;  %v1290_v38 = vpop.permute.xlu0 %1289 }
 0x391   :  { %4493 = vmatprep.subr.mxu0 %v4880_v54 }
 0x393   :  { %4486 = vmatmul.mubr.msk.f32.vlgmr.msra.gmra.mxu0 %vm417_vm7, %v942_v36  ;;  %v1118_v41 = vpop.permute.xlu1 %1117 }
 0x394   :  { %4494 = vmatpush3.xpose.msk.msra.mxu0 %vm417_vm7, %v1118_v41  ;;  %4495 = vmatprep.mubr.msk.f32.mxu0 %vm4881_vm4, %v4880_v54  ;;  %v1465_v44 = vpop.permute.xlu0 %1464 }
 0x395   :  { %4503 = vmatprep.subr.mxu0 %v4880_v54 }
 0x397   :  { %v1287_v43 = vpop.permute.xlu1 %1286  ;;  %4496 = vmatmul.mubr.msk.f32.vlgmr.msra.gmra.mxu0 %vm417_vm7, %v1115_v42 }
 0x398   :  { %4504 = vmatpush3.xpose.msk.msra.mxu0 %vm417_vm7, %v1290_v38  ;;  %4505 = vmatprep.mubr.msk.f32.mxu0 %vm4881_vm4, %v4880_v54  ;;  %v1640_v46 = vpop.permute.xlu0 %1639 }
 0x399   :  { %4513 = vmatprep.subr.mxu0 %v4880_v54 }
 0x39b   :  { %4506 = vmatmul.mubr.msk.f32.vlgmr.msra.gmra.mxu0 %vm417_vm7, %v1287_v43  ;;  %v1462_v45 = vpop.permute.xlu1 %1461 }
 0x39c   :  { %4514 = vmatpush3.xpose.msk.msra.mxu0 %vm417_vm7, %v1465_v44  ;;  %4515 = vmatprep.mubr.msk.f32.mxu0 %vm4881_vm4, %v4880_v54 }
 0x39d   :  { %4523 = vmatprep.subr.mxu0 %v4880_v54 }
 0x39f   :  { %4516 = vmatmul.mubr.msk.f32.vlgmr.msra.gmra.mxu0 %vm417_vm7, %v1462_v45  ;;  %v1637_v47 = vpop.permute.xlu1 %1636 }
 0x3a0   :  { %4524 = vmatpush3.xpose.msk.msra.mxu0 %vm417_vm7, %v1640_v46  ;;  %4525 = vmatprep.mubr.msk.f32.mxu0 %vm4881_vm4, %v4880_v54 }
 0x3a1   :  { %4533 = vmatprep.subr.bf16.mxu0 %v4880_v54 }
 0x3a3   :  { %4526 = vmatmul.mubr.msk.f32.vlgmr.msra.gmra.mxu0 %vm417_vm7, %v1637_v47 }
 0x3a4   :  { %4537 = vmatprep.mubr.msk.bf16.mxu0 %vm4881_vm4, %v4880_v54 }
 0x448   :  { %v489_v48 = vpop.f32.mrf.mxu1  ;;  %v664_v49 = vpop.f32.mrf.mxu0 }
 0x449   :  { %v494_v50 = vsel %vm493_vm8, %v489_v48, -inf  ;;  %v668_v52 = vsel %vm493_vm8, %v664_v49, -inf }
 0x44a   :  { %v4457_v51 = vpop.f32.mrf.mxu1  ;;  %495 = vmax.xlane.f32.xlu0 %v494_v50  ;;  %669 = vmax.xlane.f32.xlu1 %v668_v52  ;;  %v4467_v53 = vpop.f32.mrf.mxu0 }
 0x44f   :  { %v5230_v55 = vpop.f32.mrf.mxu0 }
 0x450   :  { %v844_v56 = vsel %vm493_vm8, %v5230_v55, -inf }
 0x451   :  { %845 = vmax.xlane.f32.xlu0 %v844_v56  ;;  %v4477_v57 = vpop.f32.mrf.mxu0 }
 0x453   :  { %v1016_v58 = vpop.f32.mrf.mxu0 }
 0x454   :  { %v1020_v59 = vsel %vm493_vm8, %v1016_v58, -inf }
 0x455   :  { %1021 = vmax.xlane.f32.xlu0 %v1020_v59  ;;  %v4487_v60 = vpop.f32.mrf.mxu0 }
 0x457   :  { %v1190_v61 = vpop.f32.mrf.mxu0 }
 0x458   :  { %v1194_v62 = vsel %vm493_vm8, %v1190_v61, -inf }
 0x459   :  { %1195 = vmax.xlane.f32.xlu0 %v1194_v62  ;;  %v4497_v63 = vpop.f32.mrf.mxu0 }
 0x45b   :  { %v1361_v0 = vpop.f32.mrf.mxu0 }
 0x45c   :  { %v1365_v1 = vsel %vm493_vm8, %v1361_v0, -inf }
 0x45d   :  { %1366 = vmax.xlane.f32.xlu1 %v1365_v1  ;;  %v4507_v2 = vpop.f32.mrf.mxu0 }
 0x45f   :  { %v1536_v3 = vpop.f32.mrf.mxu0 }
 0x460   :  { %v1540_v4 = vsel %vm493_vm8, %v1536_v3, -inf }
 0x461   :  { %1541 = vmax.xlane.f32.xlu0 %v1540_v4  ;;  %v4517_v5 = vpop.f32.mrf.mxu0 }
 0x463   :  { %v1711_v6 = vpop.f32.mrf.mxu0 }
 0x464   :  { %v1715_v8 = vsel %vm493_vm8, %v1711_v6, -inf }
 0x465   :  { %v4527_v7 = vpop.f32.mrf.mxu0 }
 0x46e   :  { %505 = vrot.lane.b32.xlu1 %v5144_v17, %s5791_s26 }
 0x492   :  { %1716 = vmax.xlane.f32.xlu1 %v1715_v8 }
 0x4a3   :  { %855 = vrot.lane.b32.xlu1 %v5146_v18, %s5789_s24 }
 0x4a7   :  { %1031 = vrot.lane.b32.xlu1 %v5154_v21, %s5787_s6 }
 0x4ab   :  { %1205 = vrot.lane.b32.xlu1 %v5170_v25, %s5791_s26 }
 0x4d3   :  { %v496_v9 = vpop.xlane.xlu0 %495  ;;  %v670_v11 = vpop.xlane.xlu1 %669 }
 0x4d4   :  { %v497_v10 = vsub.f32 %v489_v48, %v496_v9  ;;  %v671_v12 = vsub.f32 %v664_v49, %v670_v11 }
 0x4d6   :  { %v498_v13 = vmul.f32 1.442695, %v497_v10  ;;  %v672_v14 = vmul.f32 1.442695, %v671_v12 }
 0x4d8   :  { %4769 = vpow2.f32 %v498_v13 }
 0x4d9   :  { %4771 = vpow2.f32 %v672_v14 }
 0x4da   :  { %v846_v15 = vpop.xlane.xlu0 %845 }
 0x4db   :  { %v847_v31 = vsub.f32 %v5230_v55, %v846_v15 }
 0x4dd   :  { %v848_v33 = vmul.f32 1.442695, %v847_v31 }
 0x4de   :  { %v1022_v17 = vpop.xlane.xlu0 %1021 }
 0x4df   :  { %v1023_v19 = vsub.f32 %v1016_v58, %v1022_v17 }
 0x4e1   :  { %v1024_v20 = vmul.f32 1.442695, %v1023_v19 }
 0x4e2   :  { %v1196_v32 = vpop.xlane.xlu0 %1195 }
 0x4e3   :  { %4773 = vpow2.f32 %v1024_v20  ;;  %v1197_v34 = vsub.f32 %v1190_v61, %v1196_v32 }
 0x4e4   :  { %4775 = vpow2.f32 %v848_v33  ;;  %v4743_v33 = vld [vmem:[%s5764_s9 + $0x8] sm:$0xff]  }
 0x4e5   :  { %v4770_v18 = vpop.eup %4769  ;;  %v1198_v36 = vmul.f32 1.442695, %v1197_v34  ;;  %4534 = vmatpush3.bf16.msra.mxu0 %v4743_v33 }
 0x4e6   :  { %v5247_v22 = vpop.eup %4771  ;;  %v500_v21 = vsel %vm493_vm8, %v4770_v18, 0.0  ;;  %v1367_v26 = vpop.xlane.xlu1 %1366  ;;  %4535 = vmatprep.subr.bf16.mxu0 %v4880_v54 }
 0x4e7   :  { %501 = vadd.xlane.f32.xlu0 %v500_v21  ;;  %v674_v25 = vsel %vm493_vm8, %v5247_v22, 0.0  ;;  %4777 = vpow2.f32 %v1198_v36  ;;  %v1368_v38 = vsub.f32 %v1361_v0, %v1367_v26 }
 0x4e8   :  { %675 = vadd.xlane.f32.xlu1 %v674_v25 }
 0x4e9   :  { %v1369_v42 = vmul.f32 1.442695, %v1368_v38 }
 0x4ea   :  { %v506_v28 = vpop.permute.xlu1 %505  ;;  %v1542_v35 = vpop.xlane.xlu0 %1541 }
 0x4eb   :  { %4459 = vmatpush3.msk.msra.mxu1 %vm511_vm9, %v506_v28  ;;  %v1543_v37 = vsub.f32 %v1536_v3, %v1542_v35  ;;  %v4744_v35 = vld [vmem:[%s5764_s9] sm:$0xff]  }
 0x4ec   :  { %4468 = vmatprep.subr.mxu1 %v4880_v54  ;;  %4536 = vmatpush3.bf16.msra.mxu0 %v4744_v35 }
 0x4ed   :  { %v1544_v41 = vmul.f32 1.442695, %v1543_v37  ;;  %4549 = vmatprep.subr.bf16.mxu0 %v4880_v54 }
 0x4ef   :  { %4779 = vpow2.f32 %v1544_v41 }
 0x4f0   :  { %v5254_v29 = vpop.eup %4773  ;;  %4781 = vpow2.f32 %v1369_v42 }
 0x4f1   :  { %v1026_v30 = vsel %vm493_vm8, %v5254_v29, 0.0  ;;  %v4776_v43 = vpop.eup %4775 }
 0x4f2   :  { %1027 = vadd.xlane.f32.xlu1 %v1026_v30 }
 0x4f4   :  { %v5264_v44 = vpop.eup %4777 }
 0x4f5   :  { %v1200_v47 = vsel %vm493_vm8, %v5264_v44, 0.0 }
 0x4fc   :  { %v5268_v48 = vpop.eup %4779 }
 0x4fd   :  { %679 = vrot.lane.b32.xlu0 %v5142_v16, %s5785_s7  ;;  %v850_v16 = vsel %vm493_vm8, %v4776_v43, 0.0  ;;  %v1546_v49 = vsel %vm493_vm8, %v5268_v48, 0.0  ;;  %v4782_v50 = vpop.eup %4781 }
 0x4fe   :  { %v1371_v51 = vsel %vm493_vm8, %v4782_v50, 0.0 }
 0x503   :  { %1376 = vrot.lane.b32.xlu1 %v5162_v23, %s5785_s7  ;;  %s5799_s7 = smov 16  }
 0x51b   :  { %v1717_v45 = vpop.xlane.xlu1 %1716 }
 0x51c   :  { %851 = vadd.xlane.f32.xlu0 %v850_v16  ;;  %v1718_v23 = vsub.f32 %v1711_v6, %v1717_v45 }
 0x51e   :  { %v1719_v46 = vmul.f32 1.442695, %v1718_v23 }
 0x51f   :  { %v856_v55 = vpop.permute.xlu1 %855 }
 0x520   :  { %1201 = vadd.xlane.f32.xlu0 %v1200_v47  ;;  %4783 = vpow2.f32 %v1719_v46 }
 0x523   :  { %v1032_v56 = vpop.permute.xlu1 %1031 }
 0x524   :  { %1547 = vadd.xlane.f32.xlu0 %v1546_v49 }
 0x527   :  { %1372 = vadd.xlane.f32.xlu1 %v1371_v51  ;;  %v1206_v57 = vpop.permute.xlu1 %1205  ;;  %v4233_v51 = vld [vmem:[%s5765_s10] ss:$0 sm:$0xff] }
 0x52d   :  { %v5273_v52 = vpop.eup %4783 }
 0x52e   :  { %v1721_v53 = vsel %vm493_vm8, %v5273_v52, 0.0 }
 0x52f   :  { %1722 = vadd.xlane.f32.xlu0 %v1721_v53 }
 0x538   :  { %1726 = vrot.lane.b32.xlu1 %v5177_v27, %s5787_s6  ;;  %s5797_s6 = smov 24  }
 0x545   :  { %1551 = vrot.lane.b32.xlu0 %v5168_v24, %s5789_s24 }
 0x570   :  { %v502_v58 = vpop.xlane.xlu0 %501 }
 0x571   :  { %4785 = vrcp.f32 %v502_v58  ;;  %v676_v59 = vpop.xlane.xlu1 %675 }
 0x572   :  { %4787 = vrcp.f32 %v676_v59 }
 0x574   :  { %v680_v63 = vpop.permute.xlu0 %679 }
 0x57b   :  { %v1028_v27 = vpop.xlane.xlu1 %1027 }
 0x57e   :  { %v4786_v60 = vpop.eup %4785 }
 0x57f   :  { %v504_v61 = vmul.f32 %v4786_v60, %v4770_v18  ;;  %v4788_v62 = vpop.eup %4787  ;;  %v1377_v2 = vpop.permute.xlu1 %1376 }
 0x580   :  { %v678_v24 = vmul.f32 %v4788_v62, %v5247_v22 }
 0x581   :  { %4461 = vmatmul.mubr.msk.f32.vlgmr.msra.gmra.mxu1 %vm507_vm10, %v504_v61 }
 0x582   :  { %4469 = vmatpush3.msk.msra.mxu1 %vm511_vm9, %v680_v63  ;;  %4470 = vmatprep.mubr.msk.f32.mxu1 %vm4881_vm4, %v4880_v54 }
 0x583   :  { %4478 = vmatprep.subr.mxu1 %v4880_v54 }
 0x585   :  { %4471 = vmatmul.mubr.msk.f32.vlgmr.msra.gmra.mxu1 %vm507_vm10, %v678_v24 }
 0x586   :  { %4479 = vmatpush3.msk.msra.mxu1 %vm511_vm9, %v856_v55  ;;  %4480 = vmatprep.mubr.msk.f32.mxu1 %vm4881_vm4, %v4880_v54 }
 0x587   :  { %4488 = vmatprep.subr.mxu1 %v4880_v54 }
 0x5a5   :  { %v852_v0 = vpop.xlane.xlu0 %851 }
 0x5a6   :  { %4789 = vrcp.f32 %v852_v0 }
 0x5a7   :  { %4791 = vrcp.f32 %v1028_v27 }
 0x5a9   :  { %v1202_v1 = vpop.xlane.xlu0 %1201 }
 0x5aa   :  { %4793 = vrcp.f32 %v1202_v1 }
 0x5ad   :  { %v1548_v3 = vpop.xlane.xlu0 %1547 }
 0x5b0   :  { %v1373_v4 = vpop.xlane.xlu1 %1372 }
 0x5b1   :  { %4795 = vrcp.f32 %v1373_v4 }
 0x5b2   :  { %4797 = vrcp.f32 %v1548_v3 }
 0x5b3   :  { %v4790_v5 = vpop.eup %4789 }
 0x5b4   :  { %v854_v6 = vmul.f32 %v4790_v5, %v4776_v43  ;;  %v4792_v7 = vpop.eup %4791  ;;  %v1727_v19 = vpop.permute.xlu1 %1726  ;;  %v4745_v5 = vld [vmem:[%s5768_s13 + $0x8] sm:$0xff]  }
 0x5b5   :  { %v1030_v8 = vmul.f32 %v4792_v7, %v5254_v29 }
 0x5b6   :  { %4481 = vmatmul.mubr.msk.f32.vlgmr.msra.gmra.mxu1 %vm507_vm10, %v854_v6  ;;  %v4746_v6 = vld [vmem:[%s5768_s13] sm:$0xff]  }
 0x5b7   :  { %4489 = vmatpush3.msk.msra.mxu1 %vm511_vm9, %v1032_v56  ;;  %4490 = vmatprep.mubr.msk.f32.mxu1 %vm4881_vm4, %v4880_v54  ;;  %v4794_v9 = vpop.eup %4793 }
 0x5b8   :  { %4498 = vmatprep.subr.mxu1 %v4880_v54  ;;  %v1723_v10 = vpop.xlane.xlu0 %1722  ;;  %v1204_v11 = vmul.f32 %v4794_v9, %v5264_v44 }
 0x5b9   :  { %4799 = vrcp.f32 %v1723_v10 }
 0x5ba   :  { %4491 = vmatmul.mubr.msk.f32.vlgmr.msra.gmra.mxu1 %vm507_vm10, %v1030_v8 }
 0x5bb   :  { %4499 = vmatpush3.msk.msra.mxu1 %vm511_vm9, %v1206_v57  ;;  %4500 = vmatprep.mubr.msk.f32.mxu1 %vm4881_vm4, %v4880_v54 }
 0x5bc   :  { %4508 = vmatprep.subr.mxu1 %v4880_v54  ;;  %v1552_v15 = vpop.permute.xlu0 %1551 }
 0x5be   :  { %4501 = vmatmul.mubr.msk.f32.vlgmr.msra.gmra.mxu1 %vm507_vm10, %v1204_v11  ;;  %v4796_v12 = vpop.eup %4795 }
 0x5bf   :  { %4509 = vmatpush3.msk.msra.mxu1 %vm511_vm9, %v1377_v2  ;;  %4510 = vmatprep.mubr.msk.f32.mxu1 %vm4881_vm4, %v4880_v54  ;;  %v1375_v13 = vmul.f32 %v4796_v12, %v4782_v50  ;;  %v4798_v14 = vpop.eup %4797 }
 0x5c0   :  { %4518 = vmatprep.subr.mxu1 %v4880_v54  ;;  %v1550_v17 = vmul.f32 %v4798_v14, %v5268_v48 }
 0x5c2   :  { %4511 = vmatmul.mubr.msk.f32.vlgmr.msra.gmra.mxu1 %vm507_vm10, %v1375_v13 }
 0x5c3   :  { %4519 = vmatpush3.msk.msra.mxu1 %vm511_vm9, %v1552_v15  ;;  %4520 = vmatprep.mubr.msk.f32.mxu1 %vm4881_vm4, %v4880_v54  ;;  %v4237_v15 = vld [vmem:[%s5766_s11] ss:$0 sm:$0xff] }
 0x5c4   :  { %4528 = vmatprep.subr.mxu1 %v4880_v54 }
 0x5c6   :  { %4521 = vmatmul.mubr.msk.f32.vlgmr.msra.gmra.mxu1 %vm507_vm10, %v1550_v17  ;;  %v4800_v20 = vpop.eup %4799 }
 0x5c7   :  { %4529 = vmatpush3.msk.msra.mxu1 %vm511_vm9, %v1727_v19  ;;  %4530 = vmatprep.mubr.msk.f32.mxu1 %vm4881_vm4, %v4880_v54  ;;  %v1725_v18 = vmul.f32 %v4800_v20, %v5273_v52 }
 0x5c8   :  { %4541 = vmatprep.subr.bf16.mxu1 %v4880_v54 }
 0x5ca   :  { %4531 = vmatmul.mubr.msk.f32.vlgmr.msra.gmra.mxu1 %vm507_vm10, %v1725_v18  ;;  %v4238_v18 = vld [vmem:[%s5767_s12] ss:$0 sm:$0xff] }
 0x5cb   :  { %4545 = vmatprep.mubr.msk.bf16.mxu1 %vm4881_vm4, %v4880_v54  ;;  %4542 = vmatpush3.bf16.msra.mxu1 %v4745_v5 }
 0x5cc   :  { %4543 = vmatprep.subr.bf16.mxu1 %v4880_v54 }
 0x5cf   :  { %4544 = vmatpush3.bf16.msra.mxu1 %v4746_v6 }
 0x5d0   :  { %4561 = vmatprep.subr.bf16.mxu1 %v4880_v54 }
 0x641   :  { %v580_v22 = vpop.f32.mrf.mxu1 }
 0x642   :  { %585 = vst.msk [vmem:[#allocation4] sm:$0x3f] %vm584_vm11, %v580_v22 }
 0x643   :  { %v4462_v21 = vpop.f32.mrf.mxu1 }
 0x645   :  { %v752_v26 = vpop.f32.mrf.mxu1 }
 0x646   :  { %757 = vrot.lane.b32.xlu0 %v752_v26, %s5801_s28 }
 0x647   :  { %v4472_v25 = vpop.f32.mrf.mxu1 }
 0x676   :  { %v928_v28 = vpop.f32.mrf.mxu1 }
 0x677   :  { %933 = vrot.lane.b32.xlu0 %v928_v28, %s5799_s7  ;;  %v4747_v28 = vld [vmem:[%s5770_s15 + $0x18] sm:$0xff]  }
 0x678   :  { %v4482_v29 = vpop.f32.mrf.mxu1 }
 0x679   :  { %v4748_v29 = vld [vmem:[%s5770_s15 + $0x10] sm:$0xff]  }
 0x67a   :  { %v1104_v30 = vpop.f32.mrf.mxu1 }
 0x67b   :  { %1109 = vrot.lane.b32.xlu0 %v1104_v30, %s5797_s6  ;;  %v4749_v30 = vld [vmem:[%s5770_s15 + $0x8] sm:$0xff]  }
 0x67c   :  { %v4492_v31 = vpop.f32.mrf.mxu1 }
 0x67d   :  { %v4750_v31 = vld [vmem:[%s5770_s15] sm:$0xff]  }
 0x67e   :  { %v1278_v32 = vpop.f32.mrf.mxu1 }
 0x67f   :  { %1282 = vst.msk [vmem:[#allocation4 + $0x6] sm:$0x3f] %vm584_vm11, %v1278_v32  ;;  %v4239_v32 = vld [vmem:[%s5769_s14] ss:$0 sm:$0xff] }
 0x680   :  { %v4502_v34 = vpop.f32.mrf.mxu1 }
 0x682   :  { %v1449_v36 = vpop.f32.mrf.mxu1 }
 0x683   :  { %1454 = vrot.lane.b32.xlu1 %v1449_v36, %s5801_s28 }
 0x684   :  { %v4512_v37 = vpop.f32.mrf.mxu1 }
 0x686   :  { %v1624_v38 = vpop.f32.mrf.mxu1 }
 0x687   :  { %1629 = vrot.lane.b32.xlu1 %v1624_v38, %s5799_s7 }
 0x688   :  { %v4522_v41 = vpop.f32.mrf.mxu1 }
 0x68a   :  { %v1799_v42 = vpop.f32.mrf.mxu1 }
 0x68b   :  { %1804 = vrot.lane.b32.xlu1 %v1799_v42, %s5797_s6  ;;  %s5827_s6 = smov 24  }
 0x68c   :  { %v4532_v43 = vpop.f32.mrf.mxu1 }
 0x6b8   :  { %v758_v16 = vpop.permute.xlu0 %757 }
 0x6b9   :  { %761 = vst.msk [vmem:[#allocation4] sm:$0x3f] %vm760_vm12, %v758_v16 }
 0x6e9   :  { %v934_v44 = vpop.permute.xlu0 %933 }
 0x6ea   :  { %937 = vst.msk [vmem:[#allocation4] sm:$0x3f] %vm936_vm13, %v934_v44 }
 0x6ed   :  { %v1110_v45 = vpop.permute.xlu0 %1109 }
 0x6ee   :  { %1113 = vst.msk [vmem:[#allocation4] sm:$0x3f] %vm1112_vm14, %v1110_v45 }
 0x6f5   :  { %v1455_v23 = vpop.permute.xlu1 %1454 }
 0x6f6   :  { %1457 = vst.msk [vmem:[#allocation4 + $0x6] sm:$0x3f] %vm760_vm12, %v1455_v23 }
 0x6f9   :  { %v1630_v46 = vpop.permute.xlu1 %1629 }
 0x6fa   :  { %1632 = vst.msk [vmem:[#allocation4 + $0x6] sm:$0x3f] %vm936_vm13, %v1630_v46 }
 0x6fd   :  { %v1805_v47 = vpop.permute.xlu1 %1804 }
 0x6fe   :  { %1807 = vst.msk [vmem:[#allocation4 + $0x6] sm:$0x3f] %vm1112_vm14, %v1805_v47 }
 0x705   :  { %v1808_v48 = vld [vmem:[#allocation4] sm:$0xff]  ;;  %v1809_v49 = vld [vmem:[#allocation4 + $0x8] sm:$0xf] }
 0x706   :  { %v1815_v50 = vpack.c.bf16 %v1809_v49, %v1808_v48 }
 0x708   :  { %4538 = vmatmul.mubr.msk.bf16.vlgmr.msra.gmra.mxu0 %vm296_vm3, %v1815_v50 }
 0x709   :  { %4557 = vmatprep.mubr.msk.bf16.mxu0 %vm4881_vm4, %v4880_v54  ;;  %4550 = vmatpush3.bf16.msra.mxu0 %v4747_v28 }
 0x70a   :  { %4551 = vmatprep.subr.bf16.mxu0 %v4880_v54 }
 0x70d   :  { %4552 = vmatpush3.bf16.msra.mxu0 %v4748_v29 }
 0x70e   :  { %4553 = vmatprep.subr.bf16.mxu0 %v4880_v54 }
 0x711   :  { %4554 = vmatpush3.bf16.msra.mxu0 %v4749_v30  ;;  %v4252_v30 = vld [vmem:[%s5818_s27 + $0x1] ss:$0 sm:$0xff]  ;;  %s5821_s27 = smov 64  }
 0x712   :  { %4555 = vmatprep.subr.bf16.mxu0 %v4880_v54 }
 0x715   :  { %4556 = vmatpush3.bf16.msra.mxu0 %v4750_v31 }
 0x716   :  { %4579 = vmatprep.subr.mxu0 %v4880_v54 }
 0x7c8   :  { %v1871_v52 = vpop.f32.mrf.mxu0 }
 0x7c9   :  { %v1872_v53 = vadd.f32 %v4233_v51, %v1871_v52 }
 0x7ca   :  { %v4539_v55 = vpop.f32.mrf.mxu0 }
 0x7cb   :  { %v5353_v56 = vadd.f32 %v1872_v53, %v5102_v39 }
 0x7cc   :  { %v1874_v57 = vpop.f32.mrf.mxu0 }
 0x7cd   :  { %v1875_v58 = vadd.f32 %v4233_v51, %v1874_v57  ;;  %v1882_v59 = vsel %vm296_vm3, %v5353_v56, 0.0 }
 0x7ce   :  { %1883 = vadd.xlane.f32.xlu0 %v1882_v59  ;;  %v4540_v60 = vpop.f32.mrf.mxu0 }
 0x7cf   :  { %v5358_v61 = vadd.f32 %v1875_v58, %v5104_v40  ;;  %v4243_v60 = vld [vmem:[%s5771_s16] ss:$0 sm:$0xff] }
 0x7d1   :  { %v1885_v62 = vsel %vm236_vm2, %v5358_v61, 0.0 }
 0x7d2   :  { %1886 = vadd.xlane.f32.xlu1 %v1885_v62 }
 0x857   :  { %v1884_v63 = vpop.xlane.xlu0 %1883 }
 0x858   :  { %v1888_v24 = vmul.f32 0.03125, %v1884_v63 }
 0x85a   :  { %v1890_v27 = vsub.f32 %v5353_v56, %v1888_v24 }
 0x85b   :  { %v1887_v39 = vpop.xlane.xlu1 %1886 }
 0x85c   :  { %v1889_v0 = vmul.f32 0.03125, %v1887_v39  ;;  %v1892_v1 = vmul.f32 %v1890_v27, %v1890_v27 }
 0x85e   :  { %v1891_v2 = vsub.f32 %v5358_v61, %v1889_v0  ;;  %v1894_v3 = vsel %vm296_vm3, %v1892_v1, 0.0 }
 0x85f   :  { %1895 = vadd.xlane.f32.xlu0 %v1894_v3 }
 0x860   :  { %v1893_v4 = vmul.f32 %v1891_v2, %v1891_v2 }
 0x862   :  { %v1897_v40 = vsel %vm236_vm2, %v1893_v4, 0.0 }
 0x863   :  { %1898 = vadd.xlane.f32.xlu0 %v1897_v40 }
 0x8e8   :  { %v1896_v7 = vpop.xlane.xlu0 %1895 }
 0x8e9   :  { %v1900_v8 = vmul.f32 0.03125, %v1896_v7 }
 0x8eb   :  { %v1902_v9 = vadd.f32 1e-06, %v1900_v8 }
 0x8ec   :  { %v1899_v10 = vpop.xlane.xlu0 %1898 }
 0x8ed   :  { %4801 = vrsqrt.f32 %v1902_v9  ;;  %v1901_v11 = vmul.f32 0.03125, %v1899_v10 }
 0x8ef   :  { %v1903_v12 = vadd.f32 1e-06, %v1901_v11 }
 0x8f1   :  { %4803 = vrsqrt.f32 %v1903_v12  ;;  %v4751_v12 = vld [vmem:[%s5816_s30 + $0x18] sm:$0xff]  }
 0x8fa   :  { %v4802_v13 = vpop.eup %4801 }
 0x8fb   :  { %v1906_v14 = vmul.f32 %v4802_v13, %v1890_v27  ;;  %v4752_v13 = vld [vmem:[%s5816_s30 + $0x10] sm:$0xff]  }
 0x8fd   :  { %v1914_v20 = vmul.f32 %v4237_v15, %v1906_v14 }
 0x8fe   :  { %v4804_v17 = vpop.eup %4803 }
 0x8ff   :  { %v1907_v19 = vmul.f32 %v4804_v17, %v1891_v2  ;;  %v1922_v21 = vadd.f32 %v4238_v18, %v1914_v20 }
 0x901   :  { %v1915_v22 = vmul.f32 %v4237_v15, %v1907_v19 }
 0x903   :  { %v1923_v26 = vadd.f32 %v4238_v18, %v1915_v22 }
 0x905   :  { %v1929_v25 = vpack.c.bf16 %v1923_v26, %v1922_v21  ;;  %v4251_v26 = vld [vmem:[%s5817_s2 + $0x1] ss:$0 sm:$0xff]  ;;  %s5820_s2 = smov 72  }
 0x907   :  { %4546 = vmatmul.mubr.msk.bf16.vlgmr.msra.gmra.mxu1 %vm296_vm3, %v1929_v25 }
 0x908   :  { %4565 = vmatprep.mubr.msk.bf16.mxu1 %vm4881_vm4, %v4880_v54  ;;  %4562 = vmatpush3.bf16.msra.mxu1 %v4751_v12 }
 0x909   :  { %4563 = vmatprep.subr.bf16.mxu1 %v4880_v54 }
 0x90c   :  { %4564 = vmatpush3.bf16.msra.mxu1 %v4752_v13 }
 0x90d   :  { %4569 = vmatprep.subr.mxu1 %v4880_v54 }
 0x9c7   :  { %v1985_v33 = vpop.f32.mrf.mxu1 }
 0x9c8   :  { %v1986_v34 = vadd.f32 %v4239_v32, %v1985_v33 }
 0x9c9   :  { %v4547_v35 = vpop.f32.mrf.mxu1 }
 0x9ca   :  { %v1992_v36 = vmul.f32 %v1986_v34, %v1986_v34  ;;  %v4258_v35 = vld [vmem:[%s5763_s8 + $0x1] ss:$0 sm:$0xff]  ;;  %s5819_s8 = smov 104  }
 0x9cb   :  { %v1988_v37 = vpop.f32.mrf.mxu1 }
 0x9cc   :  { %v1994_v38 = vmul.f32 %v1992_v36, %v1986_v34  ;;  %v1989_v41 = vadd.f32 %v4239_v32, %v1988_v37 }
 0x9cd   :  { %v4548_v42 = vpop.f32.mrf.mxu1 }
 0x9ce   :  { %v1996_v43 = vmul.f32 0.044715, %v1994_v38  ;;  %v1993_v16 = vmul.f32 %v1989_v41, %v1989_v41 }
 0x9d0   :  { %v1998_v44 = vadd.f32 %v1996_v43, %v1986_v34  ;;  %v1995_v45 = vmul.f32 %v1993_v16, %v1989_v41 }
 0x9d2   :  { %v2000_v23 = vmul.f32 0.7978846, %v1998_v44  ;;  %v1997_v46 = vmul.f32 0.044715, %v1995_v45 }
 0x9d4   :  { %4805 = vtanh.f32 %v2000_v23  ;;  %v1999_v47 = vadd.f32 %v1997_v46, %v1989_v41 }
 0x9d6   :  { %v2001_v48 = vmul.f32 0.7978846, %v1999_v47 }
 0x9d8   :  { %4807 = vtanh.f32 %v2001_v48 }
 0x9e1   :  { %v4806_v49 = vpop.eup %4805 }
 0x9e2   :  { %v2004_v50 = vadd.f32 1.0, %v4806_v49 }
 0x9e4   :  { %v2006_v52 = vmul.f32 0.5, %v2004_v50 }
 0x9e5   :  { %v4808_v51 = vpop.eup %4807 }
 0x9e6   :  { %v2005_v53 = vadd.f32 1.0, %v4808_v51  ;;  %v2008_v57 = vmul.f32 %v2006_v52, %v1986_v34 }
 0x9e8   :  { %v2007_v55 = vmul.f32 0.5, %v2005_v53 }
 0x9ea   :  { %v2009_v58 = vmul.f32 %v2007_v55, %v1989_v41 }
 0x9ec   :  { %v2019_v59 = vpack.c.bf16 %v2009_v58, %v2008_v57 }
 0x9ee   :  { %4558 = vmatmul.mubr.msk.bf16.vlgmr.msra.gmra.mxu0 %vm188_vm0, %v2019_v59 }
 0x9ef   :  { %4581 = vmatprep.mubr.msk.f32.mxu0 %vm4881_vm4, %v4880_v54 }
 0xaae   :  { %v2087_v62 = vpop.f32.mrf.mxu0 }
 0xaaf   :  { %v2088_v63 = vadd.f32 %v4243_v60, %v2087_v62 }
 0xab0   :  { %v4559_v24 = vpop.f32.mrf.mxu0 }
 0xab1   :  { %v5409_v27 = vadd.f32 %v2088_v63, %v5353_v56 }
 0xab2   :  { %v2090_v39 = vpop.f32.mrf.mxu0 }
 0xab3   :  { %v2091_v0 = vadd.f32 %v4243_v60, %v2090_v39  ;;  %v2100_v1 = vsel %vm296_vm3, %v5409_v27, 0.0 }
 0xab4   :  { %2101 = vadd.xlane.f32.xlu0 %v2100_v1  ;;  %v4560_v2 = vpop.f32.mrf.mxu0 }
 0xab5   :  { %v5414_v3 = vadd.f32 %v2091_v0, %v5358_v61 }
 0xab7   :  { %v2103_v4 = vsel %vm236_vm2, %v5414_v3, 0.0 }
 0xab8   :  { %2104 = vadd.xlane.f32.xlu1 %v2103_v4 }
 0xb3d   :  { %v2102_v40 = vpop.xlane.xlu0 %2101 }
 0xb3e   :  { %v2106_v5 = vmul.f32 0.03125, %v2102_v40 }
 0xb40   :  { %v2108_v6 = vsub.f32 %v5409_v27, %v2106_v5 }
 0xb41   :  { %v2105_v56 = vpop.xlane.xlu1 %2104 }
 0xb42   :  { %v2107_v7 = vmul.f32 0.03125, %v2105_v56  ;;  %v2110_v8 = vmul.f32 %v2108_v6, %v2108_v6 }
 0xb44   :  { %v2109_v9 = vsub.f32 %v5414_v3, %v2107_v7  ;;  %v2112_v10 = vsel %vm296_vm3, %v2110_v8, 0.0 }
 0xb45   :  { %2113 = vadd.xlane.f32.xlu0 %v2112_v10 }
 0xb46   :  { %v2111_v11 = vmul.f32 %v2109_v9, %v2109_v9 }
 0xb48   :  { %v2115_v61 = vsel %vm236_vm2, %v2111_v11, 0.0 }
 0xb49   :  { %2116 = vadd.xlane.f32.xlu1 %v2115_v61 }
 0xbce   :  { %v2114_v14 = vpop.xlane.xlu0 %2113 }
 0xbcf   :  { %v2118_v15 = vmul.f32 0.03125, %v2114_v14 }
 0xbd1   :  { %v2120_v17 = vadd.f32 1e-06, %v2118_v15 }
 0xbd2   :  { %v2117_v19 = vpop.xlane.xlu1 %2116 }
 0xbd3   :  { %4809 = vrsqrt.f32 %v2120_v17  ;;  %v2119_v20 = vmul.f32 0.03125, %v2117_v19 }
 0xbd5   :  { %v2121_v18 = vadd.f32 1e-06, %v2119_v20 }
 0xbd7   :  { %4811 = vrsqrt.f32 %v2121_v18 }
 0xbe0   :  { %v4810_v22 = vpop.eup %4809 }
 0xbe1   :  { %v2124_v21 = vmul.f32 %v4810_v22, %v2108_v6 }
 0xbe3   :  { %v2132_v29 = vmul.f32 %v4251_v26, %v2124_v21 }
 0xbe4   :  { %v4812_v25 = vpop.eup %4811 }
 0xbe5   :  { %v2125_v28 = vmul.f32 %v4812_v25, %v2109_v9  ;;  %v2140_v32 = vadd.f32 %v4252_v30, %v2132_v29 }
 0xbe7   :  { %v2133_v31 = vmul.f32 %v4251_v26, %v2125_v28 }
 0xbe9   :  { %v2141_v33 = vadd.f32 %v4252_v30, %v2133_v31 }
 0xbeb   :  { %v2149_v34 = vpack.c.bf16 %v2141_v33, %v2140_v32 }
 0xbed   :  { %4566 = vmatmul.mubr.msk.bf16.vlgmr.msra.gmra.mxu1 %vm296_vm3, %v2149_v34 }
 0xbee   :  { %4571 = vmatprep.mubr.msk.f32.mxu1 %vm4881_vm4, %v4880_v54 }
 0xcad   :  { %v2205_v36 = vpop.f32.mrf.mxu1 }
 0xcae   :  { %v2206_v37 = vadd.f32 %v4258_v35, %v2205_v36 }
 0xcaf   :  { %v4567_v38 = vpop.f32.mrf.mxu1 }
 0xcb0   :  { %2212 = vst.msk [vmem:[#allocation3] sm:$0xff] %vm408_vm5, %v2206_v37 }
 0xcb1   :  { %v2208_v41 = vpop.f32.mrf.mxu1 }
 0xcb2   :  { %v2209_v42 = vadd.f32 %v4258_v35, %v2208_v41 }
 0xcb3   :  { %v4568_v43 = vpop.f32.mrf.mxu1 }
 0xcb4   :  { %2213 = vst.msk [vmem:[#allocation3 + $0x8] sm:$0xf] %vm410_vm6, %v2209_v42 }
 0xcb7   :  { %v5444_v16 = vld [vmem:[#allocation3] sm:$0x3f] }
 0xcb8   :  { %v5446_v44 = vld [vmem:[#allocation3] sm:$0x3f]  ;;  %2389 = vrot.lane.b32.xlu1 %v5444_v16, %s4882_s29  ;;  %v2384_v23 = vmul.f32 0.35355338, %v5444_v16 }
 0xcb9   :  { %v5448_v45 = vld [vmem:[#allocation3] sm:$0x3f]  ;;  %2217 = vrot.lane.b32.xlu0 %v5446_v44, %s4883_s3  ;;  %v2215_v60 = vmul.f32 0.35355338, %v5446_v44 }
 0xcba   :  { %v2559_v46 = vmul.f32 0.35355338, %v5448_v45  ;;  %v5456_v47 = vld [vmem:[#allocation3] sm:$0x3f] }
 0xcbb   :  { %v2734_v48 = vmul.f32 0.35355338, %v5456_v47  ;;  %v5464_v49 = vld [vmem:[#allocation3 + $0x6] sm:$0x3f] }
 0xcbc   :  { %2386 = vrot.lane.b32.xlu1 %v2384_v23, %s4884_s0  ;;  %v5470_v50 = vld [vmem:[#allocation3 + $0x6] sm:$0x3f]  ;;  %v3078_v52 = vmul.f32 0.35355338, %v5464_v49 }
 0xcbd   :  { %2561 = vrot.lane.b32.xlu0 %v2559_v46, %s4885_s4  ;;  %v5472_v51 = vld [vmem:[#allocation3 + $0x6] sm:$0x3f]  ;;  %v3253_v55 = vmul.f32 0.35355338, %v5470_v50 }
 0xcbe   :  { %v5479_v53 = vld [vmem:[#allocation3 + $0x6] sm:$0x3f]  ;;  %v2909_v4 = vmul.f32 0.35355338, %v5472_v51 }
 0xcbf   :  { %v3428_v57 = vmul.f32 0.35355338, %v5479_v53 }
 0xcc0   :  { %2564 = vrot.lane.b32.xlu1 %v5448_v45, %s4886_s25 }
 0xcc1   :  { %2736 = vrot.lane.b32.xlu0 %v2734_v48, %s5819_s8 }
 0xcc4   :  { %2739 = vrot.lane.b32.xlu1 %v5456_v47, %s5820_s2 }
 0xcc5   :  { %3083 = vrot.lane.b32.xlu0 %v5464_v49, %s4882_s29  ;;  %s5822_s29 = smov 48  }
 0xcc8   :  { %2911 = vrot.lane.b32.xlu1 %v5472_v51, %s4883_s3  ;;  %s5823_s3 = smov 40  }
 0xcc9   :  { %3258 = vrot.lane.b32.xlu0 %v5470_v50, %s4886_s25  ;;  %s5826_s25 = smov 16  }
 0xccc   :  { %3080 = vrot.lane.b32.xlu1 %v3078_v52, %s4884_s0  ;;  %s5824_s0 = smov 56  }
 0xccd   :  { %3433 = vrot.lane.b32.xlu0 %v5479_v53, %s5820_s2 }
 0xcd0   :  { %3255 = vrot.lane.b32.xlu1 %v3253_v55, %s4885_s4  ;;  %s5825_s4 = smov 8  }
 0xcd4   :  { %3430 = vrot.lane.b32.xlu1 %v3428_v57, %s5819_s8 }
 0xd2a   :  { %v2390_v58 = vpop.permute.xlu1 %2389 }
 0xd2b   :  { %v2218_v59 = vpop.permute.xlu0 %2217  ;;  %4580 = vmatpush3.xpose.msk.msra.mxu0 %vm417_vm7, %v2390_v58 }
 0xd2c   :  { %4570 = vmatpush3.xpose.msk.msra.mxu1 %vm417_vm7, %v2218_v59  ;;  %4589 = vmatprep.subr.mxu0 %v4880_v54 }
 0xd2d   :  { %4574 = vmatprep.subr.mxu1 %v4880_v54 }
 0xd2e   :  { %v2387_v62 = vpop.permute.xlu1 %2386 }
 0xd2f   :  { %v2562_v63 = vpop.permute.xlu0 %2561  ;;  %4572 = vmatmul.mubr.msk.f32.vlgmr.msra.gmra.mxu1 %vm417_vm7, %v2215_v60  ;;  %4582 = vmatmul.mubr.msk.f32.vlgmr.msra.gmra.mxu0 %vm417_vm7, %v2387_v62 }
 0xd30   :  { %4576 = vmatprep.mubr.msk.f32.mxu1 %vm4881_vm4, %v4880_v54  ;;  %4591 = vmatprep.mubr.msk.f32.mxu0 %vm4881_vm4, %v4880_v54 }
 0xd32   :  { %v2565_v24 = vpop.permute.xlu1 %2564 }
 0xd33   :  { %4590 = vmatpush3.xpose.msk.msra.mxu0 %vm417_vm7, %v2565_v24  ;;  %v2737_v39 = vpop.permute.xlu0 %2736 }
 0xd34   :  { %4599 = vmatprep.subr.mxu0 %v4880_v54 }
 0xd36   :  { %v2740_v0 = vpop.permute.xlu1 %2739  ;;  %4592 = vmatmul.mubr.msk.f32.vlgmr.msra.gmra.mxu0 %vm417_vm7, %v2562_v63 }
 0xd37   :  { %4600 = vmatpush3.xpose.msk.msra.mxu0 %vm417_vm7, %v2740_v0  ;;  %4601 = vmatprep.mubr.msk.f32.mxu0 %vm4881_vm4, %v4880_v54  ;;  %v3084_v1 = vpop.permute.xlu0 %3083 }
 0xd38   :  { %4609 = vmatprep.subr.mxu0 %v4880_v54 }
 0xd3a   :  { %4602 = vmatmul.mubr.msk.f32.vlgmr.msra.gmra.mxu0 %vm417_vm7, %v2737_v39  ;;  %v2912_v2 = vpop.permute.xlu1 %2911 }
 0xd3b   :  { %4610 = vmatpush3.xpose.msk.msra.mxu0 %vm417_vm7, %v2912_v2  ;;  %4611 = vmatprep.mubr.msk.f32.mxu0 %vm4881_vm4, %v4880_v54  ;;  %v3259_v5 = vpop.permute.xlu0 %3258 }
 0xd3c   :  { %4619 = vmatprep.subr.mxu0 %v4880_v54 }
 0xd3e   :  { %v3081_v40 = vpop.permute.xlu1 %3080  ;;  %4612 = vmatmul.mubr.msk.f32.vlgmr.msra.gmra.mxu0 %vm417_vm7, %v2909_v4 }
 0xd3f   :  { %4620 = vmatpush3.xpose.msk.msra.mxu0 %vm417_vm7, %v3084_v1  ;;  %4621 = vmatprep.mubr.msk.f32.mxu0 %vm4881_vm4, %v4880_v54  ;;  %v3434_v56 = vpop.permute.xlu0 %3433 }
 0xd40   :  { %4629 = vmatprep.subr.mxu0 %v4880_v54 }
 0xd42   :  { %4622 = vmatmul.mubr.msk.f32.vlgmr.msra.gmra.mxu0 %vm417_vm7, %v3081_v40  ;;  %v3256_v6 = vpop.permute.xlu1 %3255 }
 0xd43   :  { %4630 = vmatpush3.xpose.msk.msra.mxu0 %vm417_vm7, %v3259_v5  ;;  %4631 = vmatprep.mubr.msk.f32.mxu0 %vm4881_vm4, %v4880_v54 }
 0xd44   :  { %4639 = vmatprep.subr.mxu0 %v4880_v54 }
 0xd46   :  { %4632 = vmatmul.mubr.msk.f32.vlgmr.msra.gmra.mxu0 %vm417_vm7, %v3256_v6  ;;  %v3431_v7 = vpop.permute.xlu1 %3430 }
 0xd47   :  { %4640 = vmatpush3.xpose.msk.msra.mxu0 %vm417_vm7, %v3434_v56  ;;  %4641 = vmatprep.mubr.msk.f32.mxu0 %vm4881_vm4, %v4880_v54 }
 0xd48   :  { %4649 = vmatprep.subr.bf16.mxu0 %v4880_v54 }
 0xd4a   :  { %4642 = vmatmul.mubr.msk.f32.vlgmr.msra.gmra.mxu0 %vm417_vm7, %v3431_v7 }
 0xd4b   :  { %4653 = vmatprep.mubr.msk.bf16.mxu0 %vm4881_vm4, %v4880_v54 }
 0xdef   :  { %v2290_v8 = vpop.f32.mrf.mxu1  ;;  %v2461_v9 = vpop.f32.mrf.mxu0 }
 0xdf0   :  { %v2294_v10 = vsel %vm493_vm8, %v2290_v8, -inf  ;;  %v2465_v61 = vsel %vm493_vm8, %v2461_v9, -inf }
 0xdf1   :  { %2295 = vmax.xlane.f32.xlu0 %v2294_v10  ;;  %v4573_v11 = vpop.f32.mrf.mxu1  ;;  %2466 = vmax.xlane.f32.xlu1 %v2465_v61  ;;  %v4583_v12 = vpop.f32.mrf.mxu0 }
 0xdf6   :  { %v2636_v13 = vpop.f32.mrf.mxu0 }
 0xdf7   :  { %v2640_v14 = vsel %vm493_vm8, %v2636_v13, -inf }
 0xdf8   :  { %2641 = vmax.xlane.f32.xlu0 %v2640_v14  ;;  %v4593_v15 = vpop.f32.mrf.mxu0 }
 0xdfa   :  { %v2811_v17 = vpop.f32.mrf.mxu0 }
 0xdfb   :  { %v2815_v19 = vsel %vm493_vm8, %v2811_v17, -inf }
 0xdfc   :  { %2816 = vmax.xlane.f32.xlu0 %v2815_v19  ;;  %v4603_v20 = vpop.f32.mrf.mxu0 }
 0xdfe   :  { %v2984_v18 = vpop.f32.mrf.mxu0 }
 0xdff   :  { %v2988_v22 = vsel %vm493_vm8, %v2984_v18, -inf }
 0xe00   :  { %2989 = vmax.xlane.f32.xlu0 %v2988_v22  ;;  %v4613_v21 = vpop.f32.mrf.mxu0 }
 0xe02   :  { %v3155_v26 = vpop.f32.mrf.mxu0 }
 0xe03   :  { %v3159_v25 = vsel %vm493_vm8, %v3155_v26, -inf }
 0xe04   :  { %3160 = vmax.xlane.f32.xlu1 %v3159_v25  ;;  %v4623_v28 = vpop.f32.mrf.mxu0 }
 0xe06   :  { %v3330_v29 = vpop.f32.mrf.mxu0 }
 0xe07   :  { %v3334_v30 = vsel %vm493_vm8, %v3330_v29, -inf }
 0xe08   :  { %3335 = vmax.xlane.f32.xlu0 %v3334_v30  ;;  %v4633_v31 = vpop.f32.mrf.mxu0 }
 0xe0a   :  { %v3505_v32 = vpop.f32.mrf.mxu0 }
 0xe0b   :  { %v3509_v34 = vsel %vm493_vm8, %v3505_v32, -inf }
 0xe0c   :  { %v4643_v33 = vpop.f32.mrf.mxu0 }
 0xe15   :  { %2305 = vrot.lane.b32.xlu1 %v5446_v44, %s5821_s27 }
 0xe39   :  { %3510 = vmax.xlane.f32.xlu1 %v3509_v34 }
 0xe4a   :  { %2651 = vrot.lane.b32.xlu1 %v5448_v45, %s5822_s29 }
 0xe4e   :  { %2826 = vrot.lane.b32.xlu1 %v5456_v47, %s5823_s3 }
 0xe52   :  { %2999 = vrot.lane.b32.xlu1 %v5472_v51, %s5821_s27 }
 0xe7a   :  { %v2296_v35 = vpop.xlane.xlu0 %2295  ;;  %v2467_v37 = vpop.xlane.xlu1 %2466 }
 0xe7b   :  { %v2297_v36 = vsub.f32 %v2290_v8, %v2296_v35  ;;  %v2468_v38 = vsub.f32 %v2461_v9, %v2467_v37 }
 0xe7d   :  { %v2298_v41 = vmul.f32 1.442695, %v2297_v36  ;;  %v2469_v42 = vmul.f32 1.442695, %v2468_v38 }
 0xe7f   :  { %4813 = vpow2.f32 %v2298_v41 }
 0xe80   :  { %4815 = vpow2.f32 %v2469_v42 }
 0xe81   :  { %v2642_v43 = vpop.xlane.xlu0 %2641 }
 0xe82   :  { %v2643_v59 = vsub.f32 %v2636_v13, %v2642_v43 }
 0xe84   :  { %v2644_v62 = vmul.f32 1.442695, %v2643_v59 }
 0xe85   :  { %v2817_v44 = vpop.xlane.xlu0 %2816 }
 0xe86   :  { %v2818_v23 = vsub.f32 %v2811_v17, %v2817_v44 }
 0xe88   :  { %v2819_v46 = vmul.f32 1.442695, %v2818_v23 }
 0xe89   :  { %v2990_v60 = vpop.xlane.xlu0 %2989 }
 0xe8a   :  { %4817 = vpow2.f32 %v2819_v46  ;;  %v2991_v63 = vsub.f32 %v2984_v18, %v2990_v60 }
 0xe8b   :  { %4819 = vpow2.f32 %v2644_v62  ;;  %v4753_v62 = vld [vmem:[%s5764_s9 + $0x18] sm:$0xff]  }
 0xe8c   :  { %v4814_v45 = vpop.eup %4813  ;;  %v2992_v39 = vmul.f32 1.442695, %v2991_v63  ;;  %4650 = vmatpush3.bf16.msra.mxu0 %v4753_v62 }
 0xe8d   :  { %v5546_v48 = vpop.eup %4815  ;;  %v2300_v47 = vsel %vm493_vm8, %v4814_v45, 0.0  ;;  %v3161_v52 = vpop.xlane.xlu1 %3160  ;;  %4651 = vmatprep.subr.bf16.mxu0 %v4880_v54 }
 0xe8e   :  { %2301 = vadd.xlane.f32.xlu0 %v2300_v47  ;;  %v2471_v51 = vsel %vm493_vm8, %v5546_v48, 0.0  ;;  %4821 = vpow2.f32 %v2992_v39  ;;  %v3162_v1 = vsub.f32 %v3155_v26, %v3161_v52 }
 0xe8f   :  { %2472 = vadd.xlane.f32.xlu1 %v2471_v51 }
 0xe90   :  { %v3163_v4 = vmul.f32 1.442695, %v3162_v1 }
 0xe91   :  { %v2306_v55 = vpop.permute.xlu1 %2305  ;;  %v3336_v24 = vpop.xlane.xlu0 %3335 }
 0xe92   :  { %4575 = vmatpush3.msk.msra.mxu1 %vm511_vm9, %v2306_v55  ;;  %v3337_v0 = vsub.f32 %v3330_v29, %v3336_v24  ;;  %v4754_v24 = vld [vmem:[%s5764_s9 + $0x10] sm:$0xff]  }
 0xe93   :  { %4584 = vmatprep.subr.mxu1 %v4880_v54  ;;  %4652 = vmatpush3.bf16.msra.mxu0 %v4754_v24 }
 0xe94   :  { %v3338_v2 = vmul.f32 1.442695, %v3337_v0  ;;  %4665 = vmatprep.subr.bf16.mxu0 %v4880_v54 }
 0xe96   :  { %4823 = vpow2.f32 %v3338_v2 }
 0xe97   :  { %v5553_v57 = vpop.eup %4817  ;;  %4825 = vpow2.f32 %v3163_v4 }
 0xe98   :  { %v2821_v58 = vsel %vm493_vm8, %v5553_v57, 0.0  ;;  %v4820_v40 = vpop.eup %4819 }
 0xe99   :  { %2822 = vadd.xlane.f32.xlu1 %v2821_v58 }
 0xe9b   :  { %v5562_v5 = vpop.eup %4821 }
 0xe9c   :  { %v2994_v7 = vsel %vm493_vm8, %v5562_v5, 0.0 }
 0xea3   :  { %v5566_v8 = vpop.eup %4823 }
 0xea4   :  { %2476 = vrot.lane.b32.xlu0 %v5444_v16, %s5824_s0  ;;  %v2646_v16 = vsel %vm493_vm8, %v4820_v40, 0.0  ;;  %v3340_v9 = vsel %vm493_vm8, %v5566_v8, 0.0  ;;  %v4826_v10 = vpop.eup %4825 }
 0xea5   :  { %v3165_v11 = vsel %vm493_vm8, %v4826_v10, 0.0 }
 0xeaa   :  { %3170 = vrot.lane.b32.xlu1 %v5464_v49, %s5824_s0 }
 0xec2   :  { %v3511_v6 = vpop.xlane.xlu1 %3510 }
 0xec3   :  { %2647 = vadd.xlane.f32.xlu0 %v2646_v16  ;;  %v3512_v49 = vsub.f32 %v3505_v32, %v3511_v6 }
 0xec5   :  { %v3513_v56 = vmul.f32 1.442695, %v3512_v49 }
 0xec6   :  { %v2652_v13 = vpop.permute.xlu1 %2651 }
 0xec7   :  { %2995 = vadd.xlane.f32.xlu0 %v2994_v7  ;;  %4827 = vpow2.f32 %v3513_v56 }
 0xeca   :  { %v2827_v14 = vpop.permute.xlu1 %2826 }
 0xecb   :  { %3341 = vadd.xlane.f32.xlu0 %v3340_v9 }
 0xece   :  { %3166 = vadd.xlane.f32.xlu1 %v3165_v11  ;;  %v3000_v15 = vpop.permute.xlu1 %2999  ;;  %v4299_v11 = vld [vmem:[%s5765_s10 + $0x1] ss:$0 sm:$0xff] }
 0xed4   :  { %v5571_v61 = vpop.eup %4827 }
 0xed5   :  { %v3515_v12 = vsel %vm493_vm8, %v5571_v61, 0.0 }
 0xed6   :  { %3516 = vadd.xlane.f32.xlu0 %v3515_v12 }
 0xedf   :  { %3520 = vrot.lane.b32.xlu1 %v5479_v53, %s5823_s3 }
 0xeec   :  { %3345 = vrot.lane.b32.xlu0 %v5470_v50, %s5822_s29 }
 0xf17   :  { %v2302_v17 = vpop.xlane.xlu0 %2301 }
 0xf18   :  { %4829 = vrcp.f32 %v2302_v17  ;;  %v2473_v19 = vpop.xlane.xlu1 %2472 }
 0xf19   :  { %4831 = vrcp.f32 %v2473_v19 }
 0xf1b   :  { %v2477_v21 = vpop.permute.xlu0 %2476 }
 0xf22   :  { %v2823_v53 = vpop.xlane.xlu1 %2822 }
 0xf25   :  { %v4830_v20 = vpop.eup %4829 }
 0xf26   :  { %v2304_v18 = vmul.f32 %v4830_v20, %v4814_v45  ;;  %v4832_v22 = vpop.eup %4831  ;;  %v3171_v28 = vpop.permute.xlu1 %3170 }
 0xf27   :  { %v2475_v50 = vmul.f32 %v4832_v22, %v5546_v48 }
 0xf28   :  { %4577 = vmatmul.mubr.msk.f32.vlgmr.msra.gmra.mxu1 %vm507_vm10, %v2304_v18 }
 0xf29   :  { %4585 = vmatpush3.msk.msra.mxu1 %vm511_vm9, %v2477_v21  ;;  %4586 = vmatprep.mubr.msk.f32.mxu1 %vm4881_vm4, %v4880_v54 }
 0xf2a   :  { %4594 = vmatprep.subr.mxu1 %v4880_v54 }
 0xf2c   :  { %4587 = vmatmul.mubr.msk.f32.vlgmr.msra.gmra.mxu1 %vm507_vm10, %v2475_v50 }
 0xf2d   :  { %4595 = vmatpush3.msk.msra.mxu1 %vm511_vm9, %v2652_v13  ;;  %4596 = vmatprep.mubr.msk.f32.mxu1 %vm4881_vm4, %v4880_v54 }
 0xf2e   :  { %4604 = vmatprep.subr.mxu1 %v4880_v54 }
 0xf4c   :  { %v2648_v26 = vpop.xlane.xlu0 %2647 }
 0xf4d   :  { %4833 = vrcp.f32 %v2648_v26 }
 0xf4e   :  { %4835 = vrcp.f32 %v2823_v53 }
 0xf50   :  { %v2996_v25 = vpop.xlane.xlu0 %2995 }
 0xf51   :  { %4837 = vrcp.f32 %v2996_v25 }
 0xf54   :  { %v3342_v29 = vpop.xlane.xlu0 %3341 }
 0xf57   :  { %v3167_v30 = vpop.xlane.xlu1 %3166 }
 0xf58   :  { %4839 = vrcp.f32 %v3167_v30 }
 0xf59   :  { %4841 = vrcp.f32 %v3342_v29 }
 0xf5a   :  { %v4834_v31 = vpop.eup %4833 }
 0xf5b   :  { %v2650_v32 = vmul.f32 %v4834_v31, %v4820_v40  ;;  %v4836_v33 = vpop.eup %4835  ;;  %v3521_v23 = vpop.permute.xlu1 %3520  ;;  %v4755_v31 = vld [vmem:[%s5768_s13 + $0x18] sm:$0xff]  }
 0xf5c   :  { %v2825_v34 = vmul.f32 %v4836_v33, %v5553_v57 }
 0xf5d   :  { %4597 = vmatmul.mubr.msk.f32.vlgmr.msra.gmra.mxu1 %vm507_vm10, %v2650_v32  ;;  %v4756_v32 = vld [vmem:[%s5768_s13 + $0x10] sm:$0xff]  }
 0xf5e   :  { %4605 = vmatpush3.msk.msra.mxu1 %vm511_vm9, %v2827_v14  ;;  %4606 = vmatprep.mubr.msk.f32.mxu1 %vm4881_vm4, %v4880_v54  ;;  %v4838_v35 = vpop.eup %4837 }
 0xf5f   :  { %4614 = vmatprep.subr.mxu1 %v4880_v54  ;;  %v3517_v36 = vpop.xlane.xlu0 %3516  ;;  %v2998_v37 = vmul.f32 %v4838_v35, %v5562_v5 }
 0xf60   :  { %4843 = vrcp.f32 %v3517_v36 }
 0xf61   :  { %4607 = vmatmul.mubr.msk.f32.vlgmr.msra.gmra.mxu1 %vm507_vm10, %v2825_v34 }
 0xf62   :  { %4615 = vmatpush3.msk.msra.mxu1 %vm511_vm9, %v3000_v15  ;;  %4616 = vmatprep.mubr.msk.f32.mxu1 %vm4881_vm4, %v4880_v54 }
 0xf63   :  { %4624 = vmatprep.subr.mxu1 %v4880_v54  ;;  %v3346_v43 = vpop.permute.xlu0 %3345 }
 0xf65   :  { %4617 = vmatmul.mubr.msk.f32.vlgmr.msra.gmra.mxu1 %vm507_vm10, %v2998_v37  ;;  %v4840_v38 = vpop.eup %4839 }
 0xf66   :  { %4625 = vmatpush3.msk.msra.mxu1 %vm511_vm9, %v3171_v28  ;;  %4626 = vmatprep.mubr.msk.f32.mxu1 %vm4881_vm4, %v4880_v54  ;;  %v3169_v41 = vmul.f32 %v4840_v38, %v4826_v10  ;;  %v4842_v42 = vpop.eup %4841 }
 0xf67   :  { %4634 = vmatprep.subr.mxu1 %v4880_v54  ;;  %v3344_v44 = vmul.f32 %v4842_v42, %v5566_v8 }
 0xf69   :  { %4627 = vmatmul.mubr.msk.f32.vlgmr.msra.gmra.mxu1 %vm507_vm10, %v3169_v41 }
 0xf6a   :  { %4635 = vmatpush3.msk.msra.mxu1 %vm511_vm9, %v3346_v43  ;;  %4636 = vmatprep.mubr.msk.f32.mxu1 %vm4881_vm4, %v4880_v54  ;;  %v4305_v43 = vld [vmem:[%s5766_s11 + $0x1] ss:$0 sm:$0xff] }
 0xf6b   :  { %4644 = vmatprep.subr.mxu1 %v4880_v54 }
 0xf6d   :  { %4637 = vmatmul.mubr.msk.f32.vlgmr.msra.gmra.mxu1 %vm507_vm10, %v3344_v44  ;;  %v4844_v46 = vpop.eup %4843 }
 0xf6e   :  { %4645 = vmatpush3.msk.msra.mxu1 %vm511_vm9, %v3521_v23  ;;  %4646 = vmatprep.mubr.msk.f32.mxu1 %vm4881_vm4, %v4880_v54  ;;  %v3519_v45 = vmul.f32 %v4844_v46, %v5571_v61 }
 0xf6f   :  { %4657 = vmatprep.subr.bf16.mxu1 %v4880_v54 }
 0xf71   :  { %4647 = vmatmul.mubr.msk.f32.vlgmr.msra.gmra.mxu1 %vm507_vm10, %v3519_v45  ;;  %v4306_v45 = vld [vmem:[%s5767_s12 + $0x1] ss:$0 sm:$0xff] }
 0xf72   :  { %4661 = vmatprep.mubr.msk.bf16.mxu1 %vm4881_vm4, %v4880_v54  ;;  %4658 = vmatpush3.bf16.msra.mxu1 %v4755_v31 }
 0xf73   :  { %4659 = vmatprep.subr.bf16.mxu1 %v4880_v54 }
 0xf76   :  { %4660 = vmatpush3.bf16.msra.mxu1 %v4756_v32 }
 0xf77   :  { %4677 = vmatprep.subr.bf16.mxu1 %v4880_v54 }
 0xfe8   :  { %v2378_v48 = vpop.f32.mrf.mxu1 }
 0xfe9   :  { %2382 = vst.msk [vmem:[#allocation4] sm:$0x3f] %vm584_vm11, %v2378_v48 }
 0xfea   :  { %v4578_v47 = vpop.f32.mrf.mxu1 }
 0xfec   :  { %v2549_v52 = vpop.f32.mrf.mxu1 }
 0xfed   :  { %2554 = vrot.lane.b32.xlu0 %v2549_v52, %s5825_s4 }
 0xfee   :  { %v4588_v51 = vpop.f32.mrf.mxu1 }
0x101d   :  { %v2724_v55 = vpop.f32.mrf.mxu1 }
0x101e   :  { %2729 = vrot.lane.b32.xlu0 %v2724_v55, %s5826_s25  ;;  %v4757_v55 = vld [vmem:[%s5770_s15 + $0x38] sm:$0xff]  }
0x101f   :  { %v4598_v57 = vpop.f32.mrf.mxu1 }
0x1020   :  { %v4758_v57 = vld [vmem:[%s5770_s15 + $0x30] sm:$0xff]  }
0x1021   :  { %v2899_v58 = vpop.f32.mrf.mxu1 }
0x1022   :  { %2904 = vrot.lane.b32.xlu0 %v2899_v58, %s5827_s6  ;;  %v4759_v58 = vld [vmem:[%s5770_s15 + $0x28] sm:$0xff]  }
0x1023   :  { %v4608_v59 = vpop.f32.mrf.mxu1 }
0x1024   :  { %v4760_v59 = vld [vmem:[%s5770_s15 + $0x20] sm:$0xff]  }
0x1025   :  { %v3072_v60 = vpop.f32.mrf.mxu1 }
0x1026   :  { %3076 = vst.msk [vmem:[#allocation4 + $0x6] sm:$0x3f] %vm584_vm11, %v3072_v60  ;;  %v4312_v60 = vld [vmem:[%s5769_s14 + $0x1] ss:$0 sm:$0xff] }
0x1027   :  { %v4618_v63 = vpop.f32.mrf.mxu1 }
0x1029   :  { %v3243_v39 = vpop.f32.mrf.mxu1 }
0x102a   :  { %3248 = vrot.lane.b32.xlu1 %v3243_v39, %s5825_s4 }
0x102b   :  { %v4628_v0 = vpop.f32.mrf.mxu1 }
0x102d   :  { %v3418_v1 = vpop.f32.mrf.mxu1 }
0x102e   :  { %3423 = vrot.lane.b32.xlu1 %v3418_v1, %s5826_s25 }
0x102f   :  { %v4638_v2 = vpop.f32.mrf.mxu1 }
0x1031   :  { %v3593_v4 = vpop.f32.mrf.mxu1 }
0x1032   :  { %3598 = vrot.lane.b32.xlu1 %v3593_v4, %s5827_s6 }
0x1033   :  { %v4648_v40 = vpop.f32.mrf.mxu1 }
0x105f   :  { %v2555_v16 = vpop.permute.xlu0 %2554 }
0x1060   :  { %2557 = vst.msk [vmem:[#allocation4] sm:$0x3f] %vm760_vm12, %v2555_v16 }
0x1090   :  { %v2730_v5 = vpop.permute.xlu0 %2729 }
0x1091   :  { %2732 = vst.msk [vmem:[#allocation4] sm:$0x3f] %vm936_vm13, %v2730_v5 }
0x1094   :  { %v2905_v6 = vpop.permute.xlu0 %2904 }
0x1095   :  { %2907 = vst.msk [vmem:[#allocation4] sm:$0x3f] %vm1112_vm14, %v2905_v6 }
0x109c   :  { %v3249_v49 = vpop.permute.xlu1 %3248 }
0x109d   :  { %3251 = vst.msk [vmem:[#allocation4 + $0x6] sm:$0x3f] %vm760_vm12, %v3249_v49 }
0x10a0   :  { %v3424_v56 = vpop.permute.xlu1 %3423 }
0x10a1   :  { %3426 = vst.msk [vmem:[#allocation4 + $0x6] sm:$0x3f] %vm936_vm13, %v3424_v56 }
0x10a4   :  { %v3599_v7 = vpop.permute.xlu1 %3598 }
0x10a5   :  { %3601 = vst.msk [vmem:[#allocation4 + $0x6] sm:$0x3f] %vm1112_vm14, %v3599_v7 }
0x10ac   :  { %v3602_v8 = vld [vmem:[#allocation4] sm:$0xff]  ;;  %v3603_v9 = vld [vmem:[#allocation4 + $0x8] sm:$0xf] }
0x10ad   :  { %v3611_v10 = vpack.c.bf16 %v3603_v9, %v3602_v8 }
0x10af   :  { %4654 = vmatmul.mubr.msk.bf16.vlgmr.msra.gmra.mxu0 %vm296_vm3, %v3611_v10 }
0x10b0   :  { %4673 = vmatprep.mubr.msk.bf16.mxu0 %vm4881_vm4, %v4880_v54  ;;  %4666 = vmatpush3.bf16.msra.mxu0 %v4757_v55 }
0x10b1   :  { %4667 = vmatprep.subr.bf16.mxu0 %v4880_v54 }
0x10b4   :  { %4668 = vmatpush3.bf16.msra.mxu0 %v4758_v57 }
0x10b5   :  { %4669 = vmatprep.subr.bf16.mxu0 %v4880_v54 }
0x10b8   :  { %4670 = vmatpush3.bf16.msra.mxu0 %v4759_v58 }
0x10b9   :  { %4671 = vmatprep.subr.bf16.mxu0 %v4880_v54 }
0x10bc   :  { %4672 = vmatpush3.bf16.msra.mxu0 %v4760_v59 }
0x10bd   :  { %4693 = vmatprep.subr.bf16.mxu0 %v4880_v54 }
0x116f   :  { %v3667_v61 = vpop.f32.mrf.mxu0 }
0x1170   :  { %v3668_v12 = vadd.f32 %v4299_v11, %v3667_v61 }
0x1171   :  { %v4655_v13 = vpop.f32.mrf.mxu0 }
0x1172   :  { %v5651_v14 = vadd.f32 %v3668_v12, %v5409_v27 }
0x1173   :  { %v3670_v15 = vpop.f32.mrf.mxu0 }
0x1174   :  { %v3671_v17 = vadd.f32 %v4299_v11, %v3670_v15  ;;  %v3680_v19 = vsel %vm296_vm3, %v5651_v14, 0.0 }
0x1175   :  { %3681 = vadd.xlane.f32.xlu0 %v3680_v19  ;;  %v4656_v20 = vpop.f32.mrf.mxu0 }
0x1176   :  { %v5656_v18 = vadd.f32 %v3671_v17, %v5414_v3  ;;  %v4325_v20 = vld [vmem:[%s5771_s16 + $0x1] ss:$0 sm:$0xff] }
0x1178   :  { %v3683_v22 = vsel %vm236_vm2, %v5656_v18, 0.0 }
0x1179   :  { %3684 = vadd.xlane.f32.xlu1 %v3683_v22 }
0x11fe   :  { %v3682_v21 = vpop.xlane.xlu0 %3681 }
0x11ff   :  { %v3686_v50 = vmul.f32 0.03125, %v3682_v21 }
0x1201   :  { %v3688_v53 = vsub.f32 %v5651_v14, %v3686_v50 }
0x1202   :  { %v3685_v27 = vpop.xlane.xlu1 %3684 }
0x1203   :  { %v3687_v26 = vmul.f32 0.03125, %v3685_v27  ;;  %v3690_v25 = vmul.f32 %v3688_v53, %v3688_v53 }
0x1205   :  { %v3689_v28 = vsub.f32 %v5656_v18, %v3687_v26  ;;  %v3692_v29 = vsel %vm296_vm3, %v3690_v25, 0.0 }
0x1206   :  { %3693 = vadd.xlane.f32.xlu0 %v3692_v29 }
0x1207   :  { %v3691_v30 = vmul.f32 %v3689_v28, %v3689_v28 }
0x1209   :  { %v3695_v3 = vsel %vm236_vm2, %v3691_v30, 0.0 }
0x120a   :  { %3696 = vadd.xlane.f32.xlu0 %v3695_v3 }
0x128f   :  { %v3694_v33 = vpop.xlane.xlu0 %3693 }
0x1290   :  { %v3698_v34 = vmul.f32 0.03125, %v3694_v33 }
0x1292   :  { %v3700_v35 = vadd.f32 1e-06, %v3698_v34 }
0x1293   :  { %v3697_v36 = vpop.xlane.xlu0 %3696 }
0x1294   :  { %4845 = vrsqrt.f32 %v3700_v35  ;;  %v3699_v37 = vmul.f32 0.03125, %v3697_v36 }
0x1296   :  { %v3701_v38 = vadd.f32 1e-06, %v3699_v37 }
0x1298   :  { %4847 = vrsqrt.f32 %v3701_v38 }
0x12a1   :  { %v4846_v41 = vpop.eup %4845 }
0x12a2   :  { %v3704_v42 = vmul.f32 %v4846_v41, %v3688_v53  ;;  %v4762_v41 = vld [vmem:[%s5774_s19] sm:$0xff]  }
0x12a4   :  { %v3712_v46 = vmul.f32 %v4305_v43, %v3704_v42 }
0x12a5   :  { %v4848_v44 = vpop.eup %4847 }
0x12a6   :  { %v3705_v23 = vmul.f32 %v4848_v44, %v3689_v28  ;;  %v3720_v47 = vadd.f32 %v4306_v45, %v3712_v46 }
0x12a8   :  { %v3713_v48 = vmul.f32 %v4305_v43, %v3705_v23 }
0x12aa   :  { %v3721_v52 = vadd.f32 %v4306_v45, %v3713_v48 }
0x12ac   :  { %v3729_v51 = vpack.c.bf16 %v3721_v52, %v3720_v47  ;;  %v4331_v47 = vld [vmem:[%s5772_s17] ss:$0 sm:$0xff] }
0x12ae   :  { %4662 = vmatmul.mubr.msk.bf16.vlgmr.msra.gmra.mxu1 %vm296_vm3, %v3729_v51  ;;  %v4332_v51 = vld [vmem:[%s5773_s18] ss:$0 sm:$0xff] }
0x12af   :  { %4681 = vmatprep.mubr.msk.bf16.mxu1 %vm4881_vm4, %v4880_v54 }
0x136e   :  { %v3785_v62 = vpop.f32.mrf.mxu1 }
0x136f   :  { %v3786_v63 = vadd.f32 %v4312_v60, %v3785_v62 }
0x1370   :  { %v4663_v24 = vpop.f32.mrf.mxu1 }
0x1371   :  { %v3792_v39 = vmul.f32 %v3786_v63, %v3786_v63 }
0x1372   :  { %v3788_v0 = vpop.f32.mrf.mxu1 }
0x1373   :  { %v3794_v1 = vmul.f32 %v3792_v39, %v3786_v63  ;;  %v3789_v2 = vadd.f32 %v4312_v60, %v3788_v0  ;;  %v4763_v39 = vld [vmem:[%s5776_s21 + $0x8] sm:$0xff]  }
0x1374   :  { %v4664_v4 = vpop.f32.mrf.mxu1 }
0x1375   :  { %v3796_v40 = vmul.f32 0.044715, %v3794_v1  ;;  %v3793_v16 = vmul.f32 %v3789_v2, %v3789_v2 }
0x1377   :  { %v3798_v5 = vadd.f32 %v3796_v40, %v3786_v63  ;;  %v3795_v6 = vmul.f32 %v3793_v16, %v3789_v2 }
0x1379   :  { %v3800_v49 = vmul.f32 0.7978846, %v3798_v5  ;;  %v3797_v56 = vmul.f32 0.044715, %v3795_v6 }
0x137b   :  { %4849 = vtanh.f32 %v3800_v49  ;;  %v3799_v7 = vadd.f32 %v3797_v56, %v3789_v2 }
0x137d   :  { %v3801_v8 = vmul.f32 0.7978846, %v3799_v7 }
0x137f   :  { %4851 = vtanh.f32 %v3801_v8 }
0x1388   :  { %v4850_v9 = vpop.eup %4849 }
0x1389   :  { %v3804_v10 = vadd.f32 1.0, %v4850_v9 }
0x138b   :  { %v3806_v61 = vmul.f32 0.5, %v3804_v10  ;;  %v3948_v10 = vld [vmem:[%s5775_s20] sm:$0x1]  ;;  %s4896_s20 = smov [#allocation5]  }
0x138c   :  { %v4852_v11 = vpop.eup %4851  ;;  %s4171_s3 = sshll.u32 %s4896_s20, 4  ;;  %s4172_s3 = int_to_ptr.vmem [resolvable:$true] %s4171_s3 }
0x138d   :  { %v3805_v12 = vadd.f32 1.0, %v4852_v11  ;;  %v3808_v15 = vmul.f32 %v3806_v61, %v3786_v63  ;;  %p4862_p1 = scmp.lt.s32.totalorder %s4172_s3, %s4172_s3 }
0x138f   :  { %v3807_v13 = vmul.f32 0.5, %v3805_v12 }
0x1391   :  { %v3809_v17 = vmul.f32 %v3807_v13, %v3789_v2  ;;  %v4764_v2 = vld [vmem:[%s5776_s21] sm:$0xff]  }
0x1393   :  { %v3821_v19 = vpack.c.bf16 %v3809_v17, %v3808_v15 }
0x1395   :  { %4674 = vmatmul.mubr.msk.bf16.vlgmr.msra.gmra.mxu0 %vm188_vm0, %v3821_v19 }
0x1396   :  { %4697 = vmatprep.mubr.msk.bf16.mxu0 %vm4881_vm4, %v4880_v54 }
0x1455   :  { %v3889_v22 = vpop.f32.mrf.mxu0 }
0x1456   :  { %v3890_v21 = vadd.f32 %v4325_v20, %v3889_v22 }
0x1457   :  { %v4675_v50 = vpop.f32.mrf.mxu0 }
0x1458   :  { %v3896_v53 = vadd.f32 %v3890_v21, %v5651_v14 }
0x1459   :  { %v3892_v27 = vpop.f32.mrf.mxu0 }
0x145a   :  { %v3893_v26 = vadd.f32 %v4325_v20, %v3892_v27  ;;  %v3900_v25 = vsel %vm296_vm3, %v3896_v53, 0.0 }
0x145b   :  { %3901 = vadd.xlane.f32.xlu0 %v3900_v25  ;;  %v4676_v28 = vpop.f32.mrf.mxu0 }
0x145c   :  { %v3897_v29 = vadd.f32 %v3893_v26, %v5656_v18  ;;  %v4761_v18 = vld [vmem:[%s5774_s19 + $0x8] sm:$0xff]  }
0x145d   :  { %4678 = vmatpush3.bf16.msra.mxu1 %v4761_v18  ;;  %4694 = vmatpush3.bf16.msra.mxu0 %v4761_v18 }
0x145e   :  { %v3903_v30 = vsel %vm236_vm2, %v3897_v29, 0.0  ;;  %4679 = vmatprep.subr.bf16.mxu1 %v4880_v54  ;;  %4695 = vmatprep.subr.bf16.mxu0 %v4880_v54 }
0x145f   :  { %3904 = vadd.xlane.f32.xlu0 %v3903_v30 }
0x1461   :  { %4680 = vmatpush3.bf16.msra.mxu1 %v4762_v41  ;;  %4696 = vmatpush3.bf16.msra.mxu0 %v4762_v41 }
0x1462   :  { %4685 = vmatprep.subr.bf16.mxu1 %v4880_v54 }
0x14e4   :  { %v3902_v3 = vpop.xlane.xlu0 %3901 }
0x14e5   :  { %v3906_v31 = vmul.f32 0.03125, %v3902_v3 }
0x14e7   :  { %v3908_v32 = vsub.f32 %v3896_v53, %v3906_v31 }
0x14e8   :  { %v3905_v33 = vpop.xlane.xlu0 %3904 }
0x14e9   :  { %v3907_v34 = vmul.f32 0.03125, %v3905_v33  ;;  %v3910_v35 = vmul.f32 %v3908_v32, %v3908_v32 }
0x14eb   :  { %v3909_v36 = vsub.f32 %v3897_v29, %v3907_v34  ;;  %v3912_v14 = vsel %vm296_vm3, %v3910_v35, 0.0 }
0x14ec   :  { %3913 = vadd.xlane.f32.xlu1 %v3912_v14 }
0x14ed   :  { %v3911_v37 = vmul.f32 %v3909_v36, %v3909_v36 }
0x14ef   :  { %v3915_v38 = vsel %vm236_vm2, %v3911_v37, 0.0 }
0x14f0   :  { %3916 = vadd.xlane.f32.xlu1 %v3915_v38 }
0x1575   :  { %v3914_v42 = vpop.xlane.xlu1 %3913 }
0x1576   :  { %v3918_v43 = vmul.f32 0.03125, %v3914_v42 }
0x1578   :  { %v3920_v44 = vadd.f32 1e-06, %v3918_v43 }
0x1579   :  { %v3917_v23 = vpop.xlane.xlu1 %3916 }
0x157a   :  { %4853 = vrsqrt.f32 %v3920_v44  ;;  %v3919_v46 = vmul.f32 0.03125, %v3917_v23 }
0x157c   :  { %v3921_v45 = vadd.f32 1e-06, %v3919_v46 }
0x157e   :  { %4855 = vrsqrt.f32 %v3921_v45 }
0x1587   :  { %v4854_v48 = vpop.eup %4853 }
0x1588   :  { %v3924_v52 = vmul.f32 %v4854_v48, %v3908_v32 }
0x158a   :  { %v3932_v55 = vmul.f32 %v4331_v47, %v3924_v52 }
0x158b   :  { %v4856_v57 = vpop.eup %4855 }
0x158c   :  { %v3940_v58 = vadd.f32 %v4332_v51, %v3932_v55  ;;  %v3925_v59 = vmul.f32 %v4856_v57, %v3909_v36 }
0x158e   :  { %3942 = vst.msk [vmem:[#allocation2] sm:$0xff] %vm296_vm3, %v3940_v58  ;;  %v3933_v60 = vmul.f32 %v4331_v47, %v3925_v59 }
0x1590   :  { %v3941_v62 = vadd.f32 %v4332_v51, %v3933_v60 }
0x1592   :  { %3943 = vst.msk [vmem:[#allocation2 + $0x8] sm:$0xf] %vm236_vm2, %v3941_v62 }
0x1595   :  { %v3954_v63 = vld [vmem:[#allocation2] sm:$0x1]  ;;  %v4072_v24 = vld [vmem:[#allocation2 + $0x6] sm:$0x1]  ;;  %v3955_v4 = vld [vmem:[#allocation2 + $0x1] sm:$0x1] }
0x1596   :  { %v3956_v0 = vpack.c.bf16 %v3954_v63, %v3954_v63  ;;  %v4074_v1 = vpack.c.bf16 %v4072_v24, %v4072_v24  ;;  %v4012_v40 = vpack.c.bf16 %v3955_v4, %v3955_v4  ;;  %v4073_v16 = vld [vmem:[#allocation2 + $0x7] sm:$0x1] }
0x1597   :  { %v4118_v5 = vpack.c.bf16 %v4073_v16, %v4073_v16 }
0x1598   :  { %4682 = vmatmul.mubr.msk.bf16.vlgmr.msra.gmra.mxu1 %vm296_vm3, %v3956_v0  ;;  %4698 = vmatmul.mubr.msk.bf16.vlgmr.msra.gmra.mxu0 %vm296_vm3, %v4074_v1 }
0x1599   :  { %4686 = vmatpush3.bf16.msra.mxu1 %v4763_v39  ;;  %4689 = vmatprep.mubr.msk.bf16.mxu1 %vm4881_vm4, %v4880_v54 }
0x159a   :  { %4687 = vmatprep.subr.bf16.mxu1 %v4880_v54 }
0x159d   :  { %4688 = vmatpush3.bf16.msra.mxu1 %v4764_v2 }
0x159e   :  { %4701 = vmatprep.subr.bf16.mxu1 %v4880_v54 }
0x15a0   :  { %4690 = vmatmul.mubr.msk.bf16.vlgmr.msra.gmra.mxu1 %vm296_vm3, %v4012_v40 }
0x15a1   :  { %4702 = vmatpush3.bf16.msra.mxu1 %v4763_v39  ;;  %4705 = vmatprep.mubr.msk.bf16.mxu1 %vm4881_vm4, %v4880_v54 }
0x15a2   :  { %4703 = vmatprep.subr.bf16.mxu1 %v4880_v54  ;;  %v3953_v54 = vld [vmem:[%s5777_s22] sm:$0x1]  ;;  %s4857_s22 = scalar_lea.vmem %s4172_s3, 32 }
0x15a3   :  { %p4858_p0 = scmp.ne.s32.totalorder %s4172_s3, %s4857_s22  ;;  %p4863_p2 = scmp.lt.s32.totalorder %s4857_s22, %s4857_s22 }
0x15a5   :  { %4704 = vmatpush3.bf16.msra.mxu1 %v4764_v2  ;;  %p4864_p3 = por %p4863_p2, %p4862_p1 }
0x15a7   :  { %p4865_p4 = pnand %p4864_p3, %p4858_p0 }
0x15a8   :  { %4706 = vmatmul.mubr.msk.bf16.vlgmr.msra.gmra.mxu1 %vm296_vm3, %v4118_v5 }
0x1658   :  { %v4006_v6 = vpop.f32.mrf.mxu1  ;;  %v4112_v49 = vpop.f32.mrf.mxu0 }
0x1659   :  { %v4007_v13 = vadd.f32 %v4006_v6, %v3948_v10  ;;  %v4113_v53 = vadd.f32 %v4112_v49, %v3948_v10 }
0x165a   :  { %v4683_v56 = vpop.f32.mrf.mxu1  ;;  %v4699_v7 = vpop.f32.mrf.mxu0 }
0x165c   :  { %v4009_v8 = vpop.f32.mrf.mxu1  ;;  %v4115_v9 = vpop.f32.mrf.mxu0 }
0x165e   :  { %v4684_v11 = vpop.f32.mrf.mxu1  ;;  %v4700_v61 = vpop.f32.mrf.mxu0 }
0x1660   :  { %v4062_v12 = vpop.f32.mrf.mxu1 }
0x1661   :  { %v4063_v15 = vadd.f32 %v4062_v12, %v3953_v54 }
0x1662   :  { %v4691_v17 = vpop.f32.mrf.mxu1 }
0x1663   :  { %v4068_v19 = vadd.f32 %v4063_v15, %v4007_v13 }
0x1664   :  { %v4065_v20 = vpop.f32.mrf.mxu1 }
0x1665   :  { %v4069_v22 = vmul.f32 0.5, %v4068_v19 }
0x1666   :  { %v4692_v21 = vpop.f32.mrf.mxu1 }
0x1667   :  { %4071 = vst.msk [vmem:[#allocation5] sm:$0x1] %vm4070_vm15, %v4069_v22 }
0x1668   :  { %v4156_v50 = vpop.f32.mrf.mxu1 }
0x1669   :  { %v4157_v27 = vadd.f32 %v4156_v50, %v3953_v54 }
0x166a   :  { %v4707_v26 = vpop.f32.mrf.mxu1 }
0x166b   :  { %v4162_v25 = vadd.f32 %v4157_v27, %v4113_v53 }
0x166c   :  { %v4159_v28 = vpop.f32.mrf.mxu1 }
0x166d   :  { %v4163_v29 = vmul.f32 0.5, %v4162_v25 }
0x166e   :  { %v4708_v30 = vpop.f32.mrf.mxu1 }
0x166f   :  { %4164 = vst.msk [vmem:[#allocation5 + $0x1] sm:$0x1] %vm4070_vm15, %v4163_v29 }
0x1670   :  { %4868 = shalt.err (!%p4865_p4)
}
0x1671   :  { %4174 = dma.vmem_to_hbm [thread:$0]  %s4172_s3, 32, %s5778_s23, [#allocation6]  }
0x1672   :  { %4877 = dma.done.wait [#allocation6], 32  }
0x1673   :  { %4878 = vsyncadd [#allocation6], 4294967264 }
0x1674   :  { %4178 = vsyncpa [#allocation6], 1 }

// kernel: transgeo_forward.2
= control target key start
LH: loop header
LB: loop body
LE: loop exit
PB: predicated region body
PF: predicated region fallthrough
CT: control target
= control target key end

     0   :  { %s7039_s0 = inlined_call_operand.vmem [shape: f32[2,8,192], index: 0, kind: input, shape index: {}]   ;;  %s7040_s1 = inlined_call_operand.vmem [shape: bf16[192,32], index: 1, kind: input, shape index: {}]   ;;  %s7041_s2 = inlined_call_operand.vmem [shape: f32[1,32], index: 2, kind: input, shape index: {}]   ;;  %s7042_s3 = inlined_call_operand.vmem [shape: f32[2,32], index: 3, kind: input, shape index: {}]   ;;  %s7043_s4 = inlined_call_operand.vmem [shape: f32[10,32], index: 4, kind: input, shape index: {}]   ;;  %s7044_s5 = inlined_call_operand.vmem [shape: f32[2,1,32], index: 5, kind: input, shape index: {}]   ;;  %s7045_s6 = inlined_call_operand.vmem [shape: f32[2,1,32], index: 6, kind: input, shape index: {}]   ;;  %s7046_s7 = inlined_call_operand.vmem [shape: bf16[2,32,96], index: 7, kind: input, shape index: {}]   ;;  %s7047_s8 = inlined_call_operand.vmem [shape: f32[2,1,96], index: 8, kind: input, shape index: {}]   ;;  %s7048_s9 = inlined_call_operand.vmem [shape: bf16[2,32,32], index: 9, kind: input, shape index: {}]   ;;  %s7049_s10 = inlined_call_operand.vmem [shape: f32[2,1,32], index: 10, kind: input, shape index: {}]   ;;  %s7050_s11 = inlined_call_operand.vmem [shape: f32[2,1,32], index: 11, kind: input, shape index: {}]   ;;  %s7051_s12 = inlined_call_operand.vmem [shape: f32[2,1,32], index: 12, kind: input, shape index: {}]   ;;  %s7052_s13 = inlined_call_operand.vmem [shape: bf16[2,32,64], index: 13, kind: input, shape index: {}]   ;;  %s7053_s14 = inlined_call_operand.vmem [shape: f32[2,1,64], index: 14, kind: input, shape index: {}]   ;;  %s7054_s15 = inlined_call_operand.vmem [shape: bf16[2,64,32], index: 15, kind: input, shape index: {}]   ;;  %s7055_s16 = inlined_call_operand.vmem [shape: f32[2,1,32], index: 16, kind: input, shape index: {}]   ;;  %s7056_s17 = inlined_call_operand.vmem [shape: f32[1,32], index: 17, kind: input, shape index: {}]   ;;  %s7057_s18 = inlined_call_operand.vmem [shape: f32[1,32], index: 18, kind: input, shape index: {}]   ;;  %s7058_s19 = inlined_call_operand.vmem [shape: bf16[32,32], index: 19, kind: input, shape index: {}]   ;;  %s7059_s20 = inlined_call_operand.vmem [shape: f32[1,32], index: 20, kind: input, shape index: {}]   ;;  %s7060_s21 = inlined_call_operand.vmem [shape: bf16[32,32], index: 21, kind: input, shape index: {}]   ;;  %s7061_s22 = inlined_call_operand.vmem [shape: f32[1,32], index: 22, kind: input, shape index: {}]   ;;  %s7062_s23 = inlined_call_operand.hbm [shape: f32[2,32], index: 23, kind: output, shape index: {}]  }
   0x1   :  { %7089 = sst [smem:[#allocation8_spill]] %s7039_s0 }
   0x2   :  { %7090 = sst [smem:[#allocation9_spill]] %s7040_s1 }
   0x3   :  { %7091 = sst [smem:[#allocation10_spill]] %s7041_s2 }
   0x4   :  { %7092 = sst [smem:[#allocation11_spill]] %s7042_s3 }
   0x5   :  { %7093 = sst [smem:[#allocation12_spill]] %s7043_s4 }
   0x6   :  { %7094 = sst [smem:[#allocation13_spill]] %s7044_s5 }
   0x7   :  { %7095 = sst [smem:[#allocation14_spill]] %s7045_s6 }
   0x8   :  { %7096 = sst [smem:[#allocation15_spill]] %s7046_s7 }
   0x9   :  { %s7097_s24 = sld [smem:[#allocation9_spill]]  ;;  %v6021_v1 = vmov 0   ;;  %vm186_vm0 = vcmask 523264  }
   0xa   :  { %190 = vmatprep.subr.bf16.mxu0 %v6021_v1  ;;  %244 = vmatprep.subr.bf16.mxu1 %v6021_v1  ;;  %s7098_s28 = sld [smem:[#allocation8_spill]] }
   0xf   :  { %v5790_v0 = vld [vmem:[%s7097_s24 + $0x38] sm:$0xff]   ;;  %v5791_v2 = vld [vmem:[%s7097_s24 + $0x30] sm:$0xff]   ;;  %v5792_v3 = vld [vmem:[%s7097_s24 + $0x28] sm:$0xff]  }
  0x10   :  { %191 = vmatpush1.bf16.msra.mxu0 %v5790_v0  ;;  %245 = vmatpush1.bf16.msra.mxu1 %v5790_v0  ;;  %v5793_v4 = vld [vmem:[%s7097_s24 + $0x20] sm:$0xff]   ;;  %v105_v5 = vld [vmem:[%s7098_s28 + $0x8] sm:$0xff]  ;;  %v5064_v6 = vld [vmem:[%s7098_s28 + $0x18] sm:$0xff] }
  0x11   :  { %192 = vmatprep.subr.bf16.mxu0 %v6021_v1  ;;  %246 = vmatprep.subr.bf16.mxu1 %v6021_v1  ;;  %v5794_v7 = vld [vmem:[%s7097_s24 + $0x18] sm:$0xff]   ;;  %v107_v8 = vpack.c.bf16 %v105_v5, %v105_v5  ;;  %v240_v9 = vpack.c.bf16 %v5064_v6, %v5064_v6  ;;  %v5795_v10 = vld [vmem:[%s7097_s24 + $0x10] sm:$0xff]   ;;  %v5796_v11 = vld [vmem:[%s7097_s24 + $0x8] sm:$0xff]  }
  0x12   :  { %v5797_v12 = vld [vmem:[%s7097_s24] sm:$0xff]  }
  0x13   :  { %5062 = vmatprep.mubr.msk.bf16.mxu0 %vm186_vm0, %v107_v8  ;;  %5065 = vmatprep.mubr.msk.bf16.mxu1 %vm186_vm0, %v240_v9 }
  0x14   :  { %193 = vmatpush1.bf16.msra.mxu0 %v5791_v2  ;;  %247 = vmatpush1.bf16.msra.mxu1 %v5791_v2 }
  0x15   :  { %194 = vmatprep.subr.bf16.mxu0 %v6021_v1  ;;  %248 = vmatprep.subr.bf16.mxu1 %v6021_v1 }
  0x18   :  { %195 = vmatpush1.bf16.msra.mxu0 %v5792_v3  ;;  %249 = vmatpush1.bf16.msra.mxu1 %v5792_v3 }
  0x19   :  { %196 = vmatprep.subr.bf16.mxu0 %v6021_v1  ;;  %250 = vmatprep.subr.bf16.mxu1 %v6021_v1 }
  0x1c   :  { %197 = vmatpush1.bf16.msra.mxu0 %v5793_v4  ;;  %251 = vmatpush1.bf16.msra.mxu1 %v5793_v4 }
  0x1d   :  { %198 = vmatprep.subr.bf16.mxu0 %v6021_v1  ;;  %252 = vmatprep.subr.bf16.mxu1 %v6021_v1 }
  0x20   :  { %199 = vmatpush1.bf16.msra.mxu0 %v5794_v7  ;;  %253 = vmatpush1.bf16.msra.mxu1 %v5794_v7 }
  0x21   :  { %200 = vmatprep.subr.bf16.mxu0 %v6021_v1  ;;  %254 = vmatprep.subr.bf16.mxu1 %v6021_v1 }
  0x24   :  { %201 = vmatpush1.bf16.msra.mxu0 %v5795_v10  ;;  %255 = vmatpush1.bf16.msra.mxu1 %v5795_v10 }
  0x25   :  { %202 = vmatprep.subr.bf16.mxu0 %v6021_v1  ;;  %256 = vmatprep.subr.bf16.mxu1 %v6021_v1 }
  0x28   :  { %203 = vmatpush1.bf16.msra.mxu0 %v5796_v11  ;;  %257 = vmatpush1.bf16.msra.mxu1 %v5796_v11 }
  0x29   :  { %204 = vmatprep.subr.bf16.mxu0 %v6021_v1  ;;  %258 = vmatprep.subr.bf16.mxu1 %v6021_v1 }
  0x2a   :  { %28 = vsyncpa [#allocation6], 0  ;;  %v5798_v13 = vld [vmem:[%s7097_s24 + $0x58] sm:$0xff]   ;;  %v5799_v14 = vld [vmem:[%s7097_s24 + $0x50] sm:$0xff]   ;;  %s7099_s6 = sld [smem:[#allocation11_spill]]  ;;  %vm230_vm1 = vcmask 254976  }
  0x2b   :  { %v5800_v15 = vld [vmem:[%s7097_s24 + $0x48] sm:$0xff]   ;;  %v5801_v16 = vld [vmem:[%s7097_s24 + $0x40] sm:$0xff]   ;;  %v5063_v18 = vld [vmem:[%s7098_s28 + $0x10] sm:$0xff]  ;;  %s7100_s29 = sld [smem:[#allocation12_spill]]  ;;  %vm234_vm2 = vcmask 261120   ;;  %vm299_vm3 = vcmask 257024  }
  0x2c   :  { %205 = vmatpush1.bf16.msra.mxu0 %v5797_v12  ;;  %259 = vmatpush1.bf16.msra.mxu1 %v5797_v12  ;;  %v104_v17 = vld [vmem:[%s7098_s28] sm:$0xff]  ;;  %v239_v20 = vpack.c.bf16 %v5063_v18, %v5063_v18  ;;  %s7101_s0 = sld [smem:[#allocation10_spill]]  ;;  %vm434_vm4 = vcmask 781312   ;;  %vm431_vm5 = vcmask 785408   ;;  %vm446_vm6 = vcmask 64512   ;;  %s6022_s4 = smov 96  }
  0x2d   :  { %214 = vmatprep.subr.bf16.mxu0 %v6021_v1  ;;  %268 = vmatprep.subr.bf16.mxu1 %v6021_v1  ;;  %v106_v19 = vpack.c.bf16 %v104_v17, %v104_v17  ;;  %s7102_s1 = sld [smem:[#allocation15_spill]]  ;;  %s6023_s30 = smov 88   ;;  %vm536_vm7 = vcmask 74752   ;;  %vm532_vm8 = vcmask 80896   ;;  %vm567_vm9 = vcmask 1041408  }
  0x2e   :  { %s7103_s27 = sld [smem:[#allocation13_spill]]  ;;  %s6024_s25 = smov 120   ;;  %vm646_vm10 = vcmask 58368   ;;  %vm865_vm11 = vcmask 130112   ;;  %vm867_vm12 = vcmask 123968   ;;  %vm1086_vm13 = vcmask 195712  }
  0x2f   :  { %s7104_s28 = sld [smem:[#allocation14_spill]]  ;;  %s6025_s5 = smov 80   ;;  %vm1307_vm14 = vcmask 261312   ;;  %vm1088_vm15 = vcmask 189568  }
  0x30   :  { %215 = vmatpush2.bf16.msra.mxu0 %v5798_v13  ;;  %269 = vmatpush2.bf16.msra.mxu1 %v5798_v13  ;;  %v101_v21 = vld [vmem:[%s7099_s6] sm:$0x3]  ;;  %s7087_s26 = smov 112   ;;  %s7085_s2 = smov 64  }
  0x31   :  { %216 = vmatprep.subr.bf16.mxu0 %v6021_v1  ;;  %270 = vmatprep.subr.bf16.mxu1 %v6021_v1  ;;  %v102_v22 = vld [vmem:[%s7100_s29] sm:$0x3]  ;;  %v232_v26 = vld [vmem:[%s7100_s29 + $0x2] sm:$0xff]  ;;  %s7083_s24 = smov 56   ;;  %s7079_s6 = smov 48  }
  0x32   :  { %v103_v23 = vadd.f32 %v102_v22, %v101_v21  ;;  %v5049_v24 = vld [vmem:[%s7101_s0] ss:$0 sm:$0xff]  ;;  %s7071_s7 = smov 72   ;;  %s7069_s29 = smov 104  }
  0x33   :  { %v5802_v59 = vld [vmem:[%s7102_s1 + $0x8] sm:$0xff]   ;;  %v5803_v60 = vld [vmem:[%s7102_s1] sm:$0xff]   ;;  %s7077_s3 = smov 40   ;;  %s7075_s0 = smov 8  }
  0x34   :  { %217 = vmatpush2.bf16.msra.mxu0 %v5799_v14  ;;  %271 = vmatpush2.bf16.msra.mxu1 %v5799_v14  ;;  %231 = vst.msk [vmem:[#allocation2] sm:$0x3] %vm230_vm1, %v103_v23  ;;  %284 = vst.msk [vmem:[#allocation2 + $0xa] sm:$0x3] %vm230_vm1, %v103_v23  ;;  %v5066_v8 = vld [vmem:[%s7103_s27] ss:$0 sm:$0xff] }
  0x35   :  { %218 = vmatprep.subr.bf16.mxu0 %v6021_v1  ;;  %272 = vmatprep.subr.bf16.mxu1 %v6021_v1  ;;  %v5067_v14 = vld [vmem:[%s7104_s28] ss:$0 sm:$0xff]  ;;  %vm1309_vm1 = vcmask 255168  }
  0x36   :  { %v5068_v22 = vld [vmem:[%s7047_s8] ss:$0 sm:$0xff] }
  0x38   :  { %219 = vmatpush2.bf16.msra.mxu0 %v5800_v15  ;;  %273 = vmatpush2.bf16.msra.mxu1 %v5800_v15 }
  0x39   :  { %220 = vmatprep.subr.bf16.mxu0 %v6021_v1  ;;  %274 = vmatprep.subr.bf16.mxu1 %v6021_v1 }
  0x3c   :  { %221 = vmatpush2.bf16.msra.mxu0 %v5801_v16  ;;  %275 = vmatpush2.bf16.msra.mxu1 %v5801_v16 }
  0x3d   :  { %5444 = vmatprep.subr.bf16.mxu0 %v5802_v59 }
  0x3f   :  { %223 = vmatmul.mubr.bf16.vlgmr.msra.gmra.mxu0 %v106_v19  ;;  %277 = vmatmul.mubr.bf16.vlgmr.msra.gmra.mxu1 %v239_v20 }
  0x40   :  { %5445 = vmatpush3.bf16.msra.mxu0 %v5802_v59 }
  0x41   :  { %5446 = vmatprep.subr.bf16.mxu0 %v5803_v60 }
  0x44   :  { %5447 = vmatpush3.bf16.msra.mxu0 %v5803_v60 }
  0xff   :  { %v224_v25 = vpop.f32.mrf.mxu0  ;;  %v278_v27 = vpop.f32.mrf.mxu1 }
 0x100   :  { %v225_v28 = vadd.f32 %v5049_v24, %v224_v25  ;;  %v279_v29 = vadd.f32 %v5049_v24, %v278_v27 }
 0x101   :  { %v226_v30 = vpop.f32.mrf.mxu0  ;;  %v280_v31 = vpop.f32.mrf.mxu1 }
 0x102   :  { %v233_v32 = vadd.f32 %v232_v26, %v225_v28  ;;  %v286_v33 = vadd.f32 %v279_v29, %v232_v26 }
 0x103   :  { %v227_v34 = vpop.f32.mrf.mxu0  ;;  %v281_v35 = vpop.f32.mrf.mxu1 }
 0x104   :  { %235 = vst.msk [vmem:[#allocation2 + $0x2] sm:$0xff] %vm234_vm2, %v233_v32  ;;  %287 = vst.msk [vmem:[#allocation2 + $0xc] sm:$0xff] %vm234_vm2, %v286_v33 }
 0x105   :  { %v228_v36 = vpop.f32.mrf.mxu0  ;;  %v282_v37 = vpop.f32.mrf.mxu1 }
 0x10b   :  { %v290_v38 = vld [vmem:[#allocation2 + $0x10] sm:$0xf]  ;;  %v288_v39 = vld [vmem:[#allocation2] sm:$0xff]  ;;  %v289_v42 = vld [vmem:[#allocation2 + $0x8] sm:$0xff] }
 0x10c   :  { %v300_v40 = vsel %vm299_vm3, %v290_v38, 0.0  ;;  %v293_v41 = vsel %vm234_vm2, %v288_v39, 0.0  ;;  %v296_v43 = vsel %vm234_vm2, %v289_v42, 0.0 }
 0x10d   :  { %301 = vadd.xlane.f32.xlu1 %v300_v40  ;;  %294 = vadd.xlane.f32.xlu0 %v293_v41 }
 0x111   :  { %297 = vadd.xlane.f32.xlu0 %v296_v43 }
 0x196   :  { %v302_v44 = vpop.xlane.xlu1 %301  ;;  %v295_v45 = vpop.xlane.xlu0 %294 }
 0x197   :  { %v306_v46 = vmul.f32 0.03125, %v302_v44  ;;  %v304_v47 = vmul.f32 0.03125, %v295_v45 }
 0x199   :  { %v309_v48 = vsub.f32 %v290_v38, %v306_v46  ;;  %v307_v49 = vsub.f32 %v288_v39, %v304_v47 }
 0x19a   :  { %v298_v50 = vpop.xlane.xlu0 %297 }
 0x19b   :  { %v305_v51 = vmul.f32 0.03125, %v298_v50  ;;  %v310_v52 = vmul.f32 %v307_v49, %v307_v49  ;;  %v312_v55 = vmul.f32 %v309_v48, %v309_v48 }
 0x19d   :  { %v308_v53 = vsub.f32 %v289_v42, %v305_v51  ;;  %v313_v54 = vsel %vm234_vm2, %v310_v52, 0.0  ;;  %v319_v57 = vsel %vm299_vm3, %v312_v55, 0.0 }
 0x19e   :  { %314 = vadd.xlane.f32.xlu1 %v313_v54 }
 0x19f   :  { %v311_v56 = vmul.f32 %v308_v53, %v308_v53 }
 0x1a1   :  { %v316_v58 = vsel %vm234_vm2, %v311_v56, 0.0 }
 0x1a2   :  { %320 = vadd.xlane.f32.xlu1 %v319_v57  ;;  %317 = vadd.xlane.f32.xlu0 %v316_v58 }
 0x227   :  { %v315_v61 = vpop.xlane.xlu1 %314 }
 0x228   :  { %v322_v62 = vmul.f32 0.03125, %v315_v61 }
 0x22a   :  { %v325_v63 = vadd.f32 1e-06, %v322_v62 }
 0x22b   :  { %v321_v0 = vpop.xlane.xlu1 %320  ;;  %v318_v1 = vpop.xlane.xlu0 %317 }
 0x22c   :  { %5826 = vrsqrt.f32 %v325_v63  ;;  %v324_v2 = vmul.f32 0.03125, %v321_v0  ;;  %v323_v3 = vmul.f32 0.03125, %v318_v1 }
 0x22e   :  { %v327_v4 = vadd.f32 1e-06, %v324_v2  ;;  %v326_v5 = vadd.f32 1e-06, %v323_v3 }
 0x230   :  { %5828 = vrsqrt.f32 %v327_v4 }
 0x231   :  { %5830 = vrsqrt.f32 %v326_v5 }
 0x239   :  { %v5827_v6 = vpop.eup %5826 }
 0x23a   :  { %v331_v7 = vmul.f32 %v5827_v6, %v307_v49 }
 0x23c   :  { %v340_v13 = vmul.f32 %v5066_v8, %v331_v7 }
 0x23d   :  { %v5829_v9 = vpop.eup %5828 }
 0x23e   :  { %v5831_v10 = vpop.eup %5830  ;;  %v333_v11 = vmul.f32 %v5829_v9, %v309_v48  ;;  %v349_v18 = vadd.f32 %v5067_v14, %v340_v13 }
 0x23f   :  { %v332_v12 = vmul.f32 %v5831_v10, %v308_v53 }
 0x240   :  { %v342_v15 = vmul.f32 %v5066_v8, %v333_v11 }
 0x241   :  { %v341_v16 = vmul.f32 %v5066_v8, %v332_v12 }
 0x242   :  { %v351_v17 = vadd.f32 %v5067_v14, %v342_v15 }
 0x243   :  { %v350_v19 = vadd.f32 %v5067_v14, %v341_v16 }
 0x244   :  { %v358_v20 = vpack.c.bf16 %v351_v17, %v351_v17 }
 0x245   :  { %v357_v21 = vpack.c.bf16 %v350_v19, %v349_v18 }
 0x247   :  { %5448 = vmatprep.mubr.msk.bf16.mxu0 %vm234_vm2, %v357_v21 }
 0x248   :  { %5449 = vmatmul.mubr.msk.bf16.vlgmr.msra.gmra.mxu0 %vm234_vm2, %v358_v20 }
 0x308   :  { %v5450_v23 = vpop.f32.mrf.mxu0 }
 0x309   :  { %v426_v24 = vadd.f32 %v5450_v23, %v5068_v22 }
 0x30a   :  { %v417_v25 = vpop.f32.mrf.mxu0 }
 0x30b   :  { %435 = vst.msk [vmem:[#allocation3 + $0x10] sm:$0xf] %vm434_vm4, %v426_v24  ;;  %v418_v26 = vadd.f32 %v5068_v22, %v417_v25 }
 0x30c   :  { %v5451_v27 = vpop.f32.mrf.mxu0 }
 0x30d   :  { %432 = vst.msk [vmem:[#allocation3] sm:$0xff] %vm431_vm5, %v418_v26 }
 0x30e   :  { %v420_v28 = vpop.f32.mrf.mxu0 }
 0x30f   :  { %v421_v29 = vadd.f32 %v5068_v22, %v420_v28 }
 0x311   :  { %433 = vst.msk [vmem:[#allocation3 + $0x8] sm:$0xff] %vm431_vm5, %v421_v29 }
 0x314   :  { %v6273_v30 = vld [vmem:[#allocation3] sm:$0xff] }
 0x315   :  { %442 = vrot.lane.b32.xlu1 %v6273_v30, %s6022_s4  ;;  %v6278_v31 = vmul.f32 0.35355338, %v6273_v30 }
 0x317   :  { %5456 = vmatprep.mubr.msk.f32.mxu1 %vm446_vm6, %v6278_v31 }
 0x318   :  { %v6282_v32 = vld [vmem:[#allocation3 + $0x8] sm:$0x3] }
 0x319   :  { %v6284_v33 = vld [vmem:[#allocation3 + $0x8] sm:$0x3]  ;;  %444 = vrot.lane.b32.xlu0 %v6282_v32, %s6022_s4  ;;  %v439_v42 = vmul.f32 0.35355338, %v6282_v32 }
 0x31a   :  { %662 = vrot.lane.b32.xlu1 %v6284_v33, %s6023_s30  ;;  %v651_v34 = vmul.f32 0.35355338, %v6284_v33  ;;  %v6295_v35 = vld [vmem:[#allocation3 + $0x8] sm:$0x3] }
 0x31b   :  { %v872_v36 = vmul.f32 0.35355338, %v6295_v35  ;;  %v6351_v29 = vld [vmem:[#allocation3 + $0x8] sm:$0x3] }
 0x31d   :  { %654 = vrot.lane.b32.xlu0 %v6278_v31, %s6024_s25 }
 0x31e   :  { %660 = vrot.lane.b32.xlu1 %v6273_v30, %s6023_s30 }
 0x321   :  { %656 = vrot.lane.b32.xlu0 %v651_v34, %s6024_s25 }
 0x322   :  { %883 = vrot.lane.b32.xlu1 %v6295_v35, %s6025_s5 }
 0x325   :  { %875 = vrot.lane.b32.xlu0 %v6278_v31, %s7087_s26 }
 0x326   :  { %881 = vrot.lane.b32.xlu1 %v6273_v30, %s6025_s5 }
 0x32a   :  { %877 = vrot.lane.b32.xlu1 %v872_v36, %s7087_s26 }
 0x387   :  { %v443_v37 = vpop.permute.xlu1 %442 }
 0x38b   :  { %v445_v38 = vpop.permute.xlu0 %444 }
 0x38c   :  { %v663_v39 = vpop.permute.xlu1 %662  ;;  %5452 = vmatprep.subr.msk.mxu1 %vm446_vm6, %v445_v38 }
 0x38d   :  { %5466 = vmatprep.subr.msk.mxu0 %vm446_vm6, %v663_v39  ;;  %5453 = vmatpush3.xpose.msk.msra.mxu1 %vm446_vm6, %v445_v38 }
 0x38e   :  { %5467 = vmatpush3.xpose.msk.msra.mxu0 %vm446_vm6, %v663_v39  ;;  %5454 = vmatprep.subr.msk.mxu1 %vm446_vm6, %v443_v37 }
 0x38f   :  { %v655_v40 = vpop.permute.xlu0 %654 }
 0x390   :  { %v661_v41 = vpop.permute.xlu1 %660  ;;  %5470 = vmatprep.mubr.msk.f32.mxu0 %vm446_vm6, %v655_v40 }
 0x391   :  { %5468 = vmatprep.subr.msk.mxu0 %vm446_vm6, %v661_v41  ;;  %5455 = vmatpush3.xpose.msk.msra.mxu1 %vm446_vm6, %v443_v37 }
 0x392   :  { %5469 = vmatpush3.xpose.msk.msra.mxu0 %vm446_vm6, %v661_v41 }
 0x393   :  { %v657_v43 = vpop.permute.xlu0 %656 }
 0x394   :  { %v884_v44 = vpop.permute.xlu1 %883  ;;  %5457 = vmatmul.mubr.msk.f32.vlgmr.msra.gmra.mxu1 %vm446_vm6, %v439_v42 }
 0x395   :  { %5471 = vmatmul.mubr.msk.f32.vlgmr.msra.gmra.mxu0 %vm446_vm6, %v657_v43  ;;  %5480 = vmatprep.subr.msk.mxu0 %vm446_vm6, %v884_v44 }
 0x396   :  { %5481 = vmatpush3.xpose.msk.msra.mxu0 %vm446_vm6, %v884_v44 }
 0x397   :  { %v876_v45 = vpop.permute.xlu0 %875 }
 0x398   :  { %v882_v46 = vpop.permute.xlu1 %881  ;;  %5484 = vmatprep.mubr.msk.f32.mxu0 %vm446_vm6, %v876_v45 }
 0x399   :  { %5482 = vmatprep.subr.msk.mxu0 %vm446_vm6, %v882_v46 }
 0x39a   :  { %5483 = vmatpush3.xpose.msk.msra.mxu0 %vm446_vm6, %v882_v46 }
 0x39c   :  { %v878_v47 = vpop.permute.xlu1 %877 }
 0x39d   :  { %5485 = vmatmul.mubr.msk.f32.vlgmr.msra.gmra.mxu0 %vm446_vm6, %v878_v47 }
 0x454   :  { %v5458_v48 = vpop.f32.mrf.mxu1 }
 0x455   :  { %v5472_v49 = vpop.f32.mrf.mxu0  ;;  %v537_v51 = vsel %vm536_vm7, %v5458_v48, -inf }
 0x456   :  { %v750_v50 = vsel %vm536_vm7, %v5472_v49, -inf  ;;  %538 = vmax.xlane.f32.xlu1 %v537_v51  ;;  %v523_v52 = vpop.f32.mrf.mxu1 }
 0x457   :  { %751 = vmax.xlane.f32.xlu0 %v750_v50  ;;  %v533_v53 = vsel %vm532_vm8, %v523_v52, -inf  ;;  %v738_v54 = vpop.f32.mrf.mxu0 }
 0x458   :  { %v747_v56 = vsel %vm532_vm8, %v738_v54, -inf }
 0x45b   :  { %534 = vmax.xlane.f32.xlu0 %v533_v53 }
 0x45d   :  { %v5486_v55 = vpop.f32.mrf.mxu0 }
 0x45e   :  { %v971_v57 = vsel %vm536_vm7, %v5486_v55, -inf }
 0x45f   :  { %748 = vmax.xlane.f32.xlu0 %v747_v56  ;;  %v959_v58 = vpop.f32.mrf.mxu0  ;;  %972 = vmax.xlane.f32.xlu1 %v971_v57 }
 0x460   :  { %v968_v59 = vsel %vm532_vm8, %v959_v58, -inf }
 0x463   :  { %969 = vmax.xlane.f32.xlu0 %v968_v59 }
 0x470   :  { %556 = vrot.lane.b32.xlu1 %v6273_v30, %s7085_s2 }
 0x474   :  { %771 = vrot.lane.b32.xlu1 %v6284_v33, %s7083_s24 }
 0x478   :  { %769 = vrot.lane.b32.xlu1 %v6273_v30, %s7083_s24 }
 0x479   :  { %558 = vrot.lane.b32.xlu0 %v6282_v32, %s7085_s2  ;;  %v1093_v32 = vmul.f32 0.35355338, %v6351_v29 }
 0x47c   :  { %990 = vrot.lane.b32.xlu1 %v6273_v30, %s7079_s6 }
 0x47d   :  { %992 = vrot.lane.b32.xlu0 %v6295_v35, %s7079_s6 }
 0x4df   :  { %v539_v61 = vpop.xlane.xlu1 %538 }
 0x4e0   :  { %v752_v60 = vpop.xlane.xlu0 %751  ;;  %v541_v63 = vsub.f32 %v5458_v48, %v539_v61 }
 0x4e1   :  { %v754_v62 = vsub.f32 %v5472_v49, %v752_v60 }
 0x4e2   :  { %v544_v0 = vmul.f32 1.442695, %v541_v63 }
 0x4e3   :  { %v757_v1 = vmul.f32 1.442695, %v754_v62 }
 0x4e4   :  { %v535_v2 = vpop.xlane.xlu0 %534  ;;  %5832 = vpow2.f32 %v544_v0 }
 0x4e5   :  { %v540_v3 = vsub.f32 %v523_v52, %v535_v2  ;;  %5834 = vpow2.f32 %v757_v1 }
 0x4e7   :  { %v542_v4 = vmul.f32 1.442695, %v540_v3  ;;  %v6390_v3 = vld [vmem:[#allocation3 + $0x12] sm:$0x3] }
 0x4e8   :  { %v749_v5 = vpop.xlane.xlu0 %748  ;;  %v973_v6 = vpop.xlane.xlu1 %972 }
 0x4e9   :  { %5836 = vpow2.f32 %v542_v4  ;;  %v753_v7 = vsub.f32 %v738_v54, %v749_v5  ;;  %v975_v8 = vsub.f32 %v5486_v55, %v973_v6  ;;  %v6394_v4 = vld [vmem:[#allocation3 + $0xa] sm:$0xff] }
 0x4eb   :  { %v755_v9 = vmul.f32 1.442695, %v753_v7  ;;  %v978_v10 = vmul.f32 1.442695, %v975_v8 }
 0x4ec   :  { %v970_v11 = vpop.xlane.xlu0 %969  ;;  %v557_v13 = vpop.permute.xlu1 %556 }
 0x4ed   :  { %5838 = vpow2.f32 %v755_v9  ;;  %v974_v12 = vsub.f32 %v959_v58, %v970_v11 }
 0x4ee   :  { %5840 = vpow2.f32 %v978_v10 }
 0x4ef   :  { %v976_v14 = vmul.f32 1.442695, %v974_v12 }
 0x4f0   :  { %v559_v15 = vpop.permute.xlu0 %558  ;;  %v772_v17 = vpop.permute.xlu1 %771 }
 0x4f1   :  { %5842 = vpow2.f32 %v976_v14  ;;  %5459 = vmatprep.subr.msk.mxu1 %vm567_vm9, %v559_v15  ;;  %v5833_v16 = vpop.eup %5832 }
 0x4f2   :  { %5460 = vmatpush3.msk.msra.mxu1 %vm567_vm9, %v559_v15  ;;  %v549_v18 = vsel %vm536_vm7, %v5833_v16, 0.0  ;;  %v5835_v19 = vpop.eup %5834 }
 0x4f3   :  { %5461 = vmatprep.subr.mxu1 %v557_v13  ;;  %550 = vadd.xlane.f32.xlu1 %v549_v18  ;;  %v762_v22 = vsel %vm536_vm7, %v5835_v19, 0.0 }
 0x4f4   :  { %5462 = vmatpush3.msra.mxu1 %v557_v13  ;;  %v770_v33 = vpop.permute.xlu1 %769  ;;  %v993_v35 = vpop.permute.xlu0 %992 }
 0x4f5   :  { %5473 = vmatprep.subr.msk.mxu1 %vm567_vm9, %v772_v17 }
 0x4f6   :  { %v5837_v20 = vpop.eup %5836 }
 0x4f7   :  { %v546_v21 = vsel %vm532_vm8, %v5837_v20, 0.0  ;;  %763 = vadd.xlane.f32.xlu1 %v762_v22 }
 0x4f8   :  { %547 = vadd.xlane.f32.xlu0 %v546_v21  ;;  %v991_v34 = vpop.permute.xlu1 %990 }
 0x4fa   :  { %v5839_v23 = vpop.eup %5838 }
 0x4fb   :  { %v5841_v24 = vpop.eup %5840  ;;  %v759_v25 = vsel %vm532_vm8, %v5839_v23, 0.0 }
 0x4fc   :  { %v983_v26 = vsel %vm536_vm7, %v5841_v24, 0.0  ;;  %760 = vadd.xlane.f32.xlu0 %v759_v25  ;;  %v1314_v25 = vmul.f32 0.35355338, %v6390_v3 }
 0x4fd   :  { %984 = vadd.xlane.f32.xlu1 %v983_v26 }
 0x4fe   :  { %v5843_v27 = vpop.eup %5842 }
 0x4ff   :  { %v980_v28 = vsel %vm532_vm8, %v5843_v27, 0.0 }
 0x500   :  { %981 = vadd.xlane.f32.xlu0 %v980_v28 }
 0x50e   :  { %1102 = vrot.lane.b32.xlu1 %v6273_v30, %s7071_s7 }
 0x512   :  { %1098 = vrot.lane.b32.xlu1 %v1093_v32, %s7069_s29 }
 0x516   :  { %1104 = vrot.lane.b32.xlu0 %v6351_v29, %s7071_s7 }
 0x51a   :  { %1096 = vrot.lane.b32.xlu0 %v6278_v31, %s7069_s29 }
 0x57c   :  { %v551_v36 = vpop.xlane.xlu1 %550 }
 0x57d   :  { %5844 = vrcp.f32 %v551_v36 }
 0x580   :  { %v764_v38 = vpop.xlane.xlu1 %763 }
 0x581   :  { %v548_v37 = vpop.xlane.xlu0 %547 }
 0x582   :  { %5846 = vrcp.f32 %v548_v37 }
 0x583   :  { %5848 = vrcp.f32 %v764_v38 }
 0x585   :  { %v761_v39 = vpop.xlane.xlu0 %760 }
 0x586   :  { %v985_v40 = vpop.xlane.xlu1 %984  ;;  %5850 = vrcp.f32 %v761_v39 }
 0x587   :  { %5852 = vrcp.f32 %v985_v40 }
 0x589   :  { %v982_v41 = vpop.xlane.xlu0 %981 }
 0x58a   :  { %5854 = vrcp.f32 %v982_v41  ;;  %v5845_v42 = vpop.eup %5844  ;;  %v1103_v55 = vpop.permute.xlu1 %1102 }
 0x58b   :  { %v555_v45 = vmul.f32 %v5845_v42, %v5833_v16 }
 0x58d   :  { %v1105_v48 = vpop.permute.xlu0 %1104 }
 0x58e   :  { %v1099_v56 = vpop.permute.xlu1 %1098 }
 0x58f   :  { %v5847_v43 = vpop.eup %5846 }
 0x590   :  { %v554_v44 = vmul.f32 %v5847_v43, %v5837_v20  ;;  %v5849_v31 = vpop.eup %5848 }
 0x591   :  { %v768_v49 = vmul.f32 %v5849_v31, %v5835_v19  ;;  %v1097_v54 = vpop.permute.xlu0 %1096 }
 0x592   :  { %5463 = vmatprep.mubr.msk.f32.mxu1 %vm532_vm8, %v554_v44 }
 0x593   :  { %v5851_v46 = vpop.eup %5850  ;;  %5464 = vmatmul.mubr.msk.f32.vlgmr.msra.gmra.mxu1 %vm532_vm8, %v555_v45 }
 0x594   :  { %5474 = vmatpush3.msk.msra.mxu1 %vm567_vm9, %v772_v17  ;;  %v767_v47 = vmul.f32 %v5851_v46, %v5839_v23  ;;  %v5853_v50 = vpop.eup %5852  ;;  %v6407_v23 = vmul.f32 0.35355338, %v6394_v4 }
 0x595   :  { %5475 = vmatprep.subr.mxu1 %v770_v33  ;;  %v989_v53 = vmul.f32 %v5853_v50, %v5841_v24 }
 0x596   :  { %5476 = vmatpush3.msra.mxu1 %v770_v33  ;;  %5477 = vmatprep.mubr.msk.f32.mxu1 %vm532_vm8, %v767_v47 }
 0x597   :  { %v5855_v51 = vpop.eup %5854  ;;  %5487 = vmatprep.subr.msk.mxu1 %vm567_vm9, %v993_v35  ;;  %5478 = vmatmul.mubr.msk.f32.vlgmr.msra.gmra.mxu1 %vm532_vm8, %v768_v49 }
 0x598   :  { %5488 = vmatpush3.msk.msra.mxu1 %vm567_vm9, %v993_v35  ;;  %v988_v52 = vmul.f32 %v5855_v51, %v5843_v27 }
 0x599   :  { %5489 = vmatprep.subr.mxu1 %v991_v34 }
 0x59a   :  { %5490 = vmatpush3.msra.mxu1 %v991_v34  ;;  %5491 = vmatprep.mubr.msk.f32.mxu1 %vm532_vm8, %v988_v52  ;;  %v6425_v34 = vld [vmem:[#allocation3 + $0x12] sm:$0x3] }
 0x59b   :  { %5494 = vmatprep.subr.msk.mxu1 %vm446_vm6, %v1105_v48  ;;  %5492 = vmatmul.mubr.msk.f32.vlgmr.msra.gmra.mxu1 %vm532_vm8, %v989_v53  ;;  %v1521_v35 = vmul.f32 0.35355338, %v6425_v34 }
 0x59c   :  { %5495 = vmatpush3.xpose.msk.msra.mxu1 %vm446_vm6, %v1105_v48  ;;  %5498 = vmatprep.mubr.msk.f32.mxu1 %vm446_vm6, %v1097_v54 }
 0x59d   :  { %5496 = vmatprep.subr.msk.mxu1 %vm446_vm6, %v1103_v55 }
 0x5a0   :  { %5497 = vmatpush3.xpose.msk.msra.mxu1 %vm446_vm6, %v1103_v55 }
 0x5a3   :  { %5499 = vmatmul.mubr.msk.f32.vlgmr.msra.gmra.mxu1 %vm446_vm6, %v1099_v56 }
 0x653   :  { %v5465_v57 = vpop.f32.mrf.mxu1 }
 0x654   :  { %647 = vst.msk [vmem:[#allocation4 + $0x8] sm:$0x3] %vm646_vm10, %v5465_v57 }
 0x655   :  { %v636_v58 = vpop.f32.mrf.mxu1 }
 0x656   :  { %645 = vst.msk [vmem:[#allocation4] sm:$0xff] %vm446_vm6, %v636_v58 }
 0x657   :  { %v6378_v59 = vpop.f32.mrf.mxu1 }
 0x659   :  { %v6380_v60 = vpop.f32.mrf.mxu1 }
 0x65b   :  { %v6382_v61 = vpop.f32.mrf.mxu1 }
 0x65d   :  { %v6384_v62 = vpop.f32.mrf.mxu1 }
 0x663   :  { %v5500_v63 = vpop.f32.mrf.mxu1 }
 0x664   :  { %v1192_v0 = vsel %vm536_vm7, %v5500_v63, -inf }
 0x665   :  { %1193 = vmax.xlane.f32.xlu1 %v1192_v0  ;;  %v1180_v1 = vpop.f32.mrf.mxu1 }
 0x666   :  { %v1189_v2 = vsel %vm532_vm8, %v1180_v1, -inf }
 0x667   :  { %1190 = vmax.xlane.f32.xlu0 %v1189_v2 }
 0x676   :  { %1211 = vrot.lane.b32.xlu1 %v6273_v30, %s7077_s3 }
 0x67a   :  { %1319 = vrot.lane.b32.xlu1 %v6390_v3, %s6022_s4 }
 0x67e   :  { %1317 = vrot.lane.b32.xlu1 %v6394_v4, %s6022_s4 }
 0x6ee   :  { %v1194_v5 = vpop.xlane.xlu1 %1193 }
 0x6ef   :  { %v1196_v6 = vsub.f32 %v5500_v63, %v1194_v5 }
 0x6f0   :  { %v1191_v7 = vpop.xlane.xlu0 %1190 }
 0x6f1   :  { %v1199_v8 = vmul.f32 1.442695, %v1196_v6  ;;  %v1195_v9 = vsub.f32 %v1180_v1, %v1191_v7 }
 0x6f2   :  { %v1212_v16 = vpop.permute.xlu1 %1211 }
 0x6f3   :  { %5856 = vpow2.f32 %v1199_v8  ;;  %v1197_v10 = vmul.f32 1.442695, %v1195_v9 }
 0x6f5   :  { %5858 = vpow2.f32 %v1197_v10 }
 0x6f6   :  { %v1320_v18 = vpop.permute.xlu1 %1319 }
 0x6fa   :  { %v1318_v24 = vpop.permute.xlu1 %1317 }
 0x700   :  { %v5857_v11 = vpop.eup %5856 }
 0x701   :  { %v1204_v30 = vsel %vm536_vm7, %v5857_v11, 0.0 }
 0x702   :  { %v5859_v12 = vpop.eup %5858  ;;  %1205 = vadd.xlane.f32.xlu0 %v1204_v30 }
 0x703   :  { %v1201_v13 = vsel %vm532_vm8, %v5859_v12, 0.0 }
 0x706   :  { %1202 = vadd.xlane.f32.xlu0 %v1201_v13 }
 0x71c   :  { %1213 = vrot.lane.b32.xlu0 %v6351_v29, %s7077_s3 }
 0x78b   :  { %v1206_v14 = vpop.xlane.xlu0 %1205 }
 0x78c   :  { %5860 = vrcp.f32 %v1206_v14 }
 0x78f   :  { %v1203_v15 = vpop.xlane.xlu0 %1202 }
 0x790   :  { %5862 = vrcp.f32 %v1203_v15 }
 0x793   :  { %v1214_v17 = vpop.permute.xlu0 %1213 }
 0x794   :  { %5501 = vmatprep.subr.msk.mxu0 %vm567_vm9, %v1214_v17 }
 0x795   :  { %5502 = vmatpush3.msk.msra.mxu0 %vm567_vm9, %v1214_v17 }
 0x796   :  { %5503 = vmatprep.subr.mxu0 %v1212_v16 }
 0x797   :  { %5504 = vmatpush3.msra.mxu0 %v1212_v16 }
 0x798   :  { %5508 = vmatprep.subr.msk.mxu0 %vm446_vm6, %v1320_v18 }
 0x799   :  { %v5861_v19 = vpop.eup %5860 }
 0x79a   :  { %v1210_v22 = vmul.f32 %v5861_v19, %v5857_v11 }
 0x79d   :  { %v5863_v20 = vpop.eup %5862 }
 0x79e   :  { %v1209_v21 = vmul.f32 %v5863_v20, %v5859_v12 }
 0x7a0   :  { %5505 = vmatprep.mubr.msk.f32.mxu0 %vm532_vm8, %v1209_v21 }
 0x7a1   :  { %5506 = vmatmul.mubr.msk.f32.vlgmr.msra.gmra.mxu0 %vm532_vm8, %v1210_v22 }
 0x7a2   :  { %5509 = vmatpush3.xpose.msk.msra.mxu0 %vm446_vm6, %v1320_v18  ;;  %5512 = vmatprep.mubr.msk.f32.mxu0 %vm446_vm6, %v6407_v23 }
 0x7a3   :  { %5510 = vmatprep.subr.msk.mxu0 %vm446_vm6, %v1318_v24 }
 0x7a6   :  { %5511 = vmatpush3.xpose.msk.msra.mxu0 %vm446_vm6, %v1318_v24 }
 0x7a9   :  { %5513 = vmatmul.mubr.msk.f32.vlgmr.msra.gmra.mxu0 %vm446_vm6, %v1314_v25 }
 0x861   :  { %v6417_v26 = vpop.f32.mrf.mxu0 }
 0x863   :  { %v6419_v27 = vpop.f32.mrf.mxu0 }
 0x869   :  { %v5514_v28 = vpop.f32.mrf.mxu0 }
 0x86a   :  { %v1409_v29 = vsel %vm536_vm7, %v5514_v28, -inf }
 0x86b   :  { %1410 = vmax.xlane.f32.xlu1 %v1409_v29  ;;  %v1397_v32 = vpop.f32.mrf.mxu0 }
 0x86c   :  { %v1406_v33 = vsel %vm532_vm8, %v1397_v32, -inf }
 0x86d   :  { %1407 = vmax.xlane.f32.xlu0 %v1406_v33 }
 0x87c   :  { %1428 = vrot.lane.b32.xlu1 %v6394_v4, %s7085_s2 }
 0x880   :  { %1532 = vrot.lane.b32.xlu1 %v6425_v34, %s6023_s30 }
 0x884   :  { %1530 = vrot.lane.b32.xlu1 %v6394_v4, %s6023_s30 }
 0x888   :  { %1526 = vrot.lane.b32.xlu1 %v1521_v35, %s6024_s25 }
 0x8f4   :  { %v1411_v36 = vpop.xlane.xlu1 %1410 }
 0x8f5   :  { %v1413_v37 = vsub.f32 %v5514_v28, %v1411_v36 }
 0x8f6   :  { %v1408_v38 = vpop.xlane.xlu0 %1407 }
 0x8f7   :  { %v1416_v39 = vmul.f32 1.442695, %v1413_v37  ;;  %v1412_v40 = vsub.f32 %v1397_v32, %v1408_v38  ;;  %v6487_v38 = vld [vmem:[#allocation3 + $0x12] sm:$0x3] }
 0x8f8   :  { %v1429_v47 = vpop.permute.xlu1 %1428 }
 0x8f9   :  { %5864 = vpow2.f32 %v1416_v39  ;;  %v1414_v41 = vmul.f32 1.442695, %v1412_v40  ;;  %v1959_v39 = vmul.f32 0.35355338, %v6487_v38 }
 0x8fb   :  { %5866 = vpow2.f32 %v1414_v41 }
 0x8fc   :  { %v1533_v49 = vpop.permute.xlu1 %1532 }
 0x900   :  { %v1531_v55 = vpop.permute.xlu1 %1530 }
 0x904   :  { %v1527_v56 = vpop.permute.xlu1 %1526 }
 0x906   :  { %v5865_v42 = vpop.eup %5864 }
 0x907   :  { %v1421_v43 = vsel %vm536_vm7, %v5865_v42, 0.0 }
 0x908   :  { %v5867_v44 = vpop.eup %5866  ;;  %1422 = vadd.xlane.f32.xlu0 %v1421_v43 }
 0x909   :  { %v1418_v45 = vsel %vm532_vm8, %v5867_v44, 0.0 }
 0x90c   :  { %1419 = vadd.xlane.f32.xlu0 %v1418_v45 }
 0x922   :  { %1430 = vrot.lane.b32.xlu0 %v6390_v3, %s7085_s2  ;;  %v6455_v3 = vld [vmem:[#allocation3 + $0x12] sm:$0x3] }
 0x923   :  { %v1740_v5 = vmul.f32 0.35355338, %v6455_v3 }
 0x926   :  { %1524 = vrot.lane.b32.xlu0 %v6407_v23, %s6024_s25 }
 0x991   :  { %v1423_v31 = vpop.xlane.xlu0 %1422 }
 0x992   :  { %5868 = vrcp.f32 %v1423_v31 }
 0x995   :  { %v1420_v46 = vpop.xlane.xlu0 %1419 }
 0x996   :  { %5870 = vrcp.f32 %v1420_v46 }
 0x999   :  { %v1431_v48 = vpop.permute.xlu0 %1430 }
 0x99a   :  { %5515 = vmatprep.subr.msk.mxu1 %vm567_vm9, %v1431_v48 }
 0x99b   :  { %5516 = vmatpush3.msk.msra.mxu1 %vm567_vm9, %v1431_v48 }
 0x99c   :  { %5517 = vmatprep.subr.mxu1 %v1429_v47 }
 0x99d   :  { %5518 = vmatpush3.msra.mxu1 %v1429_v47  ;;  %v1525_v54 = vpop.permute.xlu0 %1524 }
 0x99e   :  { %5522 = vmatprep.subr.msk.mxu1 %vm446_vm6, %v1533_v49 }
 0x99f   :  { %v5869_v50 = vpop.eup %5868 }
 0x9a0   :  { %v1427_v53 = vmul.f32 %v5869_v50, %v5865_v42 }
 0x9a3   :  { %v5871_v51 = vpop.eup %5870 }
 0x9a4   :  { %v1426_v52 = vmul.f32 %v5871_v51, %v5867_v44 }
 0x9a6   :  { %5519 = vmatprep.mubr.msk.f32.mxu1 %vm532_vm8, %v1426_v52 }
 0x9a7   :  { %5520 = vmatmul.mubr.msk.f32.vlgmr.msra.gmra.mxu1 %vm532_vm8, %v1427_v53 }
 0x9a8   :  { %5523 = vmatpush3.xpose.msk.msra.mxu1 %vm446_vm6, %v1533_v49  ;;  %5526 = vmatprep.mubr.msk.f32.mxu1 %vm446_vm6, %v1525_v54 }
 0x9a9   :  { %5524 = vmatprep.subr.msk.mxu1 %vm446_vm6, %v1531_v55 }
 0x9ac   :  { %5525 = vmatpush3.xpose.msk.msra.mxu1 %vm446_vm6, %v1531_v55 }
 0x9af   :  { %5527 = vmatmul.mubr.msk.f32.vlgmr.msra.gmra.mxu1 %vm446_vm6, %v1527_v56 }
 0xa67   :  { %v5521_v57 = vpop.f32.mrf.mxu1 }
 0xa68   :  { %1517 = vst.msk [vmem:[#allocation4 + $0x12] sm:$0x3] %vm646_vm10, %v5521_v57 }
 0xa69   :  { %v1507_v58 = vpop.f32.mrf.mxu1 }
 0xa6a   :  { %1516 = vst.msk [vmem:[#allocation4 + $0xa] sm:$0xff] %vm446_vm6, %v1507_v58 }
 0xa6f   :  { %v5528_v63 = vpop.f32.mrf.mxu1 }
 0xa70   :  { %v1620_v0 = vsel %vm536_vm7, %v5528_v63, -inf }
 0xa71   :  { %1621 = vmax.xlane.f32.xlu1 %v1620_v0  ;;  %v1608_v1 = vpop.f32.mrf.mxu1 }
 0xa72   :  { %v1617_v2 = vsel %vm532_vm8, %v1608_v1, -inf }
 0xa73   :  { %1618 = vmax.xlane.f32.xlu0 %v1617_v2 }
 0xa82   :  { %1639 = vrot.lane.b32.xlu1 %v6394_v4, %s7083_s24 }
 0xa86   :  { %1751 = vrot.lane.b32.xlu1 %v6455_v3, %s6025_s5 }
 0xa8a   :  { %1749 = vrot.lane.b32.xlu1 %v6394_v4, %s6025_s5 }
 0xa8e   :  { %1745 = vrot.lane.b32.xlu1 %v1740_v5, %s7087_s26 }
 0xafa   :  { %v1622_v6 = vpop.xlane.xlu1 %1621 }
 0xafb   :  { %v1624_v7 = vsub.f32 %v5528_v63, %v1622_v6 }
 0xafc   :  { %v1619_v8 = vpop.xlane.xlu0 %1618 }
 0xafd   :  { %v1627_v9 = vmul.f32 1.442695, %v1624_v7  ;;  %v1623_v10 = vsub.f32 %v1608_v1, %v1619_v8 }
 0xafe   :  { %v1640_v17 = vpop.permute.xlu1 %1639 }
 0xaff   :  { %5872 = vpow2.f32 %v1627_v9  ;;  %v1625_v11 = vmul.f32 1.442695, %v1623_v10 }
 0xb01   :  { %5874 = vpow2.f32 %v1625_v11 }
 0xb02   :  { %v1752_v19 = vpop.permute.xlu1 %1751 }
 0xb06   :  { %v1750_v28 = vpop.permute.xlu1 %1749 }
 0xb0a   :  { %v1746_v29 = vpop.permute.xlu1 %1745 }
 0xb0c   :  { %v5873_v30 = vpop.eup %5872 }
 0xb0d   :  { %v1632_v12 = vsel %vm536_vm7, %v5873_v30, 0.0 }
 0xb0e   :  { %v5875_v13 = vpop.eup %5874  ;;  %1633 = vadd.xlane.f32.xlu0 %v1632_v12 }
 0xb0f   :  { %v1629_v14 = vsel %vm532_vm8, %v5875_v13, 0.0 }
 0xb12   :  { %1630 = vadd.xlane.f32.xlu0 %v1629_v14 }
 0xb28   :  { %1641 = vrot.lane.b32.xlu0 %v6425_v34, %s7083_s24  ;;  %s7107_s24 = smov 56  }
 0xb2c   :  { %1743 = vrot.lane.b32.xlu0 %v6407_v23, %s7087_s26 }
 0xb97   :  { %v1634_v15 = vpop.xlane.xlu0 %1633 }
 0xb98   :  { %5876 = vrcp.f32 %v1634_v15 }
 0xb9b   :  { %v1631_v16 = vpop.xlane.xlu0 %1630 }
 0xb9c   :  { %5878 = vrcp.f32 %v1631_v16 }
 0xb9f   :  { %v1642_v18 = vpop.permute.xlu0 %1641 }
 0xba0   :  { %5529 = vmatprep.subr.msk.mxu0 %vm567_vm9, %v1642_v18 }
 0xba1   :  { %5530 = vmatpush3.msk.msra.mxu0 %vm567_vm9, %v1642_v18 }
 0xba2   :  { %5531 = vmatprep.subr.mxu0 %v1640_v17 }
 0xba3   :  { %5532 = vmatpush3.msra.mxu0 %v1640_v17  ;;  %v1744_v25 = vpop.permute.xlu0 %1743 }
 0xba4   :  { %5536 = vmatprep.subr.msk.mxu0 %vm446_vm6, %v1752_v19 }
 0xba5   :  { %v5877_v20 = vpop.eup %5876 }
 0xba6   :  { %v1638_v24 = vmul.f32 %v5877_v20, %v5873_v30 }
 0xba9   :  { %v5879_v21 = vpop.eup %5878 }
 0xbaa   :  { %v1637_v22 = vmul.f32 %v5879_v21, %v5875_v13 }
 0xbac   :  { %5533 = vmatprep.mubr.msk.f32.mxu0 %vm532_vm8, %v1637_v22 }
 0xbad   :  { %5534 = vmatmul.mubr.msk.f32.vlgmr.msra.gmra.mxu0 %vm532_vm8, %v1638_v24 }
 0xbae   :  { %5537 = vmatpush3.xpose.msk.msra.mxu0 %vm446_vm6, %v1752_v19  ;;  %5540 = vmatprep.mubr.msk.f32.mxu0 %vm446_vm6, %v1744_v25 }
 0xbaf   :  { %5538 = vmatprep.subr.msk.mxu0 %vm446_vm6, %v1750_v28 }
 0xbb2   :  { %5539 = vmatpush3.xpose.msk.msra.mxu0 %vm446_vm6, %v1750_v28 }
 0xbb5   :  { %5541 = vmatmul.mubr.msk.f32.vlgmr.msra.gmra.mxu0 %vm446_vm6, %v1746_v29 }
 0xc6d   :  { %v6479_v32 = vpop.f32.mrf.mxu0 }
 0xc6f   :  { %v6481_v33 = vpop.f32.mrf.mxu0 }
 0xc75   :  { %v5542_v34 = vpop.f32.mrf.mxu0 }
 0xc76   :  { %v1839_v35 = vsel %vm536_vm7, %v5542_v34, -inf }
 0xc77   :  { %1840 = vmax.xlane.f32.xlu1 %v1839_v35  ;;  %v1827_v36 = vpop.f32.mrf.mxu0 }
 0xc78   :  { %v1836_v37 = vsel %vm532_vm8, %v1827_v36, -inf }
 0xc79   :  { %1837 = vmax.xlane.f32.xlu0 %v1836_v37 }
 0xc88   :  { %1858 = vrot.lane.b32.xlu1 %v6394_v4, %s7079_s6 }
 0xc8c   :  { %1970 = vrot.lane.b32.xlu1 %v6487_v38, %s7071_s7 }
 0xc90   :  { %1968 = vrot.lane.b32.xlu1 %v6394_v4, %s7071_s7  ;;  %s7081_s7 = smov 24  }
 0xc94   :  { %1964 = vrot.lane.b32.xlu1 %v1959_v39, %s7069_s29 }
 0xd00   :  { %v1841_v40 = vpop.xlane.xlu1 %1840 }
 0xd01   :  { %v1843_v41 = vsub.f32 %v5542_v34, %v1841_v40 }
 0xd02   :  { %v1838_v42 = vpop.xlane.xlu0 %1837 }
 0xd03   :  { %v1846_v43 = vmul.f32 1.442695, %v1843_v41  ;;  %v1842_v44 = vsub.f32 %v1827_v36, %v1838_v42 }
 0xd04   :  { %v1859_v51 = vpop.permute.xlu1 %1858 }
 0xd05   :  { %5880 = vpow2.f32 %v1846_v43  ;;  %v1844_v45 = vmul.f32 1.442695, %v1842_v44  ;;  %v5129_v44 = vld [vmem:[%s7049_s10] ss:$0 sm:$0xff] }
 0xd07   :  { %5882 = vpow2.f32 %v1844_v45 }
 0xd08   :  { %v1971_v53 = vpop.permute.xlu1 %1970 }
 0xd0c   :  { %v1969_v58 = vpop.permute.xlu1 %1968 }
 0xd10   :  { %v1965_v63 = vpop.permute.xlu1 %1964 }
 0xd12   :  { %v5881_v31 = vpop.eup %5880 }
 0xd13   :  { %v1851_v46 = vsel %vm536_vm7, %v5881_v31, 0.0 }
 0xd14   :  { %v5883_v47 = vpop.eup %5882  ;;  %1852 = vadd.xlane.f32.xlu0 %v1851_v46 }
 0xd15   :  { %v1848_v48 = vsel %vm532_vm8, %v5883_v47, 0.0 }
 0xd18   :  { %1849 = vadd.xlane.f32.xlu0 %v1848_v48  ;;  %v5996_v48 = vld [vmem:[#allocation2] sm:$0xff] }
 0xd2e   :  { %1860 = vrot.lane.b32.xlu0 %v6455_v3, %s7079_s6  ;;  %s7109_s6 = smov 72  }
 0xd32   :  { %1962 = vrot.lane.b32.xlu0 %v6407_v23, %s7069_s29  ;;  %s7073_s29 = smov 16  }
 0xd9d   :  { %v1853_v49 = vpop.xlane.xlu0 %1852 }
 0xd9e   :  { %5884 = vrcp.f32 %v1853_v49 }
 0xda1   :  { %v1850_v50 = vpop.xlane.xlu0 %1849 }
 0xda2   :  { %5886 = vrcp.f32 %v1850_v50 }
 0xda5   :  { %v1861_v52 = vpop.permute.xlu0 %1860 }
 0xda6   :  { %5543 = vmatprep.subr.msk.mxu1 %vm567_vm9, %v1861_v52 }
 0xda7   :  { %5544 = vmatpush3.msk.msra.mxu1 %vm567_vm9, %v1861_v52 }
 0xda8   :  { %5545 = vmatprep.subr.mxu1 %v1859_v51 }
 0xda9   :  { %5546 = vmatpush3.msra.mxu1 %v1859_v51  ;;  %v1963_v23 = vpop.permute.xlu0 %1962  ;;  %v5997_v51 = vld [vmem:[#allocation2 + $0x10] sm:$0xf] }
 0xdaa   :  { %5550 = vmatprep.subr.msk.mxu1 %vm446_vm6, %v1971_v53 }
 0xdab   :  { %v5885_v54 = vpop.eup %5884 }
 0xdac   :  { %v1857_v57 = vmul.f32 %v5885_v54, %v5881_v31 }
 0xdaf   :  { %v5887_v55 = vpop.eup %5886 }
 0xdb0   :  { %v1856_v56 = vmul.f32 %v5887_v55, %v5883_v47  ;;  %v5998_v55 = vld [vmem:[#allocation2 + $0x8] sm:$0xff] }
 0xdb2   :  { %5547 = vmatprep.mubr.msk.f32.mxu1 %vm532_vm8, %v1856_v56 }
 0xdb3   :  { %5548 = vmatmul.mubr.msk.f32.vlgmr.msra.gmra.mxu1 %vm532_vm8, %v1857_v57 }
 0xdb4   :  { %5551 = vmatpush3.xpose.msk.msra.mxu1 %vm446_vm6, %v1971_v53  ;;  %5554 = vmatprep.mubr.msk.f32.mxu1 %vm446_vm6, %v1963_v23 }
 0xdb5   :  { %5552 = vmatprep.subr.msk.mxu1 %vm446_vm6, %v1969_v58 }
 0xdb8   :  { %5553 = vmatpush3.xpose.msk.msra.mxu1 %vm446_vm6, %v1969_v58 }
 0xdbb   :  { %5555 = vmatmul.mubr.msk.f32.vlgmr.msra.gmra.mxu1 %vm446_vm6, %v1965_v63 }
 0xe73   :  { %v5549_v0 = vpop.f32.mrf.mxu1 }
 0xe75   :  { %v1937_v1 = vpop.f32.mrf.mxu1 }
 0xe7b   :  { %v5556_v2 = vpop.f32.mrf.mxu1 }
 0xe7c   :  { %v2058_v3 = vsel %vm536_vm7, %v5556_v2, -inf }
 0xe7d   :  { %2059 = vmax.xlane.f32.xlu1 %v2058_v3  ;;  %v2046_v5 = vpop.f32.mrf.mxu1 }
 0xe7e   :  { %v2055_v6 = vsel %vm532_vm8, %v2046_v5, -inf }
 0xe7f   :  { %2056 = vmax.xlane.f32.xlu0 %v2055_v6 }
 0xe8e   :  { %2077 = vrot.lane.b32.xlu1 %v6394_v4, %s7077_s3 }
 0xe92   :  { %859 = vrot.lane.b32.xlu1 %v6380_v60, %s7075_s0 }
 0xe96   :  { %861 = vrot.lane.b32.xlu1 %v6378_v59, %s7075_s0 }
 0xe9a   :  { %1080 = vrot.lane.b32.xlu1 %v6384_v62, %s7073_s29 }
 0xe9e   :  { %1731 = vrot.lane.b32.xlu1 %v6479_v32, %s7075_s0  ;;  %v5804_v32 = vld [vmem:[%s7048_s9 + $0x8] sm:$0xff]  }
 0xea2   :  { %1301 = vrot.lane.b32.xlu1 %v6419_v27, %s7081_s7 }
 0xea6   :  { %1950 = vrot.lane.b32.xlu1 %v5549_v0, %s7073_s29 }
 0xf06   :  { %v2060_v4 = vpop.xlane.xlu1 %2059 }
 0xf07   :  { %v2062_v7 = vsub.f32 %v5556_v2, %v2060_v4 }
 0xf08   :  { %v2057_v8 = vpop.xlane.xlu0 %2056 }
 0xf09   :  { %v2065_v60 = vmul.f32 1.442695, %v2062_v7  ;;  %v2061_v9 = vsub.f32 %v2046_v5, %v2057_v8 }
 0xf0a   :  { %v2078_v10 = vpop.permute.xlu1 %2077 }
 0xf0b   :  { %5888 = vpow2.f32 %v2065_v60  ;;  %v2063_v59 = vmul.f32 1.442695, %v2061_v9 }
 0xf0d   :  { %5890 = vpow2.f32 %v2063_v59 }
 0xf0e   :  { %v860_v62 = vpop.permute.xlu1 %859 }
 0xf0f   :  { %866 = vst.msk [vmem:[#allocation4] sm:$0xff] %vm865_vm11, %v860_v62  ;;  %v5806_v62 = vld [vmem:[%s7052_s13 + $0x8] sm:$0xff]  }
 0xf10   :  { %5572 = vmatprep.subr.bf16.mxu1 %v5806_v62 }
 0xf11   :  { %5573 = vmatpush3.bf16.msra.mxu1 %v5806_v62 }
 0xf12   :  { %v862_v11 = vpop.permute.xlu1 %861 }
 0xf13   :  { %868 = vst.msk [vmem:[#allocation4 + $0x8] sm:$0x3] %vm867_vm12, %v862_v11  ;;  %v5807_v11 = vld [vmem:[%s7052_s13] sm:$0xff]  }
 0xf14   :  { %5574 = vmatprep.subr.bf16.mxu1 %v5807_v11 }
 0xf15   :  { %5575 = vmatpush3.bf16.msra.mxu1 %v5807_v11 }
 0xf16   :  { %v1081_v27 = vpop.permute.xlu1 %1080 }
 0xf17   :  { %1087 = vst.msk [vmem:[#allocation4] sm:$0xff] %vm1086_vm13, %v1081_v27 }
 0xf18   :  { %v5889_v30 = vpop.eup %5888 }
 0xf19   :  { %v2070_v12 = vsel %vm536_vm7, %v5889_v30, 0.0 }
 0xf1a   :  { %v5891_v13 = vpop.eup %5890  ;;  %v1732_v14 = vpop.permute.xlu1 %1731  ;;  %2071 = vadd.xlane.f32.xlu0 %v2070_v12 }
 0xf1b   :  { %1736 = vst.msk [vmem:[#allocation4 + $0x12] sm:$0x3] %vm867_vm12, %v1732_v14  ;;  %v2067_v15 = vsel %vm532_vm8, %v5891_v13, 0.0 }
 0xf1e   :  { %v1302_v16 = vpop.permute.xlu1 %1301  ;;  %2068 = vadd.xlane.f32.xlu0 %v2067_v15 }
 0xf1f   :  { %1308 = vst.msk [vmem:[#allocation4] sm:$0xff] %vm1307_vm14, %v1302_v16 }
 0xf22   :  { %v1951_v17 = vpop.permute.xlu1 %1950 }
 0xf23   :  { %1955 = vst.msk [vmem:[#allocation4 + $0x12] sm:$0x3] %vm1088_vm15, %v1951_v17 }
 0xf34   :  { %2079 = vrot.lane.b32.xlu0 %v6487_v38, %s7077_s3  ;;  %v2175_v38 = vld [vmem:[#allocation4] sm:$0xff]  ;;  %s7111_s3 = smov 40  }
 0xf38   :  { %1729 = vrot.lane.b32.xlu0 %v6481_v33, %s7075_s0  ;;  %v5805_v33 = vld [vmem:[%s7048_s9] sm:$0xff]  }
 0xf3c   :  { %1082 = vrot.lane.b32.xlu0 %v6382_v61, %s7073_s29 }
 0xf40   :  { %1948 = vrot.lane.b32.xlu0 %v1937_v1, %s7073_s29  ;;  %s7110_s29 = smov 104  }
 0xf44   :  { %1303 = vrot.lane.b32.xlu0 %v6417_v26, %s7081_s7 }
 0xfa3   :  { %v2072_v18 = vpop.xlane.xlu0 %2071 }
 0xfa4   :  { %5892 = vrcp.f32 %v2072_v18 }
 0xfa7   :  { %v2069_v19 = vpop.xlane.xlu0 %2068 }
 0xfa8   :  { %5894 = vrcp.f32 %v2069_v19 }
 0xfab   :  { %v2080_v20 = vpop.permute.xlu0 %2079 }
 0xfac   :  { %5557 = vmatprep.subr.msk.mxu0 %vm567_vm9, %v2080_v20 }
 0xfad   :  { %5558 = vmatpush3.msk.msra.mxu0 %vm567_vm9, %v2080_v20 }
 0xfae   :  { %5559 = vmatprep.subr.mxu0 %v2078_v10 }
 0xfaf   :  { %5560 = vmatpush3.msra.mxu0 %v2078_v10  ;;  %v1730_v21 = vpop.permute.xlu0 %1729 }
 0xfb0   :  { %1735 = vst.msk [vmem:[#allocation4 + $0xa] sm:$0xff] %vm865_vm11, %v1730_v21  ;;  %5564 = vmatprep.subr.bf16.mxu0 %v5804_v32  ;;  %v5134_v21 = vld [vmem:[%s7050_s11] ss:$0 sm:$0xff] }
 0xfb1   :  { %v5893_v22 = vpop.eup %5892 }
 0xfb2   :  { %v2076_v28 = vmul.f32 %v5893_v22, %v5889_v30 }
 0xfb3   :  { %v1083_v61 = vpop.permute.xlu0 %1082 }
 0xfb4   :  { %1089 = vst.msk [vmem:[#allocation4 + $0x8] sm:$0x3] %vm1088_vm15, %v1083_v61 }
 0xfb5   :  { %v5895_v24 = vpop.eup %5894 }
 0xfb6   :  { %v2075_v26 = vmul.f32 %v5895_v24, %v5891_v13 }
 0xfb7   :  { %v1949_v25 = vpop.permute.xlu0 %1948 }
 0xfb8   :  { %1954 = vst.msk [vmem:[#allocation4 + $0xa] sm:$0xff] %vm1086_vm13, %v1949_v25  ;;  %5561 = vmatprep.mubr.msk.f32.mxu0 %vm532_vm8, %v2075_v26 }
 0xfb9   :  { %5562 = vmatmul.mubr.msk.f32.vlgmr.msra.gmra.mxu0 %vm532_vm8, %v2076_v28  ;;  %v5135_v28 = vld [vmem:[%s7051_s12] ss:$0 sm:$0xff] }
 0xfba   :  { %5565 = vmatpush3.bf16.msra.mxu0 %v5804_v32 }
 0xfbb   :  { %v1304_v29 = vpop.permute.xlu0 %1303  ;;  %5566 = vmatprep.subr.bf16.mxu0 %v5805_v33 }
 0xfbc   :  { %1310 = vst.msk [vmem:[#allocation4 + $0x8] sm:$0x3] %vm1309_vm1, %v1304_v29 }
 0xfbe   :  { %5567 = vmatpush3.bf16.msra.mxu0 %v5805_v33 }
0x1079   :  { %v5563_v34 = vpop.f32.mrf.mxu0 }
0x107a   :  { %2169 = vrot.lane.b32.xlu1 %v5563_v34, %s7081_s7 }
0x107b   :  { %v2156_v35 = vpop.f32.mrf.mxu0 }
0x107c   :  { %2167 = vrot.lane.b32.xlu0 %v2156_v35, %s7081_s7  ;;  %s7108_s7 = smov 48  }
0x10ec   :  { %v2170_v36 = vpop.permute.xlu1 %2169 }
0x10ed   :  { %2174 = vst.msk [vmem:[#allocation4 + $0x12] sm:$0x3] %vm1309_vm1, %v2170_v36 }
0x10ee   :  { %v2168_v37 = vpop.permute.xlu0 %2167 }
0x10ef   :  { %2173 = vst.msk [vmem:[#allocation4 + $0xa] sm:$0xff] %vm1307_vm14, %v2168_v37 }
0x10f6   :  { %v2176_v39 = vld [vmem:[#allocation4 + $0x8] sm:$0xff]  ;;  %v2177_v40 = vld [vmem:[#allocation4 + $0x10] sm:$0xf] }
0x10f7   :  { %v2183_v41 = vpack.c.bf16 %v2176_v39, %v2175_v38  ;;  %v2184_v42 = vpack.c.bf16 %v2177_v40, %v2177_v40  ;;  %v5808_v38 = vld [vmem:[%s7054_s15 + $0x18] sm:$0xff]   ;;  %v5809_v39 = vld [vmem:[%s7054_s15 + $0x10] sm:$0xff]   ;;  %v5810_v40 = vld [vmem:[%s7054_s15 + $0x8] sm:$0xff]  }
0x10f8   :  { %5580 = vmatprep.subr.bf16.mxu0 %v5808_v38 }
0x10f9   :  { %5568 = vmatprep.mubr.msk.bf16.mxu0 %vm234_vm2, %v2183_v41  ;;  %v5811_v41 = vld [vmem:[%s7054_s15] sm:$0xff]  }
0x10fa   :  { %5569 = vmatmul.mubr.msk.bf16.vlgmr.msra.gmra.mxu0 %vm234_vm2, %v2184_v42  ;;  %v5136_v42 = vld [vmem:[%s7053_s14] ss:$0 sm:$0xff] }
0x10fb   :  { %5581 = vmatpush3.bf16.msra.mxu0 %v5808_v38 }
0x10fc   :  { %5582 = vmatprep.subr.bf16.mxu0 %v5809_v39 }
0x10ff   :  { %5583 = vmatpush3.bf16.msra.mxu0 %v5809_v39 }
0x1100   :  { %5584 = vmatprep.subr.bf16.mxu0 %v5810_v40 }
0x1103   :  { %5585 = vmatpush3.bf16.msra.mxu0 %v5810_v40 }
0x1104   :  { %5586 = vmatprep.subr.bf16.mxu0 %v5811_v41 }
0x1107   :  { %5587 = vmatpush3.bf16.msra.mxu0 %v5811_v41 }
0x11ba   :  { %v5570_v43 = vpop.f32.mrf.mxu0 }
0x11bb   :  { %v2252_v31 = vadd.f32 %v5570_v43, %v5129_v44 }
0x11bc   :  { %v2243_v45 = vpop.f32.mrf.mxu0 }
0x11bd   :  { %v2244_v46 = vadd.f32 %v5129_v44, %v2243_v45  ;;  %v6568_v52 = vadd.f32 %v5997_v51, %v2252_v31 }
0x11be   :  { %v5571_v47 = vpop.f32.mrf.mxu0 }
0x11bf   :  { %v6566_v49 = vadd.f32 %v5996_v48, %v2244_v46  ;;  %v2268_v23 = vsel %vm299_vm3, %v6568_v52, 0.0 }
0x11c0   :  { %v2246_v50 = vpop.f32.mrf.mxu0 }
0x11c1   :  { %v2247_v53 = vadd.f32 %v5129_v44, %v2246_v50  ;;  %v2262_v54 = vsel %vm234_vm2, %v6566_v49, 0.0 }
0x11c2   :  { %2263 = vadd.xlane.f32.xlu0 %v2262_v54 }
0x11c3   :  { %v6572_v56 = vadd.f32 %v5998_v55, %v2247_v53 }
0x11c5   :  { %v2265_v57 = vsel %vm234_vm2, %v6572_v56, 0.0 }
0x11c6   :  { %2266 = vadd.xlane.f32.xlu1 %v2265_v57  ;;  %2269 = vadd.xlane.f32.xlu0 %v2268_v23 }
0x124b   :  { %v2264_v58 = vpop.xlane.xlu0 %2263 }
0x124c   :  { %v2271_v63 = vmul.f32 0.03125, %v2264_v58 }
0x124e   :  { %v2274_v0 = vsub.f32 %v6566_v49, %v2271_v63 }
0x124f   :  { %v2267_v1 = vpop.xlane.xlu1 %2266  ;;  %v2270_v2 = vpop.xlane.xlu0 %2269 }
0x1250   :  { %v2272_v3 = vmul.f32 0.03125, %v2267_v1  ;;  %v2273_v5 = vmul.f32 0.03125, %v2270_v2  ;;  %v2277_v6 = vmul.f32 %v2274_v0, %v2274_v0 }
0x1252   :  { %v2275_v4 = vsub.f32 %v6572_v56, %v2272_v3  ;;  %v2276_v7 = vsub.f32 %v6568_v52, %v2273_v5  ;;  %v2280_v8 = vsel %vm234_vm2, %v2277_v6, 0.0 }
0x1253   :  { %2281 = vadd.xlane.f32.xlu0 %v2280_v8 }
0x1254   :  { %v2278_v60 = vmul.f32 %v2275_v4, %v2275_v4  ;;  %v2279_v9 = vmul.f32 %v2276_v7, %v2276_v7 }
0x1256   :  { %v2283_v10 = vsel %vm234_vm2, %v2278_v60, 0.0  ;;  %v2286_v59 = vsel %vm299_vm3, %v2279_v9, 0.0 }
0x1257   :  { %2284 = vadd.xlane.f32.xlu0 %v2283_v10  ;;  %2287 = vadd.xlane.f32.xlu1 %v2286_v59 }
0x12dc   :  { %v2282_v27 = vpop.xlane.xlu0 %2281 }
0x12dd   :  { %v2289_v30 = vmul.f32 0.03125, %v2282_v27 }
0x12df   :  { %v2292_v12 = vadd.f32 1e-06, %v2289_v30 }
0x12e0   :  { %v2288_v13 = vpop.xlane.xlu1 %2287  ;;  %v2285_v14 = vpop.xlane.xlu0 %2284 }
0x12e1   :  { %5896 = vrsqrt.f32 %v2292_v12  ;;  %v2291_v15 = vmul.f32 0.03125, %v2288_v13  ;;  %v2290_v16 = vmul.f32 0.03125, %v2285_v14 }
0x12e3   :  { %v2294_v17 = vadd.f32 1e-06, %v2291_v15  ;;  %v2293_v18 = vadd.f32 1e-06, %v2290_v16  ;;  %v5141_v16 = vld [vmem:[%s7055_s16] ss:$0 sm:$0xff] }
0x12e5   :  { %5898 = vrsqrt.f32 %v2294_v17 }
0x12e6   :  { %5900 = vrsqrt.f32 %v2293_v18 }
0x12ee   :  { %v5897_v19 = vpop.eup %5896 }
0x12ef   :  { %v2298_v20 = vmul.f32 %v5897_v19, %v2274_v0 }
0x12f1   :  { %v2307_v25 = vmul.f32 %v5134_v21, %v2298_v20 }
0x12f2   :  { %v5899_v61 = vpop.eup %5898 }
0x12f3   :  { %v5901_v22 = vpop.eup %5900  ;;  %v2300_v24 = vmul.f32 %v5899_v61, %v2276_v7  ;;  %v2316_v34 = vadd.f32 %v5135_v28, %v2307_v25 }
0x12f4   :  { %v2299_v26 = vmul.f32 %v5901_v22, %v2275_v4 }
0x12f5   :  { %v2309_v29 = vmul.f32 %v5134_v21, %v2300_v24 }
0x12f6   :  { %v2308_v32 = vmul.f32 %v5134_v21, %v2299_v26 }
0x12f7   :  { %v2318_v33 = vadd.f32 %v5135_v28, %v2309_v29 }
0x12f8   :  { %v2317_v35 = vadd.f32 %v5135_v28, %v2308_v32 }
0x12f9   :  { %v2325_v36 = vpack.c.bf16 %v2318_v33, %v2318_v33 }
0x12fa   :  { %v2324_v37 = vpack.c.bf16 %v2317_v35, %v2316_v34 }
0x12fc   :  { %5576 = vmatprep.mubr.msk.bf16.mxu1 %vm234_vm2, %v2324_v37 }
0x12fd   :  { %5577 = vmatmul.mubr.msk.bf16.vlgmr.msra.gmra.mxu1 %vm234_vm2, %v2325_v36 }
0x13bd   :  { %v5578_v43 = vpop.f32.mrf.mxu1 }
0x13be   :  { %v2393_v44 = vadd.f32 %v5578_v43, %v5136_v42 }
0x13bf   :  { %v2384_v45 = vpop.f32.mrf.mxu1 }
0x13c0   :  { %v2400_v31 = vmul.f32 %v2393_v44, %v2393_v44  ;;  %v2385_v46 = vadd.f32 %v5136_v42, %v2384_v45  ;;  %v5813_v45 = vld [vmem:[%s7102_s1 + $0x10] sm:$0xff]  }
0x13c1   :  { %v5579_v47 = vpop.f32.mrf.mxu1 }
0x13c2   :  { %v2403_v48 = vmul.f32 %v2400_v31, %v2393_v44  ;;  %v2398_v50 = vmul.f32 %v2385_v46, %v2385_v46 }
0x13c3   :  { %v2387_v51 = vpop.f32.mrf.mxu1 }
0x13c4   :  { %v2406_v53 = vmul.f32 0.044715, %v2403_v48  ;;  %v2401_v54 = vmul.f32 %v2398_v50, %v2385_v46  ;;  %v2388_v55 = vadd.f32 %v5136_v42, %v2387_v51 }
0x13c6   :  { %v2409_v57 = vadd.f32 %v2406_v53, %v2393_v44  ;;  %v2404_v23 = vmul.f32 0.044715, %v2401_v54  ;;  %v2399_v58 = vmul.f32 %v2388_v55, %v2388_v55 }
0x13c8   :  { %v2412_v63 = vmul.f32 0.7978846, %v2409_v57  ;;  %v2407_v0 = vadd.f32 %v2404_v23, %v2385_v46  ;;  %v2402_v1 = vmul.f32 %v2399_v58, %v2388_v55  ;;  %v5150_v58 = vld [vmem:[%s7103_s27 + $0x1] ss:$0 sm:$0xff] }
0x13ca   :  { %5902 = vtanh.f32 %v2412_v63  ;;  %v2410_v2 = vmul.f32 0.7978846, %v2407_v0  ;;  %v2405_v3 = vmul.f32 0.044715, %v2402_v1 }
0x13cc   :  { %5904 = vtanh.f32 %v2410_v2  ;;  %v2408_v5 = vadd.f32 %v2405_v3, %v2388_v55 }
0x13ce   :  { %v2411_v6 = vmul.f32 0.7978846, %v2408_v5  ;;  %v5151_v5 = vld [vmem:[%s7104_s28 + $0x1] ss:$0 sm:$0xff]  ;;  %s7106_s28 = smov 64  }
0x13d0   :  { %5906 = vtanh.f32 %v2411_v6 }
0x13d7   :  { %v5903_v4 = vpop.eup %5902 }
0x13d8   :  { %v2418_v8 = vadd.f32 1.0, %v5903_v4 }
0x13d9   :  { %v5905_v7 = vpop.eup %5904 }
0x13da   :  { %v2416_v60 = vadd.f32 1.0, %v5905_v7  ;;  %v2421_v10 = vmul.f32 0.5, %v2418_v8 }
0x13dc   :  { %v2419_v59 = vmul.f32 0.5, %v2416_v60  ;;  %v2424_v27 = vmul.f32 %v2421_v10, %v2393_v44  ;;  %v5812_v44 = vld [vmem:[%s7102_s1 + $0x18] sm:$0xff]  }
0x13dd   :  { %v5907_v9 = vpop.eup %5906  ;;  %5592 = vmatprep.subr.bf16.mxu1 %v5812_v44 }
0x13de   :  { %v2417_v62 = vadd.f32 1.0, %v5907_v9  ;;  %v2422_v30 = vmul.f32 %v2419_v59, %v2385_v46  ;;  %v2435_v14 = vpack.c.bf16 %v2424_v27, %v2424_v27  ;;  %5593 = vmatpush3.bf16.msra.mxu1 %v5812_v44  ;;  %v5157_v59 = vld [vmem:[%s7047_s8 + $0x1] ss:$0 sm:$0xff]  ;;  %s7105_s8 = smov 112  }
0x13df   :  { %5594 = vmatprep.subr.bf16.mxu1 %v5813_v45 }
0x13e0   :  { %v2420_v11 = vmul.f32 0.5, %v2417_v62 }
0x13e2   :  { %v2423_v12 = vmul.f32 %v2420_v11, %v2388_v55  ;;  %5595 = vmatpush3.bf16.msra.mxu1 %v5813_v45 }
0x13e4   :  { %v2434_v13 = vpack.c.bf16 %v2423_v12, %v2422_v30 }
0x13e6   :  { %5588 = vmatprep.mubr.msk.bf16.mxu0 %vm186_vm0, %v2434_v13 }
0x13e7   :  { %5589 = vmatmul.mubr.msk.bf16.vlgmr.msra.gmra.mxu0 %vm186_vm0, %v2435_v14 }
0x14a7   :  { %v5590_v15 = vpop.f32.mrf.mxu0 }
0x14a8   :  { %v2515_v18 = vadd.f32 %v5590_v15, %v5141_v16 }
0x14a9   :  { %v2506_v17 = vpop.f32.mrf.mxu0 }
0x14aa   :  { %v2507_v19 = vadd.f32 %v5141_v16, %v2506_v17  ;;  %v6622_v22 = vadd.f32 %v2515_v18, %v6568_v52 }
0x14ab   :  { %v5591_v20 = vpop.f32.mrf.mxu0 }
0x14ac   :  { %v6619_v21 = vadd.f32 %v2507_v19, %v6566_v49  ;;  %v2533_v29 = vsel %vm299_vm3, %v6622_v22, 0.0 }
0x14ad   :  { %v2509_v61 = vpop.f32.mrf.mxu0 }
0x14ae   :  { %v2510_v24 = vadd.f32 %v5141_v16, %v2509_v61  ;;  %v2527_v26 = vsel %vm234_vm2, %v6619_v21, 0.0 }
0x14af   :  { %2528 = vadd.xlane.f32.xlu0 %v2527_v26 }
0x14b0   :  { %v6627_v25 = vadd.f32 %v2510_v24, %v6572_v56 }
0x14b2   :  { %v2530_v28 = vsel %vm234_vm2, %v6627_v25, 0.0 }
0x14b3   :  { %2531 = vadd.xlane.f32.xlu1 %v2530_v28  ;;  %2534 = vadd.xlane.f32.xlu0 %v2533_v29 }
0x1538   :  { %v2529_v49 = vpop.xlane.xlu0 %2528 }
0x1539   :  { %v2536_v32 = vmul.f32 0.03125, %v2529_v49 }
0x153b   :  { %v2539_v52 = vsub.f32 %v6619_v21, %v2536_v32 }
0x153c   :  { %v2532_v33 = vpop.xlane.xlu1 %2531  ;;  %v2535_v34 = vpop.xlane.xlu0 %2534 }
0x153d   :  { %v2537_v35 = vmul.f32 0.03125, %v2532_v33  ;;  %v2538_v36 = vmul.f32 0.03125, %v2535_v34  ;;  %v2542_v37 = vmul.f32 %v2539_v52, %v2539_v52 }
0x153f   :  { %v2540_v56 = vsub.f32 %v6627_v25, %v2537_v35  ;;  %v2541_v38 = vsub.f32 %v6622_v22, %v2538_v36  ;;  %v2545_v39 = vsel %vm234_vm2, %v2542_v37, 0.0 }
0x1540   :  { %2546 = vadd.xlane.f32.xlu1 %v2545_v39 }
0x1541   :  { %v2543_v40 = vmul.f32 %v2540_v56, %v2540_v56  ;;  %v2544_v41 = vmul.f32 %v2541_v38, %v2541_v38 }
0x1543   :  { %v2548_v42 = vsel %vm234_vm2, %v2543_v40, 0.0  ;;  %v2551_v43 = vsel %vm299_vm3, %v2544_v41, 0.0 }
0x1544   :  { %2549 = vadd.xlane.f32.xlu0 %v2548_v42  ;;  %2552 = vadd.xlane.f32.xlu1 %v2551_v43 }
0x15c9   :  { %v2547_v31 = vpop.xlane.xlu1 %2546 }
0x15ca   :  { %v2554_v46 = vmul.f32 0.03125, %v2547_v31 }
0x15cc   :  { %v2557_v47 = vadd.f32 1e-06, %v2554_v46 }
0x15cd   :  { %v2553_v48 = vpop.xlane.xlu1 %2552  ;;  %v2550_v50 = vpop.xlane.xlu0 %2549 }
0x15ce   :  { %5908 = vrsqrt.f32 %v2557_v47  ;;  %v2556_v51 = vmul.f32 0.03125, %v2553_v48  ;;  %v2555_v53 = vmul.f32 0.03125, %v2550_v50 }
0x15d0   :  { %v2559_v54 = vadd.f32 1e-06, %v2556_v51  ;;  %v2558_v55 = vadd.f32 1e-06, %v2555_v53 }
0x15d2   :  { %5910 = vrsqrt.f32 %v2559_v54 }
0x15d3   :  { %5912 = vrsqrt.f32 %v2558_v55 }
0x15db   :  { %v5909_v57 = vpop.eup %5908 }
0x15dc   :  { %v2563_v23 = vmul.f32 %v5909_v57, %v2539_v52 }
0x15de   :  { %v2572_v3 = vmul.f32 %v5150_v58, %v2563_v23 }
0x15df   :  { %v5911_v63 = vpop.eup %5910 }
0x15e0   :  { %v5913_v0 = vpop.eup %5912  ;;  %v2565_v1 = vmul.f32 %v5911_v63, %v2541_v38  ;;  %v2581_v8 = vadd.f32 %v5151_v5, %v2572_v3 }
0x15e1   :  { %v2564_v2 = vmul.f32 %v5913_v0, %v2540_v56 }
0x15e2   :  { %v2574_v6 = vmul.f32 %v5150_v58, %v2565_v1 }
0x15e3   :  { %v2573_v4 = vmul.f32 %v5150_v58, %v2564_v2 }
0x15e4   :  { %v2583_v7 = vadd.f32 %v5151_v5, %v2574_v6 }
0x15e5   :  { %v2582_v60 = vadd.f32 %v5151_v5, %v2573_v4 }
0x15e6   :  { %v2592_v9 = vpack.c.bf16 %v2583_v7, %v2583_v7 }
0x15e7   :  { %v2591_v10 = vpack.c.bf16 %v2582_v60, %v2581_v8 }
0x15e9   :  { %5596 = vmatprep.mubr.msk.bf16.mxu1 %vm234_vm2, %v2591_v10 }
0x15ea   :  { %5597 = vmatmul.mubr.msk.bf16.vlgmr.msra.gmra.mxu1 %vm234_vm2, %v2592_v9 }
0x16aa   :  { %v5598_v62 = vpop.f32.mrf.mxu1 }
0x16ab   :  { %v2660_v11 = vadd.f32 %v5598_v62, %v5157_v59 }
0x16ac   :  { %v2651_v27 = vpop.f32.mrf.mxu1 }
0x16ad   :  { %2667 = vst.msk [vmem:[#allocation3 + $0x10] sm:$0xf] %vm434_vm4, %v2660_v11  ;;  %v2652_v30 = vadd.f32 %v5157_v59, %v2651_v27 }
0x16ae   :  { %v5599_v12 = vpop.f32.mrf.mxu1 }
0x16af   :  { %2665 = vst.msk [vmem:[#allocation3] sm:$0xff] %vm431_vm5, %v2652_v30 }
0x16b0   :  { %v2654_v13 = vpop.f32.mrf.mxu1 }
0x16b1   :  { %v2655_v14 = vadd.f32 %v5157_v59, %v2654_v13 }
0x16b3   :  { %2666 = vst.msk [vmem:[#allocation3 + $0x8] sm:$0xff] %vm431_vm5, %v2655_v14 }
0x16b6   :  { %v6659_v15 = vld [vmem:[#allocation3] sm:$0xff] }
0x16b7   :  { %2674 = vrot.lane.b32.xlu1 %v6659_v15, %s6022_s4  ;;  %v6664_v16 = vmul.f32 0.35355338, %v6659_v15 }
0x16b9   :  { %5604 = vmatprep.mubr.msk.f32.mxu1 %vm446_vm6, %v6664_v16 }
0x16ba   :  { %v2669_v17 = vld [vmem:[#allocation3 + $0x8] sm:$0x3] }
0x16bb   :  { %v2876_v18 = vld [vmem:[#allocation3 + $0x8] sm:$0x3]  ;;  %2676 = vrot.lane.b32.xlu0 %v2669_v17, %s6022_s4  ;;  %v2671_v32 = vmul.f32 0.35355338, %v2669_v17 }
0x16bc   :  { %2889 = vrot.lane.b32.xlu1 %v2876_v18, %s6023_s30  ;;  %v2878_v19 = vmul.f32 0.35355338, %v2876_v18  ;;  %v3095_v20 = vld [vmem:[#allocation3 + $0x8] sm:$0x3] }
0x16bd   :  { %v3097_v61 = vmul.f32 0.35355338, %v3095_v20 }
0x16bf   :  { %2881 = vrot.lane.b32.xlu0 %v6664_v16, %s6024_s25 }
0x16c0   :  { %2887 = vrot.lane.b32.xlu1 %v6659_v15, %s6023_s30 }
0x16c3   :  { %2883 = vrot.lane.b32.xlu0 %v2878_v19, %s6024_s25  ;;  %v6722_v19 = vld [vmem:[#allocation3 + $0x8] sm:$0x3] }
0x16c4   :  { %3108 = vrot.lane.b32.xlu1 %v3095_v20, %s6025_s5 }
0x16c7   :  { %3100 = vrot.lane.b32.xlu0 %v6664_v16, %s7105_s8 }
0x16c8   :  { %3106 = vrot.lane.b32.xlu1 %v6659_v15, %s6025_s5 }
0x16cc   :  { %3102 = vrot.lane.b32.xlu1 %v3097_v61, %s7105_s8 }
0x1729   :  { %v2675_v24 = vpop.permute.xlu1 %2674 }
0x172d   :  { %v2677_v26 = vpop.permute.xlu0 %2676 }
0x172e   :  { %v2890_v28 = vpop.permute.xlu1 %2889  ;;  %5600 = vmatprep.subr.msk.mxu1 %vm446_vm6, %v2677_v26 }
0x172f   :  { %5614 = vmatprep.subr.msk.mxu0 %vm446_vm6, %v2890_v28  ;;  %5601 = vmatpush3.xpose.msk.msra.mxu1 %vm446_vm6, %v2677_v26 }
0x1730   :  { %5615 = vmatpush3.xpose.msk.msra.mxu0 %vm446_vm6, %v2890_v28  ;;  %5602 = vmatprep.subr.msk.mxu1 %vm446_vm6, %v2675_v24 }
0x1731   :  { %v2882_v29 = vpop.permute.xlu0 %2881 }
0x1732   :  { %v2888_v49 = vpop.permute.xlu1 %2887  ;;  %5618 = vmatprep.mubr.msk.f32.mxu0 %vm446_vm6, %v2882_v29 }
0x1733   :  { %5616 = vmatprep.subr.msk.mxu0 %vm446_vm6, %v2888_v49  ;;  %5603 = vmatpush3.xpose.msk.msra.mxu1 %vm446_vm6, %v2675_v24 }
0x1734   :  { %5617 = vmatpush3.xpose.msk.msra.mxu0 %vm446_vm6, %v2888_v49 }
0x1735   :  { %v2884_v52 = vpop.permute.xlu0 %2883 }
0x1736   :  { %v3109_v33 = vpop.permute.xlu1 %3108  ;;  %5605 = vmatmul.mubr.msk.f32.vlgmr.msra.gmra.mxu1 %vm446_vm6, %v2671_v32 }
0x1737   :  { %5619 = vmatmul.mubr.msk.f32.vlgmr.msra.gmra.mxu0 %vm446_vm6, %v2884_v52  ;;  %5628 = vmatprep.subr.msk.mxu0 %vm446_vm6, %v3109_v33 }
0x1738   :  { %5629 = vmatpush3.xpose.msk.msra.mxu0 %vm446_vm6, %v3109_v33 }
0x1739   :  { %v3101_v34 = vpop.permute.xlu0 %3100 }
0x173a   :  { %v3107_v35 = vpop.permute.xlu1 %3106  ;;  %5632 = vmatprep.mubr.msk.f32.mxu0 %vm446_vm6, %v3101_v34 }
0x173b   :  { %5630 = vmatprep.subr.msk.mxu0 %vm446_vm6, %v3107_v35 }
0x173c   :  { %5631 = vmatpush3.xpose.msk.msra.mxu0 %vm446_vm6, %v3107_v35 }
0x173e   :  { %v3103_v36 = vpop.permute.xlu1 %3102 }
0x173f   :  { %5633 = vmatmul.mubr.msk.f32.vlgmr.msra.gmra.mxu0 %vm446_vm6, %v3103_v36 }
0x17f6   :  { %v5606_v37 = vpop.f32.mrf.mxu1 }
0x17f7   :  { %v5620_v56 = vpop.f32.mrf.mxu0  ;;  %v2766_v39 = vsel %vm536_vm7, %v5606_v37, -inf }
0x17f8   :  { %v2977_v38 = vsel %vm536_vm7, %v5620_v56, -inf  ;;  %2767 = vmax.xlane.f32.xlu1 %v2766_v39  ;;  %v2754_v40 = vpop.f32.mrf.mxu1 }
0x17f9   :  { %2978 = vmax.xlane.f32.xlu0 %v2977_v38  ;;  %v2763_v41 = vsel %vm532_vm8, %v2754_v40, -inf  ;;  %v2965_v42 = vpop.f32.mrf.mxu0 }
0x17fa   :  { %v2974_v44 = vsel %vm532_vm8, %v2965_v42, -inf }
0x17fd   :  { %2764 = vmax.xlane.f32.xlu0 %v2763_v41 }
0x17ff   :  { %v5634_v43 = vpop.f32.mrf.mxu0 }
0x1800   :  { %v3196_v45 = vsel %vm536_vm7, %v5634_v43, -inf }
0x1801   :  { %2975 = vmax.xlane.f32.xlu0 %v2974_v44  ;;  %v3184_v31 = vpop.f32.mrf.mxu0  ;;  %3197 = vmax.xlane.f32.xlu1 %v3196_v45 }
0x1802   :  { %v3193_v46 = vsel %vm532_vm8, %v3184_v31, -inf }
0x1805   :  { %3194 = vmax.xlane.f32.xlu0 %v3193_v46 }
0x1812   :  { %2785 = vrot.lane.b32.xlu1 %v6659_v15, %s7106_s28 }
0x1816   :  { %2998 = vrot.lane.b32.xlu1 %v2876_v18, %s7107_s24 }
0x181a   :  { %2996 = vrot.lane.b32.xlu1 %v6659_v15, %s7107_s24 }
0x181b   :  { %2787 = vrot.lane.b32.xlu0 %v2669_v17, %s7106_s28 }
0x181e   :  { %3215 = vrot.lane.b32.xlu1 %v6659_v15, %s7108_s7 }
0x181f   :  { %3217 = vrot.lane.b32.xlu0 %v3095_v20, %s7108_s7  ;;  %v3316_v20 = vmul.f32 0.35355338, %v6722_v19 }
0x1881   :  { %v2768_v48 = vpop.xlane.xlu1 %2767 }
0x1882   :  { %v2979_v47 = vpop.xlane.xlu0 %2978  ;;  %v2770_v51 = vsub.f32 %v5606_v37, %v2768_v48 }
0x1883   :  { %v2981_v50 = vsub.f32 %v5620_v56, %v2979_v47 }
0x1884   :  { %v2773_v53 = vmul.f32 1.442695, %v2770_v51 }
0x1885   :  { %v2984_v54 = vmul.f32 1.442695, %v2981_v50 }
0x1886   :  { %v2765_v55 = vpop.xlane.xlu0 %2764  ;;  %5914 = vpow2.f32 %v2773_v53 }
0x1887   :  { %v2769_v57 = vsub.f32 %v2754_v40, %v2765_v55  ;;  %5916 = vpow2.f32 %v2984_v54 }
0x1889   :  { %v2771_v23 = vmul.f32 1.442695, %v2769_v57 }
0x188a   :  { %v2976_v58 = vpop.xlane.xlu0 %2975  ;;  %v3198_v63 = vpop.xlane.xlu1 %3197 }
0x188b   :  { %5918 = vpow2.f32 %v2771_v23  ;;  %v2980_v0 = vsub.f32 %v2965_v42, %v2976_v58  ;;  %v3200_v1 = vsub.f32 %v5634_v43, %v3198_v63  ;;  %v6761_v63 = vld [vmem:[#allocation3 + $0x12] sm:$0x3] }
0x188d   :  { %v2982_v2 = vmul.f32 1.442695, %v2980_v0  ;;  %v3203_v3 = vmul.f32 1.442695, %v3200_v1  ;;  %v6765_v0 = vld [vmem:[#allocation3 + $0xa] sm:$0xff] }
0x188e   :  { %v3195_v5 = vpop.xlane.xlu0 %3194  ;;  %v2786_v4 = vpop.permute.xlu1 %2785 }
0x188f   :  { %5920 = vpow2.f32 %v2982_v2  ;;  %v3199_v6 = vsub.f32 %v3184_v31, %v3195_v5 }
0x1890   :  { %5922 = vpow2.f32 %v3203_v3 }
0x1891   :  { %v3201_v7 = vmul.f32 1.442695, %v3199_v6 }
0x1892   :  { %v2788_v8 = vpop.permute.xlu0 %2787  ;;  %v2999_v9 = vpop.permute.xlu1 %2998 }
0x1893   :  { %5924 = vpow2.f32 %v3201_v7  ;;  %5607 = vmatprep.subr.msk.mxu1 %vm567_vm9, %v2788_v8  ;;  %v5915_v60 = vpop.eup %5914 }
0x1894   :  { %5608 = vmatpush3.msk.msra.mxu1 %vm567_vm9, %v2788_v8  ;;  %v2778_v10 = vsel %vm536_vm7, %v5915_v60, 0.0  ;;  %v5917_v59 = vpop.eup %5916 }
0x1895   :  { %5609 = vmatprep.subr.mxu1 %v2786_v4  ;;  %2779 = vadd.xlane.f32.xlu1 %v2778_v10  ;;  %v2989_v27 = vsel %vm536_vm7, %v5917_v59, 0.0 }
0x1896   :  { %5610 = vmatpush3.msra.mxu1 %v2786_v4  ;;  %v2997_v61 = vpop.permute.xlu1 %2996  ;;  %v3218_v26 = vpop.permute.xlu0 %3217 }
0x1897   :  { %5621 = vmatprep.subr.msk.mxu1 %vm567_vm9, %v2999_v9 }
0x1898   :  { %v5919_v62 = vpop.eup %5918 }
0x1899   :  { %v2775_v11 = vsel %vm532_vm8, %v5919_v62, 0.0  ;;  %2990 = vadd.xlane.f32.xlu1 %v2989_v27 }
0x189a   :  { %2776 = vadd.xlane.f32.xlu0 %v2775_v11  ;;  %v3216_v24 = vpop.permute.xlu1 %3215 }
0x189c   :  { %v5921_v30 = vpop.eup %5920 }
0x189d   :  { %v5923_v12 = vpop.eup %5922  ;;  %v2986_v13 = vsel %vm532_vm8, %v5921_v30, 0.0 }
0x189e   :  { %v3208_v14 = vsel %vm536_vm7, %v5923_v12, 0.0  ;;  %2987 = vadd.xlane.f32.xlu0 %v2986_v13 }
0x189f   :  { %3209 = vadd.xlane.f32.xlu1 %v3208_v14  ;;  %v6777_v14 = vmul.f32 0.35355338, %v6765_v0 }
0x18a0   :  { %v5925_v17 = vpop.eup %5924 }
0x18a1   :  { %v3205_v18 = vsel %vm532_vm8, %v5925_v17, 0.0 }
0x18a2   :  { %3206 = vadd.xlane.f32.xlu0 %v3205_v18  ;;  %v3535_v18 = vmul.f32 0.35355338, %v6761_v63 }
0x18b0   :  { %3325 = vrot.lane.b32.xlu1 %v6659_v15, %s7109_s6 }
0x18b4   :  { %3321 = vrot.lane.b32.xlu1 %v3316_v20, %s7110_s29 }
0x18b8   :  { %3327 = vrot.lane.b32.xlu0 %v6722_v19, %s7109_s6 }
0x18bc   :  { %3319 = vrot.lane.b32.xlu0 %v6664_v16, %s7110_s29 }
0x191e   :  { %v2780_v28 = vpop.xlane.xlu1 %2779 }
0x191f   :  { %5926 = vrcp.f32 %v2780_v28 }
0x1922   :  { %v2991_v49 = vpop.xlane.xlu1 %2990 }
0x1923   :  { %v2777_v29 = vpop.xlane.xlu0 %2776 }
0x1924   :  { %5928 = vrcp.f32 %v2777_v29  ;;  %v6796_v29 = vld [vmem:[#allocation3 + $0x12] sm:$0x3] }
0x1925   :  { %5930 = vrcp.f32 %v2991_v49  ;;  %v3742_v49 = vmul.f32 0.35355338, %v6796_v29 }
0x1927   :  { %v2988_v32 = vpop.xlane.xlu0 %2987 }
0x1928   :  { %v3210_v52 = vpop.xlane.xlu1 %3209  ;;  %5932 = vrcp.f32 %v2988_v32 }
0x1929   :  { %5934 = vrcp.f32 %v3210_v52 }
0x192b   :  { %v3207_v33 = vpop.xlane.xlu0 %3206 }
0x192c   :  { %5936 = vrcp.f32 %v3207_v33  ;;  %v5927_v34 = vpop.eup %5926  ;;  %v3326_v31 = vpop.permute.xlu1 %3325 }
0x192d   :  { %v2784_v37 = vmul.f32 %v5927_v34, %v5915_v60 }
0x192f   :  { %v3328_v39 = vpop.permute.xlu0 %3327 }
0x1930   :  { %v3322_v46 = vpop.permute.xlu1 %3321 }
0x1931   :  { %v5929_v35 = vpop.eup %5928 }
0x1932   :  { %v2783_v36 = vmul.f32 %v5929_v35, %v5919_v62  ;;  %v5931_v16 = vpop.eup %5930 }
0x1933   :  { %v2995_v40 = vmul.f32 %v5931_v16, %v5917_v59  ;;  %v3320_v45 = vpop.permute.xlu0 %3319 }
0x1934   :  { %5611 = vmatprep.mubr.msk.f32.mxu1 %vm532_vm8, %v2783_v36 }
0x1935   :  { %v5933_v56 = vpop.eup %5932  ;;  %5612 = vmatmul.mubr.msk.f32.vlgmr.msra.gmra.mxu1 %vm532_vm8, %v2784_v37 }
0x1936   :  { %5622 = vmatpush3.msk.msra.mxu1 %vm567_vm9, %v2999_v9  ;;  %v2994_v38 = vmul.f32 %v5933_v56, %v5921_v30  ;;  %v5935_v41 = vpop.eup %5934 }
0x1937   :  { %5623 = vmatprep.subr.mxu1 %v2997_v61  ;;  %v3214_v44 = vmul.f32 %v5935_v41, %v5923_v12 }
0x1938   :  { %5624 = vmatpush3.msra.mxu1 %v2997_v61  ;;  %5625 = vmatprep.mubr.msk.f32.mxu1 %vm532_vm8, %v2994_v38 }
0x1939   :  { %v5937_v42 = vpop.eup %5936  ;;  %5635 = vmatprep.subr.msk.mxu1 %vm567_vm9, %v3218_v26  ;;  %5626 = vmatmul.mubr.msk.f32.vlgmr.msra.gmra.mxu1 %vm532_vm8, %v2995_v40 }
0x193a   :  { %5636 = vmatpush3.msk.msra.mxu1 %vm567_vm9, %v3218_v26  ;;  %v3213_v43 = vmul.f32 %v5937_v42, %v5925_v17 }
0x193b   :  { %5637 = vmatprep.subr.mxu1 %v3216_v24 }
0x193c   :  { %5638 = vmatpush3.msra.mxu1 %v3216_v24  ;;  %5639 = vmatprep.mubr.msk.f32.mxu1 %vm532_vm8, %v3213_v43 }
0x193d   :  { %5642 = vmatprep.subr.msk.mxu1 %vm446_vm6, %v3328_v39  ;;  %5640 = vmatmul.mubr.msk.f32.vlgmr.msra.gmra.mxu1 %vm532_vm8, %v3214_v44 }
0x193e   :  { %5643 = vmatpush3.xpose.msk.msra.mxu1 %vm446_vm6, %v3328_v39  ;;  %5646 = vmatprep.mubr.msk.f32.mxu1 %vm446_vm6, %v3320_v45 }
0x193f   :  { %5644 = vmatprep.subr.msk.mxu1 %vm446_vm6, %v3326_v31 }
0x1942   :  { %5645 = vmatpush3.xpose.msk.msra.mxu1 %vm446_vm6, %v3326_v31 }
0x1945   :  { %5647 = vmatmul.mubr.msk.f32.vlgmr.msra.gmra.mxu1 %vm446_vm6, %v3322_v46 }
0x19f5   :  { %v5613_v47 = vpop.f32.mrf.mxu1 }
0x19f6   :  { %2874 = vst.msk [vmem:[#allocation4 + $0x8] sm:$0x3] %vm646_vm10, %v5613_v47 }
0x19f7   :  { %v2864_v48 = vpop.f32.mrf.mxu1 }
0x19f8   :  { %2873 = vst.msk [vmem:[#allocation4] sm:$0xff] %vm446_vm6, %v2864_v48 }
0x19f9   :  { %v6749_v50 = vpop.f32.mrf.mxu1 }
0x19fb   :  { %v6751_v51 = vpop.f32.mrf.mxu1 }
0x19fd   :  { %v6753_v53 = vpop.f32.mrf.mxu1 }
0x19ff   :  { %v6755_v54 = vpop.f32.mrf.mxu1 }
0x1a05   :  { %v5648_v55 = vpop.f32.mrf.mxu1 }
0x1a06   :  { %v3415_v57 = vsel %vm536_vm7, %v5648_v55, -inf }
0x1a07   :  { %3416 = vmax.xlane.f32.xlu1 %v3415_v57  ;;  %v3403_v23 = vpop.f32.mrf.mxu1 }
0x1a08   :  { %v3412_v58 = vsel %vm532_vm8, %v3403_v23, -inf }
0x1a09   :  { %3413 = vmax.xlane.f32.xlu0 %v3412_v58 }
0x1a18   :  { %3434 = vrot.lane.b32.xlu1 %v6659_v15, %s7111_s3 }
0x1a1c   :  { %3540 = vrot.lane.b32.xlu1 %v6761_v63, %s6022_s4 }
0x1a20   :  { %3538 = vrot.lane.b32.xlu1 %v6765_v0, %s6022_s4  ;;  %s7112_s4 = smov 8  }
0x1a90   :  { %v3417_v1 = vpop.xlane.xlu1 %3416 }
0x1a91   :  { %v3419_v2 = vsub.f32 %v5648_v55, %v3417_v1 }
0x1a92   :  { %v3414_v3 = vpop.xlane.xlu0 %3413 }
0x1a93   :  { %v3422_v5 = vmul.f32 1.442695, %v3419_v2  ;;  %v3418_v6 = vsub.f32 %v3403_v23, %v3414_v3  ;;  %v6826_v3 = vld [vmem:[#allocation3 + $0x12] sm:$0x3] }
0x1a94   :  { %v3435_v59 = vpop.permute.xlu1 %3434 }
0x1a95   :  { %5938 = vpow2.f32 %v3422_v5  ;;  %v3420_v4 = vmul.f32 1.442695, %v3418_v6  ;;  %v3961_v5 = vmul.f32 0.35355338, %v6826_v3 }
0x1a97   :  { %5940 = vpow2.f32 %v3420_v4 }
0x1a98   :  { %v3541_v11 = vpop.permute.xlu1 %3540 }
0x1a9c   :  { %v3539_v17 = vpop.permute.xlu1 %3538 }
0x1aa2   :  { %v5939_v7 = vpop.eup %5938 }
0x1aa3   :  { %v3427_v15 = vsel %vm536_vm7, %v5939_v7, 0.0 }
0x1aa4   :  { %v5941_v8 = vpop.eup %5940  ;;  %3428 = vadd.xlane.f32.xlu0 %v3427_v15 }
0x1aa5   :  { %v3424_v60 = vsel %vm532_vm8, %v5941_v8, 0.0 }
0x1aa8   :  { %3425 = vadd.xlane.f32.xlu0 %v3424_v60 }
0x1abe   :  { %3436 = vrot.lane.b32.xlu0 %v6722_v19, %s7111_s3 }
0x1b2d   :  { %v3429_v9 = vpop.xlane.xlu0 %3428 }
0x1b2e   :  { %5942 = vrcp.f32 %v3429_v9 }
0x1b31   :  { %v3426_v10 = vpop.xlane.xlu0 %3425 }
0x1b32   :  { %5944 = vrcp.f32 %v3426_v10 }
0x1b35   :  { %v3437_v62 = vpop.permute.xlu0 %3436 }
0x1b36   :  { %5649 = vmatprep.subr.msk.mxu0 %vm567_vm9, %v3437_v62 }
0x1b37   :  { %5650 = vmatpush3.msk.msra.mxu0 %vm567_vm9, %v3437_v62 }
0x1b38   :  { %5651 = vmatprep.subr.mxu0 %v3435_v59 }
0x1b39   :  { %5652 = vmatpush3.msra.mxu0 %v3435_v59 }
0x1b3a   :  { %5656 = vmatprep.subr.msk.mxu0 %vm446_vm6, %v3541_v11 }
0x1b3b   :  { %v5943_v27 = vpop.eup %5942 }
0x1b3c   :  { %v3433_v13 = vmul.f32 %v5943_v27, %v5939_v7 }
0x1b3f   :  { %v5945_v30 = vpop.eup %5944 }
0x1b40   :  { %v3432_v12 = vmul.f32 %v5945_v30, %v5941_v8 }
0x1b42   :  { %5653 = vmatprep.mubr.msk.f32.mxu0 %vm532_vm8, %v3432_v12 }
0x1b43   :  { %5654 = vmatmul.mubr.msk.f32.vlgmr.msra.gmra.mxu0 %vm532_vm8, %v3433_v13 }
0x1b44   :  { %5657 = vmatpush3.xpose.msk.msra.mxu0 %vm446_vm6, %v3541_v11  ;;  %5660 = vmatprep.mubr.msk.f32.mxu0 %vm446_vm6, %v6777_v14 }
0x1b45   :  { %5658 = vmatprep.subr.msk.mxu0 %vm446_vm6, %v3539_v17 }
0x1b48   :  { %5659 = vmatpush3.xpose.msk.msra.mxu0 %vm446_vm6, %v3539_v17 }
0x1b4b   :  { %5661 = vmatmul.mubr.msk.f32.vlgmr.msra.gmra.mxu0 %vm446_vm6, %v3535_v18 }
0x1c03   :  { %v6788_v19 = vpop.f32.mrf.mxu0 }
0x1c05   :  { %v6790_v20 = vpop.f32.mrf.mxu0 }
0x1c0b   :  { %v5662_v61 = vpop.f32.mrf.mxu0 }
0x1c0c   :  { %v3630_v24 = vsel %vm536_vm7, %v5662_v61, -inf }
0x1c0d   :  { %3631 = vmax.xlane.f32.xlu1 %v3630_v24  ;;  %v3618_v26 = vpop.f32.mrf.mxu0 }
0x1c0e   :  { %v3627_v28 = vsel %vm532_vm8, %v3618_v26, -inf }
0x1c0f   :  { %3628 = vmax.xlane.f32.xlu0 %v3627_v28 }
0x1c1e   :  { %3649 = vrot.lane.b32.xlu1 %v6765_v0, %s7106_s28 }
0x1c22   :  { %3753 = vrot.lane.b32.xlu1 %v6796_v29, %s6023_s30 }
0x1c26   :  { %3751 = vrot.lane.b32.xlu1 %v6765_v0, %s6023_s30  ;;  %s7113_s30 = smov 16  }
0x1c2a   :  { %3747 = vrot.lane.b32.xlu1 %v3742_v49, %s6024_s25 }
0x1c96   :  { %v3632_v32 = vpop.xlane.xlu1 %3631 }
0x1c97   :  { %v3634_v52 = vsub.f32 %v5662_v61, %v3632_v32 }
0x1c98   :  { %v3629_v33 = vpop.xlane.xlu0 %3628 }
0x1c99   :  { %v3637_v34 = vmul.f32 1.442695, %v3634_v52  ;;  %v3633_v35 = vsub.f32 %v3618_v26, %v3629_v33 }
0x1c9a   :  { %v3650_v41 = vpop.permute.xlu1 %3649 }
0x1c9b   :  { %5946 = vpow2.f32 %v3637_v34  ;;  %v3635_v36 = vmul.f32 1.442695, %v3633_v35 }
0x1c9d   :  { %5948 = vpow2.f32 %v3635_v36  ;;  %v6858_v36 = vld [vmem:[#allocation3 + $0x12] sm:$0x3] }
0x1c9e   :  { %v3754_v43 = vpop.permute.xlu1 %3753 }
0x1ca2   :  { %v3752_v48 = vpop.permute.xlu1 %3751 }
0x1ca6   :  { %v3748_v55 = vpop.permute.xlu1 %3747 }
0x1ca8   :  { %v5947_v37 = vpop.eup %5946 }
0x1ca9   :  { %v3642_v16 = vsel %vm536_vm7, %v5947_v37, 0.0 }
0x1caa   :  { %v5949_v56 = vpop.eup %5948  ;;  %3643 = vadd.xlane.f32.xlu0 %v3642_v16 }
0x1cab   :  { %v3639_v38 = vsel %vm532_vm8, %v5949_v56, 0.0 }
0x1cae   :  { %3640 = vadd.xlane.f32.xlu0 %v3639_v38 }
0x1cc4   :  { %3651 = vrot.lane.b32.xlu0 %v6761_v63, %s7106_s28 }
0x1cc8   :  { %3745 = vrot.lane.b32.xlu0 %v6777_v14, %s6024_s25  ;;  %s7114_s25 = smov 24  }
0x1d33   :  { %v3644_v39 = vpop.xlane.xlu0 %3643 }
0x1d34   :  { %5950 = vrcp.f32 %v3644_v39 }
0x1d37   :  { %v3641_v40 = vpop.xlane.xlu0 %3640 }
0x1d38   :  { %5952 = vrcp.f32 %v3641_v40 }
0x1d3b   :  { %v3652_v42 = vpop.permute.xlu0 %3651 }
0x1d3c   :  { %5663 = vmatprep.subr.msk.mxu1 %vm567_vm9, %v3652_v42 }
0x1d3d   :  { %5664 = vmatpush3.msk.msra.mxu1 %vm567_vm9, %v3652_v42 }
0x1d3e   :  { %5665 = vmatprep.subr.mxu1 %v3650_v41 }
0x1d3f   :  { %5666 = vmatpush3.msra.mxu1 %v3650_v41  ;;  %v3746_v47 = vpop.permute.xlu0 %3745 }
0x1d40   :  { %5670 = vmatprep.subr.msk.mxu1 %vm446_vm6, %v3754_v43 }
0x1d41   :  { %v5951_v44 = vpop.eup %5950 }
0x1d42   :  { %v3648_v46 = vmul.f32 %v5951_v44, %v5947_v37  ;;  %v4180_v37 = vmul.f32 0.35355338, %v6858_v36 }
0x1d45   :  { %v5953_v45 = vpop.eup %5952 }
0x1d46   :  { %v3647_v31 = vmul.f32 %v5953_v45, %v5949_v56 }
0x1d48   :  { %5667 = vmatprep.mubr.msk.f32.mxu1 %vm532_vm8, %v3647_v31 }
0x1d49   :  { %5668 = vmatmul.mubr.msk.f32.vlgmr.msra.gmra.mxu1 %vm532_vm8, %v3648_v46 }
0x1d4a   :  { %5671 = vmatpush3.xpose.msk.msra.mxu1 %vm446_vm6, %v3754_v43  ;;  %5674 = vmatprep.mubr.msk.f32.mxu1 %vm446_vm6, %v3746_v47 }
0x1d4b   :  { %5672 = vmatprep.subr.msk.mxu1 %vm446_vm6, %v3752_v48 }
0x1d4e   :  { %5673 = vmatpush3.xpose.msk.msra.mxu1 %vm446_vm6, %v3752_v48 }
0x1d51   :  { %5675 = vmatmul.mubr.msk.f32.vlgmr.msra.gmra.mxu1 %vm446_vm6, %v3748_v55 }
0x1e09   :  { %v5669_v57 = vpop.f32.mrf.mxu1 }
0x1e0a   :  { %3738 = vst.msk [vmem:[#allocation4 + $0x12] sm:$0x3] %vm646_vm10, %v5669_v57 }
0x1e0b   :  { %v3728_v23 = vpop.f32.mrf.mxu1 }
0x1e0c   :  { %3737 = vst.msk [vmem:[#allocation4 + $0xa] sm:$0xff] %vm446_vm6, %v3728_v23 }
0x1e11   :  { %v5676_v58 = vpop.f32.mrf.mxu1 }
0x1e12   :  { %v3841_v63 = vsel %vm536_vm7, %v5676_v58, -inf }
0x1e13   :  { %3842 = vmax.xlane.f32.xlu1 %v3841_v63  ;;  %v3829_v1 = vpop.f32.mrf.mxu1 }
0x1e14   :  { %v3838_v2 = vsel %vm532_vm8, %v3829_v1, -inf }
0x1e15   :  { %3839 = vmax.xlane.f32.xlu0 %v3838_v2 }
0x1e24   :  { %3860 = vrot.lane.b32.xlu1 %v6765_v0, %s7107_s24 }
0x1e28   :  { %3972 = vrot.lane.b32.xlu1 %v6826_v3, %s6025_s5 }
0x1e2c   :  { %3970 = vrot.lane.b32.xlu1 %v6765_v0, %s6025_s5 }
0x1e30   :  { %3966 = vrot.lane.b32.xlu1 %v3961_v5, %s7105_s8 }
0x1e9c   :  { %v3843_v6 = vpop.xlane.xlu1 %3842 }
0x1e9d   :  { %v3845_v4 = vsub.f32 %v5676_v58, %v3843_v6 }
0x1e9e   :  { %v3840_v7 = vpop.xlane.xlu0 %3839 }
0x1e9f   :  { %v3848_v15 = vmul.f32 1.442695, %v3845_v4  ;;  %v3844_v8 = vsub.f32 %v3829_v1, %v3840_v7 }
0x1ea0   :  { %v3861_v30 = vpop.permute.xlu1 %3860 }
0x1ea1   :  { %5954 = vpow2.f32 %v3848_v15  ;;  %v3846_v60 = vmul.f32 1.442695, %v3844_v8 }
0x1ea3   :  { %5956 = vpow2.f32 %v3846_v60 }
0x1ea4   :  { %v3973_v13 = vpop.permute.xlu1 %3972 }
0x1ea8   :  { %v3971_v28 = vpop.permute.xlu1 %3970 }
0x1eae   :  { %v5955_v9 = vpop.eup %5954 }
0x1eaf   :  { %v3853_v10 = vsel %vm536_vm7, %v5955_v9, 0.0 }
0x1eb0   :  { %v5957_v59 = vpop.eup %5956  ;;  %3854 = vadd.xlane.f32.xlu0 %v3853_v10 }
0x1eb1   :  { %v3850_v62 = vsel %vm532_vm8, %v5957_v59, 0.0 }
0x1eb4   :  { %3851 = vadd.xlane.f32.xlu0 %v3850_v62 }
0x1eca   :  { %3862 = vrot.lane.b32.xlu0 %v6796_v29, %s7107_s24  ;;  %v3967_v29 = vpop.permute.xlu1 %3966 }
0x1ece   :  { %3964 = vrot.lane.b32.xlu0 %v6777_v14, %s7105_s8 }
0x1f39   :  { %v3855_v11 = vpop.xlane.xlu0 %3854 }
0x1f3a   :  { %5958 = vrcp.f32 %v3855_v11 }
0x1f3d   :  { %v3852_v27 = vpop.xlane.xlu0 %3851 }
0x1f3e   :  { %5960 = vrcp.f32 %v3852_v27 }
0x1f41   :  { %v3863_v12 = vpop.permute.xlu0 %3862 }
0x1f42   :  { %5677 = vmatprep.subr.msk.mxu0 %vm567_vm9, %v3863_v12 }
0x1f43   :  { %5678 = vmatpush3.msk.msra.mxu0 %vm567_vm9, %v3863_v12 }
0x1f44   :  { %5679 = vmatprep.subr.mxu0 %v3861_v30 }
0x1f45   :  { %5680 = vmatpush3.msra.mxu0 %v3861_v30  ;;  %v3965_v26 = vpop.permute.xlu0 %3964 }
0x1f46   :  { %5684 = vmatprep.subr.msk.mxu0 %vm446_vm6, %v3973_v13 }
0x1f47   :  { %v5959_v17 = vpop.eup %5958 }
0x1f48   :  { %v3859_v24 = vmul.f32 %v5959_v17, %v5955_v9 }
0x1f4b   :  { %v5961_v18 = vpop.eup %5960 }
0x1f4c   :  { %v3858_v61 = vmul.f32 %v5961_v18, %v5957_v59 }
0x1f4e   :  { %5681 = vmatprep.mubr.msk.f32.mxu0 %vm532_vm8, %v3858_v61 }
0x1f4f   :  { %5682 = vmatmul.mubr.msk.f32.vlgmr.msra.gmra.mxu0 %vm532_vm8, %v3859_v24 }
0x1f50   :  { %5685 = vmatpush3.xpose.msk.msra.mxu0 %vm446_vm6, %v3973_v13  ;;  %5688 = vmatprep.mubr.msk.f32.mxu0 %vm446_vm6, %v3965_v26 }
0x1f51   :  { %5686 = vmatprep.subr.msk.mxu0 %vm446_vm6, %v3971_v28 }
0x1f54   :  { %5687 = vmatpush3.xpose.msk.msra.mxu0 %vm446_vm6, %v3971_v28 }
0x1f57   :  { %5689 = vmatmul.mubr.msk.f32.vlgmr.msra.gmra.mxu0 %vm446_vm6, %v3967_v29 }
0x200f   :  { %v6850_v49 = vpop.f32.mrf.mxu0 }
0x2011   :  { %v6852_v32 = vpop.f32.mrf.mxu0 }
0x2017   :  { %v5690_v52 = vpop.f32.mrf.mxu0 }
0x2018   :  { %v4060_v33 = vsel %vm536_vm7, %v5690_v52, -inf }
0x2019   :  { %4061 = vmax.xlane.f32.xlu1 %v4060_v33  ;;  %v4048_v34 = vpop.f32.mrf.mxu0  ;;  %v5814_v33 = vld [vmem:[%s7048_s9 + $0x18] sm:$0xff]  }
0x201a   :  { %v4057_v35 = vsel %vm532_vm8, %v4048_v34, -inf }
0x201b   :  { %4058 = vmax.xlane.f32.xlu0 %v4057_v35 }
0x202a   :  { %4079 = vrot.lane.b32.xlu1 %v6765_v0, %s7108_s7 }
0x202e   :  { %4191 = vrot.lane.b32.xlu1 %v6858_v36, %s7109_s6 }
0x2032   :  { %4189 = vrot.lane.b32.xlu1 %v6765_v0, %s7109_s6 }
0x2036   :  { %4185 = vrot.lane.b32.xlu1 %v4180_v37, %s7110_s29 }
0x20a2   :  { %v4062_v16 = vpop.xlane.xlu1 %4061 }
0x20a3   :  { %v4064_v56 = vsub.f32 %v5690_v52, %v4062_v16 }
0x20a4   :  { %v4059_v38 = vpop.xlane.xlu0 %4058 }
0x20a5   :  { %v4067_v39 = vmul.f32 1.442695, %v4064_v56  ;;  %v4063_v40 = vsub.f32 %v4048_v34, %v4059_v38  ;;  %v5815_v34 = vld [vmem:[%s7048_s9 + $0x10] sm:$0xff]  }
0x20a6   :  { %v4080_v47 = vpop.permute.xlu1 %4079 }
0x20a7   :  { %5962 = vpow2.f32 %v4067_v39  ;;  %v4065_v41 = vmul.f32 1.442695, %v4063_v40 }
0x20a9   :  { %5964 = vpow2.f32 %v4065_v41 }
0x20aa   :  { %v4192_v55 = vpop.permute.xlu1 %4191 }
0x20ae   :  { %v4190_v1 = vpop.permute.xlu1 %4189 }
0x20b2   :  { %v4186_v2 = vpop.permute.xlu1 %4185 }
0x20b4   :  { %v5963_v42 = vpop.eup %5962 }
0x20b5   :  { %v4072_v43 = vsel %vm536_vm7, %v5963_v42, 0.0 }
0x20b6   :  { %v5965_v44 = vpop.eup %5964  ;;  %4073 = vadd.xlane.f32.xlu0 %v4072_v43  ;;  %v5223_v43 = vld [vmem:[%s7049_s10 + $0x1] ss:$0 sm:$0xff] }
0x20b7   :  { %v4069_v45 = vsel %vm532_vm8, %v5965_v44, 0.0 }
0x20ba   :  { %4070 = vadd.xlane.f32.xlu0 %v4069_v45 }
0x20d0   :  { %4081 = vrot.lane.b32.xlu0 %v6826_v3, %s7108_s7 }
0x20d4   :  { %4183 = vrot.lane.b32.xlu0 %v6777_v14, %s7110_s29 }
0x213f   :  { %v4074_v31 = vpop.xlane.xlu0 %4073 }
0x2140   :  { %5966 = vrcp.f32 %v4074_v31 }
0x2143   :  { %v4071_v46 = vpop.xlane.xlu0 %4070 }
0x2144   :  { %5968 = vrcp.f32 %v4071_v46 }
0x2147   :  { %v4082_v48 = vpop.permute.xlu0 %4081 }
0x2148   :  { %5691 = vmatprep.subr.msk.mxu1 %vm567_vm9, %v4082_v48 }
0x2149   :  { %5692 = vmatpush3.msk.msra.mxu1 %vm567_vm9, %v4082_v48 }
0x214a   :  { %5693 = vmatprep.subr.mxu1 %v4080_v47 }
0x214b   :  { %5694 = vmatpush3.msra.mxu1 %v4080_v47  ;;  %v4184_v14 = vpop.permute.xlu0 %4183 }
0x214c   :  { %5698 = vmatprep.subr.msk.mxu1 %vm446_vm6, %v4192_v55 }
0x214d   :  { %v5967_v57 = vpop.eup %5966 }
0x214e   :  { %v4078_v63 = vmul.f32 %v5967_v57, %v5963_v42 }
0x2151   :  { %v5969_v23 = vpop.eup %5968 }
0x2152   :  { %v4077_v58 = vmul.f32 %v5969_v23, %v5965_v44 }
0x2154   :  { %5695 = vmatprep.mubr.msk.f32.mxu1 %vm532_vm8, %v4077_v58 }
0x2155   :  { %5696 = vmatmul.mubr.msk.f32.vlgmr.msra.gmra.mxu1 %vm532_vm8, %v4078_v63 }
0x2156   :  { %5699 = vmatpush3.xpose.msk.msra.mxu1 %vm446_vm6, %v4192_v55  ;;  %5702 = vmatprep.mubr.msk.f32.mxu1 %vm446_vm6, %v4184_v14 }
0x2157   :  { %5700 = vmatprep.subr.msk.mxu1 %vm446_vm6, %v4190_v1 }
0x215a   :  { %5701 = vmatpush3.xpose.msk.msra.mxu1 %vm446_vm6, %v4190_v1 }
0x215d   :  { %5703 = vmatmul.mubr.msk.f32.vlgmr.msra.gmra.mxu1 %vm446_vm6, %v4186_v2 }
0x2215   :  { %v5697_v3 = vpop.f32.mrf.mxu1 }
0x2217   :  { %v4158_v5 = vpop.f32.mrf.mxu1 }
0x221d   :  { %v5704_v6 = vpop.f32.mrf.mxu1 }
0x221e   :  { %v4279_v4 = vsel %vm536_vm7, %v5704_v6, -inf }
0x221f   :  { %4280 = vmax.xlane.f32.xlu1 %v4279_v4  ;;  %v4267_v7 = vpop.f32.mrf.mxu1 }
0x2220   :  { %v4276_v15 = vsel %vm532_vm8, %v4267_v7, -inf }
0x2221   :  { %4277 = vmax.xlane.f32.xlu0 %v4276_v15 }
0x2230   :  { %4298 = vrot.lane.b32.xlu1 %v6765_v0, %s7111_s3 }
0x2234   :  { %3086 = vrot.lane.b32.xlu1 %v6751_v51, %s7112_s4 }
0x2238   :  { %3088 = vrot.lane.b32.xlu1 %v6749_v50, %s7112_s4 }
0x223c   :  { %3305 = vrot.lane.b32.xlu1 %v6755_v54, %s7113_s30 }
0x2240   :  { %3952 = vrot.lane.b32.xlu1 %v6850_v49, %s7112_s4 }
0x2244   :  { %3524 = vrot.lane.b32.xlu1 %v6790_v20, %s7114_s25 }
0x2248   :  { %4171 = vrot.lane.b32.xlu1 %v5697_v3, %s7113_s30 }
0x22a8   :  { %v4281_v8 = vpop.xlane.xlu1 %4280 }
0x22a9   :  { %v4283_v60 = vsub.f32 %v5704_v6, %v4281_v8 }
0x22aa   :  { %v4278_v0 = vpop.xlane.xlu0 %4277 }
0x22ab   :  { %v4286_v9 = vmul.f32 1.442695, %v4283_v60  ;;  %v4282_v10 = vsub.f32 %v4267_v7, %v4278_v0 }
0x22ac   :  { %v4299_v51 = vpop.permute.xlu1 %4298 }
0x22ad   :  { %5970 = vpow2.f32 %v4286_v9  ;;  %v4284_v59 = vmul.f32 1.442695, %v4282_v10  ;;  %v5816_v10 = vld [vmem:[%s7052_s13 + $0x18] sm:$0xff]  }
0x22ae   :  { %5720 = vmatprep.subr.bf16.mxu1 %v5816_v10 }
0x22af   :  { %5972 = vpow2.f32 %v4284_v59  ;;  %5721 = vmatpush3.bf16.msra.mxu1 %v5816_v10 }
0x22b0   :  { %v3087_v50 = vpop.permute.xlu1 %3086 }
0x22b1   :  { %3092 = vst.msk [vmem:[#allocation4] sm:$0xff] %vm865_vm11, %v3087_v50 }
0x22b4   :  { %v3089_v54 = vpop.permute.xlu1 %3088 }
0x22b5   :  { %3093 = vst.msk [vmem:[#allocation4 + $0x8] sm:$0x3] %vm867_vm12, %v3089_v54 }
0x22b8   :  { %v3306_v62 = vpop.permute.xlu1 %3305 }
0x22b9   :  { %3311 = vst.msk [vmem:[#allocation4] sm:$0xff] %vm1086_vm13, %v3306_v62 }
0x22ba   :  { %v5971_v20 = vpop.eup %5970 }
0x22bb   :  { %v4291_v11 = vsel %vm536_vm7, %v5971_v20, 0.0 }
0x22bc   :  { %v5973_v27 = vpop.eup %5972  ;;  %v3953_v30 = vpop.permute.xlu1 %3952  ;;  %4292 = vadd.xlane.f32.xlu0 %v4291_v11 }
0x22bd   :  { %3957 = vst.msk [vmem:[#allocation4 + $0x12] sm:$0x3] %vm867_vm12, %v3953_v30  ;;  %v4288_v12 = vsel %vm532_vm8, %v5973_v27, 0.0 }
0x22c0   :  { %v3525_v13 = vpop.permute.xlu1 %3524  ;;  %4289 = vadd.xlane.f32.xlu0 %v4288_v12 }
0x22c1   :  { %3530 = vst.msk [vmem:[#allocation4] sm:$0xff] %vm1307_vm14, %v3525_v13 }
0x22c4   :  { %v4172_v17 = vpop.permute.xlu1 %4171 }
0x22c5   :  { %4176 = vst.msk [vmem:[#allocation4 + $0x12] sm:$0x3] %vm1088_vm15, %v4172_v17 }
0x22c8   :  { %v4396_v56 = vld [vmem:[#allocation4] sm:$0xff] }
0x22d6   :  { %4300 = vrot.lane.b32.xlu0 %v6858_v36, %s7111_s3 }
0x22da   :  { %3950 = vrot.lane.b32.xlu0 %v6852_v32, %s7112_s4 }
0x22de   :  { %3307 = vrot.lane.b32.xlu0 %v6753_v53, %s7113_s30 }
0x22e2   :  { %4169 = vrot.lane.b32.xlu0 %v4158_v5, %s7113_s30 }
0x22e6   :  { %3526 = vrot.lane.b32.xlu0 %v6788_v19, %s7114_s25 }
0x2345   :  { %v4293_v18 = vpop.xlane.xlu0 %4292 }
0x2346   :  { %5974 = vrcp.f32 %v4293_v18  ;;  %v5230_v18 = vld [vmem:[%s7050_s11 + $0x1] ss:$0 sm:$0xff] }
0x2349   :  { %v4290_v61 = vpop.xlane.xlu0 %4289 }
0x234a   :  { %5976 = vrcp.f32 %v4290_v61 }
0x234d   :  { %v4301_v24 = vpop.permute.xlu0 %4300 }
0x234e   :  { %5705 = vmatprep.subr.msk.mxu0 %vm567_vm9, %v4301_v24 }
0x234f   :  { %5706 = vmatpush3.msk.msra.mxu0 %vm567_vm9, %v4301_v24 }
0x2350   :  { %5707 = vmatprep.subr.mxu0 %v4299_v51 }
0x2351   :  { %5708 = vmatpush3.msra.mxu0 %v4299_v51  ;;  %v3951_v26 = vpop.permute.xlu0 %3950  ;;  %v5817_v51 = vld [vmem:[%s7052_s13 + $0x10] sm:$0xff]  }
0x2352   :  { %3956 = vst.msk [vmem:[#allocation4 + $0xa] sm:$0xff] %vm865_vm11, %v3951_v26  ;;  %5712 = vmatprep.subr.bf16.mxu0 %v5814_v33  ;;  %5722 = vmatprep.subr.bf16.mxu1 %v5817_v51 }
0x2353   :  { %v5975_v28 = vpop.eup %5974  ;;  %5723 = vmatpush3.bf16.msra.mxu1 %v5817_v51 }
0x2354   :  { %v4297_v32 = vmul.f32 %v5975_v28, %v5971_v20 }
0x2355   :  { %v3308_v53 = vpop.permute.xlu0 %3307 }
0x2356   :  { %3312 = vst.msk [vmem:[#allocation4 + $0x8] sm:$0x3] %vm1088_vm15, %v3308_v53 }
0x2357   :  { %v5977_v29 = vpop.eup %5976 }
0x2358   :  { %v4296_v19 = vmul.f32 %v5977_v29, %v5973_v27  ;;  %v5231_v29 = vld [vmem:[%s7051_s12 + $0x1] ss:$0 sm:$0xff] }
0x2359   :  { %v4170_v49 = vpop.permute.xlu0 %4169 }
0x235a   :  { %4175 = vst.msk [vmem:[#allocation4 + $0xa] sm:$0xff] %vm1086_vm13, %v4170_v49  ;;  %5709 = vmatprep.mubr.msk.f32.mxu0 %vm532_vm8, %v4296_v19 }
0x235b   :  { %5710 = vmatmul.mubr.msk.f32.vlgmr.msra.gmra.mxu0 %vm532_vm8, %v4297_v32 }
0x235c   :  { %5713 = vmatpush3.bf16.msra.mxu0 %v5814_v33 }
0x235d   :  { %v3527_v52 = vpop.permute.xlu0 %3526  ;;  %5714 = vmatprep.subr.bf16.mxu0 %v5815_v34 }
0x235e   :  { %3531 = vst.msk [vmem:[#allocation4 + $0x8] sm:$0x3] %vm1309_vm1, %v3527_v52 }
0x2360   :  { %5715 = vmatpush3.bf16.msra.mxu0 %v5815_v34 }
0x241b   :  { %v5711_v35 = vpop.f32.mrf.mxu0 }
0x241c   :  { %4390 = vrot.lane.b32.xlu1 %v5711_v35, %s7114_s25 }
0x241d   :  { %v4377_v36 = vpop.f32.mrf.mxu0 }
0x241e   :  { %4388 = vrot.lane.b32.xlu0 %v4377_v36, %s7114_s25  ;;  %v5818_v36 = vld [vmem:[%s7054_s15 + $0x38] sm:$0xff]  }
0x241f   :  { %5728 = vmatprep.subr.bf16.mxu0 %v5818_v36 }
0x248e   :  { %v4391_v37 = vpop.permute.xlu1 %4390 }
0x248f   :  { %4395 = vst.msk [vmem:[#allocation4 + $0x12] sm:$0x3] %vm1309_vm1, %v4391_v37  ;;  %v5819_v37 = vld [vmem:[%s7054_s15 + $0x30] sm:$0xff]  }
0x2490   :  { %v4389_v16 = vpop.permute.xlu0 %4388 }
0x2491   :  { %4394 = vst.msk [vmem:[#allocation4 + $0xa] sm:$0xff] %vm1307_vm14, %v4389_v16  ;;  %v5820_v16 = vld [vmem:[%s7054_s15 + $0x28] sm:$0xff]  }
0x2498   :  { %v4397_v38 = vld [vmem:[#allocation4 + $0x8] sm:$0xff]  ;;  %v4398_v39 = vld [vmem:[#allocation4 + $0x10] sm:$0xf] }
0x2499   :  { %v4406_v40 = vpack.c.bf16 %v4397_v38, %v4396_v56  ;;  %v4407_v41 = vpack.c.bf16 %v4398_v39, %v4398_v39  ;;  %v5821_v56 = vld [vmem:[%s7054_s15 + $0x20] sm:$0xff]  }
0x249a   :  { %v5237_v38 = vld [vmem:[%s7053_s14 + $0x1] ss:$0 sm:$0xff] }
0x249b   :  { %5716 = vmatprep.mubr.msk.bf16.mxu0 %vm234_vm2, %v4406_v40 }
0x249c   :  { %5717 = vmatmul.mubr.msk.bf16.vlgmr.msra.gmra.mxu0 %vm234_vm2, %v4407_v41 }
0x249d   :  { %5729 = vmatpush3.bf16.msra.mxu0 %v5818_v36 }
0x249e   :  { %5730 = vmatprep.subr.bf16.mxu0 %v5819_v37 }
0x24a1   :  { %5731 = vmatpush3.bf16.msra.mxu0 %v5819_v37 }
0x24a2   :  { %5732 = vmatprep.subr.bf16.mxu0 %v5820_v16 }
0x24a5   :  { %5733 = vmatpush3.bf16.msra.mxu0 %v5820_v16  ;;  %v5822_v16 = vld [vmem:[%s7058_s19 + $0x8] sm:$0xff]  }
0x24a6   :  { %5734 = vmatprep.subr.bf16.mxu0 %v5821_v56 }
0x24a9   :  { %5735 = vmatpush3.bf16.msra.mxu0 %v5821_v56  ;;  %v6036_v56 = vmov 0.0  }
0x24aa   :  { %5740 = vmatprep.subr.bf16.mxu1 %v6036_v56  ;;  %5756 = vmatprep.subr.bf16.mxu0 %v6036_v56 }
0x255c   :  { %v5718_v42 = vpop.f32.mrf.mxu0 }
0x255d   :  { %v4475_v45 = vadd.f32 %v5718_v42, %v5223_v43 }
0x255e   :  { %v4466_v44 = vpop.f32.mrf.mxu0 }
0x255f   :  { %v4467_v31 = vadd.f32 %v5223_v43, %v4466_v44  ;;  %v6941_v55 = vadd.f32 %v4475_v45, %v6622_v22 }
0x2560   :  { %v5719_v46 = vpop.f32.mrf.mxu0 }
0x2561   :  { %v6938_v47 = vadd.f32 %v4467_v31, %v6619_v21  ;;  %v4493_v14 = vsel %vm299_vm3, %v6941_v55, 0.0 }
0x2562   :  { %v4469_v48 = vpop.f32.mrf.mxu0 }
0x2563   :  { %v4470_v57 = vadd.f32 %v5223_v43, %v4469_v48  ;;  %v4487_v23 = vsel %vm234_vm2, %v6938_v47, 0.0 }
0x2564   :  { %4488 = vadd.xlane.f32.xlu0 %v4487_v23 }
0x2565   :  { %v6946_v58 = vadd.f32 %v4470_v57, %v6627_v25 }
0x2567   :  { %v4490_v63 = vsel %vm234_vm2, %v6946_v58, 0.0 }
0x2568   :  { %4491 = vadd.xlane.f32.xlu1 %v4490_v63  ;;  %4494 = vadd.xlane.f32.xlu0 %v4493_v14 }
0x25ed   :  { %v4489_v21 = vpop.xlane.xlu0 %4488 }
0x25ee   :  { %v4496_v1 = vmul.f32 0.03125, %v4489_v21 }
0x25f0   :  { %v4499_v22 = vsub.f32 %v6938_v47, %v4496_v1 }
0x25f1   :  { %v4492_v2 = vpop.xlane.xlu1 %4491  ;;  %v4495_v3 = vpop.xlane.xlu0 %4494 }
0x25f2   :  { %v4497_v5 = vmul.f32 0.03125, %v4492_v2  ;;  %v4498_v6 = vmul.f32 0.03125, %v4495_v3  ;;  %v4502_v4 = vmul.f32 %v4499_v22, %v4499_v22 }
0x25f4   :  { %v4500_v25 = vsub.f32 %v6946_v58, %v4497_v5  ;;  %v4501_v7 = vsub.f32 %v6941_v55, %v4498_v6  ;;  %v4505_v15 = vsel %vm234_vm2, %v4502_v4, 0.0 }
0x25f5   :  { %4506 = vadd.xlane.f32.xlu0 %v4505_v15 }
0x25f6   :  { %v4503_v8 = vmul.f32 %v4500_v25, %v4500_v25  ;;  %v4504_v60 = vmul.f32 %v4501_v7, %v4501_v7 }
0x25f8   :  { %v4508_v0 = vsel %vm234_vm2, %v4503_v8, 0.0  ;;  %v4511_v9 = vsel %vm299_vm3, %v4504_v60, 0.0 }
0x25f9   :  { %4509 = vadd.xlane.f32.xlu0 %v4508_v0  ;;  %4512 = vadd.xlane.f32.xlu1 %v4511_v9 }
0x267e   :  { %v4507_v59 = vpop.xlane.xlu0 %4506 }
0x267f   :  { %v4514_v50 = vmul.f32 0.03125, %v4507_v59 }
0x2681   :  { %v4517_v54 = vadd.f32 1e-06, %v4514_v50 }
0x2682   :  { %v4513_v62 = vpop.xlane.xlu1 %4512  ;;  %v4510_v20 = vpop.xlane.xlu0 %4509 }
0x2683   :  { %5978 = vrsqrt.f32 %v4517_v54  ;;  %v4516_v11 = vmul.f32 0.03125, %v4513_v62  ;;  %v4515_v27 = vmul.f32 0.03125, %v4510_v20 }
0x2685   :  { %v4519_v30 = vadd.f32 1e-06, %v4516_v11  ;;  %v4518_v12 = vadd.f32 1e-06, %v4515_v27  ;;  %v5251_v11 = vld [vmem:[%s7055_s16 + $0x1] ss:$0 sm:$0xff] }
0x2687   :  { %5980 = vrsqrt.f32 %v4519_v30 }
0x2688   :  { %5982 = vrsqrt.f32 %v4518_v12 }
0x2690   :  { %v5979_v13 = vpop.eup %5978 }
0x2691   :  { %v4523_v17 = vmul.f32 %v5979_v13, %v4499_v22 }
0x2693   :  { %v4532_v28 = vmul.f32 %v5230_v18, %v4523_v17 }
0x2694   :  { %v5981_v61 = vpop.eup %5980 }
0x2695   :  { %v5983_v24 = vpop.eup %5982  ;;  %v4525_v26 = vmul.f32 %v5981_v61, %v4501_v7  ;;  %v4541_v52 = vadd.f32 %v5231_v29, %v4532_v28 }
0x2696   :  { %v4524_v53 = vmul.f32 %v5983_v24, %v4500_v25 }
0x2697   :  { %v4534_v19 = vmul.f32 %v5230_v18, %v4525_v26 }
0x2698   :  { %v4533_v49 = vmul.f32 %v5230_v18, %v4524_v53 }
0x2699   :  { %v4543_v32 = vadd.f32 %v5231_v29, %v4534_v19 }
0x269a   :  { %v4542_v33 = vadd.f32 %v5231_v29, %v4533_v49 }
0x269b   :  { %v4552_v34 = vpack.c.bf16 %v4543_v32, %v4543_v32 }
0x269c   :  { %v4551_v35 = vpack.c.bf16 %v4542_v33, %v4541_v52 }
0x269e   :  { %5724 = vmatprep.mubr.msk.bf16.mxu1 %vm234_vm2, %v4551_v35 }
0x269f   :  { %5725 = vmatmul.mubr.msk.bf16.vlgmr.msra.gmra.mxu1 %vm234_vm2, %v4552_v34 }
0x26a0   :  { %5741 = vmatpush3.bf16.msra.mxu1 %v5822_v16 }
0x26a1   :  { %5742 = vmatprep.subr.bf16.mxu1 %v6036_v56 }
0x275f   :  { %v5726_v39 = vpop.f32.mrf.mxu1 }
0x2760   :  { %v4620_v40 = vadd.f32 %v5726_v39, %v5237_v38 }
0x2761   :  { %v4611_v41 = vpop.f32.mrf.mxu1 }
0x2762   :  { %v4627_v42 = vmul.f32 %v4620_v40, %v4620_v40  ;;  %v4612_v43 = vadd.f32 %v5237_v38, %v4611_v41 }
0x2763   :  { %v5727_v44 = vpop.f32.mrf.mxu1 }
0x2764   :  { %v4630_v45 = vmul.f32 %v4627_v42, %v4620_v40  ;;  %v4625_v31 = vmul.f32 %v4612_v43, %v4612_v43 }
0x2765   :  { %v4614_v46 = vpop.f32.mrf.mxu1 }
0x2766   :  { %v4633_v48 = vmul.f32 0.044715, %v4630_v45  ;;  %v4628_v57 = vmul.f32 %v4625_v31, %v4612_v43  ;;  %v4615_v23 = vadd.f32 %v5237_v38, %v4614_v46 }
0x2768   :  { %v4636_v63 = vadd.f32 %v4633_v48, %v4620_v40  ;;  %v4631_v14 = vmul.f32 0.044715, %v4628_v57  ;;  %v4626_v21 = vmul.f32 %v4615_v23, %v4615_v23 }
0x276a   :  { %v4639_v1 = vmul.f32 0.7978846, %v4636_v63  ;;  %v4634_v22 = vadd.f32 %v4631_v14, %v4612_v43  ;;  %v4629_v2 = vmul.f32 %v4626_v21, %v4615_v23  ;;  %v5259_v14 = vld [vmem:[%s7057_s18] ss:$0 sm:$0xff] }
0x276c   :  { %5984 = vtanh.f32 %v4639_v1  ;;  %v4637_v3 = vmul.f32 0.7978846, %v4634_v22  ;;  %v4632_v5 = vmul.f32 0.044715, %v4629_v2 }
0x276e   :  { %5986 = vtanh.f32 %v4637_v3  ;;  %v4635_v6 = vadd.f32 %v4632_v5, %v4615_v23 }
0x2770   :  { %v4638_v4 = vmul.f32 0.7978846, %v4635_v6 }
0x2772   :  { %5988 = vtanh.f32 %v4638_v4  ;;  %v5824_v4 = vld [vmem:[%s7060_s21 + $0x8] sm:$0xff]  }
0x2779   :  { %v5985_v25 = vpop.eup %5984 }
0x277a   :  { %v4645_v15 = vadd.f32 1.0, %v5985_v25 }
0x277b   :  { %v5987_v7 = vpop.eup %5986 }
0x277c   :  { %v4643_v8 = vadd.f32 1.0, %v5987_v7  ;;  %v4648_v0 = vmul.f32 0.5, %v4645_v15  ;;  %v5825_v15 = vld [vmem:[%s7060_s21] sm:$0xff]  }
0x277e   :  { %v4646_v9 = vmul.f32 0.5, %v4643_v8  ;;  %v4651_v59 = vmul.f32 %v4648_v0, %v4620_v40 }
0x277f   :  { %v5989_v60 = vpop.eup %5988 }
0x2780   :  { %v4644_v10 = vadd.f32 1.0, %v5989_v60  ;;  %v4649_v50 = vmul.f32 %v4646_v9, %v4612_v43  ;;  %v4664_v20 = vpack.c.bf16 %v4651_v59, %v4651_v59 }
0x2782   :  { %v4647_v51 = vmul.f32 0.5, %v4644_v10 }
0x2784   :  { %v4650_v54 = vmul.f32 %v4647_v51, %v4615_v23  ;;  %v5258_v23 = vld [vmem:[%s7056_s17] ss:$0 sm:$0xff] }
0x2786   :  { %v4663_v62 = vpack.c.bf16 %v4650_v54, %v4649_v50 }
0x2788   :  { %5736 = vmatprep.mubr.msk.bf16.mxu0 %vm186_vm0, %v4663_v62 }
0x2789   :  { %5737 = vmatmul.mubr.msk.bf16.vlgmr.msra.gmra.mxu0 %vm186_vm0, %v4664_v20  ;;  %vm6037_vm0 = vmmov 0  }
0x278a   :  { %5757 = vmatpush3.bf16.msra.mxu0 %v5822_v16  ;;  %5744 = vmatprep.mubr.msk.bf16.mxu1 %vm6037_vm0, %v6036_v56 }
0x278b   :  { %5758 = vmatprep.subr.bf16.mxu0 %v6036_v56  ;;  %5760 = vmatprep.mubr.msk.bf16.mxu0 %vm6037_vm0, %v6036_v56 }
0x2849   :  { %v5738_v27 = vpop.f32.mrf.mxu0 }
0x284a   :  { %v4744_v30 = vadd.f32 %v5738_v27, %v5251_v11 }
0x284b   :  { %v4735_v12 = vpop.f32.mrf.mxu0 }
0x284c   :  { %v4736_v13 = vadd.f32 %v5251_v11, %v4735_v12  ;;  %v4751_v34 = vadd.f32 %v4744_v30, %v6941_v55  ;;  %v5823_v55 = vld [vmem:[%s7058_s19] sm:$0xff]  }
0x284d   :  { %v5739_v17 = vpop.f32.mrf.mxu0  ;;  %5743 = vmatpush3.bf16.msra.mxu1 %v5823_v55  ;;  %5759 = vmatpush3.bf16.msra.mxu0 %v5823_v55 }
0x284e   :  { %v4749_v18 = vadd.f32 %v4736_v13, %v6938_v47  ;;  %5748 = vmatprep.subr.bf16.mxu1 %v6036_v56  ;;  %v4818_v17 = vld [vmem:[%s7059_s20] sm:$0x1]  ;;  %s6038_s20 = smov [#allocation5]  }
0x284f   :  { %v4738_v61 = vpop.f32.mrf.mxu0  ;;  %s5041_s11 = sshll.u32 %s6038_s20, 4  ;;  %s5042_s11 = int_to_ptr.vmem [resolvable:$true] %s5041_s11 }
0x2850   :  { %v4739_v24 = vadd.f32 %v5251_v11, %v4738_v61  ;;  %v4754_v26 = vsel %vm234_vm2, %v4749_v18, 0.0  ;;  %p6004_p1 = scmp.lt.s32.totalorder %s5042_s11, %s5042_s11 }
0x2851   :  { %4755 = vadd.xlane.f32.xlu0 %v4754_v26 }
0x2852   :  { %v4750_v53 = vadd.f32 %v4739_v24, %v6946_v58  ;;  %v4760_v58 = vsel %vm299_vm3, %v4751_v34, 0.0  ;;  %v4823_v24 = vld [vmem:[%s7061_s22] sm:$0x1]  ;;  %s5999_s22 = scalar_lea.vmem %s5042_s11, 32 }
0x2853   :  { %p6000_p0 = scmp.ne.s32.totalorder %s5042_s11, %s5999_s22  ;;  %p6005_p2 = scmp.lt.s32.totalorder %s5999_s22, %s5999_s22 }
0x2854   :  { %v4757_v28 = vsel %vm234_vm2, %v4750_v53, 0.0 }
0x2855   :  { %4758 = vadd.xlane.f32.xlu1 %v4757_v28  ;;  %p6006_p3 = por %p6005_p2, %p6004_p1 }
0x2857   :  { %p6007_p4 = pnand %p6006_p3, %p6000_p0 }
0x28da   :  { %v4756_v29 = vpop.xlane.xlu0 %4755 }
0x28db   :  { %v4763_v19 = vmul.f32 0.03125, %v4756_v29 }
0x28dd   :  { %v4766_v49 = vsub.f32 %v4749_v18, %v4763_v19 }
0x28de   :  { %v4759_v32 = vpop.xlane.xlu1 %4758 }
0x28df   :  { %v4764_v52 = vmul.f32 0.03125, %v4759_v32  ;;  %v4769_v33 = vmul.f32 %v4766_v49, %v4766_v49 }
0x28e1   :  { %v4767_v35 = vsub.f32 %v4750_v53, %v4764_v52  ;;  %v4772_v47 = vsel %vm234_vm2, %v4769_v33, 0.0 }
0x28e2   :  { %4773 = vadd.xlane.f32.xlu0 %v4772_v47 }
0x28e3   :  { %v4770_v36 = vmul.f32 %v4767_v35, %v4767_v35 }
0x28e5   :  { %v4775_v37 = vsel %vm234_vm2, %v4770_v36, 0.0 }
0x28e6   :  { %4776 = vadd.xlane.f32.xlu1 %v4775_v37  ;;  %4761 = vadd.xlane.f32.xlu0 %v4760_v58 }
0x296b   :  { %v4774_v38 = vpop.xlane.xlu0 %4773 }
0x296c   :  { %v4781_v39 = vmul.f32 0.03125, %v4774_v38 }
0x296e   :  { %v4784_v40 = vadd.f32 1e-06, %v4781_v39 }
0x296f   :  { %v4777_v41 = vpop.xlane.xlu1 %4776  ;;  %v4762_v42 = vpop.xlane.xlu0 %4761 }
0x2970   :  { %5990 = vrsqrt.f32 %v4784_v40  ;;  %v4782_v43 = vmul.f32 0.03125, %v4777_v41  ;;  %v4765_v44 = vmul.f32 0.03125, %v4762_v42 }
0x2972   :  { %v4785_v45 = vadd.f32 1e-06, %v4782_v43  ;;  %v4768_v31 = vsub.f32 %v4751_v34, %v4765_v44 }
0x2974   :  { %5992 = vrsqrt.f32 %v4785_v45  ;;  %v4771_v46 = vmul.f32 %v4768_v31, %v4768_v31 }
0x2976   :  { %v4778_v48 = vsel %vm299_vm3, %v4771_v46, 0.0 }
0x2977   :  { %4779 = vadd.xlane.f32.xlu1 %v4778_v48 }
0x297d   :  { %v5991_v57 = vpop.eup %5990 }
0x297e   :  { %v4790_v63 = vmul.f32 %v5991_v57, %v4766_v49 }
0x2980   :  { %v4799_v21 = vmul.f32 %v5258_v23, %v4790_v63 }
0x2981   :  { %v5993_v1 = vpop.eup %5992 }
0x2982   :  { %v4808_v22 = vadd.f32 %v5259_v14, %v4799_v21  ;;  %v4791_v2 = vmul.f32 %v5993_v1, %v4767_v35 }
0x2984   :  { %4811 = vst.msk [vmem:[#allocation2] sm:$0xff] %vm234_vm2, %v4808_v22  ;;  %v4800_v3 = vmul.f32 %v5258_v23, %v4791_v2 }
0x2986   :  { %v4809_v5 = vadd.f32 %v5259_v14, %v4800_v3 }
0x2988   :  { %4812 = vst.msk [vmem:[#allocation2 + $0x8] sm:$0xff] %vm234_vm2, %v4809_v5 }
0x298b   :  { %v4824_v6 = vld [vmem:[#allocation2] sm:$0x1]  ;;  %v4825_v60 = vld [vmem:[#allocation2 + $0x1] sm:$0x1] }
0x298c   :  { %v4826_v25 = vpack.c.bf16 %v4824_v6, %v4824_v6  ;;  %v4882_v0 = vpack.c.bf16 %v4825_v60, %v4825_v60 }
0x298e   :  { %5745 = vmatmul.mubr.msk.bf16.vlgmr.msra.gmra.mxu1 %vm234_vm2, %v4826_v25 }
0x298f   :  { %5749 = vmatpush3.bf16.msra.mxu1 %v5824_v4  ;;  %v4942_v7 = vld [vmem:[#allocation2 + $0xa] sm:$0x1]  ;;  %5752 = vmatprep.mubr.msk.bf16.mxu1 %vm6037_vm0, %v6036_v56  ;;  %v4943_v9 = vld [vmem:[#allocation2 + $0xb] sm:$0x1] }
0x2990   :  { %5750 = vmatprep.subr.bf16.mxu1 %v6036_v56  ;;  %v4944_v8 = vpack.c.bf16 %v4942_v7, %v4942_v7  ;;  %v4988_v10 = vpack.c.bf16 %v4943_v9, %v4943_v9 }
0x2992   :  { %5761 = vmatmul.mubr.msk.bf16.vlgmr.msra.gmra.mxu0 %vm234_vm2, %v4944_v8 }
0x2993   :  { %5751 = vmatpush3.bf16.msra.mxu1 %v5825_v15 }
0x2994   :  { %5764 = vmatprep.subr.bf16.mxu1 %v6036_v56 }
0x2996   :  { %5753 = vmatmul.mubr.msk.bf16.vlgmr.msra.gmra.mxu1 %vm234_vm2, %v4882_v0 }
0x2997   :  { %5765 = vmatpush3.bf16.msra.mxu1 %v5824_v4  ;;  %5768 = vmatprep.mubr.msk.bf16.mxu1 %vm6037_vm0, %v6036_v56 }
0x2998   :  { %5766 = vmatprep.subr.bf16.mxu1 %v6036_v56 }
0x299b   :  { %5767 = vmatpush3.bf16.msra.mxu1 %v5825_v15 }
0x299e   :  { %5769 = vmatmul.mubr.msk.bf16.vlgmr.msra.gmra.mxu1 %vm234_vm2, %v4988_v10  ;;  %vm4940_vm2 = vcmask 253952  }
0x2a00   :  { %v4780_v51 = vpop.xlane.xlu1 %4779 }
0x2a01   :  { %v4783_v59 = vmul.f32 0.03125, %v4780_v51 }
0x2a03   :  { %v4786_v50 = vadd.f32 1e-06, %v4783_v59 }
0x2a05   :  { %5994 = vrsqrt.f32 %v4786_v50 }
0x2a12   :  { %v5995_v54 = vpop.eup %5994 }
0x2a13   :  { %v4792_v62 = vmul.f32 %v5995_v54, %v4768_v31 }
0x2a15   :  { %v4801_v20 = vmul.f32 %v5258_v23, %v4792_v62 }
0x2a17   :  { %v4810_v11 = vadd.f32 %v5259_v14, %v4801_v20 }
0x2a19   :  { %4813 = vst.msk [vmem:[#allocation2 + $0x10] sm:$0xf] %vm299_vm3, %v4810_v11 }
0x2a4e   :  { %v4876_v27 = vpop.f32.mrf.mxu1 }
0x2a4f   :  { %v4877_v28 = vadd.f32 %v4876_v27, %v4818_v17 }
0x2a50   :  { %v5746_v30 = vpop.f32.mrf.mxu1 }
0x2a52   :  { %v4879_v12 = vpop.f32.mrf.mxu1  ;;  %v4982_v13 = vpop.f32.mrf.mxu0 }
0x2a53   :  { %v4983_v47 = vadd.f32 %v4982_v13, %v4818_v17 }
0x2a54   :  { %v5747_v18 = vpop.f32.mrf.mxu1  ;;  %v5762_v61 = vpop.f32.mrf.mxu0 }
0x2a56   :  { %v4932_v26 = vpop.f32.mrf.mxu1  ;;  %v4985_v53 = vpop.f32.mrf.mxu0 }
0x2a57   :  { %v4933_v29 = vadd.f32 %v4932_v26, %v4823_v24 }
0x2a58   :  { %v5754_v19 = vpop.f32.mrf.mxu1  ;;  %v5763_v49 = vpop.f32.mrf.mxu0 }
0x2a59   :  { %v4938_v32 = vadd.f32 %v4933_v29, %v4877_v28 }
0x2a5a   :  { %v4935_v52 = vpop.f32.mrf.mxu1 }
0x2a5b   :  { %v4939_v33 = vmul.f32 0.5, %v4938_v32 }
0x2a5c   :  { %v5755_v34 = vpop.f32.mrf.mxu1 }
0x2a5d   :  { %4941 = vst.msk [vmem:[#allocation5] sm:$0x1] %vm4940_vm2, %v4939_v33 }
0x2a5e   :  { %v5026_v35 = vpop.f32.mrf.mxu1 }
0x2a5f   :  { %v5027_v36 = vadd.f32 %v5026_v35, %v4823_v24 }
0x2a60   :  { %v5770_v37 = vpop.f32.mrf.mxu1 }
0x2a61   :  { %v5032_v58 = vadd.f32 %v5027_v36, %v4983_v47 }
0x2a62   :  { %v5029_v16 = vpop.f32.mrf.mxu1 }
0x2a63   :  { %v5033_v56 = vmul.f32 0.5, %v5032_v58 }
0x2a64   :  { %v5771_v55 = vpop.f32.mrf.mxu1 }
0x2a65   :  { %5034 = vst.msk [vmem:[#allocation5 + $0x1] sm:$0x1] %vm4940_vm2, %v5033_v56 }
0x2a66   :  { %6010 = shalt.err (!%p6007_p4)
}
0x2a67   :  { %5044 = dma.vmem_to_hbm [thread:$0]  %s5042_s11, 32, %s7062_s23, [#allocation6]  }
0x2a68   :  { %6019 = dma.done.wait [#allocation6], 32  }
0x2a69   :  { %6020 = vsyncadd [#allocation6], 4294967264 }
0x2a6a   :  { %5048 = vsyncpa [#allocation6], 1 }

</bundles_post_ra>
